<compile_context>
chip_gen: v5e
topology: v5e:2x2
jax: 0.10.0
libtpu: 0.0.40
codegen_flags: <defaults>
</compile_context>

<pallas_src>
import functools

import jax
import jax.numpy as jnp
from jax import lax
from jax.experimental import pallas as pl
from jax.experimental.pallas import tpu as pltpu


# ----------------------------- fake-quant math ------------------------------
def sym_fake_quant(x, k, x_min, x_max):
    """Symmetric per-tensor fake quantization (quantize-round-clamp-dequantize)."""
    n = 2.0 ** (k - 1) - 1.0
    sat = jnp.maximum(jnp.maximum(jnp.abs(x_min), jnp.abs(x_max)), 1e-8)
    scale = n / sat
    q = jnp.clip(jnp.round(scale * x), -(2.0 ** (k - 1)), 2.0 ** (k - 1) - 1.0)
    return q / scale


# ------------------------------ Pallas kernel -------------------------------
def _qdeform_conv_kernel(pos_ref, pyx_ref, x_ref, wq_ref, o_ref, *, K):
    # pos_ref: (HW, 2)       f32  per flat input position j: col0 = y(j), col1 = x(j)
    # pyx_ref: (1, 2, K*TP)  f32  absolute sampling coords of this output-pixel tile,
    #                             column = k*TP + t; row0 = y, row1 = x
    # x_ref:   (1, Cin, HW)  bf16 full input image of this batch
    # wq_ref:  (K*Cout, Cin) f32  fake-quantized weight, rows ordered (tap k, out-channel)
    # o_ref:   (1, Cout, TP) f32
    Cin = x_ref.shape[1]
    Cout = o_ref.shape[1]
    TP = o_ref.shape[2]

    pos = pos_ref[...]                       # (HW, 2)
    ypos = pos[:, 0:1]                       # (HW, 1)
    xpos = pos[:, 1:2]                       # (HW, 1)
    pyx = pyx_ref[0]                         # (2, K*TP)
    py = pyx[0:1, :]                         # (1, K*TP)
    px = pyx[1:2, :]                         # (1, K*TP)

    # Tent (bilinear hat) weights for ALL 4 corners of ALL K taps in one pass.
    # relu(1-|y_j - py|) equals hy/ly exactly at the two neighbouring rows and 0 elsewhere;
    # rows/cols only cover in-bounds positions, so OOB corners contribute 0 (matches the
    # reference deform_conv semantics).  Coordinate subtraction stays f32 (sub-pixel
    # precision); the [0,1] tent weights are cast to bf16 for the MXU / packed VALU mul.
    ty = jnp.maximum(1.0 - jnp.abs(ypos - py), 0.0).astype(jnp.bfloat16)   # (HW, K*TP)
    tx = jnp.maximum(1.0 - jnp.abs(xpos - px), 0.0).astype(jnp.bfloat16)   # (HW, K*TP)
    sel = ty * tx                                                          # (HW, K*TP) bf16

    # One batched gather+interpolation matmul over all K taps (bf16 in, f32 accumulate).
    x2d = x_ref[0]                                                         # (Cin, HW) bf16
    sampled = jnp.dot(x2d, sel, preferred_element_type=jnp.float32)        # (Cin, K*TP) f32

    # Weight application: K small matmuls with contraction Cin (flops << gather matmul).
    acc = jnp.zeros((Cout, TP), jnp.float32)
    for k in range(K):
        wk = wq_ref[k * Cout:(k + 1) * Cout, :]                            # (Cout, Cin) f32
        sk = sampled[:, k * TP:(k + 1) * TP]                               # (Cin, TP)  f32
        acc = acc + jnp.dot(wk, sk, preferred_element_type=jnp.float32)
    o_ref[0] = acc


# ------------------------------ tile selection -------------------------------
def _pick_tile(P, HW, Cin, Cout, K, budget=24 * 1024 * 1024):
    """Largest lane-dense (multiple-of-128) pixel tile whose per-step VMEM estimate fits.

    The 24 MiB budget (plus the explicit 48 MiB vmem_limit_bytes) is safe on v5e (16 MiB
    default scoped), v7x (64 MiB physical) and leaves v6e headroom to go big.
    """
    p128 = ((P + 127) // 128) * 128
    for tp in (1024, 512, 256, 128):
        need = HW * K * tp * 14                      # tent temporaries + bf16 sel slab
        need += 2 * Cin * HW * 2 * 2                 # double-buffered bf16 x block
        need += 2 * 2 * K * tp * 4                   # double-buffered pyx block
        need += 2 * Cout * tp * 4                    # double-buffered output block
        need += Cin * K * tp * 4 + Cout * tp * 4     # sampled + acc
        if need <= budget:
            return min(tp, p128)
    return min(128, p128)


# -------------------------------- wrapper -----------------------------------
def quant_deform_conv2d(x, offset, weight, *, weight_bit=8, stride=1, padding=1,
                        dilation=1, groups=1, deformable_groups=1):
    """Pallas forward of QuantDeformConv2d (symmetric, per-tensor weight quant)."""
    assert groups == 1 and deformable_groups == 1, (
        "TODO(synk): groups>1 / deformable_groups>1 not implemented")
    B, Cin, H, W = x.shape
    Cout, Cin_w, KH, KW = weight.shape
    assert Cin_w == Cin
    K = KH * KW
    HW = H * W
    H_out = (H + 2 * padding - dilation * (KH - 1) - 1) // stride + 1
    W_out = (W + 2 * padding - dilation * (KW - 1) - 1) // stride + 1
    P = H_out * W_out
    assert offset.shape == (B, 2 * K, H_out, W_out)

    # --- weight fake-quant, hoisted out of the kernel (tiny, runs once) ---
    w32 = weight.astype(jnp.float32)
    wq = sym_fake_quant(w32, weight_bit, jnp.min(w32), jnp.max(w32))       # (Cout,Cin,KH,KW)
    wq_rows = jnp.transpose(wq, (2, 3, 0, 1)).reshape(K * Cout, Cin)       # rows = (k, co)

    # --- lane-dense pixel tile + padding of P up to a multiple of it ---
    TP = _pick_tile(P, HW, Cin, Cout, K)
    Ppad = ((P + TP - 1) // TP) * TP
    n_tiles = Ppad // TP

    # --- absolute sampling coordinates, pre-arranged to (k*TP + t)-major columns ---
    p_idx = jnp.arange(P, dtype=jnp.int32)
    base_y = (p_idx // W_out) * stride - padding                            # (P,)
    base_x = (p_idx % W_out) * stride - padding
    k_idx = jnp.arange(K, dtype=jnp.int32)
    ky = (k_idx // KW) * dilation                                           # (K,)
    kx = (k_idx % KW) * dilation
    off = offset.reshape(B, K, 2, P).astype(jnp.float32)                    # ch 2k=dy, 2k+1=dx
    py = (base_y[None, None, :] + ky[None, :, None]).astype(jnp.float32) + off[:, :, 0, :]
    px = (base_x[None, None, :] + kx[None, :, None]).astype(jnp.float32) + off[:, :, 1, :]
    pyx = jnp.stack([py, px], axis=1)                                       # (B, 2, K, P)
    # padded output pixels get far-out-of-bounds coords -> every tent weight is 0
    pyx = jnp.pad(pyx, ((0, 0), (0, 0), (0, 0), (0, Ppad - P)), constant_values=-2.0)
    pyx = pyx.reshape(B, 2, K, n_tiles, TP).transpose(0, 1, 3, 2, 4)
    pyx = pyx.reshape(B, 2, n_tiles * K * TP)

    # per-flat-position integer (y, x) coordinates of the input image
    j_idx = jnp.arange(HW, dtype=jnp.int32)
    pos = jnp.stack([j_idx // W, j_idx % W], axis=1).astype(jnp.float32)    # (HW, 2)

    x_flat = x.reshape(B, Cin, HW).astype(jnp.bfloat16)

    kern = functools.partial(_qdeform_conv_kernel, K=K)

    out_flat = pl.pallas_call(
        kern,
        out_shape=jax.ShapeDtypeStruct((B, Cout, Ppad), jnp.float32),
        grid=(B, n_tiles),
        in_specs=[
            pl.BlockSpec((HW, 2), lambda b, p: (0, 0)),
            pl.BlockSpec((1, 2, K * TP), lambda b, p: (b, 0, p)),
            pl.BlockSpec((1, Cin, HW), lambda b, p: (b, 0, 0)),
            pl.BlockSpec((K * Cout, Cin), lambda b, p: (0, 0)),
        ],
        out_specs=pl.BlockSpec((1, Cout, TP), lambda b, p: (b, 0, p)),
        compiler_params=pltpu.CompilerParams(
            dimension_semantics=("parallel", "parallel"),
            vmem_limit_bytes=48 * 1024 * 1024),
    )(pos, pyx, x_flat, wq_rows)

    return out_flat[:, :, :P].reshape(B, Cout, H_out, W_out)


# ---------------------------- pure-JAX reference -----------------------------
def ref_forward(x, offset, weight, *, weight_bit=8, stride=1, padding=1, dilation=1):
    B, Cin, H, W = x.shape
    Cout, _, KH, KW = weight.shape
    K = KH * KW
    H_out = (H + 2 * padding - dilation * (KH - 1) - 1) // stride + 1
    W_out = (W + 2 * padding - dilation * (KW - 1) - 1) // stride + 1

    x = x.astype(jnp.float32)
    w = weight.astype(jnp.float32)
    wq = sym_fake_quant(w, weight_bit, jnp.min(w), jnp.max(w))

    off = offset.reshape(B, K, 2, H_out, W_out).astype(jnp.float32)
    dy, dx = off[:, :, 0], off[:, :, 1]                       # (B, K, H_out, W_out)

    ky, kx = jnp.meshgrid(jnp.arange(KH), jnp.arange(KW), indexing="ij")
    ky, kx = ky.reshape(K), kx.reshape(K)
    h_base = jnp.arange(H_out) * stride - padding
    w_base = jnp.arange(W_out) * stride - padding
    py = (h_base[None, :, None] + (ky * dilation)[:, None, None]).astype(jnp.float32)
    px = (w_base[None, None, :] + (kx * dilation)[:, None, None]).astype(jnp.float32)
    py = py[None] + dy                                        # (B, K, H_out, W_out)
    px = px[None] + dx

    y0 = jnp.floor(py)
    x0 = jnp.floor(px)
    ly, lx = py - y0, px - x0
    hy, hx = 1.0 - ly, 1.0 - lx

    b_idx = jnp.arange(B)[:, None, None, None, None]
    c_idx = jnp.arange(Cin)[None, :, None, None, None]

    def corner(yy, xx, cw):
        valid = (yy >= 0) & (yy < H) & (xx >= 0) & (xx < W)
        yi = jnp.clip(yy, 0, H - 1).astype(jnp.int32)
        xi = jnp.clip(xx, 0, W - 1).astype(jnp.int32)
        g = x[b_idx, c_idx, yi[:, None], xi[:, None]]         # (B, Cin, K, H_out, W_out)
        return g * (cw * valid)[:, None]

    sampled = (corner(y0, x0, hy * hx) + corner(y0, x0 + 1, hy * lx)
               + corner(y0 + 1, x0, ly * hx) + corner(y0 + 1, x0 + 1, ly * lx))
    out = jnp.einsum("bckhw,ock->bohw", sampled, wq.reshape(Cout, Cin, K),
                     precision=lax.Precision.HIGHEST)
    return out


if __name__ == "__main__":
    key = jax.random.PRNGKey(0)
    kx_, ko_, kw_ = jax.random.split(key, 3)

    B, Cin, H, W = 2, 4, 16, 16
    Cout, KH, KW = 8, 3, 3
    stride, padding, dilation = 1, 1, 1
    H_out = (H + 2 * padding - dilation * (KH - 1) - 1) // stride + 1
    W_out = (W + 2 * padding - dilation * (KW - 1) - 1) // stride + 1

    x = jax.random.normal(kx_, (B, Cin, H, W), dtype=jnp.float32)
    offset = 0.5 * jax.random.normal(ko_, (B, 2 * KH * KW, H_out, W_out), dtype=jnp.float32)
    weight = 0.3 * jax.random.normal(kw_, (Cout, Cin, KH, KW), dtype=jnp.float32)

    out = jax.block_until_ready(
        quant_deform_conv2d(x, offset, weight, weight_bit=8,
                            stride=stride, padding=padding, dilation=dilation))
    ref = jax.block_until_ready(
        ref_forward(x, offset, weight, weight_bit=8,
                    stride=stride, padding=padding, dilation=dilation))

    assert out.shape == ref.shape == (B, Cout, H_out, W_out)
    diff = jnp.abs(out - ref)
    mean_d, max_d = float(jnp.mean(diff)), float(jnp.max(diff))
    # Tolerance covers bf16 MXU inputs (f32 accumulation) for the gather matmul; any
    # structural bug (wrong tap/corner/offset channel) would exceed it by >10x.
    assert mean_d < 1.5e-2 and max_d < 1e-1, (mean_d, max_d)
    print("KERNEL_OK")
</pallas_src>

<mosaic_0001>
module attributes {stable_mosaic.version = 11 : i64} {
  func.func @_qdeform_conv_kernel(%arg0: i32, %arg1: i32, %arg2: memref<256x2xf32, #tpu.memory_space<vmem>>, %arg3: memref<1x2x2304xf32, #tpu.memory_space<vmem>>, %arg4: memref<1x4x256xbf16, #tpu.memory_space<vmem>>, %arg5: memref<72x4xf32, #tpu.memory_space<vmem>>, %arg6: memref<1x8x256xf32, #tpu.memory_space<vmem>>) attributes {dimension_semantics = [#tpu.dimension_semantics<parallel>, #tpu.dimension_semantics<parallel>], iteration_bounds = array<i64: 2, 1>, scalar_prefetch = 0 : i64, scratch_operands = 0 : i64, tpu.core_type = #tpu.core_type<tc>, window_params = [{pipeline_mode = #tpu.pipeline_mode<synchronous>, transform_indices = @transform_0, window_bounds = array<i64: 256, 2>}, {transform_indices = @transform_1, window_bounds = array<i64: 1, 2, 2304>}, {transform_indices = @transform_2, window_bounds = array<i64: 1, 4, 256>}, {pipeline_mode = #tpu.pipeline_mode<synchronous>, transform_indices = @transform_3, window_bounds = array<i64: 72, 4>}, {transform_indices = @transform_4, window_bounds = array<i64: 1, 8, 256>}]} {
    %c0 = arith.constant 0 : index
    %c0_0 = arith.constant 0 : index
    %0 = vector.load %arg2[%c0, %c0_0] : memref<256x2xf32, #tpu.memory_space<vmem>>, vector<256x2xf32>
    %1 = vector.extract_strided_slice %0 {offsets = [0, 0], sizes = [256, 1], strides = [1, 1]} : vector<256x2xf32> to vector<256x1xf32>
    %2 = vector.extract_strided_slice %0 {offsets = [0, 1], sizes = [256, 1], strides = [1, 1]} : vector<256x2xf32> to vector<256x1xf32>
    %c0_1 = arith.constant 0 : index
    %c0_2 = arith.constant 0 : index
    %c0_3 = arith.constant 0 : index
    %3 = vector.load %arg3[%c0_1, %c0_2, %c0_3] : memref<1x2x2304xf32, #tpu.memory_space<vmem>>, vector<1x2x2304xf32>
    %4 = vector.shape_cast %3 : vector<1x2x2304xf32> to vector<2x2304xf32>
    %5 = vector.extract_strided_slice %4 {offsets = [0, 0], sizes = [1, 2304], strides = [1, 1]} : vector<2x2304xf32> to vector<1x2304xf32>
    %6 = vector.extract_strided_slice %4 {offsets = [1, 0], sizes = [1, 2304], strides = [1, 1]} : vector<2x2304xf32> to vector<1x2304xf32>
    %7 = vector.broadcast %1 : vector<256x1xf32> to vector<256x2304xf32>
    %8 = vector.broadcast %5 : vector<1x2304xf32> to vector<256x2304xf32>
    %9 = arith.subf %7, %8 : vector<256x2304xf32>
    %10 = math.absf %9 : vector<256x2304xf32>
    %cst = arith.constant 1.000000e+00 : f32
    %11 = vector.broadcast %cst : f32 to vector<256x2304xf32>
    %12 = arith.subf %11, %10 : vector<256x2304xf32>
    %cst_4 = arith.constant 0.000000e+00 : f32
    %13 = vector.broadcast %cst_4 : f32 to vector<256x2304xf32>
    %14 = arith.maximumf %12, %13 : vector<256x2304xf32>
    %15 = arith.truncf %14 : vector<256x2304xf32> to vector<256x2304xbf16>
    %16 = vector.broadcast %2 : vector<256x1xf32> to vector<256x2304xf32>
    %17 = vector.broadcast %6 : vector<1x2304xf32> to vector<256x2304xf32>
    %18 = arith.subf %16, %17 : vector<256x2304xf32>
    %19 = math.absf %18 : vector<256x2304xf32>
    %cst_5 = arith.constant 1.000000e+00 : f32
    %20 = vector.broadcast %cst_5 : f32 to vector<256x2304xf32>
    %21 = arith.subf %20, %19 : vector<256x2304xf32>
    %cst_6 = arith.constant 0.000000e+00 : f32
    %22 = vector.broadcast %cst_6 : f32 to vector<256x2304xf32>
    %23 = arith.maximumf %21, %22 : vector<256x2304xf32>
    %24 = arith.truncf %23 : vector<256x2304xf32> to vector<256x2304xbf16>
    %25 = arith.mulf %15, %24 : vector<256x2304xbf16>
    %c0_7 = arith.constant 0 : index
    %c0_8 = arith.constant 0 : index
    %c0_9 = arith.constant 0 : index
    %26 = vector.load %arg4[%c0_7, %c0_8, %c0_9] : memref<1x4x256xbf16, #tpu.memory_space<vmem>>, vector<1x4x256xbf16>
    %27 = vector.shape_cast %26 : vector<1x4x256xbf16> to vector<4x256xbf16>
    %cst_10 = arith.constant dense<0.000000e+00> : vector<4x2304xf32>
    %28 = tpu.matmul %27, %25, %cst_10 {dimension_numbers = #tpu.dot_dimension_numbers<[1], [0], [0], [1], [0, 0, 1, 1], [], []>} : vector<4x256xbf16>, vector<256x2304xbf16>, vector<4x2304xf32> -> vector<4x2304xf32>
    %cst_11 = arith.constant 0.000000e+00 : f32
    %29 = vector.broadcast %cst_11 : f32 to vector<8x256xf32>
    %c0_12 = arith.constant 0 : index
    %c0_13 = arith.constant 0 : index
    %30 = vector.load %arg5[%c0_12, %c0_13] : memref<72x4xf32, #tpu.memory_space<vmem>>, vector<8x4xf32>
    %31 = vector.extract_strided_slice %28 {offsets = [0, 0], sizes = [4, 256], strides = [1, 1]} : vector<4x2304xf32> to vector<4x256xf32>
    %cst_14 = arith.constant dense<0.000000e+00> : vector<8x256xf32>
    %32 = tpu.matmul %30, %31, %cst_14 {dimension_numbers = #tpu.dot_dimension_numbers<[1], [0], [0], [1], [0, 0, 1, 1], [], []>} : vector<8x4xf32>, vector<4x256xf32>, vector<8x256xf32> -> vector<8x256xf32>
    %33 = arith.addf %29, %32 : vector<8x256xf32>
    %c8 = arith.constant 8 : index
    %c0_15 = arith.constant 0 : index
    %34 = vector.load %arg5[%c8, %c0_15] : memref<72x4xf32, #tpu.memory_space<vmem>>, vector<8x4xf32>
    %35 = vector.extract_strided_slice %28 {offsets = [0, 256], sizes = [4, 256], strides = [1, 1]} : vector<4x2304xf32> to vector<4x256xf32>
    %cst_16 = arith.constant dense<0.000000e+00> : vector<8x256xf32>
    %36 = tpu.matmul %34, %35, %cst_16 {dimension_numbers = #tpu.dot_dimension_numbers<[1], [0], [0], [1], [0, 0, 1, 1], [], []>} : vector<8x4xf32>, vector<4x256xf32>, vector<8x256xf32> -> vector<8x256xf32>
    %37 = arith.addf %33, %36 : vector<8x256xf32>
    %c16 = arith.constant 16 : index
    %c0_17 = arith.constant 0 : index
    %38 = vector.load %arg5[%c16, %c0_17] : memref<72x4xf32, #tpu.memory_space<vmem>>, vector<8x4xf32>
    %39 = vector.extract_strided_slice %28 {offsets = [0, 512], sizes = [4, 256], strides = [1, 1]} : vector<4x2304xf32> to vector<4x256xf32>
    %cst_18 = arith.constant dense<0.000000e+00> : vector<8x256xf32>
    %40 = tpu.matmul %38, %39, %cst_18 {dimension_numbers = #tpu.dot_dimension_numbers<[1], [0], [0], [1], [0, 0, 1, 1], [], []>} : vector<8x4xf32>, vector<4x256xf32>, vector<8x256xf32> -> vector<8x256xf32>
    %41 = arith.addf %37, %40 : vector<8x256xf32>
    %c24 = arith.constant 24 : index
    %c0_19 = arith.constant 0 : index
    %42 = vector.load %arg5[%c24, %c0_19] : memref<72x4xf32, #tpu.memory_space<vmem>>, vector<8x4xf32>
    %43 = vector.extract_strided_slice %28 {offsets = [0, 768], sizes = [4, 256], strides = [1, 1]} : vector<4x2304xf32> to vector<4x256xf32>
    %cst_20 = arith.constant dense<0.000000e+00> : vector<8x256xf32>
    %44 = tpu.matmul %42, %43, %cst_20 {dimension_numbers = #tpu.dot_dimension_numbers<[1], [0], [0], [1], [0, 0, 1, 1], [], []>} : vector<8x4xf32>, vector<4x256xf32>, vector<8x256xf32> -> vector<8x256xf32>
    %45 = arith.addf %41, %44 : vector<8x256xf32>
    %c32 = arith.constant 32 : index
    %c0_21 = arith.constant 0 : index
    %46 = vector.load %arg5[%c32, %c0_21] : memref<72x4xf32, #tpu.memory_space<vmem>>, vector<8x4xf32>
    %47 = vector.extract_strided_slice %28 {offsets = [0, 1024], sizes = [4, 256], strides = [1, 1]} : vector<4x2304xf32> to vector<4x256xf32>
    %cst_22 = arith.constant dense<0.000000e+00> : vector<8x256xf32>
    %48 = tpu.matmul %46, %47, %cst_22 {dimension_numbers = #tpu.dot_dimension_numbers<[1], [0], [0], [1], [0, 0, 1, 1], [], []>} : vector<8x4xf32>, vector<4x256xf32>, vector<8x256xf32> -> vector<8x256xf32>
    %49 = arith.addf %45, %48 : vector<8x256xf32>
    %c40 = arith.constant 40 : index
    %c0_23 = arith.constant 0 : index
    %50 = vector.load %arg5[%c40, %c0_23] : memref<72x4xf32, #tpu.memory_space<vmem>>, vector<8x4xf32>
    %51 = vector.extract_strided_slice %28 {offsets = [0, 1280], sizes = [4, 256], strides = [1, 1]} : vector<4x2304xf32> to vector<4x256xf32>
    %cst_24 = arith.constant dense<0.000000e+00> : vector<8x256xf32>
    %52 = tpu.matmul %50, %51, %cst_24 {dimension_numbers = #tpu.dot_dimension_numbers<[1], [0], [0], [1], [0, 0, 1, 1], [], []>} : vector<8x4xf32>, vector<4x256xf32>, vector<8x256xf32> -> vector<8x256xf32>
    %53 = arith.addf %49, %52 : vector<8x256xf32>
    %c48 = arith.constant 48 : index
    %c0_25 = arith.constant 0 : index
    %54 = vector.load %arg5[%c48, %c0_25] : memref<72x4xf32, #tpu.memory_space<vmem>>, vector<8x4xf32>
    %55 = vector.extract_strided_slice %28 {offsets = [0, 1536], sizes = [4, 256], strides = [1, 1]} : vector<4x2304xf32> to vector<4x256xf32>
    %cst_26 = arith.constant dense<0.000000e+00> : vector<8x256xf32>
    %56 = tpu.matmul %54, %55, %cst_26 {dimension_numbers = #tpu.dot_dimension_numbers<[1], [0], [0], [1], [0, 0, 1, 1], [], []>} : vector<8x4xf32>, vector<4x256xf32>, vector<8x256xf32> -> vector<8x256xf32>
    %57 = arith.addf %53, %56 : vector<8x256xf32>
    %c56 = arith.constant 56 : index
    %c0_27 = arith.constant 0 : index
    %58 = vector.load %arg5[%c56, %c0_27] : memref<72x4xf32, #tpu.memory_space<vmem>>, vector<8x4xf32>
    %59 = vector.extract_strided_slice %28 {offsets = [0, 1792], sizes = [4, 256], strides = [1, 1]} : vector<4x2304xf32> to vector<4x256xf32>
    %cst_28 = arith.constant dense<0.000000e+00> : vector<8x256xf32>
    %60 = tpu.matmul %58, %59, %cst_28 {dimension_numbers = #tpu.dot_dimension_numbers<[1], [0], [0], [1], [0, 0, 1, 1], [], []>} : vector<8x4xf32>, vector<4x256xf32>, vector<8x256xf32> -> vector<8x256xf32>
    %61 = arith.addf %57, %60 : vector<8x256xf32>
    %c64 = arith.constant 64 : index
    %c0_29 = arith.constant 0 : index
    %62 = vector.load %arg5[%c64, %c0_29] : memref<72x4xf32, #tpu.memory_space<vmem>>, vector<8x4xf32>
    %63 = vector.extract_strided_slice %28 {offsets = [0, 2048], sizes = [4, 256], strides = [1, 1]} : vector<4x2304xf32> to vector<4x256xf32>
    %cst_30 = arith.constant dense<0.000000e+00> : vector<8x256xf32>
    %64 = tpu.matmul %62, %63, %cst_30 {dimension_numbers = #tpu.dot_dimension_numbers<[1], [0], [0], [1], [0, 0, 1, 1], [], []>} : vector<8x4xf32>, vector<4x256xf32>, vector<8x256xf32> -> vector<8x256xf32>
    %65 = arith.addf %61, %64 : vector<8x256xf32>
    %c0_31 = arith.constant 0 : index
    %c0_32 = arith.constant 0 : index
    %c0_33 = arith.constant 0 : index
    %66 = vector.load %arg6[%c0_31, %c0_32, %c0_33] : memref<1x8x256xf32, #tpu.memory_space<vmem>>, vector<1x8x256xf32>
    %67 = vector.shape_cast %66 : vector<1x8x256xf32> to vector<8x256xf32>
    %68 = vector.shape_cast %65 : vector<8x256xf32> to vector<1x8x256xf32>
    tpu.vector_store %arg6[%c0_31, %c0_32, %c0_33], %68 {strides = array<i32>} : memref<1x8x256xf32, #tpu.memory_space<vmem>>, vector<1x8x256xf32>,
    return
  }
  func.func @transform_0(%arg0: i32, %arg1: i32) -> (i32, i32) {
    %c0_i32 = arith.constant 0 : i32
    %c0_i32_0 = arith.constant 0 : i32
    %c0_i32_1 = arith.constant 0 : i32
    return %c0_i32, %c0_i32_0 : i32, i32
  }
  func.func @transform_1(%arg0: i32, %arg1: i32) -> (i32, i32, i32) {
    %c0_i32 = arith.constant 0 : i32
    %c0_i32_0 = arith.constant 0 : i32
    return %arg0, %c0_i32, %arg1 : i32, i32, i32
  }
  func.func @transform_2(%arg0: i32, %arg1: i32) -> (i32, i32, i32) {
    %c0_i32 = arith.constant 0 : i32
    %c0_i32_0 = arith.constant 0 : i32
    %c0_i32_1 = arith.constant 0 : i32
    return %arg0, %c0_i32, %c0_i32_0 : i32, i32, i32
  }
  func.func @transform_3(%arg0: i32, %arg1: i32) -> (i32, i32) {
    %c0_i32 = arith.constant 0 : i32
    %c0_i32_0 = arith.constant 0 : i32
    %c0_i32_1 = arith.constant 0 : i32
    return %c0_i32, %c0_i32_0 : i32, i32
  }
  func.func @transform_4(%arg0: i32, %arg1: i32) -> (i32, i32, i32) {
    %c0_i32 = arith.constant 0 : i32
    %c0_i32_0 = arith.constant 0 : i32
    return %arg0, %c0_i32, %arg1 : i32, i32, i32
  }
}

</mosaic_0001>

<bundles_post_ra>
// kernel: tpu_custom_call.1
= control target key start
LH: loop header
LB: loop body
LE: loop exit
PB: predicated region body
PF: predicated region fallthrough
CT: control target
= control target key end

     0   :  { %9 = vsyncpa [#allocation3], 0  ;;  %s12739_s0 = inlined_call_operand.vmem [shape: f32[256,2], index: 0, kind: input, shape index: {}]   ;;  %s12740_s1 = inlined_call_operand.vmem [shape: f32[2,2,2304], index: 1, kind: input, shape index: {}]   ;;  %s12741_s2 = inlined_call_operand.vmem [shape: bf16[2,4,256], index: 2, kind: input, shape index: {}]   ;;  %s12742_s3 = inlined_call_operand.vmem [shape: f32[72,4], index: 3, kind: input, shape index: {}]   ;;  %s12743_s4 = inlined_call_operand.hbm [shape: f32[2,8,256], index: 4, kind: output, shape index: {}]  }
   0x1   :  { %11 = vsyncpa [#allocation3 + $0x1], 0  ;;  %s9204_s15 = smov 0   ;;  %s9206_s16 = smov 0  }
   0x2   :  { %s9208_s17 = smov 0   ;;  %s9210_s18 = smov 0  }
   0x3   :  { %s9212_s19 = smov 0   ;;  %s9214_s20 = smov 0  }
   0x4 LB: > { %s8935_s21 = sadd.s32 4294967295, %s9175_s20   ;;  %s8936_s22 = sadd.s32 4294967294, %s9175_s20   ;;  %s9175_s20 = sphi %s9214_s20, %s17_s20   ;;  %s9171_s19 = sphi %s9212_s19, %s13519_s19   ;;  %s9167_s18 = sphi %s9210_s18, %s13518_s18   ;;  %s9163_s17 = sphi %s9208_s17, %s13517_s17   ;;  %s9159_s16 = sphi %s9206_s16, %s13516_s16   ;;  %s9155_s15 = sphi %s9204_s15, %s13515_s15  }
   0x5   : > { %s29_s23 = sadd.s32 1, %s9171_s19  ;;  %s134_s24 = sadd.s32 1, %s9163_s17 }
   0x6   : > { %p31_p0 = scmp.ge.s32.totalorder %s29_s23, 2  ;;  %p144_p1 = scmp.ne.s32.totalorder %s9163_s17, %s9159_s16 }
   0x7   : > { %p145_p2 = scmp.eq.s32.totalorder %s8935_s21, 1  ;;  %p150_p3 = scmp.ne.s32.totalorder %s9159_s16, %s9155_s15 }
   0x8   : > { %s13521_s23 = smov (%p31_p0, %s29_s23), 0  ;;  %p151_p5 = scmp.eq.s32.totalorder %s8936_s22, 1 }
   0x9   : > { %p9244_p4 = por %p145_p2, %p144_p1  ;;  %s129_s26 = ssub.s32 %s9171_s19, %s13521_s23 }
   0xa   : > { %p8939_p6 = scmp.ge.s32.totalorder %s9175_s20, 1  ;;  %p132_p7 = scmp.eq.s32.totalorder %s129_s26, 0 }
   0xb   : > { %p9251_p8 = por %p151_p5, %p150_p3  ;;  %p196_p9 = scmp.lt.s32.totalorder %s9175_s20, 3 }
   0xc   : > { %s9257_s28 = scalar_select %p132_p7, %s9163_s17, %s134_s24  }
   0xd   : > { %p197_p10 = pnand %p8939_p6, %p196_p9 }
   0xf   : > { %200 = sbr.rel (%p197_p10) target bundleno = 2234 (0x8ba), region = 36 }
  0x14   : > { %v277_v0 = vld [vmem:[%s12739_s0 + $0xf0] sm:$0xff]  ;;  %v12744_v2 = vmov 1   ;;  %v12746_v3 = vmov 0   ;;  %v278_v5 = vld [vmem:[%s12739_s0 + $0xf8] sm:$0xff]  ;;  %v259_v8 = vld [vmem:[%s12739_s0 + $0x60] sm:$0xff]  ;;  %p232_p11 = scmp.lt.s32.totalorder %s9167_s18, 1 }
  0x15   : > { %v261_v1 = vld [vmem:[%s12739_s0 + $0x70] sm:$0xff]  ;;  %9047 = vset.pattern.permute.xlu0 %v12744_v2  ;;  %9046 = vset.pattern.permute.xlu2 %v12744_v2  ;;  %v262_v6 = vld [vmem:[%s12739_s0 + $0x78] sm:$0xff]  ;;  %v275_v10 = vld [vmem:[%s12739_s0 + $0xe0] sm:$0xff]  ;;  %vm8366_vm0 = vcmask 1043456   ;;  %vm8362_vm1 = vcmask 31744   ;;  %s228_s22 = sand.u32 1, %s9159_s16  }
  0x16   : > { %9045 = vset.pattern.permute.xlu1 %v12746_v3  ;;  %3216 = vperm.xlu0 %9047, %v277_v0   ;;  %v273_v4 = vld [vmem:[%s12739_s0 + $0xd0] sm:$0xff]  ;;  %v260_v11 = vld [vmem:[%s12739_s0 + $0x68] sm:$0xff]  ;;  %v258_v13 = vld [vmem:[%s12739_s0 + $0x58] sm:$0xff]  ;;  %s9339_s9 = scalar_select %p232_p11, %s9167_s18, 1 }
  0x17   : > { %436 = vperm.xlu1 %9045, %v277_v0   ;;  %3152 = vperm.xlu2 %9046, %v261_v1   ;;  %v9280_v7 = vld [vmem:[%s12739_s0 + $0xb0] sm:$0xff]  ;;  %v276_v12 = vld [vmem:[%s12739_s0 + $0xe8] sm:$0xff]  ;;  %v274_v15 = vld [vmem:[%s12739_s0 + $0xd8] sm:$0xff]  ;;  %s8940_s24 = sshll.u32 %s228_s22, 4  ;;  %s8986_s26 = sshll.u32 %s9167_s18, 4 }
  0x18   : > { %v9291_v9 = vld [vmem:[%s12739_s0 + $0x90] sm:$0xff]  ;;  %v255_v16 = vld [vmem:[%s12739_s0 + $0x40] sm:$0xff]  ;;  %v272_v17 = vld [vmem:[%s12739_s0 + $0xc8] sm:$0xff]  ;;  %s8987_s12 = smul.u32 36, %s9339_s9  ;;  %s8985_s11 = sshll.u32 %s9339_s9, 2 }
  0x19   : > { %v257_v14 = vld [vmem:[%s12739_s0 + $0x50] sm:$0xff]  ;;  %v271_v18 = vld [vmem:[%s12739_s0 + $0xc0] sm:$0xff]  ;;  %v256_v19 = vld [vmem:[%s12739_s0 + $0x48] sm:$0xff]  ;;  %s245_s14 = scalar_lea.vmem %s12741_s2, %s8985_s11  ;;  %s8842_s5 = scalar_lea.hbm %s12743_s4, %s8986_s26 }
  0x1a   : > { %v253_v20 = vld [vmem:[%s12739_s0 + $0x30] sm:$0xff]  ;;  %v9345_v21 = vld [vmem:[%s12739_s0 + $0xb8] sm:$0xff]  ;;  %s9355_s21 = scalar_lea.vmem %s12740_s1, %s8987_s12  ;;  %v9360_v23 = vld [vmem:[%s12739_s0 + $0xa8] sm:$0xff]  ;;  %s230_s6 = scalar_lea.vmem [#allocation2], %s8940_s24 }
  0x1b   : > { %v9363_v24 = vld [vmem:[%s9355_s21] sm:$0xff]  ;;  %v254_v28 = vld [vmem:[%s12739_s0 + $0x38] sm:$0xff]  ;;  %v9376_v29 = vld [vmem:[%s12739_s0 + $0x10] sm:$0xff]  ;;  %s8844_s7 = sshll.u32 %s230_s6, 4  ;;  %s8846_s8 = sshll.u32 %s8842_s5, 4  ;;  %s8845_s7 = int_to_ptr.vmem [resolvable:$true] %s8844_s7  ;;  %s8847_s8 = int_to_ptr.hbm [resolvable:$true] %s8846_s8 }
  0x1c   : > { %v3223_v26 = vperm.slane %v9363_v24, 1  ;;  %v3224_v27 = vperm.slane %v9363_v24, 3  ;;  %v449_v32 = vperm.slane %v9363_v24, 0  ;;  %v450_v36 = vperm.slane %v9363_v24, 2  ;;  %v9401_v39 = vld [vmem:[%s12739_s0 + $0x98] sm:$0xff]  ;;  %s8829_s18 = scalar_lea.sflag [#allocation3], %s228_s22 }
  0x1d   : > { %s9111_s10 = sshra.s32 %s8847_s8, 4  ;;  %s9112_s10 = int_to_ptr.hbm [resolvable:$true] %s9111_s10 }
  0x1e   : > { %3200 = vperm.xlu0 %9047, %v273_v4   ;;  %v9379_v30 = vperm.slane %v3223_v26, 1  ;;  %v9381_v31 = vperm.slane %v3224_v27, 1  ;;  %v9403_v40 = vperm.slane %v449_v32, 0  ;;  %v9406_v43 = vperm.slane %v450_v36, 0  ;;  %s9113_s11 = scalar_lea.hbm %s9112_s10, 16  ;;  %p9118_p1 = scmp.lt.s32.totalorder %s9112_s10, %s12743_s4 }
  0x1f   : > { %441 = vperm.xlu1 %9045, %v278_v5   ;;  %3156 = vperm.xlu2 %9046, %v262_v6   ;;  %p9114_p12 = scmp.ne.s32.totalorder %s9112_s10, %s9113_s11 }
  0x21   : > { %p9115_p13 = pnand %p9114_p12, %p9244_p4 }
  0x23   : > { %p9116_p0 = pneg %p9115_p13 }
  0x26   : > { %3184 = vperm.xlu0 %9047, %v9280_v7  }
  0x27   : > { %9048 = vset.pattern.permute.xlu1 %v12744_v2  ;;  %9049 = vset.pattern.permute.xlu2 %v12746_v3 }
  0x28   : > { %3220 = vperm.xlu1 %9048, %v278_v5   ;;  %346 = vperm.xlu2 %9049, %v259_v8  }
  0x2e   : > { %3168 = vperm.xlu0 %9047, %v9291_v9  }
  0x30   : > { %9050 = vset.pattern.permute.xlu1 %v12746_v3  ;;  %426 = vperm.xlu2 %9049, %v275_v10  }
  0x31   : > { %351 = vperm.xlu1 %9050, %v260_v11  }
  0x36   : > { %9073 = vset.pattern.permute.xlu0 %v12746_v3 }
  0x37   : > { %356 = vperm.xlu0 %9073, %v261_v1   ;;  %v9431_v1 = vld [vmem:[%s12739_s0 + $0x20] sm:$0xff] }
  0x38   : > { %9052 = vset.pattern.permute.xlu2 %v12744_v2 }
  0x39   : > { %9051 = vset.pattern.permute.xlu1 %v12744_v2  ;;  %3148 = vperm.xlu2 %9052, %v260_v11  }
  0x3a   : > { %3144 = vperm.xlu1 %9051, %v259_v8   ;;  %v9440_v8 = vld [vmem:[%s12739_s0 + $0x88] sm:$0xff] }
  0x3f   : > { %361 = vperm.xlu0 %9073, %v262_v6  }
  0x41   : > { %3212 = vperm.xlu2 %9052, %v276_v12  }
  0x42   : > { %3208 = vperm.xlu1 %9051, %v275_v10  }
  0x47   : > { %431 = vperm.xlu0 %9073, %v276_v12  }
  0x49   : > { %9054 = vset.pattern.permute.xlu2 %v12746_v3 }
  0x4a   : > { %9053 = vset.pattern.permute.xlu1 %v12746_v3  ;;  %416 = vperm.xlu2 %9054, %v273_v4  }
  0x4b   : > { %341 = vperm.xlu1 %9053, %v258_v13  }
  0x4f   : > { %336 = vperm.xlu0 %9073, %v257_v14  }
  0x52   : > { %9056 = vset.pattern.permute.xlu2 %v12744_v2 }
  0x53   : > { %3140 = vperm.xlu2 %9056, %v258_v13   ;;  %9055 = vset.pattern.permute.xlu1 %v12744_v2 }
  0x54   : > { %3136 = vperm.xlu1 %9055, %v257_v14  }
  0x57   : > { %421 = vperm.xlu0 %9073, %v274_v15  }
  0x5b   : > { %9057 = vset.pattern.permute.xlu2 %v12746_v3 }
  0x5c   : > { %3204 = vperm.xlu1 %9055, %v274_v15   ;;  %326 = vperm.xlu2 %9057, %v255_v16  }
  0x5f   : > { %411 = vperm.xlu0 %9073, %v272_v17  }
  0x64   : > { %9058 = vset.pattern.permute.xlu1 %v12746_v3  ;;  %406 = vperm.xlu2 %9057, %v271_v18  }
  0x65   : > { %331 = vperm.xlu1 %9058, %v256_v19  }
  0x67   : > { %316 = vperm.xlu0 %9073, %v253_v20  }
  0x6c   : > { %9060 = vset.pattern.permute.xlu2 %v12744_v2 }
  0x6d   : > { %9059 = vset.pattern.permute.xlu1 %v12744_v2  ;;  %3132 = vperm.xlu2 %9060, %v256_v19  }
  0x6e   : > { %3128 = vperm.xlu1 %9059, %v255_v16  }
  0x6f   : > { %401 = vperm.xlu0 %9073, %v9345_v21  }
  0x71   : > { %v9350_v22 = vpop.permute.xlu2 %3152 }
  0x72   : > { %13108 = vst [vmem:[#allocation5_spill] sm:$0xff] %v9350_v22  ;;  %v3529_v33 = vsub.f32 %v9350_v22, %v9379_v30  ;;  %v3530_v34 = vsub.f32 %v9350_v22, %v9381_v31 }
  0x74   : > { %v4105_v41 = vand.u32 2147483647, %v3529_v33  ;;  %v4106_v42 = vand.u32 2147483647, %v3530_v34 }
  0x75   : > { %3196 = vperm.xlu2 %9060, %v272_v17  }
  0x76   : > { %3192 = vperm.xlu1 %9059, %v271_v18   ;;  %v4681_v52 = vsub.f32 1.0, %v4105_v41  ;;  %v4682_v53 = vsub.f32 1.0, %v4106_v42 }
  0x77   : > { %391 = vperm.xlu0 %9073, %v9360_v23  }
  0x78   : > { %v5257_v12 = vmax.f32 %v4681_v52, 0.0  ;;  %v5258_v13 = vmax.f32 %v4682_v53, 0.0  ;;  %v252_v53 = vld [vmem:[%s12739_s0 + $0x28] sm:$0xff] }
  0x79   : > { %v9366_v25 = vpop.permute.xlu2 %3156 }
  0x7a   : > { %13109 = vst [vmem:[#allocation6_spill] sm:$0xff] %v9366_v25  ;;  %v3547_v37 = vsub.f32 %v9366_v25, %v9379_v30  ;;  %v3548_v38 = vsub.f32 %v9366_v25, %v9381_v31 }
  0x7c   : > { %v4123_v44 = vand.u32 2147483647, %v3547_v37  ;;  %v4124_v45 = vand.u32 2147483647, %v3548_v38  ;;  %v9456_v37 = vpack.c.bf16 %v5258_v13, %v5257_v12 }
  0x7d   : > { %9062 = vset.pattern.permute.xlu2 %v12746_v3 }
  0x7e   : > { %9061 = vset.pattern.permute.xlu1 %v12746_v3  ;;  %396 = vperm.xlu2 %9062, %v9280_v7   ;;  %v4699_v57 = vsub.f32 1.0, %v4123_v44  ;;  %v4700_v58 = vsub.f32 1.0, %v4124_v45 }
  0x7f   : > { %321 = vperm.xlu1 %9061, %v254_v28   ;;  %296 = vperm.xlu0 %9073, %v9376_v29  }
  0x80   : > { %v5275_v14 = vmax.f32 %v4699_v57, 0.0  ;;  %v5276_v15 = vmax.f32 %v4700_v58, 0.0 }
  0x82   : > { %v9391_v35 = vpop.permute.xlu2 %346  ;;  %v9458_v38 = vpack.c.bf16 %v5276_v15, %v5275_v14 }
  0x83   : > { %13110 = vst [vmem:[#allocation7_spill] sm:$0xff] %v9391_v35  ;;  %v719_v46 = vsub.f32 %v9391_v35, %v9403_v40  ;;  %v720_v48 = vsub.f32 %v9391_v35, %v9406_v43 }
  0x85   : > { %v1295_v61 = vand.u32 2147483647, %v719_v46  ;;  %v1296_v0 = vand.u32 2147483647, %v720_v48  ;;  %v9463_v46 = vld [vmem:[%s12739_s0 + $0xa0] sm:$0xff] }
  0x86   : > { %9064 = vset.pattern.permute.xlu2 %v12744_v2 }
  0x87   : > { %3124 = vperm.xlu2 %9064, %v254_v28   ;;  %9063 = vset.pattern.permute.xlu1 %v12744_v2  ;;  %v1871_v17 = vsub.f32 1.0, %v1295_v61  ;;  %v1872_v18 = vsub.f32 1.0, %v1296_v0  ;;  %v6698_v0 = vunpack.c.h.bf16 %v9456_v37 }
  0x88   : > { %3120 = vperm.xlu1 %9063, %v253_v20   ;;  %381 = vperm.xlu0 %9073, %v9401_v39   ;;  %v9412_v47 = vpop.permute.xlu0 %3216 }
  0x89   : > { %13111 = vst [vmem:[#allocation8_spill] sm:$0xff] %v9412_v47  ;;  %v9416_v49 = vpop.permute.xlu1 %436  ;;  %v3817_v50 = vsub.f32 %v9412_v47, %v9379_v30  ;;  %v3818_v51 = vsub.f32 %v9412_v47, %v9381_v31  ;;  %v2447_v44 = vmax.f32 %v1871_v17, 0.0  ;;  %v2448_v45 = vmax.f32 %v1872_v18, 0.0 }
  0x8a   : > { %13112 = vst [vmem:[#allocation9_spill] sm:$0xff] %v9416_v49  ;;  %v9422_v54 = vpop.permute.xlu2 %426  ;;  %v1043_v55 = vsub.f32 %v9416_v49, %v9403_v40  ;;  %v1044_v56 = vsub.f32 %v9416_v49, %v9406_v43 }
  0x8b   : > { %13113 = vst [vmem:[#allocation10_spill] sm:$0xff] %v9422_v54  ;;  %v4393_v59 = vand.u32 2147483647, %v3817_v50  ;;  %v4394_v60 = vand.u32 2147483647, %v3818_v51  ;;  %v1007_v6 = vsub.f32 %v9422_v54, %v9403_v40  ;;  %v1008_v7 = vsub.f32 %v9422_v54, %v9406_v43 }
  0x8c   : > { %v1619_v62 = vand.u32 2147483647, %v1043_v55  ;;  %v1620_v63 = vand.u32 2147483647, %v1044_v56 }
  0x8d   : > { %v4969_v4 = vsub.f32 1.0, %v4393_v59  ;;  %v4970_v5 = vsub.f32 1.0, %v4394_v60  ;;  %v1583_v27 = vand.u32 2147483647, %v1007_v6  ;;  %v1584_v28 = vand.u32 2147483647, %v1008_v7 }
  0x8e   : > { %v2195_v10 = vsub.f32 1.0, %v1619_v62  ;;  %v2196_v11 = vsub.f32 1.0, %v1620_v63  ;;  %v6697_v59 = vunpack.c.l.bf16 %v9456_v37 }
  0x8f   : > { %9065 = vset.pattern.permute.xlu2 %v12746_v3  ;;  %v5545_v20 = vmax.f32 %v4969_v4, 0.0  ;;  %v5546_v26 = vmax.f32 %v4970_v5, 0.0  ;;  %v2159_v51 = vsub.f32 1.0, %v1583_v27  ;;  %v2160_v52 = vsub.f32 1.0, %v1584_v28 }
  0x90   : > { %3188 = vperm.xlu1 %9063, %v9345_v21   ;;  %306 = vperm.xlu2 %9065, %v9431_v1   ;;  %v9445_v16 = vpop.permute.xlu0 %3200  ;;  %v2771_v33 = vmax.f32 %v2195_v10, 0.0  ;;  %v2772_v34 = vmax.f32 %v2196_v11, 0.0  ;;  %v9480_v5 = vpack.c.bf16 %v2448_v45, %v2447_v44 }
  0x91   : > { %13114 = vst [vmem:[#allocation11_spill] sm:$0xff] %v9445_v16  ;;  %371 = vperm.xlu0 %9073, %v9440_v8   ;;  %v9448_v19 = vpop.permute.xlu1 %441  ;;  %v5851_v58 = vpack.c.bf16 %v5546_v26, %v5545_v20  ;;  %v2735_v10 = vmax.f32 %v2159_v51, 0.0  ;;  %v2736_v11 = vmax.f32 %v2160_v52, 0.0 }
  0x92   : > { %13115 = vst [vmem:[#allocation12_spill] sm:$0xff] %v9448_v19  ;;  %v1061_v32 = vsub.f32 %v9448_v19, %v9403_v40  ;;  %v1062_v21 = vsub.f32 %v9448_v19, %v9406_v43  ;;  %v3077_v57 = vpack.c.bf16 %v2772_v34, %v2771_v33 }
  0x93   : > { %v9454_v36 = vpop.permute.xlu2 %3148  ;;  %v6985_v17 = vunpack.c.l.bf16 %v5851_v58  ;;  %v9496_v45 = vpack.c.bf16 %v2736_v11, %v2735_v10  ;;  %v3746_v10 = vsub.f32 %v9445_v16, %v9381_v31 }
  0x94   : > { %v1637_v41 = vand.u32 2147483647, %v1061_v32  ;;  %v1638_v42 = vand.u32 2147483647, %v1062_v21  ;;  %v3511_v48 = vsub.f32 %v9454_v36, %v9379_v30  ;;  %v3512_v50 = vsub.f32 %v9454_v36, %v9381_v31 }
  0x95   : > { %v6409_v15 = vunpack.c.l.bf16 %v3077_v57  ;;  %v6986_v32 = vunpack.c.h.bf16 %v5851_v58  ;;  %v6410_v44 = vunpack.c.h.bf16 %v3077_v57  ;;  %v3745_v57 = vsub.f32 %v9445_v16, %v9379_v30 }
  0x96   : > { %v2213_v55 = vsub.f32 1.0, %v1637_v41  ;;  %v2214_v56 = vsub.f32 1.0, %v1638_v42  ;;  %v4087_v60 = vand.u32 2147483647, %v3511_v48  ;;  %v4088_v61 = vand.u32 2147483647, %v3512_v50 }
  0x97   : > { %v7561_v48 = vmul.f32 %v6985_v17, %v6409_v15 }
  0x98   : > { %9066 = vset.pattern.permute.xlu1 %v12746_v3  ;;  %386 = vperm.xlu2 %9065, %v9463_v46   ;;  %v9475_v62 = vpop.permute.xlu0 %3184  ;;  %v4663_v6 = vsub.f32 1.0, %v4087_v60  ;;  %v4664_v7 = vsub.f32 1.0, %v4088_v61  ;;  %v2789_v13 = vmax.f32 %v2213_v55, 0.0  ;;  %v2790_v14 = vmax.f32 %v2214_v56, 0.0 }
  0x99   : > { %13116 = vst [vmem:[#allocation13_spill] sm:$0xff] %v9475_v62  ;;  %311 = vperm.xlu1 %9066, %v252_v53   ;;  %9078 = vset.pattern.permute.xlu0 %v12744_v2 }
  0x9a   : > { %v9483_v12 = vpop.permute.xlu1 %3220  ;;  %v5239_v27 = vmax.f32 %v4663_v6, 0.0  ;;  %v5240_v28 = vmax.f32 %v4664_v7, 0.0  ;;  %v3086_v55 = vpack.c.bf16 %v2790_v14, %v2789_v13  ;;  %v7562_v14 = vmul.f32 %v6986_v32, %v6410_v44 }
  0x9b   : > { %13117 = vst [vmem:[#allocation14_spill] sm:$0xff] %v9483_v12  ;;  %v9485_v18 = vpop.permute.xlu2 %3212  ;;  %v3835_v20 = vsub.f32 %v9483_v12, %v9379_v30  ;;  %v3836_v26 = vsub.f32 %v9483_v12, %v9381_v31  ;;  %v4322_v44 = vand.u32 2147483647, %v3746_v10 }
  0x9c   : > { %13118 = vst [vmem:[#allocation15_spill] sm:$0xff] %v9485_v18  ;;  %v3799_v33 = vsub.f32 %v9485_v18, %v9379_v30  ;;  %v3800_v34 = vsub.f32 %v9485_v18, %v9381_v31  ;;  %v9499_v60 = vpack.c.bf16 %v5240_v28, %v5239_v27  ;;  %v4321_v27 = vand.u32 2147483647, %v3745_v57 }
  0x9d   : > { %v4411_v41 = vand.u32 2147483647, %v3835_v20  ;;  %v4412_v42 = vand.u32 2147483647, %v3836_v26  ;;  %v4898_v63 = vsub.f32 1.0, %v4322_v44 }
  0x9e   : > { %v4375_v51 = vand.u32 2147483647, %v3799_v33  ;;  %v4376_v52 = vand.u32 2147483647, %v3800_v34  ;;  %v6427_v34 = vunpack.c.l.bf16 %v3086_v55  ;;  %v6680_v57 = vunpack.c.h.bf16 %v9499_v60 }
  0x9f   : > { %v4987_v56 = vsub.f32 1.0, %v4411_v41  ;;  %v4988_v58 = vsub.f32 1.0, %v4412_v42  ;;  %v6428_v41 = vunpack.c.h.bf16 %v3086_v55  ;;  %v6679_v42 = vunpack.c.l.bf16 %v9499_v60 }
  0xa0   : > { %9068 = vset.pattern.permute.xlu2 %v12744_v2  ;;  %v9502_v61 = vpop.permute.xlu0 %3168  ;;  %v4951_v6 = vsub.f32 1.0, %v4375_v51  ;;  %v4952_v7 = vsub.f32 1.0, %v4376_v52  ;;  %v4897_v51 = vsub.f32 1.0, %v4321_v27 }
  0xa1   : > { %13119 = vst [vmem:[#allocation16_spill] sm:$0xff] %v9502_v61  ;;  %9067 = vset.pattern.permute.xlu1 %v12744_v2  ;;  %3116 = vperm.xlu2 %9068, %v252_v53   ;;  %v5563_v11 = vmax.f32 %v4987_v56, 0.0  ;;  %v5564_v13 = vmax.f32 %v4988_v58, 0.0 }
  0xa2   : > { %3112 = vperm.xlu1 %9067, %v9431_v1   ;;  %v5527_v17 = vmax.f32 %v4951_v6, 0.0  ;;  %v5528_v20 = vmax.f32 %v4952_v7, 0.0 }
  0xa3   : > { %v9512_v28 = vpop.permute.xlu1 %351  ;;  %v5860_v33 = vpack.c.bf16 %v5564_v13, %v5563_v11 }
  0xa4   : > { %13120 = vst [vmem:[#allocation17_spill] sm:$0xff] %v9512_v28  ;;  %v9515_v53 = vpop.permute.xlu2 %416  ;;  %v737_v32 = vsub.f32 %v9512_v28, %v9403_v40  ;;  %v738_v1 = vsub.f32 %v9512_v28, %v9406_v43  ;;  %v9526_v11 = vpack.c.bf16 %v5528_v20, %v5527_v17 }
  0xa5   : > { %13121 = vst [vmem:[#allocation18_spill] sm:$0xff] %v9515_v53  ;;  %v7003_v52 = vunpack.c.l.bf16 %v5860_v33  ;;  %v7004_v56 = vunpack.c.h.bf16 %v5860_v33  ;;  %v971_v58 = vsub.f32 %v9515_v53, %v9403_v40  ;;  %v972_v55 = vsub.f32 %v9515_v53, %v9406_v43 }
  0xa6   : > { %v1313_v6 = vand.u32 2147483647, %v737_v32  ;;  %v1314_v7 = vand.u32 2147483647, %v738_v1  ;;  %v5473_v33 = vmax.f32 %v4897_v51, 0.0 }
  0xa7   : > { %v7579_v13 = vmul.f32 %v7003_v52, %v6427_v34  ;;  %v7580_v26 = vmul.f32 %v7004_v56, %v6428_v41  ;;  %v1547_v15 = vand.u32 2147483647, %v971_v58  ;;  %v1548_v4 = vand.u32 2147483647, %v972_v55 }
  0xa8   : > { %v1889_v10 = vsub.f32 1.0, %v1313_v6  ;;  %v1890_v27 = vsub.f32 1.0, %v1314_v7 }
  0xa9   : > { %3180 = vperm.xlu2 %9068, %v9360_v23   ;;  %v9529_v2 = vpop.permute.xlu0 %356  ;;  %v7867_v50 = vpack.c.bf16 %v7579_v13, %v7561_v48  ;;  %v7868_v21 = vpack.c.bf16 %v7580_v26, %v7562_v14  ;;  %v2123_v32 = vsub.f32 1.0, %v1547_v15  ;;  %v2124_v1 = vsub.f32 1.0, %v1548_v4 }
  0xaa   : > { %13122 = vst [vmem:[#allocation19_spill] sm:$0xff] %v9529_v2  ;;  %3176 = vperm.xlu1 %9067, %v9463_v46   ;;  %v755_v60 = vsub.f32 %v9529_v2, %v9403_v40  ;;  %v756_v17 = vsub.f32 %v9529_v2, %v9406_v43  ;;  %v2465_v20 = vmax.f32 %v1889_v10, 0.0  ;;  %v2466_v34 = vmax.f32 %v1890_v27, 0.0 }
  0xab   : > { %7905 = vmatpush.bf16.msra.mxu1 %v7867_v50  ;;  %7931 = vmatpush.bf16.msra.mxu3 %v7868_v21  ;;  %v2699_v41 = vmax.f32 %v2123_v32, 0.0  ;;  %v2700_v44 = vmax.f32 %v2124_v1, 0.0  ;;  %v5474_v48 = vmax.f32 %v4898_v63, 0.0  ;;  %v250_v32 = vld [vmem:[%s12739_s0 + $0x18] sm:$0xff] }
  0xac   : > { %v9537_v14 = vpop.permute.xlu1 %3144  ;;  %v1331_v4 = vand.u32 2147483647, %v755_v60  ;;  %v1332_v15 = vand.u32 2147483647, %v756_v17  ;;  %v2924_v46 = vpack.c.bf16 %v2466_v34, %v2465_v20 }
  0xad   : > { %13123 = vst [vmem:[#allocation20_spill] sm:$0xff] %v9537_v14  ;;  %v9540_v51 = vpop.permute.xlu2 %3140  ;;  %v3493_v52 = vsub.f32 %v9537_v14, %v9379_v30  ;;  %v3494_v21 = vsub.f32 %v9537_v14, %v9381_v31  ;;  %v9546_v50 = vpack.c.bf16 %v2700_v44, %v2699_v41  ;;  %v9548_v56 = vpack.c.bf16 %v5474_v48, %v5473_v33 }
  0xae   : > { %13124 = vst [vmem:[#allocation21_spill] sm:$0xff] %v9540_v51  ;;  %v1907_v63 = vsub.f32 1.0, %v1331_v4  ;;  %v1908_v58 = vsub.f32 1.0, %v1332_v15  ;;  %v6103_v55 = vunpack.c.l.bf16 %v2924_v46  ;;  %v6104_v6 = vunpack.c.h.bf16 %v2924_v46 }
  0xaf   : > { %v4069_v7 = vand.u32 2147483647, %v3493_v52  ;;  %v4070_v13 = vand.u32 2147483647, %v3494_v21  ;;  %v3475_v10 = vsub.f32 %v9540_v51, %v9379_v30  ;;  %v3476_v27 = vsub.f32 %v9540_v51, %v9381_v31 }
  0xb0   : > { %v2483_v1 = vmax.f32 %v1907_v63, 0.0  ;;  %v2484_v60 = vmax.f32 %v1908_v58, 0.0  ;;  %v9557_v33 = vmul.f32 %v6679_v42, %v6103_v55  ;;  %v9559_v17 = vmul.f32 %v6680_v57, %v6104_v6 }
  0xb1   : > { %9070 = vset.pattern.permute.xlu2 %v12746_v3  ;;  %v9562_v20 = vpop.permute.xlu0 %361  ;;  %v4645_v34 = vsub.f32 1.0, %v4069_v7  ;;  %v4646_v41 = vsub.f32 1.0, %v4070_v13  ;;  %v4051_v44 = vand.u32 2147483647, %v3475_v10  ;;  %v4052_v48 = vand.u32 2147483647, %v3476_v27 }
  0xb2   : > { %13125 = vst [vmem:[#allocation22_spill] sm:$0xff] %v9562_v20  ;;  %9069 = vset.pattern.permute.xlu1 %v12746_v3  ;;  %376 = vperm.xlu2 %9070, %v9291_v9   ;;  %v773_v4 = vsub.f32 %v9562_v20, %v9403_v40  ;;  %v774_v42 = vsub.f32 %v9562_v20, %v9406_v43  ;;  %v6337_v15 = vunpack.c.l.bf16 %v9546_v50  ;;  %v6913_v3 = vunpack.c.l.bf16 %v9548_v56 }
  0xb3   : > { %v2933_v57 = vpack.c.bf16 %v2484_v60, %v2483_v1  ;;  %301 = vperm.xlu1 %9069, %v250_v32   ;;  %v5221_v46 = vmax.f32 %v4645_v34, 0.0  ;;  %v5222_v52 = vmax.f32 %v4646_v41, 0.0  ;;  %v4627_v21 = vsub.f32 1.0, %v4051_v44 }
  0xb4   : > { %v4628_v63 = vsub.f32 1.0, %v4052_v48  ;;  %v9571_v58 = vpop.permute.xlu1 %3208  ;;  %v1349_v55 = vand.u32 2147483647, %v773_v4  ;;  %v1350_v6 = vand.u32 2147483647, %v774_v42 }
  0xb5   : > { %13126 = vst [vmem:[#allocation23_spill] sm:$0xff] %v9571_v58  ;;  %v6121_v7 = vunpack.c.l.bf16 %v2933_v57  ;;  %v6122_v9 = vunpack.c.h.bf16 %v2933_v57  ;;  %v5689_v13 = vpack.c.bf16 %v5222_v52, %v5221_v46  ;;  %v3781_v10 = vsub.f32 %v9571_v58, %v9379_v30 }
  0xb6   : > { %v3782_v27 = vsub.f32 %v9571_v58, %v9381_v31  ;;  %v5203_v1 = vmax.f32 %v4627_v21, 0.0  ;;  %v9577_v60 = vpop.permute.xlu2 %326  ;;  %v1925_v34 = vsub.f32 1.0, %v1349_v55  ;;  %v1926_v41 = vsub.f32 1.0, %v1350_v6 }
  0xb7   : > { %13127 = vst [vmem:[#allocation24_spill] sm:$0xff] %v9577_v60  ;;  %v7273_v44 = vmul.f32 %v6697_v59, %v6121_v7  ;;  %v7274_v48 = vmul.f32 %v6698_v0, %v6122_v9  ;;  %v6661_v4 = vunpack.c.l.bf16 %v5689_v13  ;;  %v6662_v42 = vunpack.c.h.bf16 %v5689_v13 }
  0xb8   : > { %v4357_v57 = vand.u32 2147483647, %v3781_v10  ;;  %v4358_v46 = vand.u32 2147483647, %v3782_v27  ;;  %v2501_v52 = vmax.f32 %v1925_v34, 0.0  ;;  %v2502_v26 = vmax.f32 %v1926_v41, 0.0 }
  0xb9   : > { %v5204_v23 = vmax.f32 %v4628_v63, 0.0  ;;  %v9584_v21 = vpop.permute.xlu0 %431  ;;  %v13129_v55 = vunpack.c.l.bf16 %v9480_v5  ;;  %v13130_v59 = vunpack.c.h.bf16 %v9480_v5  ;;  %v13131_v9 = vmov 1  }
  0xba   : > { %13128 = vst [vmem:[#allocation25_spill] sm:$0xff] %v9584_v21  ;;  %v4933_v37 = vsub.f32 1.0, %v4357_v57  ;;  %v4934_v0 = vsub.f32 1.0, %v4358_v46  ;;  %9072 = vset.pattern.permute.xlu2 %v13131_v9  ;;  %v2942_v13 = vpack.c.bf16 %v2502_v26, %v2501_v52  ;;  %v1025_v63 = vsub.f32 %v9584_v21, %v9403_v40 }
  0xbb   : > { %v9588_v6 = vmul.f32 %v6661_v4, %v13129_v55  ;;  %v9592_v7 = vmul.f32 %v6662_v42, %v13130_v59  ;;  %v1026_v10 = vsub.f32 %v9584_v21, %v9406_v43  ;;  %v9599_v27 = vpack.c.bf16 %v5204_v23, %v5203_v1  ;;  %3108 = vperm.xlu2 %9072, %v250_v32  }
  0xbc   : > { %9071 = vset.pattern.permute.xlu1 %v13131_v9  ;;  %v5509_v41 = vmax.f32 %v4933_v37, 0.0  ;;  %v5510_v4 = vmax.f32 %v4934_v0, 0.0  ;;  %v6139_v26 = vunpack.c.l.bf16 %v2942_v13  ;;  %v6140_v42 = vunpack.c.h.bf16 %v2942_v13 }
  0xbd   : > { %v7705_v5 = vpack.c.bf16 %v9557_v33, %v9588_v6  ;;  %v7706_v34 = vpack.c.bf16 %v9559_v17, %v9592_v7  ;;  %3104 = vperm.xlu1 %9071, %v9376_v29   ;;  %v1601_v57 = vand.u32 2147483647, %v1025_v63  ;;  %v1602_v46 = vand.u32 2147483647, %v1026_v10  ;;  %v9607_v52 = vpop.permute.xlu1 %341 }
  0xbe   : > { %v5833_v23 = vpack.c.bf16 %v5510_v4, %v5509_v41  ;;  %v9611_v55 = vmul.f32 %v6913_v3, %v6337_v15  ;;  %v9613_v33 = vpop.permute.xlu2 %406  ;;  %v13133_v17 = vunpack.c.l.bf16 %v9458_v38  ;;  %v13134_v29 = vunpack.c.h.bf16 %v9458_v38  ;;  %v9628_v38 = vld [vmem:[%s12739_s0] sm:$0xff] }
  0xbf   : > { %13132 = vst [vmem:[#allocation26_spill] sm:$0xff] %v9613_v33  ;;  %v2177_v7 = vsub.f32 1.0, %v1601_v57  ;;  %v2178_v37 = vsub.f32 1.0, %v1602_v46  ;;  %v701_v63 = vsub.f32 %v9607_v52, %v9403_v40  ;;  %v702_v10 = vsub.f32 %v9607_v52, %v9406_v43 }
  0xc0   : > { %v7291_v6 = vmul.f32 %v13133_v17, %v6139_v26  ;;  %v7292_v59 = vmul.f32 %v13134_v29, %v6140_v42  ;;  %v6949_v0 = vunpack.c.l.bf16 %v5833_v23  ;;  %v6950_v13 = vunpack.c.h.bf16 %v5833_v23 }
  0xc1   : > { %v2753_v41 = vmax.f32 %v2177_v7, 0.0  ;;  %v2754_v4 = vmax.f32 %v2178_v37, 0.0  ;;  %v9623_v1 = vpop.permute.xlu0 %336  ;;  %v13135_v26 = vunpack.c.l.bf16 %v9496_v45  ;;  %v13136_v57 = vunpack.c.h.bf16 %v9496_v45 }
  0xc2   : > { %v7723_v3 = vpack.c.bf16 %v7291_v6, %v7273_v44  ;;  %v7724_v15 = vpack.c.bf16 %v7292_v59, %v7274_v48  ;;  %v1277_v23 = vand.u32 2147483647, %v701_v63  ;;  %v1278_v17 = vand.u32 2147483647, %v702_v10 }
  0xc3   : > { %v7525_v42 = vmul.f32 %v6949_v0, %v13135_v26  ;;  %v7526_v46 = vmul.f32 %v6950_v13, %v13136_v57  ;;  %v3068_v44 = vpack.c.bf16 %v2754_v4, %v2753_v41  ;;  %v683_v48 = vsub.f32 %v9623_v1, %v9403_v40 }
  0xc4   : > { %7892 = vmatpush.bf16.msra.mxu0 %v7723_v3  ;;  %7918 = vmatpush.bf16.msra.mxu2 %v7724_v15  ;;  %v684_v6 = vsub.f32 %v9623_v1, %v9406_v43  ;;  %v6338_v29 = vunpack.c.h.bf16 %v9546_v50  ;;  %v13137_v59 = vmov 0   ;;  %v1853_v7 = vsub.f32 1.0, %v1277_v23 }
  0xc5   : > { %9074 = vset.pattern.permute.xlu2 %v13137_v59  ;;  %v1854_v37 = vsub.f32 1.0, %v1278_v17  ;;  %v6914_v45 = vunpack.c.h.bf16 %v9548_v56  ;;  %v647_v0 = vsub.f32 %v9577_v60, %v9403_v40  ;;  %3172 = vperm.xlu1 %9071, %v9401_v39   ;;  %v6391_v13 = vunpack.c.l.bf16 %v3068_v44 }
  0xc6   : > { %286 = vperm.xlu2 %9074, %v9628_v38   ;;  %v6392_v63 = vunpack.c.h.bf16 %v3068_v44  ;;  %v1259_v10 = vand.u32 2147483647, %v683_v48  ;;  %v1260_v3 = vand.u32 2147483647, %v684_v6  ;;  %v2429_v15 = vmax.f32 %v1853_v7, 0.0  ;;  %v9649_v26 = vpop.permute.xlu1 %3136 }
  0xc7   : > { %v2430_v41 = vmax.f32 %v1854_v37, 0.0  ;;  %v9645_v50 = vmul.f32 %v6914_v45, %v6338_v29  ;;  %v648_v4 = vsub.f32 %v9577_v60, %v9406_v43  ;;  %v13138_v56 = vunpack.c.l.bf16 %v9526_v11  ;;  %v9655_v48 = vpop.permute.xlu2 %3132 }
  0xc8   : > { %7893 = vmatpush.bf16.msra.mxu0 %v7705_v5  ;;  %7919 = vmatpush.bf16.msra.mxu2 %v7706_v34  ;;  %v13139_v57 = vunpack.c.h.bf16 %v9526_v11  ;;  %v1835_v17 = vsub.f32 1.0, %v1259_v10  ;;  %v1836_v44 = vsub.f32 1.0, %v1260_v3  ;;  %13140 = vst [vmem:[#allocation27_spill] sm:$0xff] %v9655_v48  ;;  %v3457_v29 = vsub.f32 %v9649_v26, %v9379_v30  ;;  %v9666_v11 = vld [vmem:[%s12739_s0 + $0x80] sm:$0xff] }
  0xc9   : > { %v7543_v39 = vmul.f32 %v13138_v56, %v6391_v13  ;;  %v2906_v6 = vpack.c.bf16 %v2430_v41, %v2429_v15  ;;  %v3458_v7 = vsub.f32 %v9649_v26, %v9381_v31  ;;  %v1223_v37 = vand.u32 2147483647, %v647_v0  ;;  %v9661_v13 = vpop.permute.xlu0 %421 }
  0xca   : > { %v7544_v23 = vmul.f32 %v13139_v57, %v6392_v63  ;;  %v2411_v45 = vmax.f32 %v1835_v17, 0.0  ;;  %v2412_v32 = vmax.f32 %v1836_v44, 0.0  ;;  %13141 = vst [vmem:[#allocation28_spill] sm:$0xff] %v9661_v13  ;;  %v4033_v63 = vand.u32 2147483647, %v3457_v29 }
  0xcb   : > { %v7849_v5 = vpack.c.bf16 %v7543_v39, %v7525_v42  ;;  %v4034_v10 = vand.u32 2147483647, %v3458_v7  ;;  %v6067_v3 = vunpack.c.l.bf16 %v2906_v6  ;;  %v6068_v15 = vunpack.c.h.bf16 %v2906_v6  ;;  %v248_v42 = vld [vmem:[%s12739_s0 + $0x8] sm:$0xff] }
  0xcc   : > { %v7850_v34 = vpack.c.bf16 %v7544_v23, %v7526_v46  ;;  %v2897_v46 = vpack.c.bf16 %v2412_v32, %v2411_v45  ;;  %v989_v0 = vsub.f32 %v9661_v13, %v9403_v40  ;;  %v990_v41 = vsub.f32 %v9661_v13, %v9406_v43 }
  0xcd   : > { %7906 = vmatpush.bf16.msra.mxu1 %v7849_v5  ;;  %v1224_v56 = vand.u32 2147483647, %v648_v4  ;;  %v4609_v39 = vsub.f32 1.0, %v4033_v63  ;;  %v4610_v57 = vsub.f32 1.0, %v4034_v10  ;;  %v13142_v23 = vunpack.c.l.bf16 %v9599_v27  ;;  %9075 = vset.pattern.permute.xlu1 %v13137_v59 }
  0xce   : > { %7932 = vmatpush.bf16.msra.mxu3 %v7850_v34  ;;  %v13143_v44 = vunpack.c.h.bf16 %v9599_v27  ;;  %366 = vperm.xlu2 %9074, %v9666_v11   ;;  %v6049_v32 = vunpack.c.l.bf16 %v2897_v46  ;;  %v6050_v29 = vunpack.c.h.bf16 %v2897_v46  ;;  %v1565_v7 = vand.u32 2147483647, %v989_v0  ;;  %v9681_v10 = vpop.permute.xlu1 %3204 }
  0xcf   : > { %v7219_v17 = vmul.f32 %v13142_v23, %v6067_v3  ;;  %v1566_v5 = vand.u32 2147483647, %v990_v41  ;;  %291 = vperm.xlu1 %9075, %v248_v42   ;;  %v5185_v34 = vmax.f32 %v4609_v39, 0.0  ;;  %v5186_v45 = vmax.f32 %v4610_v57, 0.0  ;;  %13144 = vst [vmem:[#allocation29_spill] sm:$0xff] %v9681_v10 }
  0xd0   : > { %v7220_v6 = vmul.f32 %v13143_v44, %v6068_v15  ;;  %v1799_v4 = vsub.f32 1.0, %v1223_v37  ;;  %v1800_v63 = vsub.f32 1.0, %v1224_v56  ;;  %v2141_v16 = vsub.f32 1.0, %v1565_v7  ;;  %v9687_v15 = vpop.permute.xlu2 %3196 }
  0xd1   : > { %v2142_v3 = vsub.f32 1.0, %v1566_v5  ;;  %v3439_v27 = vsub.f32 %v9655_v48, %v9379_v30  ;;  %v3440_v59 = vsub.f32 %v9655_v48, %v9381_v31  ;;  %13145 = vst [vmem:[#allocation30_spill] sm:$0xff] %v9687_v15  ;;  %v5671_v46 = vpack.c.bf16 %v5186_v45, %v5185_v34  ;;  %v9693_v44 = vpop.permute.xlu0 %411 }
  0xd2   : > { %v3763_v0 = vsub.f32 %v9681_v10, %v9379_v30  ;;  %v3764_v37 = vsub.f32 %v9681_v10, %v9381_v31  ;;  %v2375_v41 = vmax.f32 %v1799_v4, 0.0  ;;  %v2717_v56 = vmax.f32 %v2141_v16, 0.0  ;;  %13146 = vst [vmem:[#allocation31_spill] sm:$0xff] %v9693_v44 }
  0xd3   : > { %v2718_v39 = vmax.f32 %v2142_v3, 0.0  ;;  %v2376_v57 = vmax.f32 %v1800_v63, 0.0  ;;  %v4015_v23 = vand.u32 2147483647, %v3439_v27  ;;  %v6625_v7 = vunpack.c.l.bf16 %v5671_v46 }
  0xd4   : > { %v6626_v5 = vunpack.c.h.bf16 %v5671_v46  ;;  %v4339_v13 = vand.u32 2147483647, %v3763_v0  ;;  %v4340_v53 = vand.u32 2147483647, %v3764_v37  ;;  %v4016_v34 = vand.u32 2147483647, %v3440_v59 }
  0xd5   : > { %v3050_v18 = vpack.c.bf16 %v2718_v39, %v2717_v56  ;;  %v9695_v58 = vpack.c.bf16 %v2376_v57, %v2375_v41  ;;  %v4591_v45 = vsub.f32 1.0, %v4015_v23  ;;  %v7201_v21 = vmul.f32 %v6625_v7, %v6049_v32 }
  0xd6   : > { %v7202_v54 = vmul.f32 %v6626_v5, %v6050_v29  ;;  %v4915_v48 = vsub.f32 1.0, %v4339_v13  ;;  %v4916_v10 = vsub.f32 1.0, %v4340_v53  ;;  %9077 = vset.pattern.permute.xlu2 %v13131_v9  ;;  %v4592_v63 = vsub.f32 1.0, %v4016_v34 }
  0xd7   : > { %v6355_v16 = vunpack.c.l.bf16 %v3050_v18  ;;  %v6356_v4 = vunpack.c.h.bf16 %v3050_v18  ;;  %v5167_v3 = vmax.f32 %v4591_v45, 0.0  ;;  %9076 = vset.pattern.permute.xlu1 %v13131_v9  ;;  %3100 = vperm.xlu2 %9077, %v248_v42   ;;  %v7687_v27 = vpack.c.bf16 %v7219_v17, %v7201_v21  ;;  %v9704_v18 = vpop.permute.xlu1 %331 }
  0xd8   : > { %v7688_v46 = vpack.c.bf16 %v7220_v6, %v7202_v54  ;;  %v5491_v0 = vmax.f32 %v4915_v48, 0.0  ;;  %v5492_v37 = vmax.f32 %v4916_v10, 0.0  ;;  %3096 = vperm.xlu1 %9076, %v9628_v38   ;;  %v5168_v59 = vmax.f32 %v4592_v63, 0.0  ;;  %13147 = vst [vmem:[#allocation32_spill] sm:$0xff] %v9704_v18  ;;  %v9717_v29 = vpop.permute.xlu2 %396 }
  0xd9   : > { %v935_v13 = vsub.f32 %v9613_v33, %v9403_v40  ;;  %7894 = vmatpush.bf16.msra.mxu0 %v7687_v27  ;;  %v936_v54 = vsub.f32 %v9613_v33, %v9406_v43  ;;  %v953_v21 = vsub.f32 %v9693_v44, %v9403_v40  ;;  %v665_v48 = vsub.f32 %v9704_v18, %v9403_v40  ;;  %v9719_v10 = vpop.permute.xlu0 %316 }
  0xda   : > { %7920 = vmatpush.bf16.msra.mxu2 %v7688_v46  ;;  %v5824_v9 = vpack.c.bf16 %v5492_v37, %v5491_v0  ;;  %v666_v42 = vsub.f32 %v9704_v18, %v9406_v43  ;;  %v5662_v17 = vpack.c.bf16 %v5168_v59, %v5167_v3  ;;  %v954_v6 = vsub.f32 %v9693_v44, %v9406_v43 }
  0xdb   : > { %13148 = vst [vmem:[#allocation33_spill] sm:$0xff] %v9717_v29  ;;  %v1511_v39 = vand.u32 2147483647, %v935_v13  ;;  %v1512_v57 = vand.u32 2147483647, %v936_v54 }
  0xdc   : > { %13149 = vst [vmem:[#allocation34_spill] sm:$0xff] %v9719_v10  ;;  %v6931_v41 = vunpack.c.l.bf16 %v5824_v9  ;;  %v6932_v56 = vunpack.c.h.bf16 %v5824_v9  ;;  %v1241_v23 = vand.u32 2147483647, %v665_v48  ;;  %v1242_v7 = vand.u32 2147483647, %v666_v42 }
  0xdd   : > { %v6607_v5 = vunpack.c.l.bf16 %v5662_v17  ;;  %v6608_v34 = vunpack.c.h.bf16 %v5662_v17  ;;  %v1529_v27 = vand.u32 2147483647, %v953_v21  ;;  %v1530_v46 = vand.u32 2147483647, %v954_v6 }
  0xde   : > { %v7507_v45 = vmul.f32 %v6931_v41, %v6355_v16  ;;  %v7508_v63 = vmul.f32 %v6932_v56, %v6356_v4  ;;  %v1817_v3 = vsub.f32 1.0, %v1241_v23  ;;  %v1818_v0 = vsub.f32 1.0, %v1242_v7 }
  0xdf   : > { %v2087_v37 = vsub.f32 1.0, %v1511_v39  ;;  %v2088_v59 = vsub.f32 1.0, %v1512_v57  ;;  %3164 = vperm.xlu2 %9077, %v9440_v8   ;;  %v2105_v13 = vsub.f32 1.0, %v1529_v27  ;;  %v2106_v54 = vsub.f32 1.0, %v1530_v46 }
  0xe0   : > { %v7831_v38 = vpack.c.bf16 %v7507_v45, %v9611_v55  ;;  %v7832_v9 = vpack.c.bf16 %v7508_v63, %v9645_v50  ;;  %3160 = vperm.xlu1 %9076, %v9666_v11   ;;  %v2393_v48 = vmax.f32 %v1817_v3, 0.0  ;;  %v2394_v42 = vmax.f32 %v1818_v0, 0.0  ;;  %v9729_v55 = vpop.permute.xlu1 %3128 }
  0xe1   : > { %v2663_v16 = vmax.f32 %v2087_v37, 0.0  ;;  %v2664_v4 = vmax.f32 %v2088_v59, 0.0  ;;  %v2681_v21 = vmax.f32 %v2105_v13, 0.0  ;;  %v2682_v17 = vmax.f32 %v2106_v54, 0.0  ;;  %13150 = vst [vmem:[#allocation35_spill] sm:$0xff] %v9729_v55  ;;  %v9737_v56 = vpop.permute.xlu0 %401  ;;  %v9739_v39 = vpop.permute.xlu2 %3124 }
  0xe2   : > { %7907 = vmatpush.bf16.msra.mxu1 %v7831_v38  ;;  %7933 = vmatpush.bf16.msra.mxu3 %v7832_v9  ;;  %v3727_v6 = vsub.f32 %v9687_v15, %v9379_v30  ;;  %v3728_v8 = vsub.f32 %v9687_v15, %v9381_v31  ;;  %v2888_v50 = vpack.c.bf16 %v2394_v42, %v2393_v48  ;;  %v13156_v15 = vunpack.c.l.bf16 %v9695_v58 }
  0xe3   : > { %v9731_v41 = vpack.c.bf16 %v2664_v4, %v2663_v16  ;;  %13151 = vst [vmem:[#allocation36_spill] sm:$0xff] %v9737_v56  ;;  %v3421_v57 = vsub.f32 %v9729_v55, %v9379_v30  ;;  %v3422_v23 = vsub.f32 %v9729_v55, %v9381_v31  ;;  %v3032_v7 = vpack.c.bf16 %v2682_v17, %v2681_v21 }
  0xe4   : > { %13152 = vst [vmem:[#allocation37_spill] sm:$0xff] %v9739_v39  ;;  %v4303_v45 = vand.u32 2147483647, %v3727_v6  ;;  %v6031_v63 = vunpack.c.l.bf16 %v2888_v50  ;;  %v6032_v27 = vunpack.c.h.bf16 %v2888_v50  ;;  %v4304_v46 = vand.u32 2147483647, %v3728_v8 }
  0xe5   : > { %v3997_v0 = vand.u32 2147483647, %v3421_v57  ;;  %v3998_v37 = vand.u32 2147483647, %v3422_v23  ;;  %v6319_v9 = vunpack.c.l.bf16 %v3032_v7  ;;  %v6320_v11 = vunpack.c.h.bf16 %v3032_v7 }
  0xe6   : > { %v4879_v59 = vsub.f32 1.0, %v4303_v45  ;;  %v7183_v13 = vmul.f32 %v6607_v5, %v6031_v63  ;;  %v7184_v54 = vmul.f32 %v6608_v34, %v6032_v27  ;;  %v4880_v48 = vsub.f32 1.0, %v4304_v46 }
  0xe7   : > { %v4573_v16 = vsub.f32 1.0, %v3997_v0  ;;  %v4574_v4 = vsub.f32 1.0, %v3998_v37  ;;  %v611_v17 = vsub.f32 %v9719_v10, %v9403_v40  ;;  %v612_v6 = vsub.f32 %v9719_v10, %v9406_v43 }
  0xe8   : > { %v5455_v38 = vmax.f32 %v4879_v59, 0.0  ;;  %v5456_v21 = vmax.f32 %v4880_v48, 0.0  ;;  %v3403_v8 = vsub.f32 %v9739_v39, %v9379_v30  ;;  %v3404_v34 = vsub.f32 %v9739_v39, %v9381_v31  ;;  %v9757_v23 = vpop.permute.xlu1 %3192 }
  0xe9   : > { %v5149_v50 = vmax.f32 %v4573_v16, 0.0  ;;  %v5150_v5 = vmax.f32 %v4574_v4, 0.0  ;;  %v917_v57 = vsub.f32 %v9737_v56, %v9403_v40  ;;  %13153 = vst [vmem:[#allocation38_spill] sm:$0xff] %v9757_v23  ;;  %v1187_v45 = vand.u32 2147483647, %v611_v17  ;;  %v9759_v46 = vpop.permute.xlu0 %391 }
  0xea   : > { %v5806_v7 = vpack.c.bf16 %v5456_v21, %v5455_v38  ;;  %v1188_v63 = vand.u32 2147483647, %v612_v6  ;;  %v3979_v27 = vand.u32 2147483647, %v3403_v8  ;;  %13154 = vst [vmem:[#allocation39_spill] sm:$0xff] %v9759_v46  ;;  %v3709_v37 = vsub.f32 %v9757_v23, %v9379_v30  ;;  %v9765_v16 = vpop.permute.xlu2 %306 }
  0xeb   : > { %v5653_v0 = vpack.c.bf16 %v5150_v5, %v5149_v50  ;;  %v3710_v59 = vsub.f32 %v9757_v23, %v9381_v31  ;;  %v3980_v48 = vand.u32 2147483647, %v3404_v34  ;;  %13155 = vst [vmem:[#allocation40_spill] sm:$0xff] %v9765_v16  ;;  %v1763_v3 = vsub.f32 1.0, %v1187_v45 }
  0xec   : > { %v6895_v4 = vunpack.c.l.bf16 %v5806_v7  ;;  %v6896_v42 = vunpack.c.h.bf16 %v5806_v7  ;;  %v1764_v53 = vsub.f32 1.0, %v1188_v63  ;;  %v4285_v17 = vand.u32 2147483647, %v3709_v37 }
  0xed   : > { %v6589_v38 = vunpack.c.l.bf16 %v5653_v0  ;;  %v6590_v21 = vunpack.c.h.bf16 %v5653_v0  ;;  %v4286_v6 = vand.u32 2147483647, %v3710_v59  ;;  %v2339_v50 = vmax.f32 %v1763_v3, 0.0 }
  0xee   : > { %v7471_v8 = vmul.f32 %v6895_v4, %v6319_v9  ;;  %v7472_v32 = vmul.f32 %v6896_v42, %v6320_v11  ;;  %v2340_v5 = vmax.f32 %v1764_v53, 0.0  ;;  %v13157_v23 = vunpack.c.h.bf16 %v9695_v58 }
  0xef   : > { %v7165_v44 = vmul.f32 %v6589_v38, %v13156_v15  ;;  %v4861_v33 = vsub.f32 1.0, %v4285_v17  ;;  %v4862_v39 = vsub.f32 1.0, %v4286_v6  ;;  %v4555_v7 = vsub.f32 1.0, %v3979_v27 }
  0xf0   : > { %v7166_v34 = vmul.f32 %v6590_v21, %v13157_v23  ;;  %v9771_v10 = vpack.c.bf16 %v2340_v5, %v2339_v50  ;;  %v4556_v45 = vsub.f32 1.0, %v3980_v48  ;;  %v918_v63 = vsub.f32 %v9737_v56, %v9406_v43 }
  0xf1   : > { %v7669_v0 = vpack.c.bf16 %v7183_v13, %v7165_v44  ;;  %v5437_v11 = vmax.f32 %v4861_v33, 0.0  ;;  %v5438_v3 = vmax.f32 %v4862_v39, 0.0  ;;  %v5131_v53 = vmax.f32 %v4555_v7, 0.0  ;;  %v9777_v23 = vpop.permute.xlu1 %321  ;;  %v9791_v21 = vpop.permute.xlu0 %296 }
  0xf2   : > { %v7670_v9 = vpack.c.bf16 %v7184_v54, %v7166_v34  ;;  %v5132_v42 = vmax.f32 %v4556_v45, 0.0  ;;  %13158 = vst [vmem:[#allocation41_spill] sm:$0xff] %v9777_v23  ;;  %v13159_v27 = vsub.f32 %v9717_v29, %v9403_v40  ;;  %v13160_v44 = vsub.f32 %v9717_v29, %v9406_v43  ;;  %v9785_v13 = vpop.permute.xlu2 %386 }
  0xf3   : > { %7895 = vmatpush.bf16.msra.mxu0 %v7669_v0  ;;  %v5797_v37 = vpack.c.bf16 %v5438_v3, %v5437_v11  ;;  %v1493_v39 = vand.u32 2147483647, %v917_v57  ;;  %13161 = vst [vmem:[#allocation42_spill] sm:$0xff] %v9785_v13  ;;  %v629_v54 = vsub.f32 %v9777_v23, %v9403_v40  ;;  %v630_v48 = vsub.f32 %v9777_v23, %v9406_v43 }
  0xf4   : > { %7921 = vmatpush.bf16.msra.mxu2 %v7670_v9  ;;  %v1475_v59 = vand.u32 2147483647, %v13159_v27  ;;  %v1476_v33 = vand.u32 2147483647, %v13160_v44  ;;  %v5644_v4 = vpack.c.bf16 %v5132_v42, %v5131_v53  ;;  %v1494_v38 = vand.u32 2147483647, %v918_v63 }
  0xf5   : > { %13162 = vst [vmem:[#allocation43_spill] sm:$0xff] %v9791_v21  ;;  %v6877_v17 = vunpack.c.l.bf16 %v5797_v37  ;;  %v6878_v6 = vunpack.c.h.bf16 %v5797_v37  ;;  %v1205_v34 = vand.u32 2147483647, %v629_v54  ;;  %v1206_v7 = vand.u32 2147483647, %v630_v48 }
  0xf6   : > { %v2051_v50 = vsub.f32 1.0, %v1475_v59  ;;  %v2052_v5 = vsub.f32 1.0, %v1476_v33  ;;  %v6571_v45 = vunpack.c.l.bf16 %v5644_v4  ;;  %v6572_v57 = vunpack.c.h.bf16 %v5644_v4 }
  0xf7   : > { %v13163_v0 = vunpack.c.l.bf16 %v9731_v41  ;;  %v13164_v11 = vunpack.c.h.bf16 %v9731_v41  ;;  %v2069_v27 = vsub.f32 1.0, %v1493_v39  ;;  %v2070_v44 = vsub.f32 1.0, %v1494_v38 }
  0xf8   : > { %v1781_v53 = vsub.f32 1.0, %v1205_v34  ;;  %v1782_v63 = vsub.f32 1.0, %v1206_v7  ;;  %v2627_v42 = vmax.f32 %v2051_v50, 0.0  ;;  %v2628_v58 = vmax.f32 %v2052_v5, 0.0 }
  0xf9   : > { %v7453_v9 = vmul.f32 %v6877_v17, %v13163_v0  ;;  %v7454_v3 = vmul.f32 %v6878_v6, %v13164_v11  ;;  %v2645_v33 = vmax.f32 %v2069_v27, 0.0  ;;  %v2646_v54 = vmax.f32 %v2070_v44, 0.0 }
  0xfa   : > { %v2357_v48 = vmax.f32 %v1781_v53, 0.0  ;;  %v2358_v15 = vmax.f32 %v1782_v63, 0.0  ;;  %v9797_v4 = vpack.c.bf16 %v2628_v58, %v2627_v42  ;;  %v3673_v17 = vsub.f32 %v9475_v62, %v9379_v30  ;;  %v9811_v6 = vpop.permute.xlu1 %3120  ;;  %v9823_v63 = vpop.permute.xlu0 %381 }
  0xfb   : > { %v7813_v37 = vpack.c.bf16 %v7471_v8, %v7453_v9  ;;  %v7814_v59 = vpack.c.bf16 %v7472_v32, %v7454_v3  ;;  %v9801_v41 = vpack.c.bf16 %v2646_v54, %v2645_v33  ;;  %v3674_v39 = vsub.f32 %v9475_v62, %v9381_v31  ;;  %v9808_v32 = vld [vmem:[%s9355_s21] sm:$0xff]  ;;  %13165 = vst [vmem:[#allocation44_spill] sm:$0xff] %v9811_v6  ;;  %v9815_v7 = vpop.permute.xlu2 %3116 }
  0xfc   : > { %v2870_v58 = vpack.c.bf16 %v2358_v15, %v2357_v48  ;;  %v4249_v50 = vand.u32 2147483647, %v3673_v17  ;;  %v6265_v5 = vunpack.c.l.bf16 %v9797_v4  ;;  %v6266_v34 = vunpack.c.h.bf16 %v9797_v4  ;;  %13166 = vst [vmem:[#allocation45_spill] sm:$0xff] %v9815_v7 }
  0xfd   : > { %7908 = vmatpush.bf16.msra.mxu1 %v7813_v37  ;;  %7934 = vmatpush.bf16.msra.mxu3 %v7814_v59  ;;  %v3385_v0 = vsub.f32 %v9811_v6, %v9379_v30  ;;  %v3386_v9 = vsub.f32 %v9811_v6, %v9381_v31  ;;  %v4250_v11 = vand.u32 2147483647, %v3674_v39  ;;  %13167 = vst [vmem:[#allocation46_spill] sm:$0xff] %v9823_v63 }
  0xfe   : > { %v5995_v27 = vunpack.c.l.bf16 %v2870_v58  ;;  %v5996_v44 = vunpack.c.h.bf16 %v2870_v58  ;;  %v4825_v53 = vsub.f32 1.0, %v4249_v50  ;;  %v881_v33 = vsub.f32 %v9759_v46, %v9403_v40 }
  0xff   : > { %v3961_v42 = vand.u32 2147483647, %v3385_v0  ;;  %v3962_v37 = vand.u32 2147483647, %v3386_v9  ;;  %v4826_v59 = vsub.f32 1.0, %v4250_v11  ;;  %v882_v17 = vsub.f32 %v9759_v46, %v9406_v43 }
 0x100   : > { %v7147_v54 = vmul.f32 %v6571_v45, %v5995_v27  ;;  %v7148_v48 = vmul.f32 %v6572_v57, %v5996_v44  ;;  %v5401_v4 = vmax.f32 %v4825_v53, 0.0  ;;  %v1457_v50 = vand.u32 2147483647, %v881_v33 }
 0x101   : > { %v4537_v39 = vsub.f32 1.0, %v3961_v42  ;;  %v4538_v38 = vsub.f32 1.0, %v3962_v37  ;;  %v5402_v58 = vmax.f32 %v4826_v59, 0.0  ;;  %v1458_v8 = vand.u32 2147483647, %v882_v17 }
 0x102   : > { %v539_v15 = vsub.f32 %v9791_v21, %v9403_v40  ;;  %v540_v0 = vsub.f32 %v9791_v21, %v9406_v43  ;;  %v2033_v27 = vsub.f32 1.0, %v1457_v50  ;;  %v9835_v44 = vpop.permute.xlu1 %3188 }
 0x103   : > { %v5113_v45 = vmax.f32 %v4537_v39, 0.0  ;;  %v5114_v57 = vmax.f32 %v4538_v38, 0.0  ;;  %v5779_v11 = vpack.c.bf16 %v5402_v58, %v5401_v4  ;;  %13168 = vst [vmem:[#allocation47_spill] sm:$0xff] %v9835_v44  ;;  %v2034_v53 = vsub.f32 1.0, %v1458_v8  ;;  %v9843_v33 = vpop.permute.xlu2 %3180 }
 0x104   : > { %v9837_v42 = vand.u32 2147483647, %v539_v15  ;;  %v9839_v37 = vand.u32 2147483647, %v540_v0  ;;  %13169 = vst [vmem:[#allocation48_spill] sm:$0xff] %v9843_v33  ;;  %v3691_v9 = vsub.f32 %v9835_v44, %v9379_v30  ;;  %v3692_v38 = vsub.f32 %v9835_v44, %v9381_v31 }
 0x105   : > { %v5635_v17 = vpack.c.bf16 %v5114_v57, %v5113_v45  ;;  %v6841_v4 = vunpack.c.l.bf16 %v5779_v11  ;;  %v6842_v39 = vunpack.c.h.bf16 %v5779_v11  ;;  %v2609_v58 = vmax.f32 %v2033_v27, 0.0 }
 0x106   : > { %v2610_v8 = vmax.f32 %v2034_v53, 0.0  ;;  %v4267_v3 = vand.u32 2147483647, %v3691_v9  ;;  %v4268_v46 = vand.u32 2147483647, %v3692_v38  ;;  %v575_v45 = vsub.f32 %v9765_v16, %v9403_v40 }
 0x107   : > { %v6553_v50 = vunpack.c.l.bf16 %v5635_v17  ;;  %v6554_v0 = vunpack.c.h.bf16 %v5635_v17  ;;  %v7417_v59 = vmul.f32 %v6841_v4, %v6265_v5  ;;  %v7418_v62 = vmul.f32 %v6842_v39, %v6266_v34 }
 0x108   : > { %v576_v57 = vsub.f32 %v9765_v16, %v9406_v43  ;;  %v13170_v44 = vunpack.c.l.bf16 %v9771_v10  ;;  %v13171_v11 = vunpack.c.h.bf16 %v9771_v10  ;;  %v4843_v53 = vsub.f32 1.0, %v4267_v3 }
 0x109   : > { %v4844_v15 = vsub.f32 1.0, %v4268_v46  ;;  %v1151_v29 = vand.u32 2147483647, %v575_v45  ;;  %v3367_v5 = vsub.f32 %v9815_v7, %v9379_v30  ;;  %v3368_v34 = vsub.f32 %v9815_v7, %v9381_v31 }
 0x10a   : > { %v7129_v56 = vmul.f32 %v6553_v50, %v13170_v44  ;;  %v7130_v27 = vmul.f32 %v6554_v0, %v13171_v11  ;;  %v1152_v17 = vand.u32 2147483647, %v576_v57  ;;  %v5419_v4 = vmax.f32 %v4843_v53, 0.0 }
 0x10b   : > { %v5420_v39 = vmax.f32 %v4844_v15, 0.0  ;;  %v1727_v21 = vsub.f32 1.0, %v1151_v29  ;;  %v3943_v44 = vand.u32 2147483647, %v3367_v5  ;;  %v3944_v50 = vand.u32 2147483647, %v3368_v34  ;;  %v9862_v10 = vpop.permute.xlu1 %311 }
 0x10c   : > { %v7651_v9 = vpack.c.bf16 %v7147_v54, %v7129_v56  ;;  %v7652_v38 = vpack.c.bf16 %v7148_v48, %v7130_v27  ;;  %v1728_v16 = vsub.f32 1.0, %v1152_v17  ;;  %13172 = vst [vmem:[#allocation49_spill] sm:$0xff] %v9862_v10  ;;  %v863_v3 = vsub.f32 %v9785_v13, %v9403_v40  ;;  %v9873_v45 = vpop.permute.xlu2 %376 }
 0x10d   : > { %v5788_v46 = vpack.c.bf16 %v5420_v39, %v5419_v4  ;;  %v864_v0 = vsub.f32 %v9785_v13, %v9406_v43  ;;  %v593_v54 = vsub.f32 %v9862_v10, %v9403_v40  ;;  %v594_v29 = vsub.f32 %v9862_v10, %v9406_v43  ;;  %13173 = vst [vmem:[#allocation50_spill] sm:$0xff] %v9873_v45 }
 0x10e   : > { %7896 = vmatpush.bf16.msra.mxu0 %v7651_v9  ;;  %7922 = vmatpush.bf16.msra.mxu2 %v7652_v38  ;;  %v2303_v48 = vmax.f32 %v1727_v21, 0.0  ;;  %v2304_v15 = vmax.f32 %v1728_v16, 0.0  ;;  %v4519_v27 = vsub.f32 1.0, %v3943_v44  ;;  %v4520_v53 = vsub.f32 1.0, %v3944_v50 }
 0x10f   : > { %v6859_v57 = vunpack.c.l.bf16 %v5788_v46  ;;  %v6860_v11 = vunpack.c.h.bf16 %v5788_v46  ;;  %v1169_v17 = vand.u32 2147483647, %v593_v54  ;;  %v1170_v5 = vand.u32 2147483647, %v594_v29 }
 0x110   : > { %v9875_v34 = vpack.c.bf16 %v2304_v15, %v2303_v48  ;;  %v1439_v9 = vand.u32 2147483647, %v863_v3  ;;  %v13174_v38 = vunpack.c.l.bf16 %v9801_v41  ;;  %v13175_v39 = vunpack.c.h.bf16 %v9801_v41 }
 0x111   : > { %v5095_v13 = vmax.f32 %v4519_v27, 0.0  ;;  %v5096_v21 = vmax.f32 %v4520_v53, 0.0  ;;  %v1745_v16 = vsub.f32 1.0, %v1169_v17  ;;  %v1746_v7 = vsub.f32 1.0, %v1170_v5 }
 0x112   : > { %v7435_v4 = vmul.f32 %v6859_v57, %v13174_v38  ;;  %v7436_v56 = vmul.f32 %v6860_v11, %v13175_v39  ;;  %v1440_v29 = vand.u32 2147483647, %v864_v0  ;;  %v2015_v15 = vsub.f32 1.0, %v1439_v9 }
 0x113   : > { %v5626_v54 = vpack.c.bf16 %v5096_v21, %v5095_v13  ;;  %v2321_v48 = vmax.f32 %v1745_v16, 0.0  ;;  %v2322_v3 = vmax.f32 %v1746_v7, 0.0  ;;  %v2996_v6 = vpack.c.bf16 %v2610_v8, %v2609_v58 }
 0x114   : > { %v7795_v50 = vpack.c.bf16 %v7435_v4, %v7417_v59  ;;  %v7796_v46 = vpack.c.bf16 %v7436_v56, %v7418_v62  ;;  %v2016_v11 = vsub.f32 1.0, %v1440_v29  ;;  %v3655_v27 = vsub.f32 %v9843_v33, %v9379_v30  ;;  %v9885_v53 = vpop.permute.xlu1 %3112 }
 0x115   : > { %v6535_v41 = vunpack.c.l.bf16 %v5626_v54  ;;  %v6536_v57 = vunpack.c.h.bf16 %v5626_v54  ;;  %13176 = vst [vmem:[#allocation51_spill] sm:$0xff] %v9885_v53  ;;  %v2852_v17 = vpack.c.bf16 %v2322_v3, %v2321_v48  ;;  %v2591_v5 = vmax.f32 %v2015_v15, 0.0  ;;  %v9889_v59 = vpop.permute.xlu2 %3108 }
 0x116   : > { %7909 = vmatpush.bf16.msra.mxu1 %v7795_v50  ;;  %7935 = vmatpush.bf16.msra.mxu3 %v7796_v46  ;;  %v3656_v62 = vsub.f32 %v9843_v33, %v9381_v31  ;;  %v6247_v13 = vunpack.c.l.bf16 %v2996_v6  ;;  %13177 = vst [vmem:[#allocation52_spill] sm:$0xff] %v9889_v59  ;;  %v3349_v7 = vsub.f32 %v9885_v53, %v9379_v30  ;;  %v2592_v8 = vmax.f32 %v2016_v11, 0.0 }
 0x117   : > { %v3350_v58 = vsub.f32 %v9885_v53, %v9381_v31  ;;  %v4231_v0 = vand.u32 2147483647, %v3655_v27  ;;  %v5959_v56 = vunpack.c.l.bf16 %v2852_v17  ;;  %v5960_v9 = vunpack.c.h.bf16 %v2852_v17 }
 0x118   : > { %v4232_v38 = vand.u32 2147483647, %v3656_v62  ;;  %v6248_v4 = vunpack.c.h.bf16 %v2996_v6  ;;  %v3925_v39 = vand.u32 2147483647, %v3349_v7  ;;  %v9895_v16 = vpack.c.bf16 %v2592_v8, %v2591_v5 }
 0x119   : > { %v3926_v21 = vand.u32 2147483647, %v3350_v58  ;;  %v4807_v50 = vsub.f32 1.0, %v4231_v0  ;;  %v7111_v46 = vmul.f32 %v6535_v41, %v5959_v56  ;;  %v7112_v54 = vmul.f32 %v6536_v57, %v5960_v9 }
 0x11a   : > { %v4808_v29 = vsub.f32 1.0, %v4232_v38  ;;  %v13178_v48 = vsub.f32 1.0, %v9837_v42  ;;  %v4501_v15 = vsub.f32 1.0, %v3925_v39  ;;  %v13179_v6 = vsub.f32 1.0, %v9839_v37 }
 0x11b   : > { %v4502_v44 = vsub.f32 1.0, %v3926_v21  ;;  %v5383_v10 = vmax.f32 %v4807_v50, 0.0  ;;  %v827_v5 = vsub.f32 %v9873_v45, %v9403_v40  ;;  %v828_v42 = vsub.f32 %v9873_v45, %v9406_v43 }
 0x11c   : > { %v2267_v3 = vmax.f32 %v13178_v48, 0.0  ;;  %v5384_v27 = vmax.f32 %v4808_v29, 0.0  ;;  %v2268_v62 = vmax.f32 %v13179_v6, 0.0  ;;  %v5077_v41 = vmax.f32 %v4501_v15, 0.0  ;;  %v9910_v8 = vpop.permute.xlu1 %3176 }
 0x11d   : > { %v5078_v57 = vmax.f32 %v4502_v44, 0.0  ;;  %v13180_v7 = vsub.f32 %v9823_v63, %v9403_v40  ;;  %13181 = vst [vmem:[#allocation53_spill] sm:$0xff] %v9910_v8  ;;  %v1403_v9 = vand.u32 2147483647, %v827_v5  ;;  %v13182_v37 = vsub.f32 %v9823_v63, %v9406_v43 }
 0x11e   : > { %v5770_v0 = vpack.c.bf16 %v5384_v27, %v5383_v10  ;;  %v9912_v56 = vpack.c.bf16 %v2268_v62, %v2267_v3  ;;  %v3637_v44 = vsub.f32 %v9910_v8, %v9379_v30  ;;  %v3638_v21 = vsub.f32 %v9910_v8, %v9381_v31 }
 0x11f   : > { %v1421_v58 = vand.u32 2147483647, %v13180_v7  ;;  %v1422_v38 = vand.u32 2147483647, %v13182_v37  ;;  %v5617_v39 = vpack.c.bf16 %v5078_v57, %v5077_v41  ;;  %v1404_v50 = vand.u32 2147483647, %v828_v42 }
 0x120   : > { %v9921_v29 = vpop.permute.xlu2 %286  ;;  %v6823_v48 = vunpack.c.l.bf16 %v5770_v0  ;;  %v6824_v15 = vunpack.c.h.bf16 %v5770_v0  ;;  %v4213_v62 = vand.u32 2147483647, %v3637_v44  ;;  %v4214_v5 = vand.u32 2147483647, %v3638_v21 }
 0x121   : > { %v6517_v27 = vunpack.c.l.bf16 %v5617_v39  ;;  %v6518_v6 = vunpack.c.h.bf16 %v5617_v39  ;;  %v3331_v7 = vsub.f32 %v9889_v59, %v9379_v30  ;;  %v3332_v42 = vsub.f32 %v9889_v59, %v9381_v31 }
 0x122   : > { %v7399_v41 = vmul.f32 %v6823_v48, %v6247_v13  ;;  %v7400_v57 = vmul.f32 %v6824_v15, %v6248_v4  ;;  %v13183_v37 = vunpack.c.l.bf16 %v9875_v34  ;;  %v13184_v0 = vunpack.c.h.bf16 %v9875_v34 }
 0x123   : > { %v4789_v11 = vsub.f32 1.0, %v4213_v62  ;;  %v4790_v3 = vsub.f32 1.0, %v4214_v5  ;;  %v3907_v63 = vand.u32 2147483647, %v3331_v7  ;;  %v3908_v39 = vand.u32 2147483647, %v3332_v42 }
 0x124   : > { %v7093_v17 = vmul.f32 %v6517_v27, %v13183_v37  ;;  %v7094_v10 = vmul.f32 %v6518_v6, %v13184_v0  ;;  %v1979_v44 = vsub.f32 1.0, %v1403_v9  ;;  %v1980_v21 = vsub.f32 1.0, %v1404_v50 }
 0x125   : > { %v5365_v48 = vmax.f32 %v4789_v11, 0.0  ;;  %v5366_v15 = vmax.f32 %v4790_v3, 0.0  ;;  %v4483_v45 = vsub.f32 1.0, %v3907_v63  ;;  %v4484_v33 = vsub.f32 1.0, %v3908_v39  ;;  %v9933_v53 = vpop.permute.xlu1 %301 }
 0x126   : > { %v7633_v13 = vpack.c.bf16 %v7111_v46, %v7093_v17  ;;  %v7634_v4 = vpack.c.bf16 %v7112_v54, %v7094_v10  ;;  %v1997_v8 = vsub.f32 1.0, %v1421_v58  ;;  %v1998_v59 = vsub.f32 1.0, %v1422_v38 }
 0x127   : > { %v5761_v34 = vpack.c.bf16 %v5366_v15, %v5365_v48  ;;  %v2555_v27 = vmax.f32 %v1979_v44, 0.0  ;;  %v2556_v6 = vmax.f32 %v1980_v21, 0.0  ;;  %v3602_v62 = vsub.f32 %v9502_v61, %v9381_v31 }
 0x128   : > { %7897 = vmatpush.bf16.msra.mxu0 %v7633_v13  ;;  %7923 = vmatpush.bf16.msra.mxu2 %v7634_v4  ;;  %v9937_v9 = vpop.permute.xlu2 %366  ;;  %v557_v46 = vsub.f32 %v9933_v53, %v9403_v40  ;;  %v558_v63 = vsub.f32 %v9933_v53, %v9406_v43  ;;  %v5059_v54 = vmax.f32 %v4483_v45, 0.0  ;;  %v5060_v11 = vmax.f32 %v4484_v33, 0.0 }
 0x129   : > { %v6805_v17 = vunpack.c.l.bf16 %v5761_v34  ;;  %v6806_v58 = vunpack.c.h.bf16 %v5761_v34  ;;  %v2573_v38 = vmax.f32 %v1997_v8, 0.0  ;;  %v2574_v50 = vmax.f32 %v1998_v59, 0.0 }
 0x12a   : > { %v1133_v10 = vand.u32 2147483647, %v557_v46  ;;  %v1134_v3 = vand.u32 2147483647, %v558_v63  ;;  %v5608_v5 = vpack.c.bf16 %v5060_v11, %v5059_v54  ;;  %v2969_v7 = vpack.c.bf16 %v2556_v6, %v2555_v27 }
 0x12b   : > { %v13185_v42 = vunpack.c.l.bf16 %v9895_v16  ;;  %v13186_v0 = vunpack.c.h.bf16 %v9895_v16  ;;  %v9947_v44 = vpack.c.bf16 %v2574_v50, %v2573_v38  ;;  %v13187_v45 = vsub.f32 %v9502_v61, %v9379_v30 }
 0x12c   : > { %v1709_v21 = vsub.f32 1.0, %v1133_v10  ;;  %v1710_v13 = vsub.f32 1.0, %v1134_v3  ;;  %v6499_v8 = vunpack.c.l.bf16 %v5608_v5  ;;  %v6500_v59 = vunpack.c.h.bf16 %v5608_v5 }
 0x12d   : > { %v7381_v37 = vmul.f32 %v6805_v17, %v13185_v42  ;;  %v7382_v39 = vmul.f32 %v6806_v58, %v13186_v0  ;;  %v4177_v33 = vand.u32 2147483647, %v13187_v45  ;;  %v4178_v15 = vand.u32 2147483647, %v3602_v62 }
 0x12e   : > { %v2285_v27 = vmax.f32 %v1709_v21, 0.0  ;;  %v2286_v6 = vmax.f32 %v1710_v13, 0.0  ;;  %v6193_v46 = vunpack.c.l.bf16 %v2969_v7  ;;  %v6194_v11 = vunpack.c.h.bf16 %v2969_v7 }
 0x12f   : > { %v7777_v4 = vpack.c.bf16 %v7399_v41, %v7381_v37  ;;  %v7778_v48 = vpack.c.bf16 %v7400_v57, %v7382_v39  ;;  %v4753_v34 = vsub.f32 1.0, %v4177_v33  ;;  %v4754_v63 = vsub.f32 1.0, %v4178_v15  ;;  %v9954_v58 = vpop.permute.xlu1 %3104 }
 0x130   : > { %v2834_v38 = vpack.c.bf16 %v2286_v6, %v2285_v27  ;;  %v13188_v41 = vperm.slane %v9363_v24, 4  ;;  %v13189_v62 = vperm.slane %v9808_v32, 6  ;;  %v3313_v3 = vsub.f32 %v9954_v58, %v9379_v30 }
 0x131   : > { %7910 = vmatpush.bf16.msra.mxu1 %v7777_v4  ;;  %7936 = vmatpush.bf16.msra.mxu3 %v7778_v48  ;;  %v5329_v54 = vmax.f32 %v4753_v34, 0.0  ;;  %v3314_v5 = vsub.f32 %v9954_v58, %v9381_v31  ;;  %v5330_v7 = vmax.f32 %v4754_v63, 0.0  ;;  %v9970_v37 = vpop.permute.xlu2 %3100  ;;  %v503_v39 = vsub.f32 %v9921_v29, %v9403_v40 }
 0x132   : > { %v9958_v57 = vperm.slane %v13188_v41, 0  ;;  %v9962_v50 = vperm.slane %v13189_v62, 0  ;;  %13190 = vst [vmem:[#allocation54_spill] sm:$0xff] %v9970_v37  ;;  %v5923_v24 = vunpack.c.l.bf16 %v2834_v38  ;;  %v5924_v0 = vunpack.c.h.bf16 %v2834_v38 }
 0x133   : > { %v504_v45 = vsub.f32 %v9921_v29, %v9406_v43  ;;  %v3889_v33 = vand.u32 2147483647, %v3313_v3  ;;  %v3890_v21 = vand.u32 2147483647, %v3314_v5  ;;  %v5743_v13 = vpack.c.bf16 %v5330_v7, %v5329_v54 }
 0x134   : > { %v3295_v4 = vsub.f32 %v9970_v37, %v9379_v30  ;;  %v7075_v48 = vmul.f32 %v6499_v8, %v5923_v24  ;;  %v7076_v15 = vmul.f32 %v6500_v59, %v5924_v0  ;;  %v1079_v34 = vand.u32 2147483647, %v503_v39 }
 0x135   : > { %v1080_v27 = vand.u32 2147483647, %v504_v45  ;;  %v4465_v6 = vsub.f32 1.0, %v3889_v33  ;;  %v4466_v63 = vsub.f32 1.0, %v3890_v21  ;;  %v6769_v41 = vunpack.c.l.bf16 %v5743_v13 }
 0x136   : > { %v6770_v38 = vunpack.c.h.bf16 %v5743_v13  ;;  %v1655_v62 = vsub.f32 1.0, %v1079_v34  ;;  %v3296_v17 = vsub.f32 %v9970_v37, %v9381_v31  ;;  %v3871_v16 = vand.u32 2147483647, %v3295_v4 }
 0x137   : > { %v1656_v42 = vsub.f32 1.0, %v1080_v27  ;;  %v5041_v3 = vmax.f32 %v4465_v6, 0.0  ;;  %v5042_v5 = vmax.f32 %v4466_v63, 0.0  ;;  %v9980_v54 = vmul.f32 %v6769_v41, %v6193_v46  ;;  %v9984_v8 = vpop.permute.xlu1 %3172 }
 0x138   : > { %v9982_v7 = vmul.f32 %v6770_v38, %v6194_v11  ;;  %13191 = vst [vmem:[#allocation55_spill] sm:$0xff] %v9984_v8  ;;  %v2231_v59 = vmax.f32 %v1655_v62, 0.0  ;;  %v3872_v0 = vand.u32 2147483647, %v3296_v17  ;;  %v4447_v39 = vsub.f32 1.0, %v3871_v16 }
 0x139   : > { %v2232_v24 = vmax.f32 %v1656_v42, 0.0  ;;  %v5599_v45 = vpack.c.bf16 %v5042_v5, %v5041_v3  ;;  %v3619_v33 = vsub.f32 %v9984_v8, %v9379_v30  ;;  %v3620_v21 = vsub.f32 %v9984_v8, %v9381_v31 }
 0x13a   : > { %v757_v13 = vsub.f32 %v9529_v2, %v9958_v57  ;;  %v4448_v11 = vsub.f32 1.0, %v3872_v0  ;;  %v5023_v4 = vmax.f32 %v4447_v39, 0.0  ;;  %v758_v34 = vsub.f32 %v9529_v2, %v9962_v50 }
 0x13b   : > { %v9992_v46 = vpack.c.bf16 %v2232_v24, %v2231_v59  ;;  %v6481_v42 = vunpack.c.l.bf16 %v5599_v45  ;;  %v6482_v17 = vunpack.c.h.bf16 %v5599_v45  ;;  %v4195_v16 = vand.u32 2147483647, %v3619_v33 }
 0x13c   : > { %v4196_v27 = vand.u32 2147483647, %v3620_v21  ;;  %v5024_v6 = vmax.f32 %v4448_v11, 0.0  ;;  %v775_v38 = vsub.f32 %v9562_v20, %v9958_v57  ;;  %v13192_v62 = vunpack.c.l.bf16 %v9912_v56 }
 0x13d   : > { %v13193_v5 = vunpack.c.h.bf16 %v9912_v56  ;;  %v4771_v24 = vsub.f32 1.0, %v4195_v16  ;;  %v776_v45 = vsub.f32 %v9562_v20, %v9962_v50  ;;  %v1333_v33 = vand.u32 2147483647, %v757_v13 }
 0x13e   : > { %v7057_v3 = vmul.f32 %v6481_v42, %v13192_v62  ;;  %v4772_v0 = vsub.f32 1.0, %v4196_v27  ;;  %v10004_v39 = vpack.c.bf16 %v5024_v6, %v5023_v4  ;;  %v1334_v21 = vand.u32 2147483647, %v758_v34 }
 0x13f   : > { %v7058_v59 = vmul.f32 %v6482_v17, %v13193_v5  ;;  %v5347_v63 = vmax.f32 %v4771_v24, 0.0  ;;  %v1351_v62 = vand.u32 2147483647, %v775_v38  ;;  %v1352_v56 = vand.u32 2147483647, %v776_v45 }
 0x140   : > { %v7615_v11 = vpack.c.bf16 %v7075_v48, %v7057_v3  ;;  %v5348_v10 = vmax.f32 %v4772_v0, 0.0  ;;  %v6463_v8 = vunpack.c.l.bf16 %v10004_v39  ;;  %v6464_v42 = vunpack.c.h.bf16 %v10004_v39 }
 0x141   : > { %v7616_v41 = vpack.c.bf16 %v7076_v15, %v7058_v59  ;;  %v10010_v17 = vpop.permute.xlu1 %291  ;;  %v1909_v16 = vsub.f32 1.0, %v1333_v33  ;;  %v1910_v27 = vsub.f32 1.0, %v1334_v21  ;;  %v13195_v13 = vperm.slane %v9808_v32, 5 }
 0x142   : > { %13194 = vst [vmem:[#allocation56_spill] sm:$0xff] %v10010_v17  ;;  %7898 = vmatpush.bf16.msra.mxu0 %v7615_v11  ;;  %v5752_v4 = vpack.c.bf16 %v5348_v10, %v5347_v63  ;;  %v521_v48 = vsub.f32 %v10010_v17, %v9403_v40  ;;  %v522_v15 = vsub.f32 %v10010_v17, %v9406_v43  ;;  %v1927_v6 = vsub.f32 1.0, %v1351_v62 }
 0x143   : > { %7924 = vmatpush.bf16.msra.mxu2 %v7616_v41  ;;  %v10014_v34 = vperm.slane %v13195_v13, 1  ;;  %v1928_v38 = vsub.f32 1.0, %v1352_v56  ;;  %v2485_v59 = vmax.f32 %v1909_v16, 0.0  ;;  %v2486_v24 = vmax.f32 %v1910_v27, 0.0 }
 0x144   : > { %v6787_v3 = vunpack.c.l.bf16 %v5752_v4  ;;  %v6788_v5 = vunpack.c.h.bf16 %v5752_v4  ;;  %v1097_v41 = vand.u32 2147483647, %v521_v48  ;;  %v1098_v10 = vand.u32 2147483647, %v522_v15 }
 0x145   : > { %v2503_v63 = vmax.f32 %v1927_v6, 0.0  ;;  %v2504_v0 = vmax.f32 %v1928_v38, 0.0  ;;  %v13196_v39 = vunpack.c.l.bf16 %v9947_v44  ;;  %v13197_v33 = vunpack.c.h.bf16 %v9947_v44 }
 0x146   : > { %v2934_v11 = vpack.c.bf16 %v2486_v24, %v2485_v59  ;;  %v13198_v13 = vperm.slane %v9808_v32, 7  ;;  %v1673_v62 = vsub.f32 1.0, %v1097_v41  ;;  %v1674_v56 = vsub.f32 1.0, %v1098_v10 }
 0x147   : > { %v7363_v45 = vmul.f32 %v6787_v3, %v13196_v39  ;;  %v7364_v21 = vmul.f32 %v6788_v5, %v13197_v33  ;;  %v2943_v4 = vpack.c.bf16 %v2504_v0, %v2503_v63  ;;  %v3531_v16 = vsub.f32 %v9350_v22, %v10014_v34 }
 0x148   : > { %v10026_v61 = vperm.slane %v13198_v13, 1  ;;  %v3549_v44 = vsub.f32 %v9366_v25, %v10014_v34  ;;  %v2249_v6 = vmax.f32 %v1673_v62, 0.0  ;;  %v2250_v32 = vmax.f32 %v1674_v56, 0.0 }
 0x149   : > { %v7759_v27 = vpack.c.bf16 %v7363_v45, %v9980_v54  ;;  %v7760_v48 = vpack.c.bf16 %v7364_v21, %v9982_v7  ;;  %v4107_v3 = vand.u32 2147483647, %v3531_v16  ;;  %v6123_v24 = vunpack.c.l.bf16 %v2934_v11 }
 0x14a   : > { %v3532_v15 = vsub.f32 %v9350_v22, %v10026_v61  ;;  %v3550_v38 = vsub.f32 %v9366_v25, %v10026_v61  ;;  %v4125_v59 = vand.u32 2147483647, %v3549_v44  ;;  %v6141_v54 = vunpack.c.l.bf16 %v2943_v4  ;;  %v10038_v41 = vpop.permute.xlu1 %3096 }
 0x14b   : > { %7911 = vmatpush.bf16.msra.mxu1 %v7759_v27  ;;  %7937 = vmatpush.bf16.msra.mxu3 %v7760_v48  ;;  %13199 = vst [vmem:[#allocation57_spill] sm:$0xff] %v10038_v41  ;;  %v2816_v7 = vpack.c.bf16 %v2250_v32, %v2249_v6  ;;  %v4683_v63 = vsub.f32 1.0, %v4107_v3  ;;  %v6124_v0 = vunpack.c.h.bf16 %v2934_v11  ;;  %v3277_v39 = vsub.f32 %v10038_v41, %v9379_v30 }
 0x14c   : > { %v4108_v5 = vand.u32 2147483647, %v3532_v15  ;;  %v4126_v10 = vand.u32 2147483647, %v3550_v38  ;;  %v3278_v45 = vsub.f32 %v10038_v41, %v9381_v31  ;;  %v4701_v21 = vsub.f32 1.0, %v4125_v59 }
 0x14d   : > { %v5887_v13 = vunpack.c.l.bf16 %v2816_v7  ;;  %v5888_v62 = vunpack.c.h.bf16 %v2816_v7  ;;  %v5259_v16 = vmax.f32 %v4683_v63, 0.0  ;;  %v3853_v27 = vand.u32 2147483647, %v3277_v39 }
 0x14e   : > { %v4684_v33 = vsub.f32 1.0, %v4108_v5  ;;  %v4702_v56 = vsub.f32 1.0, %v4126_v10  ;;  %v3854_v48 = vand.u32 2147483647, %v3278_v45  ;;  %v5277_v44 = vmax.f32 %v4701_v21, 0.0 }
 0x14f   : > { %v7039_v6 = vmul.f32 %v6463_v8, %v5887_v13  ;;  %v7040_v32 = vmul.f32 %v6464_v42, %v5888_v62  ;;  %v6142_v11 = vunpack.c.h.bf16 %v2943_v4  ;;  %v4429_v3 = vsub.f32 1.0, %v3853_v27 }
 0x150   : > { %v5260_v15 = vmax.f32 %v4684_v33, 0.0  ;;  %v5278_v38 = vmax.f32 %v4702_v56, 0.0  ;;  %v4430_v25 = vsub.f32 1.0, %v3854_v48  ;;  %v721_v20 = vsub.f32 %v9391_v35, %v9958_v57 }
 0x151   : > { %v722_v59 = vsub.f32 %v9391_v35, %v9962_v50  ;;  %v739_v7 = vsub.f32 %v9512_v28, %v9958_v57  ;;  %v740_v10 = vsub.f32 %v9512_v28, %v9962_v50  ;;  %v5005_v8 = vmax.f32 %v4429_v3, 0.0 }
 0x152   : > { %v5708_v22 = vpack.c.bf16 %v5260_v15, %v5259_v16  ;;  %v5717_v5 = vpack.c.bf16 %v5278_v38, %v5277_v44  ;;  %v5006_v42 = vmax.f32 %v4430_v25, 0.0  ;;  %v1297_v33 = vand.u32 2147483647, %v721_v20 }
 0x153   : > { %v1298_v21 = vand.u32 2147483647, %v722_v59  ;;  %v1315_v16 = vand.u32 2147483647, %v739_v7  ;;  %v1316_v15 = vand.u32 2147483647, %v740_v10  ;;  %v13201_v59 = vunpack.c.h.bf16 %v9992_v46 }
 0x154   : > { %v6699_v63 = vunpack.c.l.bf16 %v5708_v22  ;;  %v6700_v4 = vunpack.c.h.bf16 %v5708_v22  ;;  %v6717_v39 = vunpack.c.l.bf16 %v5717_v5  ;;  %v6718_v45 = vunpack.c.h.bf16 %v5717_v5 }
 0x155   : > { %v5581_v13 = vpack.c.bf16 %v5006_v42, %v5005_v8  ;;  %v1873_v44 = vsub.f32 1.0, %v1297_v33  ;;  %v1874_v2 = vsub.f32 1.0, %v1298_v21  ;;  %v1891_v28 = vsub.f32 1.0, %v1315_v16 }
 0x156   : > { %v7275_v62 = vmul.f32 %v6699_v63, %v6123_v24  ;;  %v7276_v56 = vmul.f32 %v6700_v4, %v6124_v0  ;;  %v7293_v27 = vmul.f32 %v6717_v39, %v6141_v54  ;;  %v7294_v48 = vmul.f32 %v6718_v45, %v6142_v11 }
 0x157   : > { %v6445_v38 = vunpack.c.l.bf16 %v5581_v13  ;;  %v6446_v35 = vunpack.c.h.bf16 %v5581_v13  ;;  %v1892_v37 = vsub.f32 1.0, %v1316_v15  ;;  %v2449_v22 = vmax.f32 %v1873_v44, 0.0 }
 0x158   : > { %v7725_v3 = vpack.c.bf16 %v7293_v27, %v7275_v62  ;;  %v7726_v25 = vpack.c.bf16 %v7294_v48, %v7276_v56  ;;  %v13200_v5 = vunpack.c.l.bf16 %v9992_v46  ;;  %v2450_v0 = vmax.f32 %v1874_v2, 0.0  ;;  %v10064_v46 = vpop.permute.xlu0 %371 }
 0x159   : > { %v7022_v24 = vmul.f32 %v6446_v35, %v13201_v59  ;;  %v2467_v7 = vmax.f32 %v1891_v28, 0.0  ;;  %v2468_v54 = vmax.f32 %v1892_v37, 0.0  ;;  %v3495_v11 = vsub.f32 %v9537_v14, %v10014_v34 }
 0x15a   : > { %v7021_v20 = vmul.f32 %v6445_v38, %v13200_v5  ;;  %v3496_v10 = vsub.f32 %v9537_v14, %v10026_v61  ;;  %v3513_v8 = vsub.f32 %v9454_v36, %v10014_v34  ;;  %v2916_v4 = vpack.c.bf16 %v2450_v0, %v2449_v22  ;;  %v10074_v38 = vpop.permute.xlu2 %3164 }
 0x15b   : > { %v7598_v63 = vpack.c.bf16 %v7040_v32, %v7022_v24  ;;  %v3514_v39 = vsub.f32 %v9454_v36, %v10026_v61  ;;  %v2925_v2 = vpack.c.bf16 %v2468_v54, %v2467_v7  ;;  %v4071_v35 = vand.u32 2147483647, %v3495_v11 }
 0x15c   : > { %v7597_v42 = vpack.c.bf16 %v7039_v6, %v7021_v20  ;;  %v4072_v28 = vand.u32 2147483647, %v3496_v10  ;;  %v4089_v37 = vand.u32 2147483647, %v3513_v8  ;;  %v6087_v33 = vunpack.c.l.bf16 %v2916_v4  ;;  %v10068_v6 = vpop.permute.xlu1 %3160 }
 0x15d   : > { %7925 = vmatpush.bf16.msra.mxu2 %v7598_v63  ;;  %v4090_v45 = vand.u32 2147483647, %v3514_v39  ;;  %v6088_v21 = vunpack.c.h.bf16 %v2916_v4  ;;  %v791_v13 = vsub.f32 %v9937_v9, %v9403_v40  ;;  %v4647_v32 = vsub.f32 1.0, %v4071_v35 }
 0x15e   : > { %7899 = vmatpush.bf16.msra.mxu0 %v7597_v42  ;;  %v4648_v62 = vsub.f32 1.0, %v4072_v28  ;;  %v4665_v56 = vsub.f32 1.0, %v4089_v37  ;;  %v6105_v16 = vunpack.c.l.bf16 %v2925_v2  ;;  %v6106_v48 = vunpack.c.h.bf16 %v2925_v2 }
 0x15f   : > { %v4666_v27 = vsub.f32 1.0, %v4090_v45  ;;  %v792_v15 = vsub.f32 %v9937_v9, %v9406_v43  ;;  %v809_v44 = vsub.f32 %v10064_v46, %v9403_v40  ;;  %v5223_v22 = vmax.f32 %v4647_v32, 0.0 }
 0x160   : > { %v5224_v5 = vmax.f32 %v4648_v62, 0.0  ;;  %v5241_v20 = vmax.f32 %v4665_v56, 0.0  ;;  %v1367_v59 = vand.u32 2147483647, %v791_v13  ;;  %v3565_v0 = vsub.f32 %v10068_v6, %v9379_v30 }
 0x161   : > { %7970 = vmatpush.bf16.msrb.mxu2 %v7726_v25  ;;  %v5242_v25 = vmax.f32 %v4666_v27, 0.0  ;;  %v1368_v24 = vand.u32 2147483647, %v792_v15  ;;  %v1385_v54 = vand.u32 2147483647, %v809_v44  ;;  %v3566_v40 = vsub.f32 %v10068_v6, %v9381_v31 }
 0x162   : > { %7944 = vmatpush.bf16.msrb.mxu0 %v7725_v3  ;;  %v810_v3 = vsub.f32 %v10064_v46, %v9406_v43  ;;  %v5690_v7 = vpack.c.bf16 %v5224_v5, %v5223_v22  ;;  %v1943_v8 = vsub.f32 1.0, %v1367_v59  ;;  %v3583_v63 = vsub.f32 %v10074_v38, %v9379_v30 }
 0x163   : > { %v5699_v10 = vpack.c.bf16 %v5242_v25, %v5241_v20  ;;  %v1944_v42 = vsub.f32 1.0, %v1368_v24  ;;  %v1961_v39 = vsub.f32 1.0, %v1385_v54  ;;  %v3584_v22 = vsub.f32 %v10074_v38, %v9381_v31 }
 0x164   : > { %v1386_v11 = vand.u32 2147483647, %v810_v3  ;;  %v6663_v4 = vunpack.c.l.bf16 %v5690_v7  ;;  %v6664_v43 = vunpack.c.h.bf16 %v5690_v7  ;;  %v2519_v37 = vmax.f32 %v1943_v8, 0.0 }
 0x165   : > { %v6681_v35 = vunpack.c.l.bf16 %v5699_v10  ;;  %v6682_v28 = vunpack.c.h.bf16 %v5699_v10  ;;  %v2520_v45 = vmax.f32 %v1944_v42, 0.0  ;;  %v2537_v62 = vmax.f32 %v1961_v39, 0.0 }
 0x166   : > { %v1962_v2 = vsub.f32 1.0, %v1386_v11  ;;  %v7239_v13 = vmul.f32 %v6663_v4, %v6087_v33  ;;  %v7240_v32 = vmul.f32 %v6664_v43, %v6088_v21  ;;  %v4141_v30 = vand.u32 2147483647, %v3565_v0 }
 0x167   : > { %v7257_v27 = vmul.f32 %v6681_v35, %v6105_v16  ;;  %v7258_v15 = vmul.f32 %v6682_v28, %v6106_v48  ;;  %v2951_v44 = vpack.c.bf16 %v2520_v45, %v2519_v37  ;;  %v4142_v20 = vand.u32 2147483647, %v3566_v40 }
 0x168   : > { %v2538_v56 = vmax.f32 %v1962_v2, 0.0  ;;  %v4159_v3 = vand.u32 2147483647, %v3583_v63  ;;  %v4160_v24 = vand.u32 2147483647, %v3584_v22  ;;  %v4717_v54 = vsub.f32 1.0, %v4141_v30 }
 0x169   : > { %v7707_v25 = vpack.c.bf16 %v7257_v27, %v7239_v13  ;;  %v7708_v59 = vpack.c.bf16 %v7258_v15, %v7240_v32  ;;  %v6157_v7 = vunpack.c.l.bf16 %v2951_v44  ;;  %v4718_v11 = vsub.f32 1.0, %v4142_v20 }
 0x16a   : > { %v2960_v5 = vpack.c.bf16 %v2538_v56, %v2537_v62  ;;  %v4735_v33 = vsub.f32 1.0, %v4159_v3  ;;  %v4736_v16 = vsub.f32 1.0, %v4160_v24  ;;  %v6158_v48 = vunpack.c.h.bf16 %v2951_v44 }
 0x16b   : > { %7945 = vmatpush.bf16.msrb.mxu0 %v7707_v25  ;;  %7971 = vmatpush.bf16.msrb.mxu2 %v7708_v59  ;;  %v685_v31 = vsub.f32 %v9623_v1, %v9958_v57  ;;  %v5293_v8 = vmax.f32 %v4717_v54, 0.0  ;;  %v5294_v0 = vmax.f32 %v4718_v11, 0.0  ;;  %v686_v42 = vsub.f32 %v9623_v1, %v9962_v50 }
 0x16c   : > { %v6175_v21 = vunpack.c.l.bf16 %v2960_v5  ;;  %v6176_v10 = vunpack.c.h.bf16 %v2960_v5  ;;  %v5311_v40 = vmax.f32 %v4735_v33, 0.0  ;;  %v5312_v63 = vmax.f32 %v4736_v16, 0.0 }
 0x16d   : > { %v703_v4 = vsub.f32 %v9607_v52, %v9958_v57  ;;  %v704_v43 = vsub.f32 %v9607_v52, %v9962_v50  ;;  %v1261_v39 = vand.u32 2147483647, %v685_v31  ;;  %v5725_v2 = vpack.c.bf16 %v5294_v0, %v5293_v8 }
 0x16e   : > { %v1262_v35 = vand.u32 2147483647, %v686_v42  ;;  %v3459_v28 = vsub.f32 %v9649_v26, %v10014_v34  ;;  %v3460_v37 = vsub.f32 %v9649_v26, %v10026_v61  ;;  %v5734_v45 = vpack.c.bf16 %v5312_v63, %v5311_v40 }
 0x16f   : > { %v1279_v13 = vand.u32 2147483647, %v703_v4  ;;  %v1280_v32 = vand.u32 2147483647, %v704_v43  ;;  %v1837_v62 = vsub.f32 1.0, %v1261_v39  ;;  %v6733_v56 = vunpack.c.l.bf16 %v5725_v2 }
 0x170   : > { %v6734_v27 = vunpack.c.h.bf16 %v5725_v2  ;;  %v1838_v15 = vsub.f32 1.0, %v1262_v35  ;;  %v3477_v44 = vsub.f32 %v9540_v51, %v10014_v34  ;;  %v6751_v22 = vunpack.c.l.bf16 %v5734_v45 }
 0x171   : > { %v6752_v5 = vunpack.c.h.bf16 %v5734_v45  ;;  %v1855_v30 = vsub.f32 1.0, %v1279_v13  ;;  %v1856_v20 = vsub.f32 1.0, %v1280_v32  ;;  %v7309_v3 = vmul.f32 %v6733_v56, %v6157_v7 }
 0x172   : > { %v7310_v25 = vmul.f32 %v6734_v27, %v6158_v48  ;;  %v2413_v59 = vmax.f32 %v1837_v62, 0.0  ;;  %v2414_v24 = vmax.f32 %v1838_v15, 0.0  ;;  %v7327_v54 = vmul.f32 %v6751_v22, %v6175_v21 }
 0x173   : > { %v7328_v11 = vmul.f32 %v6752_v5, %v6176_v10  ;;  %v2431_v33 = vmax.f32 %v1855_v30, 0.0  ;;  %v2432_v16 = vmax.f32 %v1856_v20, 0.0  ;;  %v3478_v8 = vsub.f32 %v9540_v51, %v10026_v61 }
 0x174   : > { %v10100_v31 = vpack.c.bf16 %v2414_v24, %v2413_v59  ;;  %v4035_v0 = vand.u32 2147483647, %v3459_v28  ;;  %v4036_v40 = vand.u32 2147483647, %v3460_v37  ;;  %v7741_v42 = vpack.c.bf16 %v7327_v54, %v7309_v3 }
 0x175   : > { %v7742_v63 = vpack.c.bf16 %v7328_v11, %v7310_v25  ;;  %v10104_v4 = vpack.c.bf16 %v2432_v16, %v2431_v33  ;;  %v4053_v43 = vand.u32 2147483647, %v3477_v44  ;;  %v4054_v7 = vand.u32 2147483647, %v3478_v8 }
 0x176   : > { %v4611_v48 = vsub.f32 1.0, %v4035_v0  ;;  %v4612_v39 = vsub.f32 1.0, %v4036_v40  ;;  %v6051_v21 = vunpack.c.l.bf16 %v10100_v31  ;;  %7912 = vmatpush.bf16.msra.mxu1 %v7741_v42  ;;  %v1045_v35 = vsub.f32 %v9416_v49, %v9958_v57 }
 0x177   : > { %7938 = vmatpush.bf16.msra.mxu3 %v7742_v63  ;;  %v4629_v10 = vsub.f32 1.0, %v4053_v43  ;;  %v6069_v2 = vunpack.c.l.bf16 %v10104_v4  ;;  %v1046_v28 = vsub.f32 %v9416_v49, %v9962_v50  ;;  %v4630_v37 = vsub.f32 1.0, %v4054_v7 }
 0x178   : > { %v5187_v45 = vmax.f32 %v4611_v48, 0.0  ;;  %v5188_v13 = vmax.f32 %v4612_v39, 0.0  ;;  %v1063_v32 = vsub.f32 %v9448_v19, %v9958_v57  ;;  %v1064_v56 = vsub.f32 %v9448_v19, %v9962_v50 }
 0x179   : > { %v5205_v62 = vmax.f32 %v4629_v10, 0.0  ;;  %v1621_v27 = vand.u32 2147483647, %v1045_v35  ;;  %v1622_v15 = vand.u32 2147483647, %v1046_v28  ;;  %v5206_v44 = vmax.f32 %v4630_v37, 0.0 }
 0x17a   : > { %v5672_v22 = vpack.c.bf16 %v5188_v13, %v5187_v45  ;;  %v1639_v5 = vand.u32 2147483647, %v1063_v32  ;;  %v3819_v30 = vsub.f32 %v9412_v47, %v10014_v34  ;;  %v1640_v20 = vand.u32 2147483647, %v1064_v56 }
 0x17b   : > { %v2197_v3 = vsub.f32 1.0, %v1621_v27  ;;  %v2198_v25 = vsub.f32 1.0, %v1622_v15  ;;  %v3820_v59 = vsub.f32 %v9412_v47, %v10026_v61  ;;  %v5681_v24 = vpack.c.bf16 %v5206_v44, %v5205_v62 }
 0x17c   : > { %v6627_v54 = vunpack.c.l.bf16 %v5672_v22  ;;  %v2215_v11 = vsub.f32 1.0, %v1639_v5  ;;  %v3837_v33 = vsub.f32 %v9483_v12, %v10014_v34  ;;  %v2216_v16 = vsub.f32 1.0, %v1640_v20 }
 0x17d   : > { %v2773_v8 = vmax.f32 %v2197_v3, 0.0  ;;  %v2774_v0 = vmax.f32 %v2198_v25, 0.0  ;;  %v3838_v40 = vsub.f32 %v9483_v12, %v10026_v61  ;;  %v6645_v42 = vunpack.c.l.bf16 %v5681_v24 }
 0x17e   : > { %v7203_v63 = vmul.f32 %v6627_v54, %v6051_v21  ;;  %v2791_v43 = vmax.f32 %v2215_v11, 0.0  ;;  %v4395_v7 = vand.u32 2147483647, %v3819_v30  ;;  %v2792_v48 = vmax.f32 %v2216_v16, 0.0 }
 0x17f   : > { %v3078_v39 = vpack.c.bf16 %v2774_v0, %v2773_v8  ;;  %v4396_v10 = vand.u32 2147483647, %v3820_v59  ;;  %v4413_v35 = vand.u32 2147483647, %v3837_v33  ;;  %v7221_v28 = vmul.f32 %v6645_v42, %v6069_v2 }
 0x180   : > { %v4414_v37 = vand.u32 2147483647, %v3838_v40  ;;  %v4971_v45 = vsub.f32 1.0, %v4395_v7  ;;  %v6052_v13 = vunpack.c.h.bf16 %v10100_v31  ;;  %v3087_v32 = vpack.c.bf16 %v2792_v48, %v2791_v43 }
 0x181   : > { %v4972_v62 = vsub.f32 1.0, %v4396_v10  ;;  %v4989_v56 = vsub.f32 1.0, %v4413_v35  ;;  %v6411_v27 = vunpack.c.l.bf16 %v3078_v39  ;;  %v7689_v15 = vpack.c.bf16 %v7221_v28, %v7203_v63 }
 0x182   : > { %v4990_v44 = vsub.f32 1.0, %v4414_v37  ;;  %v5547_v5 = vmax.f32 %v4971_v45, 0.0  ;;  %v6070_v21 = vunpack.c.h.bf16 %v10104_v4  ;;  %v6429_v3 = vunpack.c.l.bf16 %v3087_v32 }
 0x183   : > { %v5548_v20 = vmax.f32 %v4972_v62, 0.0  ;;  %v5565_v30 = vmax.f32 %v4989_v56, 0.0  ;;  %v6628_v25 = vunpack.c.h.bf16 %v5672_v22  ;;  %7946 = vmatpush.bf16.msrb.mxu0 %v7689_v15  ;;  %v6646_v2 = vunpack.c.h.bf16 %v5681_v24 }
 0x184   : > { %v5566_v59 = vmax.f32 %v4990_v44, 0.0  ;;  %v6412_v54 = vunpack.c.h.bf16 %v3078_v39  ;;  %v6430_v11 = vunpack.c.h.bf16 %v3087_v32  ;;  %v649_v16 = vsub.f32 %v9577_v60, %v9958_v57 }
 0x185   : > { %v5852_v33 = vpack.c.bf16 %v5548_v20, %v5547_v5  ;;  %v7204_v31 = vmul.f32 %v6628_v25, %v6052_v13  ;;  %v650_v8 = vsub.f32 %v9577_v60, %v9962_v50  ;;  %v7222_v40 = vmul.f32 %v6646_v2, %v6070_v21  ;;  %v13202_v2 = vld [vmem:[#allocation27_spill] sm:$0xff] }
 0x186   : > { %v5861_v0 = vpack.c.bf16 %v5566_v59, %v5565_v30  ;;  %v667_v4 = vsub.f32 %v9704_v18, %v9958_v57  ;;  %v668_v22 = vsub.f32 %v9704_v18, %v9962_v50  ;;  %v1225_v63 = vand.u32 2147483647, %v649_v16  ;;  %v13203_v16 = vld [vmem:[#allocation10_spill] sm:$0xff] }
 0x187   : > { %v6987_v42 = vunpack.c.l.bf16 %v5852_v33  ;;  %v6988_v24 = vunpack.c.h.bf16 %v5852_v33  ;;  %v1226_v43 = vand.u32 2147483647, %v650_v8  ;;  %v7690_v48 = vpack.c.bf16 %v7222_v40, %v7204_v31 }
 0x188   : > { %v7005_v7 = vunpack.c.l.bf16 %v5861_v0  ;;  %v7006_v39 = vunpack.c.h.bf16 %v5861_v0  ;;  %v1243_v10 = vand.u32 2147483647, %v667_v4  ;;  %v1244_v37 = vand.u32 2147483647, %v668_v22 }
 0x189   : > { %v7563_v35 = vmul.f32 %v6987_v42, %v6411_v27  ;;  %v7564_v28 = vmul.f32 %v6988_v24, %v6412_v54  ;;  %v1801_v45 = vsub.f32 1.0, %v1225_v63  ;;  %7972 = vmatpush.bf16.msrb.mxu2 %v7690_v48  ;;  %v1802_v62 = vsub.f32 1.0, %v1226_v43  ;;  %v13204_v43 = vld [vmem:[#allocation25_spill] sm:$0xff] }
 0x18a   : > { %v7581_v13 = vmul.f32 %v7005_v7, %v6429_v3  ;;  %v7582_v32 = vmul.f32 %v7006_v39, %v6430_v11  ;;  %v1819_v56 = vsub.f32 1.0, %v1243_v10  ;;  %v1820_v15 = vsub.f32 1.0, %v1244_v37 }
 0x18b   : > { %v2377_v44 = vmax.f32 %v1801_v45, 0.0  ;;  %v3423_v5 = vsub.f32 %v9729_v55, %v10014_v34  ;;  %v3424_v21 = vsub.f32 %v9729_v55, %v10026_v61  ;;  %v2378_v25 = vmax.f32 %v1802_v62, 0.0 }
 0x18c   : > { %v7869_v20 = vpack.c.bf16 %v7581_v13, %v7563_v35  ;;  %v7870_v30 = vpack.c.bf16 %v7582_v32, %v7564_v28  ;;  %v2395_v27 = vmax.f32 %v1819_v56, 0.0  ;;  %v2396_v59 = vmax.f32 %v1820_v15, 0.0  ;;  %v13205_v32 = vld [vmem:[#allocation23_spill] sm:$0xff] }
 0x18d   : > { %v3441_v3 = vsub.f32 %v13202_v2, %v10014_v34  ;;  %v3442_v54 = vsub.f32 %v13202_v2, %v10026_v61  ;;  %v3999_v11 = vand.u32 2147483647, %v3423_v5  ;;  %v10142_v33 = vpack.c.bf16 %v2378_v25, %v2377_v44 }
 0x18e   : > { %7957 = vmatpush.bf16.msrb.mxu1 %v7869_v20  ;;  %7983 = vmatpush.bf16.msrb.mxu3 %v7870_v30  ;;  %v4000_v31 = vand.u32 2147483647, %v3424_v21  ;;  %v1009_v8 = vsub.f32 %v13203_v16, %v9958_v57  ;;  %v1010_v0 = vsub.f32 %v13203_v16, %v9962_v50  ;;  %v10148_v40 = vpack.c.bf16 %v2396_v59, %v2395_v27 }
 0x18f   : > { %v4017_v4 = vand.u32 2147483647, %v3441_v3  ;;  %v4018_v22 = vand.u32 2147483647, %v3442_v54  ;;  %v4575_v42 = vsub.f32 1.0, %v3999_v11  ;;  %v6015_v63 = vunpack.c.l.bf16 %v10142_v33  ;;  %v13206_v54 = vld [vmem:[#allocation15_spill] sm:$0xff] }
 0x190   : > { %v4576_v24 = vsub.f32 1.0, %v4000_v31  ;;  %v1027_v7 = vsub.f32 %v13204_v43, %v9958_v57  ;;  %v1028_v48 = vsub.f32 %v13204_v43, %v9962_v50  ;;  %v6033_v28 = vunpack.c.l.bf16 %v10148_v40 }
 0x191   : > { %v4593_v39 = vsub.f32 1.0, %v4017_v4  ;;  %v4594_v10 = vsub.f32 1.0, %v4018_v22  ;;  %v5151_v35 = vmax.f32 %v4575_v42, 0.0  ;;  %v1585_v45 = vand.u32 2147483647, %v1009_v8 }
 0x192   : > { %v5152_v37 = vmax.f32 %v4576_v24, 0.0  ;;  %v1586_v13 = vand.u32 2147483647, %v1010_v0  ;;  %v3783_v62 = vsub.f32 %v13205_v32, %v10014_v34  ;;  %v1603_v44 = vand.u32 2147483647, %v1027_v7 }
 0x193   : > { %v5169_v56 = vmax.f32 %v4593_v39, 0.0  ;;  %v5170_v15 = vmax.f32 %v4594_v10, 0.0  ;;  %v1604_v5 = vand.u32 2147483647, %v1028_v48  ;;  %v2161_v20 = vsub.f32 1.0, %v1585_v45 }
 0x194   : > { %v5654_v21 = vpack.c.bf16 %v5152_v37, %v5151_v35  ;;  %v2162_v30 = vsub.f32 1.0, %v1586_v13  ;;  %v3784_v25 = vsub.f32 %v13205_v32, %v10026_v61  ;;  %v2179_v59 = vsub.f32 1.0, %v1603_v44 }
 0x195   : > { %v5663_v27 = vpack.c.bf16 %v5170_v15, %v5169_v56  ;;  %v2180_v3 = vsub.f32 1.0, %v1604_v5  ;;  %v3801_v11 = vsub.f32 %v13206_v54, %v10014_v34  ;;  %v2737_v8 = vmax.f32 %v2161_v20, 0.0 }
 0x196   : > { %v6591_v31 = vunpack.c.l.bf16 %v5654_v21  ;;  %v2738_v0 = vmax.f32 %v2162_v30, 0.0  ;;  %v3802_v4 = vsub.f32 %v13206_v54, %v10026_v61  ;;  %v2755_v42 = vmax.f32 %v2179_v59, 0.0 }
 0x197   : > { %v6609_v22 = vunpack.c.l.bf16 %v5663_v27  ;;  %v2756_v24 = vmax.f32 %v2180_v3, 0.0  ;;  %v4359_v7 = vand.u32 2147483647, %v3783_v62  ;;  %v4360_v10 = vand.u32 2147483647, %v3784_v25 }
 0x198   : > { %v7167_v48 = vmul.f32 %v6591_v31, %v6015_v63  ;;  %v3060_v39 = vpack.c.bf16 %v2738_v0, %v2737_v8  ;;  %v4377_v35 = vand.u32 2147483647, %v3801_v11  ;;  %v4378_v13 = vand.u32 2147483647, %v3802_v4  ;;  %v13207_v4 = vld [vmem:[#allocation34_spill] sm:$0xff] }
 0x199   : > { %v7185_v37 = vmul.f32 %v6609_v22, %v6033_v28  ;;  %v3069_v45 = vpack.c.bf16 %v2756_v24, %v2755_v42  ;;  %v4935_v56 = vsub.f32 1.0, %v4359_v7  ;;  %v4936_v15 = vsub.f32 1.0, %v4360_v10 }
 0x19a   : > { %v4953_v44 = vsub.f32 1.0, %v4377_v35  ;;  %v6375_v5 = vunpack.c.l.bf16 %v3060_v39  ;;  %v6016_v20 = vunpack.c.h.bf16 %v10142_v33  ;;  %v4954_v32 = vsub.f32 1.0, %v4378_v13 }
 0x19b   : > { %v7671_v30 = vpack.c.bf16 %v7185_v37, %v7167_v48  ;;  %v5511_v54 = vmax.f32 %v4935_v56, 0.0  ;;  %v6393_v43 = vunpack.c.l.bf16 %v3069_v45  ;;  %v5512_v59 = vmax.f32 %v4936_v15, 0.0 }
 0x19c   : > { %v5529_v3 = vmax.f32 %v4953_v44, 0.0  ;;  %v6034_v63 = vunpack.c.h.bf16 %v10148_v40  ;;  %v6592_v62 = vunpack.c.h.bf16 %v5654_v21  ;;  %v5530_v25 = vmax.f32 %v4954_v32, 0.0 }
 0x19d   : > { %7947 = vmatpush.bf16.msrb.mxu0 %v7671_v30  ;;  %v6610_v28 = vunpack.c.h.bf16 %v5663_v27  ;;  %v6376_v11 = vunpack.c.h.bf16 %v3060_v39  ;;  %v6394_v31 = vunpack.c.h.bf16 %v3069_v45  ;;  %v5834_v8 = vpack.c.bf16 %v5512_v59, %v5511_v54 }
 0x19e   : > { %v7168_v0 = vmul.f32 %v6592_v62, %v6016_v20  ;;  %v613_v22 = vsub.f32 %v13207_v4, %v9958_v57  ;;  %v614_v33 = vsub.f32 %v13207_v4, %v9962_v50  ;;  %v5843_v42 = vpack.c.bf16 %v5530_v25, %v5529_v3 }
 0x19f   : > { %v7186_v24 = vmul.f32 %v6610_v28, %v6034_v63  ;;  %v631_v7 = vsub.f32 %v9777_v23, %v9958_v57  ;;  %v632_v40 = vsub.f32 %v9777_v23, %v9962_v50  ;;  %v6951_v32 = vunpack.c.l.bf16 %v5834_v8  ;;  %v13208_v63 = vld [vmem:[#allocation44_spill] sm:$0xff] }
 0x1a0   : > { %v6952_v21 = vunpack.c.h.bf16 %v5834_v8  ;;  %v1189_v27 = vand.u32 2147483647, %v613_v22  ;;  %v1190_v48 = vand.u32 2147483647, %v614_v33  ;;  %v6969_v54 = vunpack.c.l.bf16 %v5843_v42  ;;  %v13209_v22 = vld [vmem:[#allocation37_spill] sm:$0xff] }
 0x1a1   : > { %v7672_v39 = vpack.c.bf16 %v7186_v24, %v7168_v0  ;;  %v6970_v10 = vunpack.c.h.bf16 %v5843_v42  ;;  %v1207_v35 = vand.u32 2147483647, %v631_v7  ;;  %v7527_v37 = vmul.f32 %v6951_v32, %v6375_v5  ;;  %v13210_v7 = vld [vmem:[#allocation18_spill] sm:$0xff] }
 0x1a2   : > { %v7528_v45 = vmul.f32 %v6952_v21, %v6376_v11  ;;  %v1208_v13 = vand.u32 2147483647, %v632_v40  ;;  %v1765_v56 = vsub.f32 1.0, %v1189_v27  ;;  %v7545_v15 = vmul.f32 %v6969_v54, %v6393_v43 }
 0x1a3   : > { %7973 = vmatpush.bf16.msrb.mxu2 %v7672_v39  ;;  %v7546_v44 = vmul.f32 %v6970_v10, %v6394_v31  ;;  %v1766_v20 = vsub.f32 1.0, %v1190_v48  ;;  %v1783_v30 = vsub.f32 1.0, %v1207_v35  ;;  %v3387_v62 = vsub.f32 %v13208_v63, %v10014_v34  ;;  %v13211_v35 = vld [vmem:[#allocation28_spill] sm:$0xff] }
 0x1a4   : > { %v1784_v59 = vsub.f32 1.0, %v1208_v13  ;;  %v2341_v3 = vmax.f32 %v1765_v56, 0.0  ;;  %v3388_v25 = vsub.f32 %v13208_v63, %v10026_v61  ;;  %v7851_v28 = vpack.c.bf16 %v7545_v15, %v7527_v37 }
 0x1a5   : > { %v7852_v8 = vpack.c.bf16 %v7546_v44, %v7528_v45  ;;  %v2342_v0 = vmax.f32 %v1766_v20, 0.0  ;;  %v2359_v5 = vmax.f32 %v1783_v30, 0.0  ;;  %v3405_v43 = vsub.f32 %v13209_v22, %v10014_v34 }
 0x1a6   : > { %v2360_v11 = vmax.f32 %v1784_v59, 0.0  ;;  %v3406_v31 = vsub.f32 %v13209_v22, %v10026_v61  ;;  %v3963_v33 = vand.u32 2147483647, %v3387_v62  ;;  %7958 = vmatpush.bf16.msrb.mxu1 %v7851_v28  ;;  %v3964_v24 = vand.u32 2147483647, %v3388_v25 }
 0x1a7   : > { %7984 = vmatpush.bf16.msrb.mxu3 %v7852_v8  ;;  %v10182_v42 = vpack.c.bf16 %v2342_v0, %v2341_v3  ;;  %v973_v40 = vsub.f32 %v13210_v7, %v9958_v57  ;;  %v974_v32 = vsub.f32 %v13210_v7, %v9962_v50  ;;  %v3981_v27 = vand.u32 2147483647, %v3405_v43  ;;  %v13212_v3 = vld [vmem:[#allocation11_spill] sm:$0xff] }
 0x1a8   : > { %v10188_v21 = vpack.c.bf16 %v2360_v11, %v2359_v5  ;;  %v3982_v48 = vand.u32 2147483647, %v3406_v31  ;;  %v4539_v54 = vsub.f32 1.0, %v3963_v33  ;;  %v4540_v39 = vsub.f32 1.0, %v3964_v24 }
 0x1a9   : > { %v5979_v10 = vunpack.c.l.bf16 %v10182_v42  ;;  %v991_v37 = vsub.f32 %v13211_v35, %v9958_v57  ;;  %v992_v45 = vsub.f32 %v13211_v35, %v9962_v50  ;;  %v4557_v13 = vsub.f32 1.0, %v3981_v27 }
 0x1aa   : > { %v4558_v56 = vsub.f32 1.0, %v3982_v48  ;;  %v5115_v15 = vmax.f32 %v4539_v54, 0.0  ;;  %v5997_v44 = vunpack.c.l.bf16 %v10188_v21  ;;  %v5116_v20 = vmax.f32 %v4540_v39, 0.0  ;;  %v13213_v48 = vld [vmem:[#allocation29_spill] sm:$0xff] }
 0x1ab   : > { %v1549_v30 = vand.u32 2147483647, %v973_v40  ;;  %v1550_v59 = vand.u32 2147483647, %v974_v32  ;;  %v3747_v62 = vsub.f32 %v13212_v3, %v10014_v34  ;;  %v5133_v25 = vmax.f32 %v4557_v13, 0.0 }
 0x1ac   : > { %v5134_v28 = vmax.f32 %v4558_v56, 0.0  ;;  %v1567_v8 = vand.u32 2147483647, %v991_v37  ;;  %v1568_v0 = vand.u32 2147483647, %v992_v45  ;;  %v5636_v5 = vpack.c.bf16 %v5116_v20, %v5115_v15 }
 0x1ad   : > { %v2125_v11 = vsub.f32 1.0, %v1549_v30  ;;  %v2126_v43 = vsub.f32 1.0, %v1550_v59  ;;  %v3748_v31 = vsub.f32 %v13212_v3, %v10026_v61  ;;  %v3765_v40 = vsub.f32 %v13213_v48, %v10014_v34 }
 0x1ae   : > { %v5645_v33 = vpack.c.bf16 %v5134_v28, %v5133_v25  ;;  %v2143_v24 = vsub.f32 1.0, %v1567_v8  ;;  %v2144_v27 = vsub.f32 1.0, %v1568_v0  ;;  %v6555_v32 = vunpack.c.l.bf16 %v5636_v5 }
 0x1af   : > { %v2701_v54 = vmax.f32 %v2125_v11, 0.0  ;;  %v2702_v39 = vmax.f32 %v2126_v43, 0.0  ;;  %v3766_v13 = vsub.f32 %v13213_v48, %v10026_v61  ;;  %v4323_v15 = vand.u32 2147483647, %v3747_v62 }
 0x1b0   : > { %v6573_v37 = vunpack.c.l.bf16 %v5645_v33  ;;  %v2719_v45 = vmax.f32 %v2143_v24, 0.0  ;;  %v2720_v56 = vmax.f32 %v2144_v27, 0.0  ;;  %v7131_v20 = vmul.f32 %v6555_v32, %v5979_v10 }
 0x1b1   : > { %v3042_v30 = vpack.c.bf16 %v2702_v39, %v2701_v54  ;;  %v4324_v59 = vand.u32 2147483647, %v3748_v31  ;;  %v4341_v3 = vand.u32 2147483647, %v3765_v40  ;;  %v4342_v8 = vand.u32 2147483647, %v3766_v13 }
 0x1b2   : > { %v7149_v25 = vmul.f32 %v6573_v37, %v5997_v44  ;;  %v3051_v28 = vpack.c.bf16 %v2720_v56, %v2719_v45  ;;  %v4899_v0 = vsub.f32 1.0, %v4323_v15  ;;  %v5980_v11 = vunpack.c.h.bf16 %v10182_v42 }
 0x1b3   : > { %v4900_v35 = vsub.f32 1.0, %v4324_v59  ;;  %v4917_v7 = vsub.f32 1.0, %v4341_v3  ;;  %v6339_v22 = vunpack.c.l.bf16 %v3042_v30  ;;  %v4918_v63 = vsub.f32 1.0, %v4342_v8  ;;  %v13214_v3 = vld [vmem:[#allocation40_spill] sm:$0xff] }
 0x1b4   : > { %v7653_v43 = vpack.c.bf16 %v7149_v25, %v7131_v20  ;;  %v5475_v48 = vmax.f32 %v4899_v0, 0.0  ;;  %v6357_v23 = vunpack.c.l.bf16 %v3051_v28  ;;  %v5998_v10 = vunpack.c.h.bf16 %v10188_v21 }
 0x1b5   : > { %v5476_v24 = vmax.f32 %v4900_v35, 0.0  ;;  %v5493_v27 = vmax.f32 %v4917_v7, 0.0  ;;  %v6556_v62 = vunpack.c.h.bf16 %v5636_v5  ;;  %v5494_v31 = vmax.f32 %v4918_v63, 0.0  ;;  %v13215_v7 = vld [vmem:[#allocation49_spill] sm:$0xff] }
 0x1b6   : > { %7948 = vmatpush.bf16.msrb.mxu0 %v7653_v43  ;;  %v6574_v44 = vunpack.c.h.bf16 %v5645_v33  ;;  %v6340_v40 = vunpack.c.h.bf16 %v3042_v30  ;;  %v6358_v32 = vunpack.c.h.bf16 %v3051_v28  ;;  %v577_v13 = vsub.f32 %v13214_v3, %v9958_v57 }
 0x1b7   : > { %v5816_v54 = vpack.c.bf16 %v5476_v24, %v5475_v48  ;;  %v7132_v39 = vmul.f32 %v6556_v62, %v5980_v11  ;;  %v578_v42 = vsub.f32 %v13214_v3, %v9962_v50  ;;  %v5825_v37 = vpack.c.bf16 %v5494_v31, %v5493_v27  ;;  %v13216_v62 = vld [vmem:[#allocation51_spill] sm:$0xff] }
 0x1b8   : > { %v7150_v45 = vmul.f32 %v6574_v44, %v5998_v10  ;;  %v595_v35 = vsub.f32 %v13215_v7, %v9958_v57  ;;  %v596_v21 = vsub.f32 %v13215_v7, %v9962_v50  ;;  %v1153_v33 = vand.u32 2147483647, %v577_v13 }
 0x1b9   : > { %v6915_v63 = vunpack.c.l.bf16 %v5816_v54  ;;  %v6916_v5 = vunpack.c.h.bf16 %v5816_v54  ;;  %v1154_v56 = vand.u32 2147483647, %v578_v42  ;;  %v6933_v48 = vunpack.c.l.bf16 %v5825_v37  ;;  %v13217_v42 = vld [vmem:[#allocation45_spill] sm:$0xff] }
 0x1ba   : > { %v7654_v15 = vpack.c.bf16 %v7150_v45, %v7132_v39  ;;  %v6934_v20 = vunpack.c.h.bf16 %v5825_v37  ;;  %v1171_v30 = vand.u32 2147483647, %v595_v35  ;;  %v1172_v28 = vand.u32 2147483647, %v596_v21  ;;  %v13218_v21 = vld [vmem:[#allocation26_spill] sm:$0xff] }
 0x1bb   : > { %v7491_v59 = vmul.f32 %v6915_v63, %v6339_v22  ;;  %v7492_v25 = vmul.f32 %v6916_v5, %v6340_v40  ;;  %v1729_v8 = vsub.f32 1.0, %v1153_v33  ;;  %v7509_v0 = vmul.f32 %v6933_v48, %v6357_v23 }
 0x1bc   : > { %7974 = vmatpush.bf16.msrb.mxu2 %v7654_v15  ;;  %v7510_v11 = vmul.f32 %v6934_v20, %v6358_v32  ;;  %v1730_v43 = vsub.f32 1.0, %v1154_v56  ;;  %v1747_v24 = vsub.f32 1.0, %v1171_v30  ;;  %v1748_v27 = vsub.f32 1.0, %v1172_v28 }
 0x1bd   : > { %v2305_v10 = vmax.f32 %v1729_v8, 0.0  ;;  %v3351_v31 = vsub.f32 %v13216_v62, %v10014_v34  ;;  %v3352_v44 = vsub.f32 %v13216_v62, %v10026_v61  ;;  %v7833_v54 = vpack.c.bf16 %v7509_v0, %v7491_v59  ;;  %v13219_v59 = vld [vmem:[#allocation31_spill] sm:$0xff] }
 0x1be   : > { %v7834_v39 = vpack.c.bf16 %v7510_v11, %v7492_v25  ;;  %v2306_v13 = vmax.f32 %v1730_v43, 0.0  ;;  %v2323_v22 = vmax.f32 %v1747_v24, 0.0  ;;  %v2324_v40 = vmax.f32 %v1748_v27, 0.0 }
 0x1bf   : > { %v3369_v23 = vsub.f32 %v13217_v42, %v10014_v34  ;;  %v3370_v32 = vsub.f32 %v13217_v42, %v10026_v61  ;;  %v3927_v37 = vand.u32 2147483647, %v3351_v31  ;;  %7959 = vmatpush.bf16.msrb.mxu1 %v7833_v54  ;;  %v3928_v35 = vand.u32 2147483647, %v3352_v44  ;;  %v13220_v31 = vld [vmem:[#allocation38_spill] sm:$0xff] }
 0x1c0   : > { %7985 = vmatpush.bf16.msrb.mxu3 %v7834_v39  ;;  %v10222_v45 = vpack.c.bf16 %v2306_v13, %v2305_v10  ;;  %v937_v63 = vsub.f32 %v13218_v21, %v9958_v57  ;;  %v938_v5 = vsub.f32 %v13218_v21, %v9962_v50  ;;  %v10228_v33 = vpack.c.bf16 %v2324_v40, %v2323_v22 }
 0x1c1   : > { %v3945_v56 = vand.u32 2147483647, %v3369_v23  ;;  %v3946_v48 = vand.u32 2147483647, %v3370_v32  ;;  %v4503_v15 = vsub.f32 1.0, %v3927_v37  ;;  %v4504_v20 = vsub.f32 1.0, %v3928_v35 }
 0x1c2   : > { %v5943_v30 = vunpack.c.l.bf16 %v10222_v45  ;;  %v955_v25 = vsub.f32 %v13219_v59, %v9958_v57  ;;  %v956_v28 = vsub.f32 %v13219_v59, %v9962_v50  ;;  %v5961_v43 = vunpack.c.l.bf16 %v10228_v33 }
 0x1c3   : > { %v4521_v8 = vsub.f32 1.0, %v3945_v56  ;;  %v4522_v0 = vsub.f32 1.0, %v3946_v48  ;;  %v5079_v11 = vmax.f32 %v4503_v15, 0.0  ;;  %v5080_v24 = vmax.f32 %v4504_v20, 0.0  ;;  %v13221_v15 = vld [vmem:[#allocation30_spill] sm:$0xff] }
 0x1c4   : > { %v1513_v27 = vand.u32 2147483647, %v937_v63  ;;  %v1514_v10 = vand.u32 2147483647, %v938_v5  ;;  %v3711_v44 = vsub.f32 %v13220_v31, %v10014_v34  ;;  %v1531_v13 = vand.u32 2147483647, %v955_v25 }
 0x1c5   : > { %v5097_v54 = vmax.f32 %v4521_v8, 0.0  ;;  %v5098_v39 = vmax.f32 %v4522_v0, 0.0  ;;  %v1532_v22 = vand.u32 2147483647, %v956_v28  ;;  %v5618_v40 = vpack.c.bf16 %v5080_v24, %v5079_v11 }
 0x1c6   : > { %v2089_v23 = vsub.f32 1.0, %v1513_v27  ;;  %v2090_v32 = vsub.f32 1.0, %v1514_v10  ;;  %v3712_v37 = vsub.f32 %v13220_v31, %v10026_v61  ;;  %v2107_v56 = vsub.f32 1.0, %v1531_v13 }
 0x1c7   : > { %v5627_v35 = vpack.c.bf16 %v5098_v39, %v5097_v54  ;;  %v2108_v48 = vsub.f32 1.0, %v1532_v22  ;;  %v3729_v63 = vsub.f32 %v13221_v15, %v10014_v34  ;;  %v6519_v5 = vunpack.c.l.bf16 %v5618_v40 }
 0x1c8   : > { %v2665_v20 = vmax.f32 %v2089_v23, 0.0  ;;  %v2666_v59 = vmax.f32 %v2090_v32, 0.0  ;;  %v3730_v8 = vsub.f32 %v13221_v15, %v10026_v61  ;;  %v2683_v28 = vmax.f32 %v2107_v56, 0.0 }
 0x1c9   : > { %v6537_v25 = vunpack.c.l.bf16 %v5627_v35  ;;  %v2684_v0 = vmax.f32 %v2108_v48, 0.0  ;;  %v4287_v11 = vand.u32 2147483647, %v3711_v44  ;;  %v7095_v24 = vmul.f32 %v6519_v5, %v5943_v30 }
 0x1ca   : > { %v3024_v27 = vpack.c.bf16 %v2666_v59, %v2665_v20  ;;  %v4288_v10 = vand.u32 2147483647, %v3712_v37  ;;  %v4305_v31 = vand.u32 2147483647, %v3729_v63  ;;  %v4306_v13 = vand.u32 2147483647, %v3730_v8 }
 0x1cb   : > { %v7113_v54 = vmul.f32 %v6537_v25, %v5961_v43  ;;  %v3033_v39 = vpack.c.bf16 %v2684_v0, %v2683_v28  ;;  %v4863_v22 = vsub.f32 1.0, %v4287_v11  ;;  %v5944_v23 = vunpack.c.h.bf16 %v10222_v45 }
 0x1cc   : > { %v4864_v21 = vsub.f32 1.0, %v4288_v10  ;;  %v4881_v42 = vsub.f32 1.0, %v4305_v31  ;;  %v6303_v62 = vunpack.c.l.bf16 %v3024_v27  ;;  %v4882_v7 = vsub.f32 1.0, %v4306_v13  ;;  %v13222_v31 = vld [vmem:[#allocation43_spill] sm:$0xff] }
 0x1cd   : > { %v7635_v32 = vpack.c.bf16 %v7113_v54, %v7095_v24  ;;  %v5439_v15 = vmax.f32 %v4863_v22, 0.0  ;;  %v6321_v3 = vunpack.c.l.bf16 %v3033_v39  ;;  %v5962_v30 = vunpack.c.h.bf16 %v10228_v33 }
 0x1ce   : > { %v5440_v56 = vmax.f32 %v4864_v21, 0.0  ;;  %v5457_v48 = vmax.f32 %v4881_v42, 0.0  ;;  %v6520_v59 = vunpack.c.h.bf16 %v5618_v40  ;;  %v5458_v44 = vmax.f32 %v4882_v7, 0.0 }
 0x1cf   : > { %7949 = vmatpush.bf16.msrb.mxu0 %v7635_v32  ;;  %v6538_v43 = vunpack.c.h.bf16 %v5627_v35  ;;  %v6304_v37 = vunpack.c.h.bf16 %v3024_v27  ;;  %v6322_v63 = vunpack.c.h.bf16 %v3033_v39  ;;  %v541_v8 = vsub.f32 %v13222_v31, %v9958_v57 }
 0x1d0   : > { %v5798_v5 = vpack.c.bf16 %v5440_v56, %v5439_v15  ;;  %v7096_v20 = vmul.f32 %v6520_v59, %v5944_v23  ;;  %v542_v45 = vsub.f32 %v13222_v31, %v9962_v50  ;;  %v5807_v25 = vpack.c.bf16 %v5458_v44, %v5457_v48 }
 0x1d1   : > { %v7114_v28 = vmul.f32 %v6538_v43, %v5962_v30  ;;  %v559_v42 = vsub.f32 %v9933_v53, %v9958_v57  ;;  %v560_v21 = vsub.f32 %v9933_v53, %v9962_v50  ;;  %v1117_v40 = vand.u32 2147483647, %v541_v8 }
 0x1d2   : > { %v6879_v7 = vunpack.c.l.bf16 %v5798_v5  ;;  %v6880_v33 = vunpack.c.h.bf16 %v5798_v5  ;;  %v1118_v35 = vand.u32 2147483647, %v542_v45  ;;  %v6897_v15 = vunpack.c.l.bf16 %v5807_v25 }
 0x1d3   : > { %v7636_v0 = vpack.c.bf16 %v7114_v28, %v7096_v20  ;;  %v6898_v11 = vunpack.c.h.bf16 %v5807_v25  ;;  %v1135_v24 = vand.u32 2147483647, %v559_v42  ;;  %v1136_v54 = vand.u32 2147483647, %v560_v21  ;;  %v13223_v20 = vld [vmem:[#allocation52_spill] sm:$0xff]  ;;  %v13224_v28 = vld [vmem:[#allocation33_spill] sm:$0xff] }
 0x1d4   : > { %v7455_v27 = vmul.f32 %v6879_v7, %v6303_v62  ;;  %v7456_v10 = vmul.f32 %v6880_v33, %v6304_v37  ;;  %v1693_v39 = vsub.f32 1.0, %v1117_v40  ;;  %v7473_v13 = vmul.f32 %v6897_v15, %v6321_v3 }
 0x1d5   : > { %7975 = vmatpush.bf16.msrb.mxu2 %v7636_v0  ;;  %v7474_v22 = vmul.f32 %v6898_v11, %v6322_v63  ;;  %v1694_v23 = vsub.f32 1.0, %v1118_v35  ;;  %v1711_v32 = vsub.f32 1.0, %v1135_v24  ;;  %v1712_v56 = vsub.f32 1.0, %v1136_v54  ;;  %v13225_v11 = vld [vmem:[#allocation36_spill] sm:$0xff] }
 0x1d6   : > { %v2269_v48 = vmax.f32 %v1693_v39, 0.0  ;;  %v3315_v30 = vsub.f32 %v9954_v58, %v10014_v34  ;;  %v3316_v59 = vsub.f32 %v9954_v58, %v10026_v61  ;;  %v7815_v44 = vpack.c.bf16 %v7473_v13, %v7455_v27 }
 0x1d7   : > { %v7816_v43 = vpack.c.bf16 %v7474_v22, %v7456_v10  ;;  %v2270_v5 = vmax.f32 %v1694_v23, 0.0  ;;  %v2287_v62 = vmax.f32 %v1711_v32, 0.0  ;;  %v2288_v37 = vmax.f32 %v1712_v56, 0.0  ;;  %v13226_v56 = vld [vmem:[#allocation13_spill] sm:$0xff] }
 0x1d8   : > { %v3333_v3 = vsub.f32 %v13223_v20, %v10014_v34  ;;  %v3334_v63 = vsub.f32 %v13223_v20, %v10026_v61  ;;  %v3891_v8 = vand.u32 2147483647, %v3315_v30  ;;  %7960 = vmatpush.bf16.msrb.mxu1 %v7815_v44  ;;  %v3892_v25 = vand.u32 2147483647, %v3316_v59 }
 0x1d9   : > { %7986 = vmatpush.bf16.msrb.mxu3 %v7816_v43  ;;  %v10262_v45 = vpack.c.bf16 %v2270_v5, %v2269_v48  ;;  %v901_v42 = vsub.f32 %v13224_v28, %v9958_v57  ;;  %v902_v21 = vsub.f32 %v13224_v28, %v9962_v50  ;;  %v10268_v7 = vpack.c.bf16 %v2288_v37, %v2287_v62 }
 0x1da   : > { %v3909_v33 = vand.u32 2147483647, %v3333_v3  ;;  %v3910_v40 = vand.u32 2147483647, %v3334_v63  ;;  %v4467_v35 = vsub.f32 1.0, %v3891_v8  ;;  %v4468_v15 = vsub.f32 1.0, %v3892_v25 }
 0x1db   : > { %v5907_v0 = vunpack.c.l.bf16 %v10262_v45  ;;  %v919_v24 = vsub.f32 %v13225_v11, %v9958_v57  ;;  %v920_v27 = vsub.f32 %v13225_v11, %v9962_v50  ;;  %v5925_v13 = vunpack.c.l.bf16 %v10268_v7 }
 0x1dc   : > { %v4485_v10 = vsub.f32 1.0, %v3909_v33  ;;  %v4486_v54 = vsub.f32 1.0, %v3910_v40  ;;  %v5043_v39 = vmax.f32 %v4467_v35, 0.0  ;;  %v5044_v22 = vmax.f32 %v4468_v15, 0.0  ;;  %v13227_v33 = vld [vmem:[#allocation47_spill] sm:$0xff] }
 0x1dd   : > { %v1477_v23 = vand.u32 2147483647, %v901_v42  ;;  %v1478_v32 = vand.u32 2147483647, %v902_v21  ;;  %v3675_v48 = vsub.f32 %v13226_v56, %v10014_v34  ;;  %v1495_v44 = vand.u32 2147483647, %v919_v24 }
 0x1de   : > { %v5061_v30 = vmax.f32 %v4485_v10, 0.0  ;;  %v5062_v59 = vmax.f32 %v4486_v54, 0.0  ;;  %v1496_v43 = vand.u32 2147483647, %v920_v27  ;;  %v5600_v5 = vpack.c.bf16 %v5044_v22, %v5043_v39 }
 0x1df   : > { %v2053_v62 = vsub.f32 1.0, %v1477_v23  ;;  %v2054_v37 = vsub.f32 1.0, %v1478_v32  ;;  %v3676_v3 = vsub.f32 %v13226_v56, %v10026_v61  ;;  %v2071_v8 = vsub.f32 1.0, %v1495_v44 }
 0x1e0   : > { %v5609_v63 = vpack.c.bf16 %v5062_v59, %v5061_v30  ;;  %v2072_v25 = vsub.f32 1.0, %v1496_v43  ;;  %v3693_v42 = vsub.f32 %v13227_v33, %v10014_v34  ;;  %v6483_v21 = vunpack.c.l.bf16 %v5600_v5 }
 0x1e1   : > { %v2629_v40 = vmax.f32 %v2053_v62, 0.0  ;;  %v2630_v35 = vmax.f32 %v2054_v37, 0.0  ;;  %v3694_v15 = vsub.f32 %v13227_v33, %v10026_v61  ;;  %v2647_v27 = vmax.f32 %v2071_v8, 0.0 }
 0x1e2   : > { %v6501_v24 = vunpack.c.l.bf16 %v5609_v63  ;;  %v2648_v10 = vmax.f32 %v2072_v25, 0.0  ;;  %v4251_v54 = vand.u32 2147483647, %v3675_v48  ;;  %v7059_v39 = vmul.f32 %v6483_v21, %v5907_v0 }
 0x1e3   : > { %v3006_v22 = vpack.c.bf16 %v2630_v35, %v2629_v40  ;;  %v4252_v23 = vand.u32 2147483647, %v3676_v3  ;;  %v4269_v32 = vand.u32 2147483647, %v3693_v42  ;;  %v4270_v44 = vand.u32 2147483647, %v3694_v15 }
 0x1e4   : > { %v7077_v30 = vmul.f32 %v6501_v24, %v5925_v13  ;;  %v3015_v59 = vpack.c.bf16 %v2648_v10, %v2647_v27  ;;  %v4827_v43 = vsub.f32 1.0, %v4251_v54  ;;  %v5908_v37 = vunpack.c.h.bf16 %v10262_v45 }
 0x1e5   : > { %v4828_v56 = vsub.f32 1.0, %v4252_v23  ;;  %v4845_v11 = vsub.f32 1.0, %v4269_v32  ;;  %v6267_v62 = vunpack.c.l.bf16 %v3006_v22  ;;  %v4846_v28 = vsub.f32 1.0, %v4270_v44 }
 0x1e6   : > { %v7617_v33 = vpack.c.bf16 %v7077_v30, %v7059_v39  ;;  %v5403_v20 = vmax.f32 %v4827_v43, 0.0  ;;  %v6285_v8 = vunpack.c.l.bf16 %v3015_v59  ;;  %v5926_v0 = vunpack.c.h.bf16 %v10268_v7 }
 0x1e7   : > { %v5404_v25 = vmax.f32 %v4828_v56, 0.0  ;;  %v5421_v48 = vmax.f32 %v4845_v11, 0.0  ;;  %v6484_v3 = vunpack.c.h.bf16 %v5600_v5  ;;  %v5422_v13 = vmax.f32 %v4846_v28, 0.0 }
 0x1e8   : > { %7950 = vmatpush.bf16.msrb.mxu0 %v7617_v33  ;;  %v6502_v42 = vunpack.c.h.bf16 %v5609_v63  ;;  %v6268_v21 = vunpack.c.h.bf16 %v3006_v22  ;;  %v6286_v40 = vunpack.c.h.bf16 %v3015_v59  ;;  %v505_v15 = vsub.f32 %v9921_v29, %v9958_v57 }
 0x1e9   : > { %v5780_v45 = vpack.c.bf16 %v5404_v25, %v5403_v20  ;;  %v7060_v35 = vmul.f32 %v6484_v3, %v5908_v37  ;;  %v506_v11 = vsub.f32 %v9921_v29, %v9962_v50  ;;  %v5789_v56 = vpack.c.bf16 %v5422_v13, %v5421_v48  ;;  %v7885_v20 = vld [vmem:[%s245_s14] sm:$0xf]  ;;  %s9117_s14 = scalar_lea.hbm %s12743_s4, 32 }
 0x1ea   : > { %v7078_v7 = vmul.f32 %v6502_v42, %v5926_v0  ;;  %v523_v28 = vsub.f32 %v10010_v17, %v9958_v57  ;;  %v524_v5 = vsub.f32 %v10010_v17, %v9962_v50  ;;  %v1081_v24 = vand.u32 2147483647, %v505_v15  ;;  %7887 = vst [vmem:[#allocation1] ss:$4 sm:$0xff] %v7885_v20  ;;  %v13228_v15 = vld [vmem:[#allocation54_spill] sm:$0xff]  ;;  %p9119_p2 = scmp.lt.s32.totalorder %s9117_s14, %s9113_s11 }
 0x1eb   : > { %v6843_v63 = vunpack.c.l.bf16 %v5780_v45  ;;  %v6844_v33 = vunpack.c.h.bf16 %v5780_v45  ;;  %v1082_v27 = vand.u32 2147483647, %v506_v11  ;;  %v6861_v10 = vunpack.c.l.bf16 %v5789_v56 }
 0x1ec   : > { %v7618_v54 = vpack.c.bf16 %v7078_v7, %v7060_v35  ;;  %v6862_v39 = vunpack.c.h.bf16 %v5789_v56  ;;  %v1099_v22 = vand.u32 2147483647, %v523_v28  ;;  %v1100_v30 = vand.u32 2147483647, %v524_v5  ;;  %v13229_v28 = vld [vmem:[#allocation42_spill] sm:$0xff]  ;;  %p9120_p3 = por %p9119_p2, %p9118_p1 }
 0x1ed   : > { %v7419_v23 = vmul.f32 %v6843_v63, %v6267_v62  ;;  %v7420_v32 = vmul.f32 %v6844_v33, %v6268_v21  ;;  %v1657_v59 = vsub.f32 1.0, %v1081_v24  ;;  %v7437_v44 = vmul.f32 %v6861_v10, %v6285_v8 }
 0x1ee   : > { %7976 = vmatpush.bf16.msrb.mxu2 %v7618_v54  ;;  %v7438_v43 = vmul.f32 %v6862_v39, %v6286_v40  ;;  %v1658_v37 = vsub.f32 1.0, %v1082_v27  ;;  %v1675_v25 = vsub.f32 1.0, %v1099_v22  ;;  %v1676_v48 = vsub.f32 1.0, %v1100_v30  ;;  %v13230_v39 = vld [vmem:[#allocation39_spill] sm:$0xff]  ;;  %p9121_p5 = pnand %p9120_p3, %p9116_p0 }
 0x1ef   : > { %v2233_v0 = vmax.f32 %v1657_v59, 0.0  ;;  %v3279_v3 = vsub.f32 %v10038_v41, %v10014_v34  ;;  %v3280_v13 = vsub.f32 %v10038_v41, %v10026_v61  ;;  %v7797_v42 = vpack.c.bf16 %v7437_v44, %v7419_v23 }
 0x1f0   : > { %v7798_v45 = vpack.c.bf16 %v7438_v43, %v7420_v32  ;;  %v2234_v35 = vmax.f32 %v1658_v37, 0.0  ;;  %v2251_v62 = vmax.f32 %v1675_v25, 0.0  ;;  %v2252_v21 = vmax.f32 %v1676_v48, 0.0 }
 0x1f1   : > { %v3297_v8 = vsub.f32 %v13228_v15, %v10014_v34  ;;  %v3298_v40 = vsub.f32 %v13228_v15, %v10026_v61  ;;  %v3855_v11 = vand.u32 2147483647, %v3279_v3  ;;  %7961 = vmatpush.bf16.msrb.mxu1 %v7797_v42  ;;  %v3856_v7 = vand.u32 2147483647, %v3280_v13  ;;  %v13231_v3 = vld [vmem:[#allocation53_spill] sm:$0xff] }
 0x1f2   : > { %7987 = vmatpush.bf16.msrb.mxu3 %v7798_v45  ;;  %v10306_v56 = vpack.c.bf16 %v2234_v35, %v2233_v0  ;;  %v865_v5 = vsub.f32 %v13229_v28, %v9958_v57  ;;  %v866_v63 = vsub.f32 %v13229_v28, %v9962_v50  ;;  %v10312_v33 = vpack.c.bf16 %v2252_v21, %v2251_v62  ;;  %v10319_v32 = vld.sshfl [vmem:[#allocation1] sm:$0xff pattern:$0x73625140]  ;;  %v10324_v37 = vld.sshfl [vmem:[#allocation1 + $0x8] sm:$0xff pattern:$0x73625140] }
 0x1f3   : > { %v3873_v24 = vand.u32 2147483647, %v3297_v8  ;;  %v3874_v27 = vand.u32 2147483647, %v3298_v40  ;;  %v4431_v20 = vsub.f32 1.0, %v3855_v11  ;;  %v4432_v10 = vsub.f32 1.0, %v3856_v7  ;;  %7900 = vmatmul.bf16.vlgmr.msra.gmra.mxu0 %v10319_v32  ;;  %7926 = vmatmul.bf16.vlgmr.msra.gmra.mxu2 %v10319_v32 }
 0x1f4   : > { %v5871_v54 = vunpack.c.l.bf16 %v10306_v56  ;;  %v883_v22 = vsub.f32 %v13230_v39, %v9958_v57  ;;  %v884_v23 = vsub.f32 %v13230_v39, %v9962_v50  ;;  %v5889_v43 = vunpack.c.l.bf16 %v10312_v33  ;;  %7939 = vmatmul.bf16.vlgmr.msra.gmra.mxu3 %v10324_v37  ;;  %7913 = vmatmul.bf16.vlgmr.msra.gmra.mxu1 %v10324_v37 }
 0x1f5   : > { %v4449_v30 = vsub.f32 1.0, %v3873_v24  ;;  %v4450_v59 = vsub.f32 1.0, %v3874_v27  ;;  %v5007_v44 = vmax.f32 %v4431_v20, 0.0  ;;  %v5008_v25 = vmax.f32 %v4432_v10, 0.0  ;;  %v13232_v24 = vld [vmem:[#allocation48_spill] sm:$0xff] }
 0x1f6   : > { %v1441_v48 = vand.u32 2147483647, %v865_v5  ;;  %v1442_v0 = vand.u32 2147483647, %v866_v63  ;;  %v3639_v13 = vsub.f32 %v13231_v3, %v10014_v34  ;;  %v1459_v35 = vand.u32 2147483647, %v883_v22 }
 0x1f7   : > { %v5025_v42 = vmax.f32 %v4449_v30, 0.0  ;;  %v5026_v45 = vmax.f32 %v4450_v59, 0.0  ;;  %v1460_v62 = vand.u32 2147483647, %v884_v23  ;;  %v5582_v21 = vpack.c.bf16 %v5008_v25, %v5007_v44 }
 0x1f8   : > { %v2017_v8 = vsub.f32 1.0, %v1441_v48  ;;  %v2018_v40 = vsub.f32 1.0, %v1442_v0  ;;  %v3640_v11 = vsub.f32 %v13231_v3, %v10026_v61  ;;  %v2035_v5 = vsub.f32 1.0, %v1459_v35 }
 0x1f9   : > { %v5591_v7 = vpack.c.bf16 %v5026_v45, %v5025_v42  ;;  %v2036_v63 = vsub.f32 1.0, %v1460_v62  ;;  %v3657_v27 = vsub.f32 %v13232_v24, %v10014_v34  ;;  %v6447_v20 = vunpack.c.l.bf16 %v5582_v21 }
 0x1fa   : > { %v2593_v10 = vmax.f32 %v2017_v8, 0.0  ;;  %v2594_v39 = vmax.f32 %v2018_v40, 0.0  ;;  %v3658_v30 = vsub.f32 %v13232_v24, %v10026_v61  ;;  %v2611_v23 = vmax.f32 %v2035_v5, 0.0 }
 0x1fb   : > { %v6465_v22 = vunpack.c.l.bf16 %v5591_v7  ;;  %v2612_v59 = vmax.f32 %v2036_v63, 0.0  ;;  %v4215_v44 = vand.u32 2147483647, %v3639_v13  ;;  %v7023_v25 = vmul.f32 %v6447_v20, %v5871_v54  ;;  %v280_v63 = vld [vmem:[%s9355_s21 + $0x8] sm:$0xff] }
 0x1fc   : > { %v2988_v48 = vpack.c.bf16 %v2594_v39, %v2593_v10  ;;  %v4216_v0 = vand.u32 2147483647, %v3640_v11  ;;  %v4233_v42 = vand.u32 2147483647, %v3657_v27  ;;  %v4234_v62 = vand.u32 2147483647, %v3658_v30 }
 0x1fd   : > { %v7041_v45 = vmul.f32 %v6465_v22, %v5889_v43  ;;  %v2997_v35 = vpack.c.bf16 %v2612_v59, %v2611_v23  ;;  %v4791_v3 = vsub.f32 1.0, %v4215_v44  ;;  %v5872_v40 = vunpack.c.h.bf16 %v10306_v56 }
 0x1fe   : > { %v4792_v28 = vsub.f32 1.0, %v4216_v0  ;;  %v4809_v15 = vsub.f32 1.0, %v4233_v42  ;;  %v6231_v8 = vunpack.c.l.bf16 %v2988_v48  ;;  %v4810_v24 = vsub.f32 1.0, %v4234_v62 }
 0x1ff   : > { %v7599_v41 = vpack.c.bf16 %v7041_v45, %v7023_v25  ;;  %v5367_v17 = vmax.f32 %v4791_v3, 0.0  ;;  %v6249_v5 = vunpack.c.l.bf16 %v2997_v35  ;;  %v5890_v39 = vunpack.c.h.bf16 %v10312_v33 }
 0x200   : > { %v5368_v13 = vmax.f32 %v4792_v28, 0.0  ;;  %v5385_v54 = vmax.f32 %v4809_v15, 0.0  ;;  %v6448_v11 = vunpack.c.h.bf16 %v5582_v21  ;;  %v5386_v43 = vmax.f32 %v4810_v24, 0.0 }
 0x201   : > { %7951 = vmatpush.bf16.msrb.mxu0 %v7599_v41  ;;  %v6466_v27 = vunpack.c.h.bf16 %v5591_v7  ;;  %v6232_v20 = vunpack.c.h.bf16 %v2988_v48  ;;  %v6250_v10 = vunpack.c.h.bf16 %v2997_v35  ;;  %v453_v23 = vperm.slane %v280_v63, 0  ;;  %v13233_v48 = vld [vmem:[#allocation19_spill] sm:$0xff] }
 0x202   : > { %v5762_v30 = vpack.c.bf16 %v5368_v13, %v5367_v17  ;;  %v7024_v22 = vmul.f32 %v6448_v11, %v5872_v40  ;;  %v454_v59 = vperm.slane %v280_v63, 2  ;;  %v5771_v56 = vpack.c.bf16 %v5386_v43, %v5385_v54 }
 0x203   : > { %v7042_v44 = vmul.f32 %v6466_v27, %v5890_v39  ;;  %v3227_v25 = vperm.slane %v280_v63, 1  ;;  %v3228_v3 = vperm.slane %v280_v63, 3  ;;  %v10339_v28 = vperm.slane %v453_v23, 0  ;;  %v13234_v63 = vld [vmem:[#allocation22_spill] sm:$0xff] }
 0x204   : > { %v6807_v0 = vunpack.c.l.bf16 %v5762_v30  ;;  %v6808_v42 = vunpack.c.h.bf16 %v5762_v30  ;;  %v10341_v15 = vperm.slane %v454_v59, 0  ;;  %v6825_v33 = vunpack.c.l.bf16 %v5771_v56  ;;  %7952 = vmatmul.bf16.vlgmr.msrb.gmra.mxu0 %v10319_v32 }
 0x205   : > { %v7600_v41 = vpack.c.bf16 %v7042_v44, %v7024_v22  ;;  %v6826_v21 = vunpack.c.h.bf16 %v5771_v56  ;;  %v10343_v7 = vperm.slane %v3227_v25, 1  ;;  %v759_v45 = vsub.f32 %v13233_v48, %v10339_v28  ;;  %v13236_v56 = vld [vmem:[#allocation6_spill] sm:$0xff] }
 0x206   : > { %v7383_v17 = vmul.f32 %v6807_v0, %v6231_v8  ;;  %v7384_v24 = vmul.f32 %v6808_v42, %v6232_v20  ;;  %v760_v35 = vsub.f32 %v13233_v48, %v10341_v15  ;;  %v7401_v62 = vmul.f32 %v6825_v33, %v6249_v5  ;;  %v13235_v8 = vld [vmem:[#allocation5_spill] sm:$0xff]  ;;  %v13240_v48 = vld [vmem:[#allocation55_spill] sm:$0xff] }
 0x207   : > { %7977 = vmatpush.bf16.msrb.mxu2 %v7600_v41  ;;  %v7402_v40 = vmul.f32 %v6826_v21, %v6250_v10  ;;  %v777_v13 = vsub.f32 %v13234_v63, %v10339_v28  ;;  %v778_v54 = vsub.f32 %v13234_v63, %v10341_v15  ;;  %v1335_v39 = vand.u32 2147483647, %v759_v45 }
 0x208   : > { %v1336_v11 = vand.u32 2147483647, %v760_v35  ;;  %v10354_v43 = vperm.slane %v3228_v3, 1  ;;  %v3533_v27 = vsub.f32 %v13235_v8, %v10343_v7  ;;  %v7779_v20 = vpack.c.bf16 %v7401_v62, %v7383_v17 }
 0x209   : > { %v7780_v30 = vpack.c.bf16 %v7402_v40, %v7384_v24  ;;  %v1353_v22 = vand.u32 2147483647, %v777_v13  ;;  %v1354_v23 = vand.u32 2147483647, %v778_v54  ;;  %v1911_v5 = vsub.f32 1.0, %v1335_v39 }
 0x20a   : > { %v1912_v59 = vsub.f32 1.0, %v1336_v11  ;;  %v3534_v10 = vsub.f32 %v13235_v8, %v10354_v43  ;;  %v3551_v44 = vsub.f32 %v13236_v56, %v10343_v7  ;;  %7978 = vmatmul.bf16.vlgmr.msrb.gmra.mxu2 %v10319_v32  ;;  %7962 = vmatpush.bf16.msrb.mxu1 %v7779_v20  ;;  %v3552_v0 = vsub.f32 %v13236_v56, %v10354_v43  ;;  %v13237_v32 = vld [vmem:[#allocation50_spill] sm:$0xff] }
 0x20b   : > { %7988 = vmatpush.bf16.msrb.mxu3 %v7780_v30  ;;  %v1929_v25 = vsub.f32 1.0, %v1353_v22  ;;  %v1930_v3 = vsub.f32 1.0, %v1354_v23  ;;  %v4109_v42 = vand.u32 2147483647, %v3533_v27  ;;  %v2487_v33 = vmax.f32 %v1911_v5, 0.0 }
 0x20c   : > { %v2488_v41 = vmax.f32 %v1912_v59, 0.0  ;;  %v4110_v21 = vand.u32 2147483647, %v3534_v10  ;;  %v4127_v17 = vand.u32 2147483647, %v3551_v44  ;;  %v829_v39 = vsub.f32 %v13237_v32, %v9958_v57 }
 0x20d   : > { %v2505_v24 = vmax.f32 %v1929_v25, 0.0  ;;  %v2506_v45 = vmax.f32 %v1930_v3, 0.0  ;;  %v4128_v35 = vand.u32 2147483647, %v3552_v0  ;;  %v4685_v62 = vsub.f32 1.0, %v4109_v42  ;;  %v13238_v3 = vld [vmem:[#allocation46_spill] sm:$0xff] }
 0x20e   : > { %v2935_v40 = vpack.c.bf16 %v2488_v41, %v2487_v33  ;;  %v4686_v13 = vsub.f32 1.0, %v4110_v21  ;;  %v4703_v54 = vsub.f32 1.0, %v4127_v17  ;;  %v830_v27 = vsub.f32 %v13237_v32, %v9962_v50 }
 0x20f   : > { %v2944_v11 = vpack.c.bf16 %v2506_v45, %v2505_v24  ;;  %v4704_v20 = vsub.f32 1.0, %v4128_v35  ;;  %v5261_v30 = vmax.f32 %v4685_v62, 0.0  ;;  %v847_v0 = vsub.f32 %v13238_v3, %v9958_v57  ;;  %v13239_v45 = vld [vmem:[#allocation16_spill] sm:$0xff] }
 0x210   : > { %v5262_v22 = vmax.f32 %v4686_v13, 0.0  ;;  %v5279_v23 = vmax.f32 %v4703_v54, 0.0  ;;  %v6125_v5 = vunpack.c.l.bf16 %v2935_v40  ;;  %v6126_v59 = vunpack.c.h.bf16 %v2935_v40 }
 0x211   : > { %v5280_v10 = vmax.f32 %v4704_v20, 0.0  ;;  %v6143_v44 = vunpack.c.l.bf16 %v2944_v11  ;;  %v6144_v25 = vunpack.c.h.bf16 %v2944_v11  ;;  %v848_v33 = vsub.f32 %v13238_v3, %v9962_v50 }
 0x212   : > { %v5709_v42 = vpack.c.bf16 %v5262_v22, %v5261_v30  ;;  %v1405_v41 = vand.u32 2147483647, %v829_v39  ;;  %v1406_v21 = vand.u32 2147483647, %v830_v27  ;;  %v1423_v24 = vand.u32 2147483647, %v847_v0 }
 0x213   : > { %v5718_v17 = vpack.c.bf16 %v5280_v10, %v5279_v23  ;;  %v3603_v35 = vsub.f32 %v13239_v45, %v10014_v34  ;;  %v3604_v62 = vsub.f32 %v13239_v45, %v10026_v61  ;;  %v1424_v54 = vand.u32 2147483647, %v848_v33 }
 0x214   : > { %v6701_v40 = vunpack.c.l.bf16 %v5709_v42  ;;  %v6702_v13 = vunpack.c.h.bf16 %v5709_v42  ;;  %v1981_v11 = vsub.f32 1.0, %v1405_v41  ;;  %v1982_v30 = vsub.f32 1.0, %v1406_v21 }
 0x215   : > { %v6719_v20 = vunpack.c.l.bf16 %v5718_v17  ;;  %v6720_v32 = vunpack.c.h.bf16 %v5718_v17  ;;  %v1999_v22 = vsub.f32 1.0, %v1423_v24  ;;  %v2000_v39 = vsub.f32 1.0, %v1424_v54  ;;  %v13241_v54 = vld [vmem:[#allocation7_spill] sm:$0xff] }
 0x216   : > { %v7277_v56 = vmul.f32 %v6701_v40, %v6125_v5  ;;  %v7278_v3 = vmul.f32 %v6702_v13, %v6126_v59  ;;  %v2557_v27 = vmax.f32 %v1981_v11, 0.0  ;;  %v2558_v0 = vmax.f32 %v1982_v30, 0.0 }
 0x217   : > { %v7295_v23 = vmul.f32 %v6719_v20, %v6143_v44  ;;  %v7296_v10 = vmul.f32 %v6720_v32, %v6144_v25  ;;  %v2575_v8 = vmax.f32 %v1999_v22, 0.0  ;;  %v2576_v63 = vmax.f32 %v2000_v39, 0.0 }
 0x218   : > { %v3621_v45 = vsub.f32 %v13240_v48, %v10014_v34  ;;  %v3622_v42 = vsub.f32 %v13240_v48, %v10026_v61  ;;  %v4179_v33 = vand.u32 2147483647, %v3603_v35  ;;  %v2970_v21 = vpack.c.bf16 %v2558_v0, %v2557_v27 }
 0x219   : > { %v7727_v41 = vpack.c.bf16 %v7295_v23, %v7277_v56  ;;  %v7728_v17 = vpack.c.bf16 %v7296_v10, %v7278_v3  ;;  %v4180_v24 = vand.u32 2147483647, %v3604_v62  ;;  %v2979_v5 = vpack.c.bf16 %v2576_v63, %v2575_v8  ;;  %v13242_v8 = vld [vmem:[#allocation17_spill] sm:$0xff] }
 0x21a   : > { %v4197_v59 = vand.u32 2147483647, %v3621_v45  ;;  %v4198_v40 = vand.u32 2147483647, %v3622_v42  ;;  %v4755_v13 = vsub.f32 1.0, %v4179_v33  ;;  %v6195_v44 = vunpack.c.l.bf16 %v2970_v21 }
 0x21b   : > { %7996 = vmatpush.bf16.msra.mxu0 %v7727_v41  ;;  %8022 = vmatpush.bf16.msra.mxu2 %v7728_v17  ;;  %v4756_v32 = vsub.f32 1.0, %v4180_v24  ;;  %v6196_v25 = vunpack.c.h.bf16 %v2970_v21  ;;  %v723_v11 = vsub.f32 %v13241_v54, %v10339_v28  ;;  %v6213_v35 = vunpack.c.l.bf16 %v2979_v5 }
 0x21c   : > { %v4773_v20 = vsub.f32 1.0, %v4197_v59  ;;  %v4774_v30 = vsub.f32 1.0, %v4198_v40  ;;  %v5331_v22 = vmax.f32 %v4755_v13, 0.0  ;;  %v6214_v3 = vunpack.c.h.bf16 %v2979_v5 }
 0x21d   : > { %v5332_v56 = vmax.f32 %v4756_v32, 0.0  ;;  %v724_v63 = vsub.f32 %v13241_v54, %v10341_v15  ;;  %v741_v45 = vsub.f32 %v13242_v8, %v10339_v28  ;;  %v742_v27 = vsub.f32 %v13242_v8, %v10341_v15 }
 0x21e   : > { %v5349_v62 = vmax.f32 %v4773_v20, 0.0  ;;  %v5350_v39 = vmax.f32 %v4774_v30, 0.0  ;;  %v1299_v23 = vand.u32 2147483647, %v723_v11  ;;  %v3497_v33 = vsub.f32 %v9537_v14, %v10343_v7 }
 0x21f   : > { %v5744_v10 = vpack.c.bf16 %v5332_v56, %v5331_v22  ;;  %v1300_v0 = vand.u32 2147483647, %v724_v63  ;;  %v1317_v42 = vand.u32 2147483647, %v741_v45  ;;  %v1318_v17 = vand.u32 2147483647, %v742_v27 }
 0x220   : > { %v5753_v41 = vpack.c.bf16 %v5350_v39, %v5349_v62  ;;  %v1875_v21 = vsub.f32 1.0, %v1299_v23  ;;  %v3498_v24 = vsub.f32 %v9537_v14, %v10354_v43  ;;  %v3515_v39 = vsub.f32 %v9454_v36, %v10343_v7 }
 0x221   : > { %v6771_v5 = vunpack.c.l.bf16 %v5744_v10  ;;  %v6772_v59 = vunpack.c.h.bf16 %v5744_v10  ;;  %v1876_v40 = vsub.f32 1.0, %v1300_v0  ;;  %v1893_v13 = vsub.f32 1.0, %v1317_v42 }
 0x222   : > { %v6789_v32 = vunpack.c.l.bf16 %v5753_v41  ;;  %v6790_v20 = vunpack.c.h.bf16 %v5753_v41  ;;  %v1894_v30 = vsub.f32 1.0, %v1318_v17  ;;  %v2451_v11 = vmax.f32 %v1875_v21, 0.0 }
 0x223   : > { %v7347_v22 = vmul.f32 %v6771_v5, %v6195_v44  ;;  %v7348_v56 = vmul.f32 %v6772_v59, %v6196_v25  ;;  %v2452_v63 = vmax.f32 %v1876_v40, 0.0  ;;  %v2469_v45 = vmax.f32 %v1893_v13, 0.0 }
 0x224   : > { %v7365_v8 = vmul.f32 %v6789_v32, %v6213_v35  ;;  %v7366_v54 = vmul.f32 %v6790_v20, %v6214_v3  ;;  %v2470_v62 = vmax.f32 %v1894_v30, 0.0  ;;  %v3516_v23 = vsub.f32 %v9454_v36, %v10354_v43 }
 0x225   : > { %v2917_v27 = vpack.c.bf16 %v2452_v63, %v2451_v11  ;;  %v4073_v10 = vand.u32 2147483647, %v3497_v33  ;;  %v4074_v0 = vand.u32 2147483647, %v3498_v24  ;;  %v4091_v21 = vand.u32 2147483647, %v3515_v39 }
 0x226   : > { %v7761_v42 = vpack.c.bf16 %v7365_v8, %v7347_v22  ;;  %v7762_v41 = vpack.c.bf16 %v7366_v54, %v7348_v56  ;;  %v2926_v17 = vpack.c.bf16 %v2470_v62, %v2469_v45  ;;  %v4092_v44 = vand.u32 2147483647, %v3516_v23 }
 0x227   : > { %v4649_v25 = vsub.f32 1.0, %v4073_v10  ;;  %v4650_v5 = vsub.f32 1.0, %v4074_v0  ;;  %v6089_v59 = vunpack.c.l.bf16 %v2917_v27  ;;  %v4667_v35 = vsub.f32 1.0, %v4091_v21 }
 0x228   : > { %7963 = vmatpush.bf16.msrb.mxu1 %v7761_v42  ;;  %7989 = vmatpush.bf16.msrb.mxu3 %v7762_v41  ;;  %v6107_v3 = vunpack.c.l.bf16 %v2926_v17  ;;  %v6090_v40 = vunpack.c.h.bf16 %v2917_v27  ;;  %v6108_v13 = vunpack.c.h.bf16 %v2926_v17  ;;  %v4668_v32 = vsub.f32 1.0, %v4092_v44 }
 0x229   : > { %v5225_v20 = vmax.f32 %v4649_v25, 0.0  ;;  %v5226_v30 = vmax.f32 %v4650_v5, 0.0  ;;  %v793_v33 = vsub.f32 %v9937_v9, %v9958_v57  ;;  %v5243_v8 = vmax.f32 %v4667_v35, 0.0 }
 0x22a   : > { %v794_v54 = vsub.f32 %v9937_v9, %v9962_v50  ;;  %v811_v24 = vsub.f32 %v10064_v46, %v9958_v57  ;;  %v812_v11 = vsub.f32 %v10064_v46, %v9962_v50  ;;  %v5244_v22 = vmax.f32 %v4668_v32, 0.0 }
 0x22b   : > { %v5691_v56 = vpack.c.bf16 %v5226_v30, %v5225_v20  ;;  %v1369_v63 = vand.u32 2147483647, %v793_v33  ;;  %v3567_v45 = vsub.f32 %v10068_v6, %v10014_v34  ;;  %v3568_v23 = vsub.f32 %v10068_v6, %v10026_v61 }
 0x22c   : > { %v1370_v62 = vand.u32 2147483647, %v794_v54  ;;  %v1387_v39 = vand.u32 2147483647, %v811_v24  ;;  %v1388_v27 = vand.u32 2147483647, %v812_v11  ;;  %v5700_v10 = vpack.c.bf16 %v5244_v22, %v5243_v8 }
 0x22d   : > { %v6665_v0 = vunpack.c.l.bf16 %v5691_v56  ;;  %v6666_v42 = vunpack.c.h.bf16 %v5691_v56  ;;  %v1945_v41 = vsub.f32 1.0, %v1369_v63  ;;  %v3585_v50 = vsub.f32 %v10074_v38, %v10014_v34 }
 0x22e   : > { %v1946_v57 = vsub.f32 1.0, %v1370_v62  ;;  %v1963_v17 = vsub.f32 1.0, %v1387_v39  ;;  %v1964_v21 = vsub.f32 1.0, %v1388_v27  ;;  %v6683_v44 = vunpack.c.l.bf16 %v5700_v10 }
 0x22f   : > { %v7241_v25 = vmul.f32 %v6665_v0, %v6089_v59  ;;  %v6684_v5 = vunpack.c.h.bf16 %v5700_v10  ;;  %v7242_v35 = vmul.f32 %v6666_v42, %v6090_v40  ;;  %v2521_v32 = vmax.f32 %v1945_v41, 0.0 }
 0x230   : > { %v2522_v20 = vmax.f32 %v1946_v57, 0.0  ;;  %v2539_v30 = vmax.f32 %v1963_v17, 0.0  ;;  %v2540_v33 = vmax.f32 %v1964_v21, 0.0  ;;  %v7259_v54 = vmul.f32 %v6683_v44, %v6107_v3 }
 0x231   : > { %v7260_v24 = vmul.f32 %v6684_v5, %v6108_v13  ;;  %v3586_v8 = vsub.f32 %v10074_v38, %v10026_v61  ;;  %v4143_v11 = vand.u32 2147483647, %v3567_v45  ;;  %v4144_v63 = vand.u32 2147483647, %v3568_v23 }
 0x232   : > { %v2952_v22 = vpack.c.bf16 %v2522_v20, %v2521_v32  ;;  %v2961_v56 = vpack.c.bf16 %v2540_v33, %v2539_v30  ;;  %v4161_v62 = vand.u32 2147483647, %v3585_v50  ;;  %v7709_v39 = vpack.c.bf16 %v7259_v54, %v7241_v25 }
 0x233   : > { %v7710_v34 = vpack.c.bf16 %v7260_v24, %v7242_v35  ;;  %v4162_v27 = vand.u32 2147483647, %v3586_v8  ;;  %v4719_v59 = vsub.f32 1.0, %v4143_v11  ;;  %v4720_v10 = vsub.f32 1.0, %v4144_v63 }
 0x234   : > { %v4737_v40 = vsub.f32 1.0, %v4161_v62  ;;  %v6159_v0 = vunpack.c.l.bf16 %v2952_v22  ;;  %v6177_v42 = vunpack.c.l.bf16 %v2961_v56  ;;  %7997 = vmatpush.bf16.msra.mxu0 %v7709_v39  ;;  %v6160_v41 = vunpack.c.h.bf16 %v2952_v22 }
 0x235   : > { %8023 = vmatpush.bf16.msra.mxu2 %v7710_v34  ;;  %v4738_v3 = vsub.f32 1.0, %v4162_v27  ;;  %v5295_v13 = vmax.f32 %v4719_v59, 0.0  ;;  %v6178_v57 = vunpack.c.h.bf16 %v2961_v56  ;;  %v5296_v61 = vmax.f32 %v4720_v10, 0.0 }
 0x236   : > { %v5313_v45 = vmax.f32 %v4737_v40, 0.0  ;;  %v687_v23 = vsub.f32 %v9623_v1, %v10339_v28  ;;  %v688_v17 = vsub.f32 %v9623_v1, %v10341_v15  ;;  %v705_v50 = vsub.f32 %v9607_v52, %v10339_v28 }
 0x237   : > { %v5314_v21 = vmax.f32 %v4738_v3, 0.0  ;;  %v706_v44 = vsub.f32 %v9607_v52, %v10341_v15  ;;  %v3461_v25 = vsub.f32 %v9649_v26, %v10343_v7  ;;  %v5726_v5 = vpack.c.bf16 %v5296_v61, %v5295_v13 }
 0x238   : > { %v1263_v35 = vand.u32 2147483647, %v687_v23  ;;  %v1264_v32 = vand.u32 2147483647, %v688_v17  ;;  %v3462_v20 = vsub.f32 %v9649_v26, %v10354_v43  ;;  %v1281_v33 = vand.u32 2147483647, %v705_v50 }
 0x239   : > { %v5735_v30 = vpack.c.bf16 %v5314_v21, %v5313_v45  ;;  %v1282_v54 = vand.u32 2147483647, %v706_v44  ;;  %v3479_v24 = vsub.f32 %v9540_v51, %v10343_v7  ;;  %v6735_v8 = vunpack.c.l.bf16 %v5726_v5 }
 0x23a   : > { %v6736_v11 = vunpack.c.h.bf16 %v5726_v5  ;;  %v1839_v22 = vsub.f32 1.0, %v1263_v35  ;;  %v1840_v56 = vsub.f32 1.0, %v1264_v32  ;;  %v1857_v39 = vsub.f32 1.0, %v1281_v33 }
 0x23b   : > { %v6753_v63 = vunpack.c.l.bf16 %v5735_v30  ;;  %v6754_v62 = vunpack.c.h.bf16 %v5735_v30  ;;  %v1858_v34 = vsub.f32 1.0, %v1282_v54  ;;  %v7311_v27 = vmul.f32 %v6735_v8, %v6159_v0 }
 0x23c   : > { %v7312_v59 = vmul.f32 %v6736_v11, %v6160_v41  ;;  %v2415_v10 = vmax.f32 %v1839_v22, 0.0  ;;  %v2416_v40 = vmax.f32 %v1840_v56, 0.0  ;;  %v2433_v61 = vmax.f32 %v1857_v39, 0.0 }
 0x23d   : > { %v7329_v3 = vmul.f32 %v6753_v63, %v6177_v42  ;;  %v7330_v13 = vmul.f32 %v6754_v62, %v6178_v57  ;;  %v2434_v45 = vmax.f32 %v1858_v34, 0.0  ;;  %v3480_v17 = vsub.f32 %v9540_v51, %v10354_v43 }
 0x23e   : > { %v10427_v23 = vpack.c.bf16 %v2416_v40, %v2415_v10  ;;  %v4037_v21 = vand.u32 2147483647, %v3461_v25  ;;  %v4038_v50 = vand.u32 2147483647, %v3462_v20  ;;  %v4055_v32 = vand.u32 2147483647, %v3479_v24 }
 0x23f   : > { %v7743_v44 = vpack.c.bf16 %v7329_v3, %v7311_v27  ;;  %v7744_v5 = vpack.c.bf16 %v7330_v13, %v7312_v59  ;;  %v10431_v35 = vpack.c.bf16 %v2434_v45, %v2433_v61  ;;  %v4056_v0 = vand.u32 2147483647, %v3480_v17 }
 0x240   : > { %v4613_v41 = vsub.f32 1.0, %v4037_v21  ;;  %v4614_v30 = vsub.f32 1.0, %v4038_v50  ;;  %v6053_v42 = vunpack.c.l.bf16 %v10427_v23  ;;  %v4631_v57 = vsub.f32 1.0, %v4055_v32 }
 0x241   : > { %7964 = vmatpush.bf16.msrb.mxu1 %v7743_v44  ;;  %7990 = vmatpush.bf16.msrb.mxu3 %v7744_v5  ;;  %v6071_v33 = vunpack.c.l.bf16 %v10431_v35  ;;  %v1047_v54 = vsub.f32 %v9416_v49, %v10339_v28  ;;  %v1048_v25 = vsub.f32 %v9416_v49, %v10341_v15  ;;  %v4632_v20 = vsub.f32 1.0, %v4056_v0 }
 0x242   : > { %v5189_v8 = vmax.f32 %v4613_v41, 0.0  ;;  %v5190_v11 = vmax.f32 %v4614_v30, 0.0  ;;  %v1065_v24 = vsub.f32 %v9448_v19, %v10339_v28  ;;  %v5207_v22 = vmax.f32 %v4631_v57, 0.0 }
 0x243   : > { %v1066_v56 = vsub.f32 %v9448_v19, %v10341_v15  ;;  %v1623_v63 = vand.u32 2147483647, %v1047_v54  ;;  %v1624_v62 = vand.u32 2147483647, %v1048_v25  ;;  %v5208_v39 = vmax.f32 %v4632_v20, 0.0 }
 0x244   : > { %v5673_v34 = vpack.c.bf16 %v5190_v11, %v5189_v8  ;;  %v1641_v27 = vand.u32 2147483647, %v1065_v24  ;;  %v3821_v59 = vsub.f32 %v9412_v47, %v10343_v7  ;;  %7991 = vmatmul.bf16.vlgmr.msrb.gmra.mxu3 %v10324_v37  ;;  %7965 = vmatmul.bf16.vlgmr.msrb.gmra.mxu1 %v10324_v37  ;;  %v3822_v13 = vsub.f32 %v9412_v47, %v10354_v43 }
 0x245   : > { %v1642_v10 = vand.u32 2147483647, %v1066_v56  ;;  %v2199_v40 = vsub.f32 1.0, %v1623_v63  ;;  %v2200_v3 = vsub.f32 1.0, %v1624_v62  ;;  %v5682_v61 = vpack.c.bf16 %v5208_v39, %v5207_v22 }
 0x246   : > { %v6629_v45 = vunpack.c.l.bf16 %v5673_v34  ;;  %v2217_v17 = vsub.f32 1.0, %v1641_v27  ;;  %v3839_v21 = vsub.f32 %v9483_v12, %v10343_v7  ;;  %v3840_v32 = vsub.f32 %v9483_v12, %v10354_v43 }
 0x247   : > { %v2218_v50 = vsub.f32 1.0, %v1642_v10  ;;  %v2775_v44 = vmax.f32 %v2199_v40, 0.0  ;;  %v2776_v5 = vmax.f32 %v2200_v3, 0.0  ;;  %v6647_v0 = vunpack.c.l.bf16 %v5682_v61 }
 0x248   : > { %v7205_v37 = vmul.f32 %v6629_v45, %v6053_v42  ;;  %v2793_v41 = vmax.f32 %v2217_v17, 0.0  ;;  %v4397_v30 = vand.u32 2147483647, %v3821_v59  ;;  %v4398_v25 = vand.u32 2147483647, %v3822_v13 }
 0x249   : > { %v2794_v57 = vmax.f32 %v2218_v50, 0.0  ;;  %v3079_v54 = vpack.c.bf16 %v2776_v5, %v2775_v44  ;;  %v4415_v20 = vand.u32 2147483647, %v3839_v21  ;;  %v7223_v8 = vmul.f32 %v6647_v0, %v6071_v33 }
 0x24a   : > { %v4416_v11 = vand.u32 2147483647, %v3840_v32  ;;  %v4973_v24 = vsub.f32 1.0, %v4397_v30  ;;  %v6054_v22 = vunpack.c.h.bf16 %v10427_v23  ;;  %v4974_v63 = vsub.f32 1.0, %v4398_v25 }
 0x24b   : > { %v3088_v56 = vpack.c.bf16 %v2794_v57, %v2793_v41  ;;  %v4991_v62 = vsub.f32 1.0, %v4415_v20  ;;  %v6413_v39 = vunpack.c.l.bf16 %v3079_v54  ;;  %v7691_v27 = vpack.c.bf16 %v7223_v8, %v7205_v37 }
 0x24c   : > { %v4992_v10 = vsub.f32 1.0, %v4416_v11  ;;  %v5549_v40 = vmax.f32 %v4973_v24, 0.0  ;;  %v6072_v42 = vunpack.c.h.bf16 %v10431_v35  ;;  %v5550_v3 = vmax.f32 %v4974_v63, 0.0 }
 0x24d   : > { %v5567_v59 = vmax.f32 %v4991_v62, 0.0  ;;  %v6431_v45 = vunpack.c.l.bf16 %v3088_v56  ;;  %v6630_v17 = vunpack.c.h.bf16 %v5673_v34  ;;  %7998 = vmatpush.bf16.msra.mxu0 %v7691_v27  ;;  %v6648_v33 = vunpack.c.h.bf16 %v5682_v61 }
 0x24e   : > { %v5568_v13 = vmax.f32 %v4992_v10, 0.0  ;;  %v6414_v21 = vunpack.c.h.bf16 %v3079_v54  ;;  %v6432_v50 = vunpack.c.h.bf16 %v3088_v56  ;;  %v5853_v44 = vpack.c.bf16 %v5550_v3, %v5549_v40 }
 0x24f   : > { %v7206_v23 = vmul.f32 %v6630_v17, %v6054_v22  ;;  %v651_v5 = vsub.f32 %v9577_v60, %v10339_v28  ;;  %v652_v32 = vsub.f32 %v9577_v60, %v10341_v15  ;;  %v7224_v37 = vmul.f32 %v6648_v33, %v6072_v42 }
 0x250   : > { %v5862_v0 = vpack.c.bf16 %v5568_v13, %v5567_v59  ;;  %v669_v35 = vsub.f32 %v9704_v18, %v10339_v28  ;;  %v670_v34 = vsub.f32 %v9704_v18, %v10341_v15  ;;  %v6989_v41 = vunpack.c.l.bf16 %v5853_v44 }
 0x251   : > { %v6990_v61 = vunpack.c.h.bf16 %v5853_v44  ;;  %v1227_v30 = vand.u32 2147483647, %v651_v5  ;;  %v1228_v57 = vand.u32 2147483647, %v652_v32  ;;  %v7692_v25 = vpack.c.bf16 %v7224_v37, %v7206_v23 }
 0x252   : > { %v7007_v54 = vunpack.c.l.bf16 %v5862_v0  ;;  %v7008_v20 = vunpack.c.h.bf16 %v5862_v0  ;;  %v1245_v8 = vand.u32 2147483647, %v669_v35  ;;  %v7565_v11 = vmul.f32 %v6989_v41, %v6413_v39 }
 0x253   : > { %v7566_v24 = vmul.f32 %v6990_v61, %v6414_v21  ;;  %v1246_v22 = vand.u32 2147483647, %v670_v34  ;;  %v1803_v56 = vsub.f32 1.0, %v1227_v30  ;;  %8024 = vmatpush.bf16.msra.mxu2 %v7692_v25  ;;  %v1804_v27 = vsub.f32 1.0, %v1228_v57  ;;  %v13243_v57 = vld [vmem:[#allocation25_spill] sm:$0xff] }
 0x254   : > { %v7583_v63 = vmul.f32 %v7007_v54, %v6431_v45  ;;  %v7584_v62 = vmul.f32 %v7008_v20, %v6432_v50  ;;  %v1821_v10 = vsub.f32 1.0, %v1245_v8  ;;  %v3425_v3 = vsub.f32 %v9729_v55, %v10343_v7 }
 0x255   : > { %v1822_v40 = vsub.f32 1.0, %v1246_v22  ;;  %v2379_v42 = vmax.f32 %v1803_v56, 0.0  ;;  %v3426_v59 = vsub.f32 %v9729_v55, %v10354_v43  ;;  %v2380_v33 = vmax.f32 %v1804_v27, 0.0 }
 0x256   : > { %v7871_v17 = vpack.c.bf16 %v7583_v63, %v7565_v11  ;;  %v7872_v13 = vpack.c.bf16 %v7584_v62, %v7566_v24  ;;  %v2397_v39 = vmax.f32 %v1821_v10, 0.0  ;;  %v3443_v45 = vsub.f32 %v13202_v2, %v10343_v7  ;;  %v13244_v62 = vld [vmem:[#allocation23_spill] sm:$0xff] }
 0x257   : > { %v2398_v21 = vmax.f32 %v1822_v40, 0.0  ;;  %v3444_v50 = vsub.f32 %v13202_v2, %v10354_v43  ;;  %v4001_v44 = vand.u32 2147483647, %v3425_v3  ;;  %v10471_v23 = vpack.c.bf16 %v2380_v33, %v2379_v42 }
 0x258   : > { %8009 = vmatpush.bf16.msra.mxu1 %v7871_v17  ;;  %8035 = vmatpush.bf16.msra.mxu3 %v7872_v13  ;;  %v4002_v5 = vand.u32 2147483647, %v3426_v59  ;;  %v1011_v32 = vsub.f32 %v13203_v16, %v10339_v28  ;;  %v1012_v0 = vsub.f32 %v13203_v16, %v10341_v15  ;;  %v4019_v35 = vand.u32 2147483647, %v3443_v45 }
 0x259   : > { %v10477_v37 = vpack.c.bf16 %v2398_v21, %v2397_v39  ;;  %v4020_v34 = vand.u32 2147483647, %v3444_v50  ;;  %v4577_v41 = vsub.f32 1.0, %v4001_v44  ;;  %v6017_v30 = vunpack.c.l.bf16 %v10471_v23  ;;  %v13245_v50 = vld [vmem:[#allocation15_spill] sm:$0xff] }
 0x25a   : > { %v4578_v61 = vsub.f32 1.0, %v4002_v5  ;;  %v1029_v54 = vsub.f32 %v13243_v57, %v10339_v28  ;;  %v1030_v25 = vsub.f32 %v13243_v57, %v10341_v15  ;;  %v4595_v20 = vsub.f32 1.0, %v4019_v35 }
 0x25b   : > { %v4596_v8 = vsub.f32 1.0, %v4020_v34  ;;  %v5153_v11 = vmax.f32 %v4577_v41, 0.0  ;;  %v6035_v24 = vunpack.c.l.bf16 %v10477_v37  ;;  %v1587_v56 = vand.u32 2147483647, %v1011_v32 }
 0x25c   : > { %v5154_v22 = vmax.f32 %v4578_v61, 0.0  ;;  %v1588_v63 = vand.u32 2147483647, %v1012_v0  ;;  %v3785_v27 = vsub.f32 %v13244_v62, %v10343_v7  ;;  %v5171_v10 = vmax.f32 %v4595_v20, 0.0 }
 0x25d   : > { %v5172_v40 = vmax.f32 %v4596_v8, 0.0  ;;  %v1605_v42 = vand.u32 2147483647, %v1029_v54  ;;  %v1606_v3 = vand.u32 2147483647, %v1030_v25  ;;  %v2163_v17 = vsub.f32 1.0, %v1587_v56 }
 0x25e   : > { %v5655_v59 = vpack.c.bf16 %v5154_v22, %v5153_v11  ;;  %v2164_v13 = vsub.f32 1.0, %v1588_v63  ;;  %v3786_v33 = vsub.f32 %v13244_v62, %v10354_v43  ;;  %v3803_v44 = vsub.f32 %v13245_v50, %v10343_v7 }
 0x25f   : > { %v5664_v39 = vpack.c.bf16 %v5172_v40, %v5171_v10  ;;  %v2181_v21 = vsub.f32 1.0, %v1605_v42  ;;  %v2182_v45 = vsub.f32 1.0, %v1606_v3  ;;  %v2739_v32 = vmax.f32 %v2163_v17, 0.0 }
 0x260   : > { %v6593_v5 = vunpack.c.l.bf16 %v5655_v59  ;;  %v2740_v0 = vmax.f32 %v2164_v13, 0.0  ;;  %v3804_v35 = vsub.f32 %v13245_v50, %v10354_v43  ;;  %v4361_v54 = vand.u32 2147483647, %v3785_v27 }
 0x261   : > { %v6611_v34 = vunpack.c.l.bf16 %v5664_v39  ;;  %v2757_v41 = vmax.f32 %v2181_v21, 0.0  ;;  %v2758_v61 = vmax.f32 %v2182_v45, 0.0  ;;  %v4362_v8 = vand.u32 2147483647, %v3786_v33 }
 0x262   : > { %v7169_v25 = vmul.f32 %v6593_v5, %v6017_v30  ;;  %v3061_v20 = vpack.c.bf16 %v2740_v0, %v2739_v32  ;;  %v4379_v11 = vand.u32 2147483647, %v3803_v44  ;;  %v4380_v63 = vand.u32 2147483647, %v3804_v35 }
 0x263   : > { %v7187_v22 = vmul.f32 %v6611_v34, %v6035_v24  ;;  %v3070_v56 = vpack.c.bf16 %v2758_v61, %v2757_v41  ;;  %v4937_v10 = vsub.f32 1.0, %v4361_v54  ;;  %v4938_v40 = vsub.f32 1.0, %v4362_v8  ;;  %v13246_v61 = vld [vmem:[#allocation41_spill] sm:$0xff] }
 0x264   : > { %v4955_v42 = vsub.f32 1.0, %v4379_v11  ;;  %v6377_v3 = vunpack.c.l.bf16 %v3061_v20  ;;  %v6018_v17 = vunpack.c.h.bf16 %v10471_v23  ;;  %v4956_v62 = vsub.f32 1.0, %v4380_v63 }
 0x265   : > { %v7673_v13 = vpack.c.bf16 %v7187_v22, %v7169_v25  ;;  %v5513_v50 = vmax.f32 %v4937_v10, 0.0  ;;  %v6395_v57 = vunpack.c.l.bf16 %v3070_v56  ;;  %v5514_v21 = vmax.f32 %v4938_v40, 0.0 }
 0x266   : > { %v5531_v45 = vmax.f32 %v4955_v42, 0.0  ;;  %v6036_v30 = vunpack.c.h.bf16 %v10477_v37  ;;  %v6594_v27 = vunpack.c.h.bf16 %v5655_v59  ;;  %v5532_v33 = vmax.f32 %v4956_v62, 0.0 }
 0x267   : > { %7999 = vmatpush.bf16.msra.mxu0 %v7673_v13  ;;  %v6612_v24 = vunpack.c.h.bf16 %v5664_v39  ;;  %v6378_v44 = vunpack.c.h.bf16 %v3061_v20  ;;  %v6396_v5 = vunpack.c.h.bf16 %v3070_v56  ;;  %v5835_v32 = vpack.c.bf16 %v5514_v21, %v5513_v50 }
 0x268   : > { %v7170_v0 = vmul.f32 %v6594_v27, %v6018_v17  ;;  %v615_v35 = vsub.f32 %v13207_v4, %v10339_v28  ;;  %v616_v23 = vsub.f32 %v13207_v4, %v10341_v15  ;;  %v5844_v34 = vpack.c.bf16 %v5532_v33, %v5531_v45 }
 0x269   : > { %v7188_v41 = vmul.f32 %v6612_v24, %v6036_v30  ;;  %v633_v54 = vsub.f32 %v13246_v61, %v10339_v28  ;;  %v634_v37 = vsub.f32 %v13246_v61, %v10341_v15  ;;  %v6953_v62 = vunpack.c.l.bf16 %v5835_v32  ;;  %v13247_v30 = vld [vmem:[#allocation44_spill] sm:$0xff] }
 0x26a   : > { %v6954_v59 = vunpack.c.h.bf16 %v5835_v32  ;;  %v1191_v39 = vand.u32 2147483647, %v615_v35  ;;  %v1192_v25 = vand.u32 2147483647, %v616_v23  ;;  %v6971_v50 = vunpack.c.l.bf16 %v5844_v34  ;;  %v13248_v35 = vld [vmem:[#allocation37_spill] sm:$0xff] }
 0x26b   : > { %v7674_v20 = vpack.c.bf16 %v7188_v41, %v7170_v0  ;;  %v6972_v8 = vunpack.c.h.bf16 %v5844_v34  ;;  %v1209_v11 = vand.u32 2147483647, %v633_v54  ;;  %v7529_v22 = vmul.f32 %v6953_v62, %v6377_v3  ;;  %v13249_v54 = vld [vmem:[#allocation18_spill] sm:$0xff] }
 0x26c   : > { %v7530_v56 = vmul.f32 %v6954_v59, %v6378_v44  ;;  %v1210_v63 = vand.u32 2147483647, %v634_v37  ;;  %v1767_v10 = vsub.f32 1.0, %v1191_v39  ;;  %v7547_v40 = vmul.f32 %v6971_v50, %v6395_v57 }
 0x26d   : > { %8025 = vmatpush.bf16.msra.mxu2 %v7674_v20  ;;  %v7548_v42 = vmul.f32 %v6972_v8, %v6396_v5  ;;  %v1768_v17 = vsub.f32 1.0, %v1192_v25  ;;  %v1785_v13 = vsub.f32 1.0, %v1209_v11  ;;  %v3389_v27 = vsub.f32 %v13247_v30, %v10343_v7  ;;  %v13250_v11 = vld [vmem:[#allocation28_spill] sm:$0xff] }
 0x26e   : > { %v1786_v21 = vsub.f32 1.0, %v1210_v63  ;;  %v2343_v45 = vmax.f32 %v1767_v10, 0.0  ;;  %v3390_v33 = vsub.f32 %v13247_v30, %v10354_v43  ;;  %v7853_v24 = vpack.c.bf16 %v7547_v40, %v7529_v22 }
 0x26f   : > { %v7854_v32 = vpack.c.bf16 %v7548_v42, %v7530_v56  ;;  %v2344_v0 = vmax.f32 %v1768_v17, 0.0  ;;  %v2361_v3 = vmax.f32 %v1785_v13, 0.0  ;;  %v3407_v57 = vsub.f32 %v13248_v35, %v10343_v7 }
 0x270   : > { %v2362_v44 = vmax.f32 %v1786_v21, 0.0  ;;  %v3408_v5 = vsub.f32 %v13248_v35, %v10354_v43  ;;  %v3965_v23 = vand.u32 2147483647, %v3389_v27  ;;  %8010 = vmatpush.bf16.msra.mxu1 %v7853_v24  ;;  %v3966_v41 = vand.u32 2147483647, %v3390_v33 }
 0x271   : > { %8036 = vmatpush.bf16.msra.mxu3 %v7854_v32  ;;  %v10511_v34 = vpack.c.bf16 %v2344_v0, %v2343_v45  ;;  %v975_v37 = vsub.f32 %v13249_v54, %v10339_v28  ;;  %v976_v62 = vsub.f32 %v13249_v54, %v10341_v15  ;;  %v3983_v39 = vand.u32 2147483647, %v3407_v57  ;;  %v13251_v45 = vld [vmem:[#allocation11_spill] sm:$0xff] }
 0x272   : > { %v10517_v59 = vpack.c.bf16 %v2362_v44, %v2361_v3  ;;  %v3984_v25 = vand.u32 2147483647, %v3408_v5  ;;  %v4541_v50 = vsub.f32 1.0, %v3965_v23  ;;  %v4542_v20 = vsub.f32 1.0, %v3966_v41 }
 0x273   : > { %v5981_v8 = vunpack.c.l.bf16 %v10511_v34  ;;  %v993_v22 = vsub.f32 %v13250_v11, %v10339_v28  ;;  %v994_v56 = vsub.f32 %v13250_v11, %v10341_v15  ;;  %v4559_v63 = vsub.f32 1.0, %v3983_v39 }
 0x274   : > { %v4560_v10 = vsub.f32 1.0, %v3984_v25  ;;  %v5117_v40 = vmax.f32 %v4541_v50, 0.0  ;;  %v5999_v42 = vunpack.c.l.bf16 %v10517_v59  ;;  %v5118_v17 = vmax.f32 %v4542_v20, 0.0  ;;  %v13252_v25 = vld [vmem:[#allocation29_spill] sm:$0xff] }
 0x275   : > { %v1551_v13 = vand.u32 2147483647, %v975_v37  ;;  %v1552_v21 = vand.u32 2147483647, %v976_v62  ;;  %v3749_v27 = vsub.f32 %v13251_v45, %v10343_v7  ;;  %v5135_v33 = vmax.f32 %v4559_v63, 0.0 }
 0x276   : > { %v5136_v24 = vmax.f32 %v4560_v10, 0.0  ;;  %v1569_v32 = vand.u32 2147483647, %v993_v22  ;;  %v1570_v0 = vand.u32 2147483647, %v994_v56  ;;  %v5637_v3 = vpack.c.bf16 %v5118_v17, %v5117_v40 }
 0x277   : > { %v2127_v44 = vsub.f32 1.0, %v1551_v13  ;;  %v2128_v57 = vsub.f32 1.0, %v1552_v21  ;;  %v3750_v5 = vsub.f32 %v13251_v45, %v10354_v43  ;;  %v3767_v37 = vsub.f32 %v13252_v25, %v10343_v7 }
 0x278   : > { %v5646_v23 = vpack.c.bf16 %v5136_v24, %v5135_v33  ;;  %v2145_v41 = vsub.f32 1.0, %v1569_v32  ;;  %v2146_v39 = vsub.f32 1.0, %v1570_v0  ;;  %v6557_v62 = vunpack.c.l.bf16 %v5637_v3 }
 0x279   : > { %v2703_v50 = vmax.f32 %v2127_v44, 0.0  ;;  %v2704_v20 = vmax.f32 %v2128_v57, 0.0  ;;  %v3768_v63 = vsub.f32 %v13252_v25, %v10354_v43  ;;  %v4325_v40 = vand.u32 2147483647, %v3749_v27 }
 0x27a   : > { %v6575_v22 = vunpack.c.l.bf16 %v5646_v23  ;;  %v2721_v56 = vmax.f32 %v2145_v41, 0.0  ;;  %v2722_v10 = vmax.f32 %v2146_v39, 0.0  ;;  %v7133_v17 = vmul.f32 %v6557_v62, %v5981_v8 }
 0x27b   : > { %v3043_v13 = vpack.c.bf16 %v2704_v20, %v2703_v50  ;;  %v4326_v21 = vand.u32 2147483647, %v3750_v5  ;;  %v4343_v45 = vand.u32 2147483647, %v3767_v37  ;;  %v4344_v32 = vand.u32 2147483647, %v3768_v63 }
 0x27c   : > { %v7151_v33 = vmul.f32 %v6575_v22, %v5999_v42  ;;  %v3052_v24 = vpack.c.bf16 %v2722_v10, %v2721_v56  ;;  %v4901_v0 = vsub.f32 1.0, %v4325_v40  ;;  %v5982_v44 = vunpack.c.h.bf16 %v10511_v34 }
 0x27d   : > { %v4902_v11 = vsub.f32 1.0, %v4326_v21  ;;  %v4919_v54 = vsub.f32 1.0, %v4343_v45  ;;  %v6341_v35 = vunpack.c.l.bf16 %v3043_v13  ;;  %v4920_v30 = vsub.f32 1.0, %v4344_v32  ;;  %v13253_v45 = vld [vmem:[#allocation40_spill] sm:$0xff] }
 0x27e   : > { %v7655_v57 = vpack.c.bf16 %v7151_v33, %v7133_v17  ;;  %v5477_v25 = vmax.f32 %v4901_v0, 0.0  ;;  %v6359_v61 = vunpack.c.l.bf16 %v3052_v24  ;;  %v6000_v8 = vunpack.c.h.bf16 %v10517_v59 }
 0x27f   : > { %v5478_v41 = vmax.f32 %v4902_v11, 0.0  ;;  %v5495_v39 = vmax.f32 %v4919_v54, 0.0  ;;  %v6558_v27 = vunpack.c.h.bf16 %v5637_v3  ;;  %v5496_v5 = vmax.f32 %v4920_v30, 0.0  ;;  %v13254_v54 = vld [vmem:[#allocation49_spill] sm:$0xff] }
 0x280   : > { %8000 = vmatpush.bf16.msra.mxu0 %v7655_v57  ;;  %v6576_v42 = vunpack.c.h.bf16 %v5646_v23  ;;  %v6342_v37 = vunpack.c.h.bf16 %v3043_v13  ;;  %v6360_v62 = vunpack.c.h.bf16 %v3052_v24  ;;  %v579_v63 = vsub.f32 %v13253_v45, %v10339_v28 }
 0x281   : > { %v5817_v50 = vpack.c.bf16 %v5478_v41, %v5477_v25  ;;  %v7134_v20 = vmul.f32 %v6558_v27, %v5982_v44  ;;  %v580_v34 = vsub.f32 %v13253_v45, %v10341_v15  ;;  %v5826_v22 = vpack.c.bf16 %v5496_v5, %v5495_v39  ;;  %v13255_v27 = vld [vmem:[#allocation51_spill] sm:$0xff] }
 0x282   : > { %v7152_v56 = vmul.f32 %v6576_v42, %v6000_v8  ;;  %v597_v11 = vsub.f32 %v13254_v54, %v10339_v28  ;;  %v598_v59 = vsub.f32 %v13254_v54, %v10341_v15  ;;  %v1155_v23 = vand.u32 2147483647, %v579_v63 }
 0x283   : > { %v6917_v30 = vunpack.c.l.bf16 %v5817_v50  ;;  %v6918_v3 = vunpack.c.h.bf16 %v5817_v50  ;;  %v1156_v10 = vand.u32 2147483647, %v580_v34  ;;  %v6935_v25 = vunpack.c.l.bf16 %v5826_v22  ;;  %v13256_v34 = vld [vmem:[#allocation45_spill] sm:$0xff] }
 0x284   : > { %v7656_v40 = vpack.c.bf16 %v7152_v56, %v7134_v20  ;;  %v6936_v17 = vunpack.c.h.bf16 %v5826_v22  ;;  %v1173_v13 = vand.u32 2147483647, %v597_v11  ;;  %v1174_v24 = vand.u32 2147483647, %v598_v59  ;;  %v13257_v59 = vld [vmem:[#allocation26_spill] sm:$0xff] }
 0x285   : > { %v7493_v21 = vmul.f32 %v6917_v30, %v6341_v35  ;;  %v7494_v33 = vmul.f32 %v6918_v3, %v6342_v37  ;;  %v1731_v32 = vsub.f32 1.0, %v1155_v23  ;;  %v7511_v0 = vmul.f32 %v6935_v25, %v6359_v61 }
 0x286   : > { %8026 = vmatpush.bf16.msra.mxu2 %v7656_v40  ;;  %v7512_v44 = vmul.f32 %v6936_v17, %v6360_v62  ;;  %v1732_v57 = vsub.f32 1.0, %v1156_v10  ;;  %v1749_v41 = vsub.f32 1.0, %v1173_v13  ;;  %v1750_v39 = vsub.f32 1.0, %v1174_v24 }
 0x287   : > { %v2307_v8 = vmax.f32 %v1731_v32, 0.0  ;;  %v3353_v5 = vsub.f32 %v13255_v27, %v10343_v7  ;;  %v3354_v42 = vsub.f32 %v13255_v27, %v10354_v43  ;;  %v7835_v50 = vpack.c.bf16 %v7511_v0, %v7493_v21  ;;  %v13258_v21 = vld [vmem:[#allocation31_spill] sm:$0xff] }
 0x288   : > { %v7836_v20 = vpack.c.bf16 %v7512_v44, %v7494_v33  ;;  %v2308_v63 = vmax.f32 %v1732_v57, 0.0  ;;  %v2325_v35 = vmax.f32 %v1749_v41, 0.0  ;;  %v2326_v37 = vmax.f32 %v1750_v39, 0.0 }
 0x289   : > { %v3371_v61 = vsub.f32 %v13256_v34, %v10343_v7  ;;  %v3372_v62 = vsub.f32 %v13256_v34, %v10354_v43  ;;  %v3929_v22 = vand.u32 2147483647, %v3353_v5  ;;  %8011 = vmatpush.bf16.msra.mxu1 %v7835_v50  ;;  %v3930_v11 = vand.u32 2147483647, %v3354_v42  ;;  %v13259_v5 = vld [vmem:[#allocation38_spill] sm:$0xff] }
 0x28a   : > { %8037 = vmatpush.bf16.msra.mxu3 %v7836_v20  ;;  %v10551_v56 = vpack.c.bf16 %v2308_v63, %v2307_v8  ;;  %v939_v30 = vsub.f32 %v13257_v59, %v10339_v28  ;;  %v940_v3 = vsub.f32 %v13257_v59, %v10341_v15  ;;  %v10557_v23 = vpack.c.bf16 %v2326_v37, %v2325_v35 }
 0x28b   : > { %v3947_v10 = vand.u32 2147483647, %v3371_v61  ;;  %v3948_v25 = vand.u32 2147483647, %v3372_v62  ;;  %v4505_v40 = vsub.f32 1.0, %v3929_v22  ;;  %v4506_v17 = vsub.f32 1.0, %v3930_v11 }
 0x28c   : > { %v5945_v13 = vunpack.c.l.bf16 %v10551_v56  ;;  %v957_v33 = vsub.f32 %v13258_v21, %v10339_v28  ;;  %v958_v24 = vsub.f32 %v13258_v21, %v10341_v15  ;;  %v5963_v57 = vunpack.c.l.bf16 %v10557_v23 }
 0x28d   : > { %v4523_v32 = vsub.f32 1.0, %v3947_v10  ;;  %v4524_v0 = vsub.f32 1.0, %v3948_v25  ;;  %v5081_v44 = vmax.f32 %v4505_v40, 0.0  ;;  %v5082_v41 = vmax.f32 %v4506_v17, 0.0  ;;  %v13260_v40 = vld [vmem:[#allocation30_spill] sm:$0xff] }
 0x28e   : > { %v1515_v39 = vand.u32 2147483647, %v939_v30  ;;  %v1516_v8 = vand.u32 2147483647, %v940_v3  ;;  %v3713_v42 = vsub.f32 %v13259_v5, %v10343_v7  ;;  %v1533_v63 = vand.u32 2147483647, %v957_v33 }
 0x28f   : > { %v5099_v50 = vmax.f32 %v4523_v32, 0.0  ;;  %v5100_v20 = vmax.f32 %v4524_v0, 0.0  ;;  %v1534_v35 = vand.u32 2147483647, %v958_v24  ;;  %v5619_v37 = vpack.c.bf16 %v5082_v41, %v5081_v44 }
 0x290   : > { %v2091_v61 = vsub.f32 1.0, %v1515_v39  ;;  %v2092_v62 = vsub.f32 1.0, %v1516_v8  ;;  %v3714_v22 = vsub.f32 %v13259_v5, %v10354_v43  ;;  %v2109_v10 = vsub.f32 1.0, %v1533_v63 }
 0x291   : > { %v5628_v11 = vpack.c.bf16 %v5100_v20, %v5099_v50  ;;  %v2110_v25 = vsub.f32 1.0, %v1534_v35  ;;  %v3731_v30 = vsub.f32 %v13260_v40, %v10343_v7  ;;  %v6521_v3 = vunpack.c.l.bf16 %v5619_v37 }
 0x292   : > { %v2667_v17 = vmax.f32 %v2091_v61, 0.0  ;;  %v2668_v21 = vmax.f32 %v2092_v62, 0.0  ;;  %v3732_v32 = vsub.f32 %v13260_v40, %v10354_v43  ;;  %v2685_v24 = vmax.f32 %v2109_v10, 0.0 }
 0x293   : > { %v6539_v33 = vunpack.c.l.bf16 %v5628_v11  ;;  %v2686_v0 = vmax.f32 %v2110_v25, 0.0  ;;  %v4289_v44 = vand.u32 2147483647, %v3713_v42  ;;  %v7097_v41 = vmul.f32 %v6521_v3, %v5945_v13 }
 0x294   : > { %v3025_v39 = vpack.c.bf16 %v2668_v21, %v2667_v17  ;;  %v4290_v8 = vand.u32 2147483647, %v3714_v22  ;;  %v4307_v5 = vand.u32 2147483647, %v3731_v30  ;;  %v4308_v63 = vand.u32 2147483647, %v3732_v32 }
 0x295   : > { %v7115_v50 = vmul.f32 %v6539_v33, %v5963_v57  ;;  %v3034_v20 = vpack.c.bf16 %v2686_v0, %v2685_v24  ;;  %v4865_v35 = vsub.f32 1.0, %v4289_v44  ;;  %v5946_v61 = vunpack.c.h.bf16 %v10551_v56 }
 0x296   : > { %v4866_v59 = vsub.f32 1.0, %v4290_v8  ;;  %v4883_v34 = vsub.f32 1.0, %v4307_v5  ;;  %v6305_v27 = vunpack.c.l.bf16 %v3025_v39  ;;  %v4884_v54 = vsub.f32 1.0, %v4308_v63 }
 0x297   : > { %v7637_v62 = vpack.c.bf16 %v7115_v50, %v7097_v41  ;;  %v5441_v40 = vmax.f32 %v4865_v35, 0.0  ;;  %v6323_v45 = vunpack.c.l.bf16 %v3034_v20  ;;  %v5964_v13 = vunpack.c.h.bf16 %v10557_v23 }
 0x298   : > { %v5442_v10 = vmax.f32 %v4866_v59, 0.0  ;;  %v5459_v25 = vmax.f32 %v4883_v34, 0.0  ;;  %v6522_v21 = vunpack.c.h.bf16 %v5619_v37  ;;  %v5460_v42 = vmax.f32 %v4884_v54, 0.0 }
 0x299   : > { %8001 = vmatpush.bf16.msra.mxu0 %v7637_v62  ;;  %v6540_v57 = vunpack.c.h.bf16 %v5628_v11  ;;  %v6306_v22 = vunpack.c.h.bf16 %v3025_v39  ;;  %v6324_v30 = vunpack.c.h.bf16 %v3034_v20  ;;  %v543_v5 = vsub.f32 %v13222_v31, %v10339_v28 }
 0x29a   : > { %v5799_v3 = vpack.c.bf16 %v5442_v10, %v5441_v40  ;;  %v7098_v17 = vmul.f32 %v6522_v21, %v5946_v61  ;;  %v544_v56 = vsub.f32 %v13222_v31, %v10341_v15  ;;  %v5808_v32 = vpack.c.bf16 %v5460_v42, %v5459_v25 }
 0x29b   : > { %v7116_v33 = vmul.f32 %v6540_v57, %v5964_v13  ;;  %v561_v34 = vsub.f32 %v9933_v53, %v10339_v28  ;;  %v562_v59 = vsub.f32 %v9933_v53, %v10341_v15  ;;  %v1119_v37 = vand.u32 2147483647, %v543_v5 }
 0x29c   : > { %v6881_v54 = vunpack.c.l.bf16 %v5799_v3  ;;  %v6882_v23 = vunpack.c.h.bf16 %v5799_v3  ;;  %v1120_v11 = vand.u32 2147483647, %v544_v56  ;;  %v6899_v40 = vunpack.c.l.bf16 %v5808_v32  ;;  %v13261_v3 = vld [vmem:[#allocation52_spill] sm:$0xff] }
 0x29d   : > { %v7638_v24 = vpack.c.bf16 %v7116_v33, %v7098_v17  ;;  %v6900_v0 = vunpack.c.h.bf16 %v5808_v32  ;;  %v1137_v44 = vand.u32 2147483647, %v561_v34  ;;  %v1138_v8 = vand.u32 2147483647, %v562_v59  ;;  %v13262_v32 = vld [vmem:[#allocation33_spill] sm:$0xff] }
 0x29e   : > { %v7457_v41 = vmul.f32 %v6881_v54, %v6305_v27  ;;  %v7458_v39 = vmul.f32 %v6882_v23, %v6306_v22  ;;  %v1695_v50 = vsub.f32 1.0, %v1119_v37  ;;  %v7475_v20 = vmul.f32 %v6899_v40, %v6323_v45 }
 0x29f   : > { %8027 = vmatpush.bf16.msra.mxu2 %v7638_v24  ;;  %v7476_v63 = vmul.f32 %v6900_v0, %v6324_v30  ;;  %v1696_v35 = vsub.f32 1.0, %v1120_v11  ;;  %v1713_v61 = vsub.f32 1.0, %v1137_v44  ;;  %v1714_v62 = vsub.f32 1.0, %v1138_v8  ;;  %v13263_v24 = vld [vmem:[#allocation36_spill] sm:$0xff] }
 0x2a0   : > { %v2271_v10 = vmax.f32 %v1695_v50, 0.0  ;;  %v3317_v25 = vsub.f32 %v9954_v58, %v10343_v7  ;;  %v3318_v13 = vsub.f32 %v9954_v58, %v10354_v43  ;;  %v7817_v21 = vpack.c.bf16 %v7475_v20, %v7457_v41 }
 0x2a1   : > { %v7818_v42 = vpack.c.bf16 %v7476_v63, %v7458_v39  ;;  %v2272_v57 = vmax.f32 %v1696_v35, 0.0  ;;  %v2289_v27 = vmax.f32 %v1713_v61, 0.0  ;;  %v2290_v22 = vmax.f32 %v1714_v62, 0.0  ;;  %v13264_v61 = vld [vmem:[#allocation13_spill] sm:$0xff] }
 0x2a2   : > { %v3335_v45 = vsub.f32 %v13261_v3, %v10343_v7  ;;  %v3336_v30 = vsub.f32 %v13261_v3, %v10354_v43  ;;  %v3893_v17 = vand.u32 2147483647, %v3317_v25  ;;  %8012 = vmatpush.bf16.msra.mxu1 %v7817_v21  ;;  %v3894_v56 = vand.u32 2147483647, %v3318_v13 }
 0x2a3   : > { %8038 = vmatpush.bf16.msra.mxu3 %v7818_v42  ;;  %v10591_v5 = vpack.c.bf16 %v2272_v57, %v2271_v10  ;;  %v903_v33 = vsub.f32 %v13262_v32, %v10339_v28  ;;  %v904_v34 = vsub.f32 %v13262_v32, %v10341_v15  ;;  %v10597_v59 = vpack.c.bf16 %v2290_v22, %v2289_v27 }
 0x2a4   : > { %v3911_v54 = vand.u32 2147483647, %v3335_v45  ;;  %v3912_v23 = vand.u32 2147483647, %v3336_v30  ;;  %v4469_v37 = vsub.f32 1.0, %v3893_v17  ;;  %v4470_v11 = vsub.f32 1.0, %v3894_v56 }
 0x2a5   : > { %v5909_v40 = vunpack.c.l.bf16 %v10591_v5  ;;  %v921_v0 = vsub.f32 %v13263_v24, %v10339_v28  ;;  %v922_v44 = vsub.f32 %v13263_v24, %v10341_v15  ;;  %v5927_v50 = vunpack.c.l.bf16 %v10597_v59  ;;  %v13265_v56 = vld [vmem:[#allocation47_spill] sm:$0xff] }
 0x2a6   : > { %v4487_v41 = vsub.f32 1.0, %v3911_v54  ;;  %v4488_v39 = vsub.f32 1.0, %v3912_v23  ;;  %v5045_v8 = vmax.f32 %v4469_v37, 0.0  ;;  %v5046_v20 = vmax.f32 %v4470_v11, 0.0 }
 0x2a7   : > { %v1479_v63 = vand.u32 2147483647, %v903_v33  ;;  %v1480_v35 = vand.u32 2147483647, %v904_v34  ;;  %v3677_v62 = vsub.f32 %v13264_v61, %v10343_v7  ;;  %v1497_v13 = vand.u32 2147483647, %v921_v0 }
 0x2a8   : > { %v5063_v10 = vmax.f32 %v4487_v41, 0.0  ;;  %v5064_v25 = vmax.f32 %v4488_v39, 0.0  ;;  %v1498_v21 = vand.u32 2147483647, %v922_v44  ;;  %v5601_v42 = vpack.c.bf16 %v5046_v20, %v5045_v8 }
 0x2a9   : > { %v2055_v57 = vsub.f32 1.0, %v1479_v63  ;;  %v2056_v27 = vsub.f32 1.0, %v1480_v35  ;;  %v3678_v22 = vsub.f32 %v13264_v61, %v10354_v43  ;;  %v2073_v30 = vsub.f32 1.0, %v1497_v13 }
 0x2aa   : > { %v5610_v45 = vpack.c.bf16 %v5064_v25, %v5063_v10  ;;  %v2074_v17 = vsub.f32 1.0, %v1498_v21  ;;  %v3695_v33 = vsub.f32 %v13265_v56, %v10343_v7  ;;  %v6485_v34 = vunpack.c.l.bf16 %v5601_v42 }
 0x2ab   : > { %v2631_v54 = vmax.f32 %v2055_v57, 0.0  ;;  %v2632_v23 = vmax.f32 %v2056_v27, 0.0  ;;  %v3696_v37 = vsub.f32 %v13265_v56, %v10354_v43  ;;  %v2649_v0 = vmax.f32 %v2073_v30, 0.0 }
 0x2ac   : > { %v6503_v11 = vunpack.c.l.bf16 %v5610_v45  ;;  %v2650_v44 = vmax.f32 %v2074_v17, 0.0  ;;  %v4253_v41 = vand.u32 2147483647, %v3677_v62  ;;  %v7061_v39 = vmul.f32 %v6485_v34, %v5909_v40 }
 0x2ad   : > { %v3007_v8 = vpack.c.bf16 %v2632_v23, %v2631_v54  ;;  %v4254_v20 = vand.u32 2147483647, %v3678_v22  ;;  %v4271_v63 = vand.u32 2147483647, %v3695_v33  ;;  %v4272_v25 = vand.u32 2147483647, %v3696_v37 }
 0x2ae   : > { %v7079_v35 = vmul.f32 %v6503_v11, %v5927_v50  ;;  %v3016_v10 = vpack.c.bf16 %v2650_v44, %v2649_v0  ;;  %v4829_v13 = vsub.f32 1.0, %v4253_v41  ;;  %v5910_v57 = vunpack.c.h.bf16 %v10591_v5 }
 0x2af   : > { %v4830_v21 = vsub.f32 1.0, %v4254_v20  ;;  %v4847_v61 = vsub.f32 1.0, %v4271_v63  ;;  %v6269_v24 = vunpack.c.l.bf16 %v3007_v8  ;;  %v4848_v32 = vsub.f32 1.0, %v4272_v25 }
 0x2b0   : > { %v7619_v27 = vpack.c.bf16 %v7079_v35, %v7061_v39  ;;  %v5405_v56 = vmax.f32 %v4829_v13, 0.0  ;;  %v6287_v3 = vunpack.c.l.bf16 %v3016_v10  ;;  %v5928_v40 = vunpack.c.h.bf16 %v10597_v59 }
 0x2b1   : > { %v5406_v30 = vmax.f32 %v4830_v21, 0.0  ;;  %v5423_v17 = vmax.f32 %v4847_v61, 0.0  ;;  %v6486_v62 = vunpack.c.h.bf16 %v5601_v42  ;;  %v5424_v22 = vmax.f32 %v4848_v32, 0.0  ;;  %v13266_v61 = vld [vmem:[#allocation56_spill] sm:$0xff] }
 0x2b2   : > { %8002 = vmatpush.bf16.msra.mxu0 %v7619_v27  ;;  %v6504_v50 = vunpack.c.h.bf16 %v5610_v45  ;;  %v6270_v33 = vunpack.c.h.bf16 %v3007_v8  ;;  %v6288_v34 = vunpack.c.h.bf16 %v3016_v10  ;;  %v507_v37 = vsub.f32 %v9921_v29, %v10339_v28 }
 0x2b3   : > { %v5781_v54 = vpack.c.bf16 %v5406_v30, %v5405_v56  ;;  %v7062_v23 = vmul.f32 %v6486_v62, %v5910_v57  ;;  %v508_v5 = vsub.f32 %v9921_v29, %v10341_v15  ;;  %v5790_v11 = vpack.c.bf16 %v5424_v22, %v5423_v17 }
 0x2b4   : > { %v7080_v0 = vmul.f32 %v6504_v50, %v5928_v40  ;;  %v525_v44 = vsub.f32 %v13266_v61, %v10339_v28  ;;  %v526_v59 = vsub.f32 %v13266_v61, %v10341_v15  ;;  %v1083_v45 = vand.u32 2147483647, %v507_v37  ;;  %v13267_v40 = vld [vmem:[#allocation57_spill] sm:$0xff]  ;;  %v13268_v37 = vld [vmem:[#allocation54_spill] sm:$0xff] }
 0x2b5   : > { %v6845_v32 = vunpack.c.l.bf16 %v5781_v54  ;;  %v6846_v42 = vunpack.c.h.bf16 %v5781_v54  ;;  %v1084_v41 = vand.u32 2147483647, %v508_v5  ;;  %v6863_v56 = vunpack.c.l.bf16 %v5790_v11 }
 0x2b6   : > { %v7620_v39 = vpack.c.bf16 %v7080_v0, %v7062_v23  ;;  %v6864_v8 = vunpack.c.h.bf16 %v5790_v11  ;;  %v1101_v20 = vand.u32 2147483647, %v525_v44  ;;  %v1102_v10 = vand.u32 2147483647, %v526_v59  ;;  %v13269_v44 = vld [vmem:[#allocation42_spill] sm:$0xff] }
 0x2b7   : > { %v7421_v63 = vmul.f32 %v6845_v32, %v6269_v24  ;;  %v7422_v35 = vmul.f32 %v6846_v42, %v6270_v33  ;;  %v1659_v25 = vsub.f32 1.0, %v1083_v45  ;;  %v7439_v13 = vmul.f32 %v6863_v56, %v6287_v3 }
 0x2b8   : > { %8028 = vmatpush.bf16.msra.mxu2 %v7620_v39  ;;  %v7440_v21 = vmul.f32 %v6864_v8, %v6288_v34  ;;  %v1660_v57 = vsub.f32 1.0, %v1084_v41  ;;  %v1677_v27 = vsub.f32 1.0, %v1101_v20  ;;  %v1678_v30 = vsub.f32 1.0, %v1102_v10  ;;  %v13270_v20 = vld [vmem:[#allocation39_spill] sm:$0xff] }
 0x2b9   : > { %v2235_v17 = vmax.f32 %v1659_v25, 0.0  ;;  %v3281_v62 = vsub.f32 %v13267_v40, %v10343_v7  ;;  %v3282_v22 = vsub.f32 %v13267_v40, %v10354_v43  ;;  %v7799_v50 = vpack.c.bf16 %v7439_v13, %v7421_v63 }
 0x2ba   : > { %v7800_v54 = vpack.c.bf16 %v7440_v21, %v7422_v35  ;;  %v2236_v23 = vmax.f32 %v1660_v57, 0.0  ;;  %v2253_v24 = vmax.f32 %v1677_v27, 0.0  ;;  %v2254_v33 = vmax.f32 %v1678_v30, 0.0 }
 0x2bb   : > { %v3299_v3 = vsub.f32 %v13268_v37, %v10343_v7  ;;  %v3300_v34 = vsub.f32 %v13268_v37, %v10354_v43  ;;  %v3857_v5 = vand.u32 2147483647, %v3281_v62  ;;  %8013 = vmatpush.bf16.msra.mxu1 %v7799_v50  ;;  %v3858_v0 = vand.u32 2147483647, %v3282_v22 }
 0x2bc   : > { %8039 = vmatpush.bf16.msra.mxu3 %v7800_v54  ;;  %v10631_v11 = vpack.c.bf16 %v2236_v23, %v2235_v17  ;;  %v867_v59 = vsub.f32 %v13269_v44, %v10339_v28  ;;  %v868_v32 = vsub.f32 %v13269_v44, %v10341_v15  ;;  %v10637_v42 = vpack.c.bf16 %v2254_v33, %v2253_v24  ;;  %v13271_v17 = vld [vmem:[#allocation53_spill] sm:$0xff] }
 0x2bd   : > { %v3875_v45 = vand.u32 2147483647, %v3299_v3  ;;  %v3876_v41 = vand.u32 2147483647, %v3300_v34  ;;  %v4433_v56 = vsub.f32 1.0, %v3857_v5  ;;  %v4434_v39 = vsub.f32 1.0, %v3858_v0 }
 0x2be   : > { %v5873_v8 = vunpack.c.l.bf16 %v10631_v11  ;;  %v885_v63 = vsub.f32 %v13270_v20, %v10339_v28  ;;  %v886_v35 = vsub.f32 %v13270_v20, %v10341_v15  ;;  %v5891_v21 = vunpack.c.l.bf16 %v10637_v42 }
 0x2bf   : > { %v4451_v10 = vsub.f32 1.0, %v3875_v45  ;;  %v4452_v25 = vsub.f32 1.0, %v3876_v41  ;;  %v5009_v13 = vmax.f32 %v4433_v56, 0.0  ;;  %v5010_v57 = vmax.f32 %v4434_v39, 0.0  ;;  %v13272_v41 = vld [vmem:[#allocation48_spill] sm:$0xff] }
 0x2c0   : > { %v1443_v27 = vand.u32 2147483647, %v867_v59  ;;  %v1444_v30 = vand.u32 2147483647, %v868_v32  ;;  %v3641_v62 = vsub.f32 %v13271_v17, %v10343_v7  ;;  %v1461_v54 = vand.u32 2147483647, %v885_v63 }
 0x2c1   : > { %v5027_v22 = vmax.f32 %v4451_v10, 0.0  ;;  %v5028_v50 = vmax.f32 %v4452_v25, 0.0  ;;  %v1462_v23 = vand.u32 2147483647, %v886_v35  ;;  %v5583_v24 = vpack.c.bf16 %v5010_v57, %v5009_v13 }
 0x2c2   : > { %v2019_v33 = vsub.f32 1.0, %v1443_v27  ;;  %v2020_v3 = vsub.f32 1.0, %v1444_v30  ;;  %v3642_v34 = vsub.f32 %v13271_v17, %v10354_v43  ;;  %v2037_v0 = vsub.f32 1.0, %v1461_v54 }
 0x2c3   : > { %v5592_v5 = vpack.c.bf16 %v5028_v50, %v5027_v22  ;;  %v2038_v45 = vsub.f32 1.0, %v1462_v23  ;;  %v3659_v59 = vsub.f32 %v13272_v41, %v10343_v7  ;;  %v6449_v32 = vunpack.c.l.bf16 %v5583_v24 }
 0x2c4   : > { %v2595_v56 = vmax.f32 %v2019_v33, 0.0  ;;  %v2596_v39 = vmax.f32 %v2020_v3, 0.0  ;;  %v3660_v10 = vsub.f32 %v13272_v41, %v10354_v43  ;;  %v2613_v35 = vmax.f32 %v2037_v0, 0.0 }
 0x2c5   : > { %v6467_v63 = vunpack.c.l.bf16 %v5592_v5  ;;  %v2614_v25 = vmax.f32 %v2038_v45, 0.0  ;;  %v4217_v13 = vand.u32 2147483647, %v3641_v62  ;;  %v7025_v57 = vmul.f32 %v6449_v32, %v5873_v8 }
 0x2c6   : > { %v2989_v27 = vpack.c.bf16 %v2596_v39, %v2595_v56  ;;  %v4218_v30 = vand.u32 2147483647, %v3642_v34  ;;  %v4235_v17 = vand.u32 2147483647, %v3659_v59  ;;  %v4236_v54 = vand.u32 2147483647, %v3660_v10 }
 0x2c7   : > { %v7043_v22 = vmul.f32 %v6467_v63, %v5891_v21  ;;  %v2998_v50 = vpack.c.bf16 %v2614_v25, %v2613_v35  ;;  %v4793_v23 = vsub.f32 1.0, %v4217_v13  ;;  %v5874_v33 = vunpack.c.h.bf16 %v10631_v11  ;;  %v9080_v10 = vld [vmem:[%s9355_s21 + $0x8] sm:$0xff] }
 0x2c8   : > { %v4794_v20 = vsub.f32 1.0, %v4218_v30  ;;  %v4811_v44 = vsub.f32 1.0, %v4235_v17  ;;  %v6233_v37 = vunpack.c.l.bf16 %v2989_v27  ;;  %v4812_v41 = vsub.f32 1.0, %v4236_v54  ;;  %v13273_v54 = vld [vmem:[#allocation19_spill] sm:$0xff] }
 0x2c9   : > { %v7601_v3 = vpack.c.bf16 %v7043_v22, %v7025_v57  ;;  %v5369_v40 = vmax.f32 %v4793_v23, 0.0  ;;  %v6251_v0 = vunpack.c.l.bf16 %v2998_v50  ;;  %v5892_v8 = vunpack.c.h.bf16 %v10637_v42 }
 0x2ca   : > { %v5370_v45 = vmax.f32 %v4794_v20, 0.0  ;;  %v5387_v62 = vmax.f32 %v4811_v44, 0.0  ;;  %v6450_v34 = vunpack.c.h.bf16 %v5583_v24  ;;  %v5388_v21 = vmax.f32 %v4812_v41, 0.0  ;;  %v9081_v24 = vld.sshfl [vmem:[#allocation1] sm:$0xff pattern:$0x73625140] }
 0x2cb   : > { %8003 = vmatpush.bf16.msra.mxu0 %v7601_v3  ;;  %v6468_v59 = vunpack.c.h.bf16 %v5592_v5  ;;  %v6234_v32 = vunpack.c.h.bf16 %v2989_v27  ;;  %v6252_v56 = vunpack.c.h.bf16 %v2998_v50  ;;  %v455_v63 = vperm.slane %v9080_v10, 4 }
 0x2cc   : > { %v5763_v39 = vpack.c.bf16 %v5370_v45, %v5369_v40  ;;  %v7026_v17 = vmul.f32 %v6450_v34, %v5874_v33  ;;  %v456_v11 = vperm.slane %v9080_v10, 6  ;;  %v5772_v35 = vpack.c.bf16 %v5388_v21, %v5387_v62  ;;  %v13274_v62 = vld [vmem:[#allocation22_spill] sm:$0xff] }
 0x2cd   : > { %v7044_v25 = vmul.f32 %v6468_v59, %v5892_v8  ;;  %v3229_v13 = vperm.slane %v9080_v10, 5  ;;  %v3230_v57 = vperm.slane %v9080_v10, 7  ;;  %v10656_v44 = vperm.slane %v455_v63, 0 }
 0x2ce   : > { %v6809_v30 = vunpack.c.l.bf16 %v5763_v39  ;;  %v6810_v20 = vunpack.c.h.bf16 %v5763_v39  ;;  %v10658_v42 = vperm.slane %v456_v11, 0  ;;  %8004 = vmatmul.bf16.vlgmr.msra.gmra.mxu0 %v9081_v24  ;;  %v6827_v5 = vunpack.c.l.bf16 %v5772_v35 }
 0x2cf   : > { %v7602_v41 = vpack.c.bf16 %v7044_v25, %v7026_v17  ;;  %v6828_v27 = vunpack.c.h.bf16 %v5772_v35  ;;  %v10660_v40 = vperm.slane %v3229_v13, 1  ;;  %v761_v23 = vsub.f32 %v13273_v54, %v10656_v44  ;;  %v13276_v25 = vld [vmem:[#allocation6_spill] sm:$0xff] }
 0x2d0   : > { %v7385_v22 = vmul.f32 %v6809_v30, %v6233_v37  ;;  %v7386_v50 = vmul.f32 %v6810_v20, %v6234_v32  ;;  %v762_v33 = vsub.f32 %v13273_v54, %v10658_v42  ;;  %v7403_v3 = vmul.f32 %v6827_v5, %v6251_v0  ;;  %v13275_v37 = vld [vmem:[#allocation5_spill] sm:$0xff] }
 0x2d1   : > { %8029 = vmatpush.bf16.msra.mxu2 %v7602_v41  ;;  %v7404_v45 = vmul.f32 %v6828_v27, %v6252_v56  ;;  %v779_v8 = vsub.f32 %v13274_v62, %v10656_v44  ;;  %v780_v34 = vsub.f32 %v13274_v62, %v10658_v42  ;;  %v1337_v21 = vand.u32 2147483647, %v761_v23 }
 0x2d2   : > { %v1338_v59 = vand.u32 2147483647, %v762_v33  ;;  %v10670_v39 = vperm.slane %v3230_v57, 1  ;;  %v3535_v32 = vsub.f32 %v13275_v37, %v10660_v40  ;;  %v7781_v17 = vpack.c.bf16 %v7403_v3, %v7385_v22 }
 0x2d3   : > { %v7782_v10 = vpack.c.bf16 %v7404_v45, %v7386_v50  ;;  %v1355_v63 = vand.u32 2147483647, %v779_v8  ;;  %v1356_v11 = vand.u32 2147483647, %v780_v34  ;;  %v1913_v0 = vsub.f32 1.0, %v1337_v21 }
 0x2d4   : > { %v1914_v35 = vsub.f32 1.0, %v1338_v59  ;;  %v3536_v56 = vsub.f32 %v13275_v37, %v10670_v39  ;;  %v3553_v13 = vsub.f32 %v13276_v25, %v10660_v40  ;;  %8030 = vmatmul.bf16.vlgmr.msra.gmra.mxu2 %v9081_v24  ;;  %8014 = vmatpush.bf16.msra.mxu1 %v7781_v17  ;;  %v3554_v20 = vsub.f32 %v13276_v25, %v10670_v39  ;;  %v13277_v24 = vld [vmem:[#allocation50_spill] sm:$0xff] }
 0x2d5   : > { %8040 = vmatpush.bf16.msra.mxu3 %v7782_v10  ;;  %v1931_v57 = vsub.f32 1.0, %v1355_v63  ;;  %v1932_v30 = vsub.f32 1.0, %v1356_v11  ;;  %v4111_v5 = vand.u32 2147483647, %v3535_v32  ;;  %v2489_v41 = vmax.f32 %v1913_v0, 0.0 }
 0x2d6   : > { %v2490_v27 = vmax.f32 %v1914_v35, 0.0  ;;  %v4112_v22 = vand.u32 2147483647, %v3536_v56  ;;  %v4129_v50 = vand.u32 2147483647, %v3553_v13  ;;  %v831_v59 = vsub.f32 %v13277_v24, %v10339_v28 }
 0x2d7   : > { %v2507_v23 = vmax.f32 %v1931_v57, 0.0  ;;  %v2508_v33 = vmax.f32 %v1932_v30, 0.0  ;;  %v4130_v3 = vand.u32 2147483647, %v3554_v20  ;;  %v4687_v45 = vsub.f32 1.0, %v4111_v5  ;;  %v13278_v20 = vld [vmem:[#allocation46_spill] sm:$0xff] }
 0x2d8   : > { %v2936_v8 = vpack.c.bf16 %v2490_v27, %v2489_v41  ;;  %v4688_v34 = vsub.f32 1.0, %v4112_v22  ;;  %v4705_v21 = vsub.f32 1.0, %v4129_v50  ;;  %v832_v32 = vsub.f32 %v13277_v24, %v10341_v15 }
 0x2d9   : > { %v2945_v17 = vpack.c.bf16 %v2508_v33, %v2507_v23  ;;  %v4706_v10 = vsub.f32 1.0, %v4130_v3  ;;  %v5263_v63 = vmax.f32 %v4687_v45, 0.0  ;;  %v849_v5 = vsub.f32 %v13278_v20, %v10339_v28  ;;  %v13279_v3 = vld [vmem:[#allocation16_spill] sm:$0xff] }
 0x2da   : > { %v5264_v11 = vmax.f32 %v4688_v34, 0.0  ;;  %v5281_v0 = vmax.f32 %v4705_v21, 0.0  ;;  %v6127_v35 = vunpack.c.l.bf16 %v2936_v8  ;;  %v6128_v56 = vunpack.c.h.bf16 %v2936_v8 }
 0x2db   : > { %v5282_v13 = vmax.f32 %v4706_v10, 0.0  ;;  %v6145_v57 = vunpack.c.l.bf16 %v2945_v17  ;;  %v6146_v30 = vunpack.c.h.bf16 %v2945_v17  ;;  %v850_v27 = vsub.f32 %v13278_v20, %v10341_v15 }
 0x2dc   : > { %v5710_v41 = vpack.c.bf16 %v5264_v11, %v5263_v63  ;;  %v1407_v22 = vand.u32 2147483647, %v831_v59  ;;  %v1408_v50 = vand.u32 2147483647, %v832_v32  ;;  %v1425_v33 = vand.u32 2147483647, %v849_v5 }
 0x2dd   : > { %v5719_v23 = vpack.c.bf16 %v5282_v13, %v5281_v0  ;;  %v3605_v45 = vsub.f32 %v13279_v3, %v10343_v7  ;;  %v3606_v8 = vsub.f32 %v13279_v3, %v10354_v43  ;;  %v1426_v17 = vand.u32 2147483647, %v850_v27 }
 0x2de   : > { %v6703_v34 = vunpack.c.l.bf16 %v5710_v41  ;;  %v6704_v21 = vunpack.c.h.bf16 %v5710_v41  ;;  %v1983_v10 = vsub.f32 1.0, %v1407_v22  ;;  %v1984_v63 = vsub.f32 1.0, %v1408_v50 }
 0x2df   : > { %v6721_v24 = vunpack.c.l.bf16 %v5719_v23  ;;  %v6722_v25 = vunpack.c.h.bf16 %v5719_v23  ;;  %v2001_v11 = vsub.f32 1.0, %v1425_v33  ;;  %v2002_v59 = vsub.f32 1.0, %v1426_v17 }
 0x2e0   : > { %v7279_v37 = vmul.f32 %v6703_v34, %v6127_v35  ;;  %v7280_v20 = vmul.f32 %v6704_v21, %v6128_v56  ;;  %v2559_v32 = vmax.f32 %v1983_v10, 0.0  ;;  %v2560_v5 = vmax.f32 %v1984_v63, 0.0 }
 0x2e1   : > { %v7297_v0 = vmul.f32 %v6721_v24, %v6145_v57  ;;  %v7298_v13 = vmul.f32 %v6722_v25, %v6146_v30  ;;  %v2577_v62 = vmax.f32 %v2001_v11, 0.0  ;;  %v2578_v54 = vmax.f32 %v2002_v59, 0.0  ;;  %v13280_v30 = vld [vmem:[#allocation7_spill] sm:$0xff] }
 0x2e2   : > { %v3623_v3 = vsub.f32 %v13240_v48, %v10343_v7  ;;  %v3624_v41 = vsub.f32 %v13240_v48, %v10354_v43  ;;  %v4181_v27 = vand.u32 2147483647, %v3605_v45  ;;  %v2971_v50 = vpack.c.bf16 %v2560_v5, %v2559_v32 }
 0x2e3   : > { %v7729_v22 = vpack.c.bf16 %v7297_v0, %v7279_v37  ;;  %v7730_v23 = vpack.c.bf16 %v7298_v13, %v7280_v20  ;;  %v4182_v33 = vand.u32 2147483647, %v3606_v8  ;;  %v2980_v35 = vpack.c.bf16 %v2578_v54, %v2577_v62  ;;  %v13281_v62 = vld [vmem:[#allocation17_spill] sm:$0xff] }
 0x2e4   : > { %v4199_v56 = vand.u32 2147483647, %v3623_v3  ;;  %v4200_v34 = vand.u32 2147483647, %v3624_v41  ;;  %v4757_v21 = vsub.f32 1.0, %v4181_v27  ;;  %v6197_v24 = vunpack.c.l.bf16 %v2971_v50 }
 0x2e5   : > { %8048 = vmatpush.bf16.msrb.mxu0 %v7729_v22  ;;  %8074 = vmatpush.bf16.msrb.mxu2 %v7730_v23  ;;  %v4758_v25 = vsub.f32 1.0, %v4182_v33  ;;  %v6198_v57 = vunpack.c.h.bf16 %v2971_v50  ;;  %v725_v17 = vsub.f32 %v13280_v30, %v10656_v44  ;;  %v6215_v45 = vunpack.c.l.bf16 %v2980_v35 }
 0x2e6   : > { %v4775_v10 = vsub.f32 1.0, %v4199_v56  ;;  %v4776_v63 = vsub.f32 1.0, %v4200_v34  ;;  %v5333_v11 = vmax.f32 %v4757_v21, 0.0  ;;  %v6216_v20 = vunpack.c.h.bf16 %v2980_v35 }
 0x2e7   : > { %v5334_v37 = vmax.f32 %v4758_v25, 0.0  ;;  %v726_v54 = vsub.f32 %v13280_v30, %v10658_v42  ;;  %v743_v3 = vsub.f32 %v13281_v62, %v10656_v44  ;;  %v744_v32 = vsub.f32 %v13281_v62, %v10658_v42 }
 0x2e8   : > { %v5351_v8 = vmax.f32 %v4775_v10, 0.0  ;;  %v5352_v59 = vmax.f32 %v4776_v63, 0.0  ;;  %v1301_v0 = vand.u32 2147483647, %v725_v17  ;;  %v3499_v27 = vsub.f32 %v9537_v14, %v10660_v40 }
 0x2e9   : > { %v5745_v13 = vpack.c.bf16 %v5334_v37, %v5333_v11  ;;  %v1302_v5 = vand.u32 2147483647, %v726_v54  ;;  %v1319_v41 = vand.u32 2147483647, %v743_v3  ;;  %v1320_v23 = vand.u32 2147483647, %v744_v32 }
 0x2ea   : > { %v5754_v22 = vpack.c.bf16 %v5352_v59, %v5351_v8  ;;  %v1877_v50 = vsub.f32 1.0, %v1301_v0  ;;  %v3500_v33 = vsub.f32 %v9537_v14, %v10670_v39  ;;  %v3517_v59 = vsub.f32 %v9454_v36, %v10660_v40 }
 0x2eb   : > { %v6773_v35 = vunpack.c.l.bf16 %v5745_v13  ;;  %v6774_v56 = vunpack.c.h.bf16 %v5745_v13  ;;  %v1878_v34 = vsub.f32 1.0, %v1302_v5  ;;  %v1895_v21 = vsub.f32 1.0, %v1319_v41 }
 0x2ec   : > { %v6791_v25 = vunpack.c.l.bf16 %v5754_v22  ;;  %v6792_v10 = vunpack.c.h.bf16 %v5754_v22  ;;  %v1896_v63 = vsub.f32 1.0, %v1320_v23  ;;  %v2453_v17 = vmax.f32 %v1877_v50, 0.0 }
 0x2ed   : > { %v7349_v11 = vmul.f32 %v6773_v35, %v6197_v24  ;;  %v7350_v37 = vmul.f32 %v6774_v56, %v6198_v57  ;;  %v2454_v54 = vmax.f32 %v1878_v34, 0.0  ;;  %v2471_v3 = vmax.f32 %v1895_v21, 0.0 }
 0x2ee   : > { %v7367_v62 = vmul.f32 %v6791_v25, %v6215_v45  ;;  %v7368_v30 = vmul.f32 %v6792_v10, %v6216_v20  ;;  %v2472_v8 = vmax.f32 %v1896_v63, 0.0  ;;  %v3518_v0 = vsub.f32 %v9454_v36, %v10670_v39 }
 0x2ef   : > { %v2918_v32 = vpack.c.bf16 %v2454_v54, %v2453_v17  ;;  %v4075_v13 = vand.u32 2147483647, %v3499_v27  ;;  %v4076_v5 = vand.u32 2147483647, %v3500_v33  ;;  %v4093_v50 = vand.u32 2147483647, %v3517_v59 }
 0x2f0   : > { %v7763_v41 = vpack.c.bf16 %v7367_v62, %v7349_v11  ;;  %v7764_v22 = vpack.c.bf16 %v7368_v30, %v7350_v37  ;;  %v2927_v23 = vpack.c.bf16 %v2472_v8, %v2471_v3  ;;  %v4094_v24 = vand.u32 2147483647, %v3518_v0 }
 0x2f1   : > { %v4651_v57 = vsub.f32 1.0, %v4075_v13  ;;  %v4652_v35 = vsub.f32 1.0, %v4076_v5  ;;  %v6091_v56 = vunpack.c.l.bf16 %v2918_v32  ;;  %v4669_v45 = vsub.f32 1.0, %v4093_v50 }
 0x2f2   : > { %8015 = vmatpush.bf16.msra.mxu1 %v7763_v41  ;;  %8041 = vmatpush.bf16.msra.mxu3 %v7764_v22  ;;  %v6109_v20 = vunpack.c.l.bf16 %v2927_v23  ;;  %v6092_v34 = vunpack.c.h.bf16 %v2918_v32  ;;  %v6110_v21 = vunpack.c.h.bf16 %v2927_v23  ;;  %v4670_v25 = vsub.f32 1.0, %v4094_v24 }
 0x2f3   : > { %v5227_v10 = vmax.f32 %v4651_v57, 0.0  ;;  %v5228_v63 = vmax.f32 %v4652_v35, 0.0  ;;  %v795_v27 = vsub.f32 %v9937_v9, %v10339_v28  ;;  %v5245_v62 = vmax.f32 %v4669_v45, 0.0 }
 0x2f4   : > { %v796_v30 = vsub.f32 %v9937_v9, %v10341_v15  ;;  %v813_v33 = vsub.f32 %v10064_v46, %v10339_v28  ;;  %v814_v17 = vsub.f32 %v10064_v46, %v10341_v15  ;;  %v5246_v11 = vmax.f32 %v4670_v25, 0.0 }
 0x2f5   : > { %v5692_v37 = vpack.c.bf16 %v5228_v63, %v5227_v10  ;;  %v1371_v54 = vand.u32 2147483647, %v795_v27  ;;  %v3569_v3 = vsub.f32 %v10068_v6, %v10343_v7  ;;  %v3570_v0 = vsub.f32 %v10068_v6, %v10354_v43 }
 0x2f6   : > { %v1372_v8 = vand.u32 2147483647, %v796_v30  ;;  %v1389_v59 = vand.u32 2147483647, %v813_v33  ;;  %v1390_v32 = vand.u32 2147483647, %v814_v17  ;;  %v5701_v13 = vpack.c.bf16 %v5246_v11, %v5245_v62 }
 0x2f7   : > { %v6667_v5 = vunpack.c.l.bf16 %v5692_v37  ;;  %v6668_v41 = vunpack.c.h.bf16 %v5692_v37  ;;  %v1947_v22 = vsub.f32 1.0, %v1371_v54  ;;  %v3587_v15 = vsub.f32 %v10074_v38, %v10343_v7 }
 0x2f8   : > { %v1948_v28 = vsub.f32 1.0, %v1372_v8  ;;  %v1965_v23 = vsub.f32 1.0, %v1389_v59  ;;  %v1966_v50 = vsub.f32 1.0, %v1390_v32  ;;  %v6685_v24 = vunpack.c.l.bf16 %v5701_v13 }
 0x2f9   : > { %v7243_v57 = vmul.f32 %v6667_v5, %v6091_v56  ;;  %v6686_v35 = vunpack.c.h.bf16 %v5701_v13  ;;  %v7244_v45 = vmul.f32 %v6668_v41, %v6092_v34  ;;  %v2523_v25 = vmax.f32 %v1947_v22, 0.0 }
 0x2fa   : > { %v2524_v10 = vmax.f32 %v1948_v28, 0.0  ;;  %v2541_v63 = vmax.f32 %v1965_v23, 0.0  ;;  %v2542_v27 = vmax.f32 %v1966_v50, 0.0  ;;  %v7261_v30 = vmul.f32 %v6685_v24, %v6109_v20 }
 0x2fb   : > { %v7262_v33 = vmul.f32 %v6686_v35, %v6110_v21  ;;  %v3588_v62 = vsub.f32 %v10074_v38, %v10354_v43  ;;  %v4145_v17 = vand.u32 2147483647, %v3569_v3  ;;  %v4146_v54 = vand.u32 2147483647, %v3570_v0 }
 0x2fc   : > { %v2953_v11 = vpack.c.bf16 %v2524_v10, %v2523_v25  ;;  %v2962_v37 = vpack.c.bf16 %v2542_v27, %v2541_v63  ;;  %v4163_v8 = vand.u32 2147483647, %v3587_v15  ;;  %v7711_v59 = vpack.c.bf16 %v7261_v30, %v7243_v57 }
 0x2fd   : > { %v7712_v7 = vpack.c.bf16 %v7262_v33, %v7244_v45  ;;  %v4164_v32 = vand.u32 2147483647, %v3588_v62  ;;  %v4721_v56 = vsub.f32 1.0, %v4145_v17  ;;  %v4722_v13 = vsub.f32 1.0, %v4146_v54 }
 0x2fe   : > { %v4739_v34 = vsub.f32 1.0, %v4163_v8  ;;  %v6161_v5 = vunpack.c.l.bf16 %v2953_v11  ;;  %v6179_v41 = vunpack.c.l.bf16 %v2962_v37  ;;  %8049 = vmatpush.bf16.msrb.mxu0 %v7711_v59  ;;  %v6162_v22 = vunpack.c.h.bf16 %v2953_v11 }
 0x2ff   : > { %8075 = vmatpush.bf16.msrb.mxu2 %v7712_v7  ;;  %v4740_v20 = vsub.f32 1.0, %v4164_v32  ;;  %v5297_v21 = vmax.f32 %v4721_v56, 0.0  ;;  %v6180_v28 = vunpack.c.h.bf16 %v2962_v37  ;;  %v5298_v43 = vmax.f32 %v4722_v13, 0.0 }
 0x300   : > { %v5315_v3 = vmax.f32 %v4739_v34, 0.0  ;;  %v689_v0 = vsub.f32 %v9623_v1, %v10656_v44  ;;  %v690_v23 = vsub.f32 %v9623_v1, %v10658_v42  ;;  %v707_v15 = vsub.f32 %v9607_v52, %v10656_v44 }
 0x301   : > { %v5316_v50 = vmax.f32 %v4740_v20, 0.0  ;;  %v708_v24 = vsub.f32 %v9607_v52, %v10658_v42  ;;  %v3463_v57 = vsub.f32 %v9649_v26, %v10660_v40  ;;  %v5727_v35 = vpack.c.bf16 %v5298_v43, %v5297_v21 }
 0x302   : > { %v1265_v45 = vand.u32 2147483647, %v689_v0  ;;  %v1266_v25 = vand.u32 2147483647, %v690_v23  ;;  %v3464_v10 = vsub.f32 %v9649_v26, %v10670_v39  ;;  %v1283_v27 = vand.u32 2147483647, %v707_v15 }
 0x303   : > { %v5736_v63 = vpack.c.bf16 %v5316_v50, %v5315_v3  ;;  %v1284_v30 = vand.u32 2147483647, %v708_v24  ;;  %v3481_v33 = vsub.f32 %v9540_v51, %v10660_v40  ;;  %v6737_v62 = vunpack.c.l.bf16 %v5727_v35 }
 0x304   : > { %v6738_v17 = vunpack.c.h.bf16 %v5727_v35  ;;  %v1841_v11 = vsub.f32 1.0, %v1265_v45  ;;  %v1842_v37 = vsub.f32 1.0, %v1266_v25  ;;  %v1859_v59 = vsub.f32 1.0, %v1283_v27 }
 0x305   : > { %v6755_v54 = vunpack.c.l.bf16 %v5736_v63  ;;  %v6756_v8 = vunpack.c.h.bf16 %v5736_v63  ;;  %v1860_v7 = vsub.f32 1.0, %v1284_v30  ;;  %v7313_v32 = vmul.f32 %v6737_v62, %v6161_v5 }
 0x306   : > { %v7314_v56 = vmul.f32 %v6738_v17, %v6162_v22  ;;  %v2417_v13 = vmax.f32 %v1841_v11, 0.0  ;;  %v2418_v34 = vmax.f32 %v1842_v37, 0.0  ;;  %v2435_v43 = vmax.f32 %v1859_v59, 0.0 }
 0x307   : > { %v7331_v20 = vmul.f32 %v6755_v54, %v6179_v41  ;;  %v7332_v21 = vmul.f32 %v6756_v8, %v6180_v28  ;;  %v2436_v3 = vmax.f32 %v1860_v7, 0.0  ;;  %v3482_v23 = vsub.f32 %v9540_v51, %v10670_v39 }
 0x308   : > { %v10742_v0 = vpack.c.bf16 %v2418_v34, %v2417_v13  ;;  %v4039_v50 = vand.u32 2147483647, %v3463_v57  ;;  %v4040_v15 = vand.u32 2147483647, %v3464_v10  ;;  %v4057_v25 = vand.u32 2147483647, %v3481_v33 }
 0x309   : > { %v7745_v24 = vpack.c.bf16 %v7331_v20, %v7313_v32  ;;  %v7746_v35 = vpack.c.bf16 %v7332_v21, %v7314_v56  ;;  %v10746_v45 = vpack.c.bf16 %v2436_v3, %v2435_v43  ;;  %v4058_v5 = vand.u32 2147483647, %v3482_v23  ;;  %v9082_v13 = vld.sshfl [vmem:[#allocation1 + $0x8] sm:$0xff pattern:$0x73625140] }
 0x30a   : > { %v4615_v22 = vsub.f32 1.0, %v4039_v50  ;;  %v4616_v63 = vsub.f32 1.0, %v4040_v15  ;;  %v6055_v41 = vunpack.c.l.bf16 %v10742_v0  ;;  %v4633_v28 = vsub.f32 1.0, %v4057_v25 }
 0x30b   : > { %8016 = vmatpush.bf16.msra.mxu1 %v7745_v24  ;;  %8042 = vmatpush.bf16.msra.mxu3 %v7746_v35  ;;  %v6073_v27 = vunpack.c.l.bf16 %v10746_v45  ;;  %v1049_v30 = vsub.f32 %v9416_v49, %v10656_v44  ;;  %v1050_v57 = vsub.f32 %v9416_v49, %v10658_v42  ;;  %v4634_v10 = vsub.f32 1.0, %v4058_v5 }
 0x30c   : > { %v5191_v62 = vmax.f32 %v4615_v22, 0.0  ;;  %v5192_v17 = vmax.f32 %v4616_v63, 0.0  ;;  %v1067_v33 = vsub.f32 %v9448_v19, %v10656_v44  ;;  %v5209_v11 = vmax.f32 %v4633_v28, 0.0 }
 0x30d   : > { %v1068_v37 = vsub.f32 %v9448_v19, %v10658_v42  ;;  %v1625_v54 = vand.u32 2147483647, %v1049_v30  ;;  %v1626_v8 = vand.u32 2147483647, %v1050_v57  ;;  %v5210_v59 = vmax.f32 %v4634_v10, 0.0 }
 0x30e   : > { %v5674_v7 = vpack.c.bf16 %v5192_v17, %v5191_v62  ;;  %v1643_v32 = vand.u32 2147483647, %v1067_v33  ;;  %v3823_v56 = vsub.f32 %v9412_v47, %v10660_v40  ;;  %8043 = vmatmul.bf16.vlgmr.msra.gmra.mxu3 %v9082_v13  ;;  %8017 = vmatmul.bf16.vlgmr.msra.gmra.mxu1 %v9082_v13  ;;  %v3824_v43 = vsub.f32 %v9412_v47, %v10670_v39 }
 0x30f   : > { %v1644_v34 = vand.u32 2147483647, %v1068_v37  ;;  %v2201_v20 = vsub.f32 1.0, %v1625_v54  ;;  %v2202_v21 = vsub.f32 1.0, %v1626_v8  ;;  %v5683_v3 = vpack.c.bf16 %v5210_v59, %v5209_v11 }
 0x310   : > { %v6631_v23 = vunpack.c.l.bf16 %v5674_v7  ;;  %v2219_v50 = vsub.f32 1.0, %v1643_v32  ;;  %v3841_v15 = vsub.f32 %v9483_v12, %v10660_v40  ;;  %v3842_v5 = vsub.f32 %v9483_v12, %v10670_v39 }
 0x311   : > { %v2220_v24 = vsub.f32 1.0, %v1644_v34  ;;  %v2777_v35 = vmax.f32 %v2201_v20, 0.0  ;;  %v2778_v25 = vmax.f32 %v2202_v21, 0.0  ;;  %v6649_v22 = vunpack.c.l.bf16 %v5683_v3 }
 0x312   : > { %v7207_v63 = vmul.f32 %v6631_v23, %v6055_v41  ;;  %v2795_v28 = vmax.f32 %v2219_v50, 0.0  ;;  %v4399_v30 = vand.u32 2147483647, %v3823_v56  ;;  %v4400_v62 = vand.u32 2147483647, %v3824_v43 }
 0x313   : > { %v2796_v57 = vmax.f32 %v2220_v24, 0.0  ;;  %v3080_v10 = vpack.c.bf16 %v2778_v25, %v2777_v35  ;;  %v4417_v17 = vand.u32 2147483647, %v3841_v15  ;;  %v7225_v33 = vmul.f32 %v6649_v22, %v6073_v27 }
 0x314   : > { %v4418_v11 = vand.u32 2147483647, %v3842_v5  ;;  %v4975_v37 = vsub.f32 1.0, %v4399_v30  ;;  %v6056_v54 = vunpack.c.h.bf16 %v10742_v0  ;;  %v4976_v59 = vsub.f32 1.0, %v4400_v62 }
 0x315   : > { %v3089_v8 = vpack.c.bf16 %v2796_v57, %v2795_v28  ;;  %v4993_v32 = vsub.f32 1.0, %v4417_v17  ;;  %v6415_v13 = vunpack.c.l.bf16 %v3080_v10  ;;  %v7693_v34 = vpack.c.bf16 %v7225_v33, %v7207_v63 }
 0x316   : > { %v4994_v20 = vsub.f32 1.0, %v4418_v11  ;;  %v5551_v21 = vmax.f32 %v4975_v37, 0.0  ;;  %v6074_v41 = vunpack.c.h.bf16 %v10746_v45  ;;  %v5552_v23 = vmax.f32 %v4976_v59, 0.0 }
 0x317   : > { %v5569_v56 = vmax.f32 %v4993_v32, 0.0  ;;  %v6433_v50 = vunpack.c.l.bf16 %v3089_v8  ;;  %v6632_v24 = vunpack.c.h.bf16 %v5674_v7  ;;  %8050 = vmatpush.bf16.msrb.mxu0 %v7693_v34  ;;  %v6650_v27 = vunpack.c.h.bf16 %v5683_v3 }
 0x318   : > { %v5570_v43 = vmax.f32 %v4994_v20, 0.0  ;;  %v6416_v15 = vunpack.c.h.bf16 %v3080_v10  ;;  %v6434_v35 = vunpack.c.h.bf16 %v3089_v8  ;;  %v5854_v25 = vpack.c.bf16 %v5552_v23, %v5551_v21 }
 0x319   : > { %v7208_v0 = vmul.f32 %v6632_v24, %v6056_v54  ;;  %v653_v5 = vsub.f32 %v9577_v60, %v10656_v44  ;;  %v654_v22 = vsub.f32 %v9577_v60, %v10658_v42  ;;  %v7226_v28 = vmul.f32 %v6650_v27, %v6074_v41 }
 0x31a   : > { %v5863_v63 = vpack.c.bf16 %v5570_v43, %v5569_v56  ;;  %v671_v45 = vsub.f32 %v9704_v18, %v10656_v44  ;;  %v672_v7 = vsub.f32 %v9704_v18, %v10658_v42  ;;  %v6991_v30 = vunpack.c.l.bf16 %v5854_v25 }
 0x31b   : > { %v6992_v3 = vunpack.c.h.bf16 %v5854_v25  ;;  %v1229_v57 = vand.u32 2147483647, %v653_v5  ;;  %v1230_v10 = vand.u32 2147483647, %v654_v22  ;;  %v7694_v17 = vpack.c.bf16 %v7226_v28, %v7208_v0 }
 0x31c   : > { %v7009_v62 = vunpack.c.l.bf16 %v5863_v63  ;;  %v7010_v33 = vunpack.c.h.bf16 %v5863_v63  ;;  %v1247_v11 = vand.u32 2147483647, %v671_v45  ;;  %v7567_v37 = vmul.f32 %v6991_v30, %v6415_v13 }
 0x31d   : > { %v7568_v54 = vmul.f32 %v6992_v3, %v6416_v15  ;;  %v1248_v8 = vand.u32 2147483647, %v672_v7  ;;  %v1805_v59 = vsub.f32 1.0, %v1229_v57  ;;  %8076 = vmatpush.bf16.msrb.mxu2 %v7694_v17  ;;  %v1806_v20 = vsub.f32 1.0, %v1230_v10 }
 0x31e   : > { %v7585_v32 = vmul.f32 %v7009_v62, %v6433_v50  ;;  %v7586_v34 = vmul.f32 %v7010_v33, %v6434_v35  ;;  %v1823_v21 = vsub.f32 1.0, %v1247_v11  ;;  %v3427_v56 = vsub.f32 %v9729_v55, %v10660_v40  ;;  %v13282_v62 = vld [vmem:[#allocation25_spill] sm:$0xff] }
 0x31f   : > { %v1824_v41 = vsub.f32 1.0, %v1248_v8  ;;  %v2381_v23 = vmax.f32 %v1805_v59, 0.0  ;;  %v3428_v24 = vsub.f32 %v9729_v55, %v10670_v39  ;;  %v2382_v25 = vmax.f32 %v1806_v20, 0.0  ;;  %v13283_v20 = vld [vmem:[#allocation23_spill] sm:$0xff] }
 0x320   : > { %v7873_v43 = vpack.c.bf16 %v7585_v32, %v7567_v37  ;;  %v7874_v27 = vpack.c.bf16 %v7586_v34, %v7568_v54  ;;  %v2399_v13 = vmax.f32 %v1823_v21, 0.0  ;;  %v3445_v50 = vsub.f32 %v13202_v2, %v10660_v40 }
 0x321   : > { %v2400_v15 = vmax.f32 %v1824_v41, 0.0  ;;  %v3446_v35 = vsub.f32 %v13202_v2, %v10670_v39  ;;  %v4003_v0 = vand.u32 2147483647, %v3427_v56  ;;  %v10784_v5 = vpack.c.bf16 %v2382_v25, %v2381_v23 }
 0x322   : > { %8061 = vmatpush.bf16.msrb.mxu1 %v7873_v43  ;;  %8087 = vmatpush.bf16.msrb.mxu3 %v7874_v27  ;;  %v4004_v22 = vand.u32 2147483647, %v3428_v24  ;;  %v1013_v63 = vsub.f32 %v13203_v16, %v10656_v44  ;;  %v1014_v28 = vsub.f32 %v13203_v16, %v10658_v42  ;;  %v4021_v7 = vand.u32 2147483647, %v3445_v50 }
 0x323   : > { %v10790_v45 = vpack.c.bf16 %v2400_v15, %v2399_v13  ;;  %v4022_v30 = vand.u32 2147483647, %v3446_v35  ;;  %v4579_v3 = vsub.f32 1.0, %v4003_v0  ;;  %v6019_v10 = vunpack.c.l.bf16 %v10784_v5  ;;  %v13284_v0 = vld [vmem:[#allocation15_spill] sm:$0xff] }
 0x324   : > { %v4580_v57 = vsub.f32 1.0, %v4004_v22  ;;  %v1031_v17 = vsub.f32 %v13282_v62, %v10656_v44  ;;  %v1032_v33 = vsub.f32 %v13282_v62, %v10658_v42  ;;  %v4597_v11 = vsub.f32 1.0, %v4021_v7 }
 0x325   : > { %v4598_v37 = vsub.f32 1.0, %v4022_v30  ;;  %v5155_v54 = vmax.f32 %v4579_v3, 0.0  ;;  %v6037_v8 = vunpack.c.l.bf16 %v10790_v45  ;;  %v1589_v32 = vand.u32 2147483647, %v1013_v63 }
 0x326   : > { %v5156_v59 = vmax.f32 %v4580_v57, 0.0  ;;  %v1590_v34 = vand.u32 2147483647, %v1014_v28  ;;  %v3787_v21 = vsub.f32 %v13283_v20, %v10660_v40  ;;  %v5173_v41 = vmax.f32 %v4597_v11, 0.0 }
 0x327   : > { %v5174_v23 = vmax.f32 %v4598_v37, 0.0  ;;  %v1607_v56 = vand.u32 2147483647, %v1031_v17  ;;  %v1608_v24 = vand.u32 2147483647, %v1032_v33  ;;  %v2165_v27 = vsub.f32 1.0, %v1589_v32 }
 0x328   : > { %v5656_v43 = vpack.c.bf16 %v5156_v59, %v5155_v54  ;;  %v2166_v25 = vsub.f32 1.0, %v1590_v34  ;;  %v3788_v13 = vsub.f32 %v13283_v20, %v10670_v39  ;;  %v3805_v22 = vsub.f32 %v13284_v0, %v10660_v40 }
 0x329   : > { %v5665_v15 = vpack.c.bf16 %v5174_v23, %v5173_v41  ;;  %v2183_v50 = vsub.f32 1.0, %v1607_v56  ;;  %v2184_v35 = vsub.f32 1.0, %v1608_v24  ;;  %v2741_v28 = vmax.f32 %v2165_v27, 0.0 }
 0x32a   : > { %v6595_v63 = vunpack.c.l.bf16 %v5656_v43  ;;  %v2742_v7 = vmax.f32 %v2166_v25, 0.0  ;;  %v3806_v30 = vsub.f32 %v13284_v0, %v10670_v39  ;;  %v4363_v33 = vand.u32 2147483647, %v3787_v21 }
 0x32b   : > { %v6613_v3 = vunpack.c.l.bf16 %v5665_v15  ;;  %v2759_v57 = vmax.f32 %v2183_v50, 0.0  ;;  %v2760_v17 = vmax.f32 %v2184_v35, 0.0  ;;  %v4364_v54 = vand.u32 2147483647, %v3788_v13 }
 0x32c   : > { %v7171_v11 = vmul.f32 %v6595_v63, %v6019_v10  ;;  %v3062_v37 = vpack.c.bf16 %v2742_v7, %v2741_v28  ;;  %v4381_v59 = vand.u32 2147483647, %v3805_v22  ;;  %v4382_v41 = vand.u32 2147483647, %v3806_v30 }
 0x32d   : > { %v7189_v32 = vmul.f32 %v6613_v3, %v6037_v8  ;;  %v3071_v34 = vpack.c.bf16 %v2760_v17, %v2759_v57  ;;  %v4939_v23 = vsub.f32 1.0, %v4363_v33  ;;  %v4940_v56 = vsub.f32 1.0, %v4364_v54  ;;  %v13285_v17 = vld [vmem:[#allocation41_spill] sm:$0xff] }
 0x32e   : > { %v4957_v24 = vsub.f32 1.0, %v4381_v59  ;;  %v6379_v20 = vunpack.c.l.bf16 %v3062_v37  ;;  %v6020_v27 = vunpack.c.h.bf16 %v10784_v5  ;;  %v4958_v62 = vsub.f32 1.0, %v4382_v41 }
 0x32f   : > { %v7675_v25 = vpack.c.bf16 %v7189_v32, %v7171_v11  ;;  %v5515_v0 = vmax.f32 %v4939_v23, 0.0  ;;  %v6397_v16 = vunpack.c.l.bf16 %v3071_v34  ;;  %v5516_v50 = vmax.f32 %v4940_v56, 0.0 }
 0x330   : > { %v5533_v35 = vmax.f32 %v4957_v24, 0.0  ;;  %v6038_v10 = vunpack.c.h.bf16 %v10790_v45  ;;  %v6596_v21 = vunpack.c.h.bf16 %v5656_v43  ;;  %v5534_v13 = vmax.f32 %v4958_v62, 0.0 }
 0x331   : > { %8051 = vmatpush.bf16.msrb.mxu0 %v7675_v25  ;;  %v6614_v8 = vunpack.c.h.bf16 %v5665_v15  ;;  %v6380_v22 = vunpack.c.h.bf16 %v3062_v37  ;;  %v6398_v63 = vunpack.c.h.bf16 %v3071_v34  ;;  %v5836_v28 = vpack.c.bf16 %v5516_v50, %v5515_v0 }
 0x332   : > { %v7172_v7 = vmul.f32 %v6596_v21, %v6020_v27  ;;  %v617_v30 = vsub.f32 %v13207_v4, %v10656_v44  ;;  %v618_v5 = vsub.f32 %v13207_v4, %v10658_v42  ;;  %v5845_v3 = vpack.c.bf16 %v5534_v13, %v5533_v35 }
 0x333   : > { %v7190_v57 = vmul.f32 %v6614_v8, %v6038_v10  ;;  %v635_v33 = vsub.f32 %v13285_v17, %v10656_v44  ;;  %v636_v45 = vsub.f32 %v13285_v17, %v10658_v42  ;;  %v6955_v62 = vunpack.c.l.bf16 %v5836_v28  ;;  %v13286_v10 = vld [vmem:[#allocation44_spill] sm:$0xff] }
 0x334   : > { %v6956_v43 = vunpack.c.h.bf16 %v5836_v28  ;;  %v1193_v15 = vand.u32 2147483647, %v617_v30  ;;  %v1194_v11 = vand.u32 2147483647, %v618_v5  ;;  %v6973_v0 = vunpack.c.l.bf16 %v5845_v3  ;;  %v13287_v30 = vld [vmem:[#allocation37_spill] sm:$0xff] }
 0x335   : > { %v7676_v37 = vpack.c.bf16 %v7190_v57, %v7172_v7  ;;  %v6974_v54 = vunpack.c.h.bf16 %v5845_v3  ;;  %v1211_v59 = vand.u32 2147483647, %v635_v33  ;;  %v7531_v32 = vmul.f32 %v6955_v62, %v6379_v20  ;;  %v13288_v33 = vld [vmem:[#allocation18_spill] sm:$0xff] }
 0x336   : > { %v7532_v34 = vmul.f32 %v6956_v43, %v6380_v22  ;;  %v1212_v41 = vand.u32 2147483647, %v636_v45  ;;  %v1769_v23 = vsub.f32 1.0, %v1193_v15  ;;  %v7549_v56 = vmul.f32 %v6973_v0, %v6397_v16 }
 0x337   : > { %8077 = vmatpush.bf16.msrb.mxu2 %v7676_v37  ;;  %v7550_v24 = vmul.f32 %v6974_v54, %v6398_v63  ;;  %v1770_v27 = vsub.f32 1.0, %v1194_v11  ;;  %v1787_v25 = vsub.f32 1.0, %v1211_v59  ;;  %v3391_v21 = vsub.f32 %v13286_v10, %v10660_v40  ;;  %v13289_v59 = vld [vmem:[#allocation28_spill] sm:$0xff] }
 0x338   : > { %v1788_v50 = vsub.f32 1.0, %v1212_v41  ;;  %v2345_v35 = vmax.f32 %v1769_v23, 0.0  ;;  %v3392_v13 = vsub.f32 %v13286_v10, %v10670_v39  ;;  %v7855_v8 = vpack.c.bf16 %v7549_v56, %v7531_v32 }
 0x339   : > { %v7856_v28 = vpack.c.bf16 %v7550_v24, %v7532_v34  ;;  %v2346_v7 = vmax.f32 %v1770_v27, 0.0  ;;  %v2363_v20 = vmax.f32 %v1787_v25, 0.0  ;;  %v3409_v16 = vsub.f32 %v13287_v30, %v10660_v40 }
 0x33a   : > { %v2364_v22 = vmax.f32 %v1788_v50, 0.0  ;;  %v3410_v63 = vsub.f32 %v13287_v30, %v10670_v39  ;;  %v3967_v5 = vand.u32 2147483647, %v3391_v21  ;;  %8062 = vmatpush.bf16.msrb.mxu1 %v7855_v8  ;;  %v3968_v57 = vand.u32 2147483647, %v3392_v13 }
 0x33b   : > { %8088 = vmatpush.bf16.msrb.mxu3 %v7856_v28  ;;  %v10824_v3 = vpack.c.bf16 %v2346_v7, %v2345_v35  ;;  %v977_v45 = vsub.f32 %v13288_v33, %v10656_v44  ;;  %v978_v62 = vsub.f32 %v13288_v33, %v10658_v42  ;;  %v3985_v15 = vand.u32 2147483647, %v3409_v16  ;;  %v13290_v35 = vld [vmem:[#allocation11_spill] sm:$0xff] }
 0x33c   : > { %v10830_v43 = vpack.c.bf16 %v2364_v22, %v2363_v20  ;;  %v3986_v11 = vand.u32 2147483647, %v3410_v63  ;;  %v4543_v0 = vsub.f32 1.0, %v3967_v5  ;;  %v4544_v37 = vsub.f32 1.0, %v3968_v57 }
 0x33d   : > { %v5983_v54 = vunpack.c.l.bf16 %v10824_v3  ;;  %v995_v32 = vsub.f32 %v13289_v59, %v10656_v44  ;;  %v996_v34 = vsub.f32 %v13289_v59, %v10658_v42  ;;  %v4561_v41 = vsub.f32 1.0, %v3985_v15 }
 0x33e   : > { %v4562_v23 = vsub.f32 1.0, %v3986_v11  ;;  %v5119_v56 = vmax.f32 %v4543_v0, 0.0  ;;  %v6001_v24 = vunpack.c.l.bf16 %v10830_v43  ;;  %v5120_v27 = vmax.f32 %v4544_v37, 0.0  ;;  %v13291_v11 = vld [vmem:[#allocation29_spill] sm:$0xff] }
 0x33f   : > { %v1553_v25 = vand.u32 2147483647, %v977_v45  ;;  %v1554_v50 = vand.u32 2147483647, %v978_v62  ;;  %v3751_v21 = vsub.f32 %v13290_v35, %v10660_v40  ;;  %v5137_v13 = vmax.f32 %v4561_v41, 0.0 }
 0x340   : > { %v5138_v8 = vmax.f32 %v4562_v23, 0.0  ;;  %v1571_v28 = vand.u32 2147483647, %v995_v32  ;;  %v1572_v7 = vand.u32 2147483647, %v996_v34  ;;  %v5638_v20 = vpack.c.bf16 %v5120_v27, %v5119_v56 }
 0x341   : > { %v2129_v22 = vsub.f32 1.0, %v1553_v25  ;;  %v2130_v16 = vsub.f32 1.0, %v1554_v50  ;;  %v3752_v63 = vsub.f32 %v13290_v35, %v10670_v39  ;;  %v3769_v45 = vsub.f32 %v13291_v11, %v10660_v40 }
 0x342   : > { %v5647_v5 = vpack.c.bf16 %v5138_v8, %v5137_v13  ;;  %v2147_v57 = vsub.f32 1.0, %v1571_v28  ;;  %v2148_v15 = vsub.f32 1.0, %v1572_v7  ;;  %v6559_v62 = vunpack.c.l.bf16 %v5638_v20 }
 0x343   : > { %v2705_v0 = vmax.f32 %v2129_v22, 0.0  ;;  %v2706_v37 = vmax.f32 %v2130_v16, 0.0  ;;  %v3770_v41 = vsub.f32 %v13291_v11, %v10670_v39  ;;  %v4327_v56 = vand.u32 2147483647, %v3751_v21 }
 0x344   : > { %v6577_v32 = vunpack.c.l.bf16 %v5647_v5  ;;  %v2723_v34 = vmax.f32 %v2147_v57, 0.0  ;;  %v2724_v23 = vmax.f32 %v2148_v15, 0.0  ;;  %v7135_v27 = vmul.f32 %v6559_v62, %v5983_v54 }
 0x345   : > { %v3044_v25 = vpack.c.bf16 %v2706_v37, %v2705_v0  ;;  %v4328_v50 = vand.u32 2147483647, %v3752_v63  ;;  %v4345_v35 = vand.u32 2147483647, %v3769_v45  ;;  %v4346_v28 = vand.u32 2147483647, %v3770_v41 }
 0x346   : > { %v7153_v13 = vmul.f32 %v6577_v32, %v6001_v24  ;;  %v3053_v8 = vpack.c.bf16 %v2724_v23, %v2723_v34  ;;  %v4903_v7 = vsub.f32 1.0, %v4327_v56  ;;  %v5984_v22 = vunpack.c.h.bf16 %v10824_v3 }
 0x347   : > { %v4904_v59 = vsub.f32 1.0, %v4328_v50  ;;  %v4921_v33 = vsub.f32 1.0, %v4345_v35  ;;  %v6343_v30 = vunpack.c.l.bf16 %v3044_v25  ;;  %v4922_v10 = vsub.f32 1.0, %v4346_v28  ;;  %v13292_v35 = vld [vmem:[#allocation40_spill] sm:$0xff] }
 0x348   : > { %v7657_v16 = vpack.c.bf16 %v7153_v13, %v7135_v27  ;;  %v5479_v11 = vmax.f32 %v4903_v7, 0.0  ;;  %v6361_v17 = vunpack.c.l.bf16 %v3053_v8  ;;  %v6002_v54 = vunpack.c.h.bf16 %v10830_v43 }
 0x349   : > { %v5480_v57 = vmax.f32 %v4904_v59, 0.0  ;;  %v5497_v15 = vmax.f32 %v4921_v33, 0.0  ;;  %v6560_v21 = vunpack.c.h.bf16 %v5638_v20  ;;  %v5498_v63 = vmax.f32 %v4922_v10, 0.0  ;;  %v13293_v33 = vld [vmem:[#allocation49_spill] sm:$0xff] }
 0x34a   : > { %8052 = vmatpush.bf16.msrb.mxu0 %v7657_v16  ;;  %v6578_v24 = vunpack.c.h.bf16 %v5647_v5  ;;  %v6344_v45 = vunpack.c.h.bf16 %v3044_v25  ;;  %v6362_v62 = vunpack.c.h.bf16 %v3053_v8  ;;  %v581_v41 = vsub.f32 %v13292_v35, %v10656_v44 }
 0x34b   : > { %v5818_v0 = vpack.c.bf16 %v5480_v57, %v5479_v11  ;;  %v7136_v37 = vmul.f32 %v6560_v21, %v5984_v22  ;;  %v582_v3 = vsub.f32 %v13292_v35, %v10658_v42  ;;  %v5827_v32 = vpack.c.bf16 %v5498_v63, %v5497_v15  ;;  %v13294_v21 = vld [vmem:[#allocation51_spill] sm:$0xff] }
 0x34c   : > { %v7154_v34 = vmul.f32 %v6578_v24, %v6002_v54  ;;  %v599_v59 = vsub.f32 %v13293_v33, %v10656_v44  ;;  %v600_v43 = vsub.f32 %v13293_v33, %v10658_v42  ;;  %v1157_v5 = vand.u32 2147483647, %v581_v41 }
 0x34d   : > { %v6919_v10 = vunpack.c.l.bf16 %v5818_v0  ;;  %v6920_v20 = vunpack.c.h.bf16 %v5818_v0  ;;  %v1158_v23 = vand.u32 2147483647, %v582_v3  ;;  %v6937_v11 = vunpack.c.l.bf16 %v5827_v32  ;;  %v13295_v3 = vld [vmem:[#allocation45_spill] sm:$0xff] }
 0x34e   : > { %v7658_v56 = vpack.c.bf16 %v7154_v34, %v7136_v37  ;;  %v6938_v27 = vunpack.c.h.bf16 %v5827_v32  ;;  %v1175_v25 = vand.u32 2147483647, %v599_v59  ;;  %v1176_v8 = vand.u32 2147483647, %v600_v43  ;;  %v13296_v43 = vld [vmem:[#allocation26_spill] sm:$0xff] }
 0x34f   : > { %v7495_v50 = vmul.f32 %v6919_v10, %v6343_v30  ;;  %v7496_v13 = vmul.f32 %v6920_v20, %v6344_v45  ;;  %v1733_v28 = vsub.f32 1.0, %v1157_v5  ;;  %v7513_v7 = vmul.f32 %v6937_v11, %v6361_v17 }
 0x350   : > { %8078 = vmatpush.bf16.msrb.mxu2 %v7658_v56  ;;  %v7514_v22 = vmul.f32 %v6938_v27, %v6362_v62  ;;  %v1734_v16 = vsub.f32 1.0, %v1158_v23  ;;  %v1751_v57 = vsub.f32 1.0, %v1175_v25  ;;  %v1752_v15 = vsub.f32 1.0, %v1176_v8 }
 0x351   : > { %v2309_v54 = vmax.f32 %v1733_v28, 0.0  ;;  %v3355_v63 = vsub.f32 %v13294_v21, %v10660_v40  ;;  %v3356_v24 = vsub.f32 %v13294_v21, %v10670_v39  ;;  %v7837_v0 = vpack.c.bf16 %v7513_v7, %v7495_v50  ;;  %v13297_v50 = vld [vmem:[#allocation31_spill] sm:$0xff] }
 0x352   : > { %v7838_v37 = vpack.c.bf16 %v7514_v22, %v7496_v13  ;;  %v2310_v41 = vmax.f32 %v1734_v16, 0.0  ;;  %v2327_v30 = vmax.f32 %v1751_v57, 0.0  ;;  %v2328_v45 = vmax.f32 %v1752_v15, 0.0 }
 0x353   : > { %v3373_v17 = vsub.f32 %v13295_v3, %v10660_v40  ;;  %v3374_v62 = vsub.f32 %v13295_v3, %v10670_v39  ;;  %v3931_v32 = vand.u32 2147483647, %v3355_v63  ;;  %8063 = vmatpush.bf16.msrb.mxu1 %v7837_v0  ;;  %v3932_v59 = vand.u32 2147483647, %v3356_v24  ;;  %v13298_v63 = vld [vmem:[#allocation38_spill] sm:$0xff] }
 0x354   : > { %8089 = vmatpush.bf16.msrb.mxu3 %v7838_v37  ;;  %v10864_v34 = vpack.c.bf16 %v2310_v41, %v2309_v54  ;;  %v941_v10 = vsub.f32 %v13296_v43, %v10656_v44  ;;  %v942_v20 = vsub.f32 %v13296_v43, %v10658_v42  ;;  %v10870_v5 = vpack.c.bf16 %v2328_v45, %v2327_v30 }
 0x355   : > { %v3949_v23 = vand.u32 2147483647, %v3373_v17  ;;  %v3950_v11 = vand.u32 2147483647, %v3374_v62  ;;  %v4507_v56 = vsub.f32 1.0, %v3931_v32  ;;  %v4508_v27 = vsub.f32 1.0, %v3932_v59 }
 0x356   : > { %v5947_v25 = vunpack.c.l.bf16 %v10864_v34  ;;  %v959_v13 = vsub.f32 %v13297_v50, %v10656_v44  ;;  %v960_v8 = vsub.f32 %v13297_v50, %v10658_v42  ;;  %v5965_v16 = vunpack.c.l.bf16 %v10870_v5 }
 0x357   : > { %v4525_v28 = vsub.f32 1.0, %v3949_v23  ;;  %v4526_v7 = vsub.f32 1.0, %v3950_v11  ;;  %v5083_v22 = vmax.f32 %v4507_v56, 0.0  ;;  %v5084_v57 = vmax.f32 %v4508_v27, 0.0  ;;  %v13299_v56 = vld [vmem:[#allocation30_spill] sm:$0xff] }
 0x358   : > { %v1517_v15 = vand.u32 2147483647, %v941_v10  ;;  %v1518_v54 = vand.u32 2147483647, %v942_v20  ;;  %v3715_v24 = vsub.f32 %v13298_v63, %v10660_v40  ;;  %v1535_v41 = vand.u32 2147483647, %v959_v13 }
 0x359   : > { %v5101_v0 = vmax.f32 %v4525_v28, 0.0  ;;  %v5102_v37 = vmax.f32 %v4526_v7, 0.0  ;;  %v1536_v30 = vand.u32 2147483647, %v960_v8  ;;  %v5620_v45 = vpack.c.bf16 %v5084_v57, %v5083_v22 }
 0x35a   : > { %v2093_v17 = vsub.f32 1.0, %v1517_v15  ;;  %v2094_v62 = vsub.f32 1.0, %v1518_v54  ;;  %v3716_v32 = vsub.f32 %v13298_v63, %v10670_v39  ;;  %v2111_v23 = vsub.f32 1.0, %v1535_v41 }
 0x35b   : > { %v5629_v59 = vpack.c.bf16 %v5102_v37, %v5101_v0  ;;  %v2112_v11 = vsub.f32 1.0, %v1536_v30  ;;  %v3733_v10 = vsub.f32 %v13299_v56, %v10660_v40  ;;  %v6523_v20 = vunpack.c.l.bf16 %v5620_v45 }
 0x35c   : > { %v2669_v27 = vmax.f32 %v2093_v17, 0.0  ;;  %v2670_v50 = vmax.f32 %v2094_v62, 0.0  ;;  %v3734_v28 = vsub.f32 %v13299_v56, %v10670_v39  ;;  %v2687_v8 = vmax.f32 %v2111_v23, 0.0 }
 0x35d   : > { %v6541_v13 = vunpack.c.l.bf16 %v5629_v59  ;;  %v2688_v7 = vmax.f32 %v2112_v11, 0.0  ;;  %v4291_v22 = vand.u32 2147483647, %v3715_v24  ;;  %v7099_v57 = vmul.f32 %v6523_v20, %v5947_v25 }
 0x35e   : > { %v3026_v15 = vpack.c.bf16 %v2670_v50, %v2669_v27  ;;  %v4292_v54 = vand.u32 2147483647, %v3716_v32  ;;  %v4309_v63 = vand.u32 2147483647, %v3733_v10  ;;  %v4310_v41 = vand.u32 2147483647, %v3734_v28 }
 0x35f   : > { %v7117_v0 = vmul.f32 %v6541_v13, %v5965_v16  ;;  %v3035_v37 = vpack.c.bf16 %v2688_v7, %v2687_v8  ;;  %v4867_v30 = vsub.f32 1.0, %v4291_v22  ;;  %v5948_v17 = vunpack.c.h.bf16 %v10864_v34 }
 0x360   : > { %v4868_v43 = vsub.f32 1.0, %v4292_v54  ;;  %v4885_v3 = vsub.f32 1.0, %v4309_v63  ;;  %v6307_v21 = vunpack.c.l.bf16 %v3026_v15  ;;  %v4886_v33 = vsub.f32 1.0, %v4310_v41 }
 0x361   : > { %v7639_v62 = vpack.c.bf16 %v7117_v0, %v7099_v57  ;;  %v5443_v56 = vmax.f32 %v4867_v30, 0.0  ;;  %v6325_v35 = vunpack.c.l.bf16 %v3035_v37  ;;  %v5966_v25 = vunpack.c.h.bf16 %v10870_v5 }
 0x362   : > { %v5444_v23 = vmax.f32 %v4868_v43, 0.0  ;;  %v5461_v11 = vmax.f32 %v4885_v3, 0.0  ;;  %v6524_v50 = vunpack.c.h.bf16 %v5620_v45  ;;  %v5462_v24 = vmax.f32 %v4886_v33, 0.0 }
 0x363   : > { %8053 = vmatpush.bf16.msrb.mxu0 %v7639_v62  ;;  %v6542_v16 = vunpack.c.h.bf16 %v5629_v59  ;;  %v6308_v32 = vunpack.c.h.bf16 %v3026_v15  ;;  %v6326_v10 = vunpack.c.h.bf16 %v3035_v37  ;;  %v545_v63 = vsub.f32 %v13222_v31, %v10656_v44 }
 0x364   : > { %v5800_v20 = vpack.c.bf16 %v5444_v23, %v5443_v56  ;;  %v7100_v27 = vmul.f32 %v6524_v50, %v5948_v17  ;;  %v546_v34 = vsub.f32 %v13222_v31, %v10658_v42  ;;  %v5809_v28 = vpack.c.bf16 %v5462_v24, %v5461_v11 }
 0x365   : > { %v7118_v13 = vmul.f32 %v6542_v16, %v5966_v25  ;;  %v563_v3 = vsub.f32 %v9933_v53, %v10656_v44  ;;  %v564_v43 = vsub.f32 %v9933_v53, %v10658_v42  ;;  %v1121_v45 = vand.u32 2147483647, %v545_v63 }
 0x366   : > { %v6883_v33 = vunpack.c.l.bf16 %v5800_v20  ;;  %v6884_v5 = vunpack.c.h.bf16 %v5800_v20  ;;  %v1122_v59 = vand.u32 2147483647, %v546_v34  ;;  %v6901_v56 = vunpack.c.l.bf16 %v5809_v28  ;;  %v13300_v20 = vld [vmem:[#allocation52_spill] sm:$0xff] }
 0x367   : > { %v7640_v8 = vpack.c.bf16 %v7118_v13, %v7100_v27  ;;  %v6902_v7 = vunpack.c.h.bf16 %v5809_v28  ;;  %v1139_v22 = vand.u32 2147483647, %v563_v3  ;;  %v1140_v54 = vand.u32 2147483647, %v564_v43  ;;  %v13301_v28 = vld [vmem:[#allocation33_spill] sm:$0xff] }
 0x368   : > { %v7459_v57 = vmul.f32 %v6883_v33, %v6307_v21  ;;  %v7460_v15 = vmul.f32 %v6884_v5, %v6308_v32  ;;  %v1697_v0 = vsub.f32 1.0, %v1121_v45  ;;  %v7477_v37 = vmul.f32 %v6901_v56, %v6325_v35 }
 0x369   : > { %8079 = vmatpush.bf16.msrb.mxu2 %v7640_v8  ;;  %v7478_v41 = vmul.f32 %v6902_v7, %v6326_v10  ;;  %v1698_v30 = vsub.f32 1.0, %v1122_v59  ;;  %v1715_v17 = vsub.f32 1.0, %v1139_v22  ;;  %v1716_v62 = vsub.f32 1.0, %v1140_v54  ;;  %v13302_v8 = vld [vmem:[#allocation36_spill] sm:$0xff] }
 0x36a   : > { %v2273_v23 = vmax.f32 %v1697_v0, 0.0  ;;  %v3319_v11 = vsub.f32 %v9954_v58, %v10660_v40  ;;  %v3320_v25 = vsub.f32 %v9954_v58, %v10670_v39  ;;  %v7819_v50 = vpack.c.bf16 %v7477_v37, %v7459_v57 }
 0x36b   : > { %v7820_v24 = vpack.c.bf16 %v7478_v41, %v7460_v15  ;;  %v2274_v16 = vmax.f32 %v1698_v30, 0.0  ;;  %v2291_v21 = vmax.f32 %v1715_v17, 0.0  ;;  %v2292_v32 = vmax.f32 %v1716_v62, 0.0  ;;  %v13303_v17 = vld [vmem:[#allocation13_spill] sm:$0xff] }
 0x36c   : > { %v3337_v35 = vsub.f32 %v13300_v20, %v10660_v40  ;;  %v3338_v10 = vsub.f32 %v13300_v20, %v10670_v39  ;;  %v3895_v27 = vand.u32 2147483647, %v3319_v11  ;;  %8064 = vmatpush.bf16.msrb.mxu1 %v7819_v50  ;;  %v3896_v34 = vand.u32 2147483647, %v3320_v25 }
 0x36d   : > { %8090 = vmatpush.bf16.msrb.mxu3 %v7820_v24  ;;  %v10904_v63 = vpack.c.bf16 %v2274_v16, %v2273_v23  ;;  %v905_v13 = vsub.f32 %v13301_v28, %v10656_v44  ;;  %v906_v3 = vsub.f32 %v13301_v28, %v10658_v42  ;;  %v10910_v43 = vpack.c.bf16 %v2292_v32, %v2291_v21 }
 0x36e   : > { %v3913_v33 = vand.u32 2147483647, %v3337_v35  ;;  %v3914_v5 = vand.u32 2147483647, %v3338_v10  ;;  %v4471_v45 = vsub.f32 1.0, %v3895_v27  ;;  %v4472_v59 = vsub.f32 1.0, %v3896_v34 }
 0x36f   : > { %v5911_v56 = vunpack.c.l.bf16 %v10904_v63  ;;  %v923_v7 = vsub.f32 %v13302_v8, %v10656_v44  ;;  %v924_v22 = vsub.f32 %v13302_v8, %v10658_v42  ;;  %v5929_v0 = vunpack.c.l.bf16 %v10910_v43  ;;  %v13304_v34 = vld [vmem:[#allocation47_spill] sm:$0xff] }
 0x370   : > { %v4489_v57 = vsub.f32 1.0, %v3913_v33  ;;  %v4490_v15 = vsub.f32 1.0, %v3914_v5  ;;  %v5047_v54 = vmax.f32 %v4471_v45, 0.0  ;;  %v5048_v37 = vmax.f32 %v4472_v59, 0.0 }
 0x371   : > { %v1481_v41 = vand.u32 2147483647, %v905_v13  ;;  %v1482_v30 = vand.u32 2147483647, %v906_v3  ;;  %v3679_v62 = vsub.f32 %v13303_v17, %v10660_v40  ;;  %v1499_v25 = vand.u32 2147483647, %v923_v7 }
 0x372   : > { %v5065_v23 = vmax.f32 %v4489_v57, 0.0  ;;  %v5066_v11 = vmax.f32 %v4490_v15, 0.0  ;;  %v1500_v50 = vand.u32 2147483647, %v924_v22  ;;  %v5602_v24 = vpack.c.bf16 %v5048_v37, %v5047_v54 }
 0x373   : > { %v2057_v16 = vsub.f32 1.0, %v1481_v41  ;;  %v2058_v21 = vsub.f32 1.0, %v1482_v30  ;;  %v3680_v32 = vsub.f32 %v13303_v17, %v10670_v39  ;;  %v2075_v10 = vsub.f32 1.0, %v1499_v25 }
 0x374   : > { %v5611_v35 = vpack.c.bf16 %v5066_v11, %v5065_v23  ;;  %v2076_v27 = vsub.f32 1.0, %v1500_v50  ;;  %v3697_v13 = vsub.f32 %v13304_v34, %v10660_v40  ;;  %v6487_v3 = vunpack.c.l.bf16 %v5602_v24 }
 0x375   : > { %v2633_v33 = vmax.f32 %v2057_v16, 0.0  ;;  %v2634_v5 = vmax.f32 %v2058_v21, 0.0  ;;  %v3698_v45 = vsub.f32 %v13304_v34, %v10670_v39  ;;  %v2651_v7 = vmax.f32 %v2075_v10, 0.0 }
 0x376   : > { %v6505_v59 = vunpack.c.l.bf16 %v5611_v35  ;;  %v2652_v22 = vmax.f32 %v2076_v27, 0.0  ;;  %v4255_v57 = vand.u32 2147483647, %v3679_v62  ;;  %v7063_v15 = vmul.f32 %v6487_v3, %v5911_v56 }
 0x377   : > { %v3008_v54 = vpack.c.bf16 %v2634_v5, %v2633_v33  ;;  %v4256_v37 = vand.u32 2147483647, %v3680_v32  ;;  %v4273_v41 = vand.u32 2147483647, %v3697_v13  ;;  %v4274_v11 = vand.u32 2147483647, %v3698_v45 }
 0x378   : > { %v7081_v30 = vmul.f32 %v6505_v59, %v5929_v0  ;;  %v3017_v23 = vpack.c.bf16 %v2652_v22, %v2651_v7  ;;  %v4831_v25 = vsub.f32 1.0, %v4255_v57  ;;  %v5912_v16 = vunpack.c.h.bf16 %v10904_v63 }
 0x379   : > { %v4832_v50 = vsub.f32 1.0, %v4256_v37  ;;  %v4849_v17 = vsub.f32 1.0, %v4273_v41  ;;  %v6271_v8 = vunpack.c.l.bf16 %v3008_v54  ;;  %v4850_v28 = vsub.f32 1.0, %v4274_v11 }
 0x37a   : > { %v7621_v21 = vpack.c.bf16 %v7081_v30, %v7063_v15  ;;  %v5407_v34 = vmax.f32 %v4831_v25, 0.0  ;;  %v6289_v20 = vunpack.c.l.bf16 %v3017_v23  ;;  %v5930_v56 = vunpack.c.h.bf16 %v10910_v43 }
 0x37b   : > { %v5408_v10 = vmax.f32 %v4832_v50, 0.0  ;;  %v5425_v27 = vmax.f32 %v4849_v17, 0.0  ;;  %v6488_v62 = vunpack.c.h.bf16 %v5602_v24  ;;  %v5426_v32 = vmax.f32 %v4850_v28, 0.0 }
 0x37c   : > { %8054 = vmatpush.bf16.msrb.mxu0 %v7621_v21  ;;  %v6506_v0 = vunpack.c.h.bf16 %v5611_v35  ;;  %v6272_v13 = vunpack.c.h.bf16 %v3008_v54  ;;  %v6290_v3 = vunpack.c.h.bf16 %v3017_v23  ;;  %v509_v45 = vsub.f32 %v9921_v29, %v10656_v44 }
 0x37d   : > { %v5782_v33 = vpack.c.bf16 %v5408_v10, %v5407_v34  ;;  %v7064_v5 = vmul.f32 %v6488_v62, %v5912_v16  ;;  %v510_v63 = vsub.f32 %v9921_v29, %v10658_v42  ;;  %v5791_v59 = vpack.c.bf16 %v5426_v32, %v5425_v27  ;;  %v13305_v27 = vld [vmem:[#allocation57_spill] sm:$0xff] }
 0x37e   : > { %v7082_v7 = vmul.f32 %v6506_v0, %v5930_v56  ;;  %v527_v17 = vsub.f32 %v13266_v61, %v10656_v44  ;;  %v528_v43 = vsub.f32 %v13266_v61, %v10658_v42  ;;  %v1085_v35 = vand.u32 2147483647, %v509_v45 }
 0x37f   : > { %v6847_v28 = vunpack.c.l.bf16 %v5782_v33  ;;  %v6848_v24 = vunpack.c.h.bf16 %v5782_v33  ;;  %v1086_v22 = vand.u32 2147483647, %v510_v63  ;;  %v6865_v34 = vunpack.c.l.bf16 %v5791_v59 }
 0x380   : > { %v7622_v57 = vpack.c.bf16 %v7082_v7, %v7064_v5  ;;  %v6866_v15 = vunpack.c.h.bf16 %v5791_v59  ;;  %v1103_v54 = vand.u32 2147483647, %v527_v17  ;;  %v1104_v30 = vand.u32 2147483647, %v528_v43  ;;  %v13306_v5 = vld [vmem:[#allocation54_spill] sm:$0xff] }
 0x381   : > { %v7423_v37 = vmul.f32 %v6847_v28, %v6271_v8  ;;  %v7424_v41 = vmul.f32 %v6848_v24, %v6272_v13  ;;  %v1661_v23 = vsub.f32 1.0, %v1085_v35  ;;  %v7441_v11 = vmul.f32 %v6865_v34, %v6289_v20  ;;  %v13307_v7 = vld [vmem:[#allocation42_spill] sm:$0xff] }
 0x382   : > { %8080 = vmatpush.bf16.msrb.mxu2 %v7622_v57  ;;  %v7442_v25 = vmul.f32 %v6866_v15, %v6290_v3  ;;  %v1662_v50 = vsub.f32 1.0, %v1086_v22  ;;  %v1679_v16 = vsub.f32 1.0, %v1103_v54  ;;  %v1680_v21 = vsub.f32 1.0, %v1104_v30  ;;  %v13308_v15 = vld [vmem:[#allocation39_spill] sm:$0xff] }
 0x383   : > { %v2237_v10 = vmax.f32 %v1661_v23, 0.0  ;;  %v3283_v56 = vsub.f32 %v13305_v27, %v10660_v40  ;;  %v3284_v62 = vsub.f32 %v13305_v27, %v10670_v39  ;;  %v7801_v32 = vpack.c.bf16 %v7441_v11, %v7423_v37 }
 0x384   : > { %v7802_v0 = vpack.c.bf16 %v7442_v25, %v7424_v41  ;;  %v2238_v33 = vmax.f32 %v1662_v50, 0.0  ;;  %v2255_v8 = vmax.f32 %v1679_v16, 0.0  ;;  %v2256_v13 = vmax.f32 %v1680_v21, 0.0  ;;  %v13309_v21 = vld [vmem:[#allocation53_spill] sm:$0xff] }
 0x385   : > { %v3301_v20 = vsub.f32 %v13306_v5, %v10660_v40  ;;  %v3302_v3 = vsub.f32 %v13306_v5, %v10670_v39  ;;  %v3859_v45 = vand.u32 2147483647, %v3283_v56  ;;  %8065 = vmatpush.bf16.msrb.mxu1 %v7801_v32  ;;  %v3860_v59 = vand.u32 2147483647, %v3284_v62 }
 0x386   : > { %8091 = vmatpush.bf16.msrb.mxu3 %v7802_v0  ;;  %v10944_v63 = vpack.c.bf16 %v2238_v33, %v2237_v10  ;;  %v869_v17 = vsub.f32 %v13307_v7, %v10656_v44  ;;  %v870_v43 = vsub.f32 %v13307_v7, %v10658_v42  ;;  %v10950_v28 = vpack.c.bf16 %v2256_v13, %v2255_v8 }
 0x387   : > { %v3877_v24 = vand.u32 2147483647, %v3301_v20  ;;  %v3878_v35 = vand.u32 2147483647, %v3302_v3  ;;  %v4435_v22 = vsub.f32 1.0, %v3859_v45  ;;  %v4436_v34 = vsub.f32 1.0, %v3860_v59 }
 0x388   : > { %v5875_v57 = vunpack.c.l.bf16 %v10944_v63  ;;  %v887_v54 = vsub.f32 %v13308_v15, %v10656_v44  ;;  %v888_v37 = vsub.f32 %v13308_v15, %v10658_v42  ;;  %v5893_v11 = vunpack.c.l.bf16 %v10950_v28 }
 0x389   : > { %v4453_v41 = vsub.f32 1.0, %v3877_v24  ;;  %v4454_v30 = vsub.f32 1.0, %v3878_v35  ;;  %v5011_v23 = vmax.f32 %v4435_v22, 0.0  ;;  %v5012_v25 = vmax.f32 %v4436_v34, 0.0  ;;  %v13310_v24 = vld [vmem:[#allocation48_spill] sm:$0xff] }
 0x38a   : > { %v1445_v50 = vand.u32 2147483647, %v869_v17  ;;  %v1446_v16 = vand.u32 2147483647, %v870_v43  ;;  %v3643_v10 = vsub.f32 %v13309_v21, %v10660_v40  ;;  %v1463_v32 = vand.u32 2147483647, %v887_v54 }
 0x38b   : > { %v5029_v56 = vmax.f32 %v4453_v41, 0.0  ;;  %v5030_v62 = vmax.f32 %v4454_v30, 0.0  ;;  %v1464_v0 = vand.u32 2147483647, %v888_v37  ;;  %v5584_v33 = vpack.c.bf16 %v5012_v25, %v5011_v23 }
 0x38c   : > { %v2021_v8 = vsub.f32 1.0, %v1445_v50  ;;  %v2022_v13 = vsub.f32 1.0, %v1446_v16  ;;  %v3644_v20 = vsub.f32 %v13309_v21, %v10670_v39  ;;  %v2039_v45 = vsub.f32 1.0, %v1463_v32 }
 0x38d   : > { %v5593_v3 = vpack.c.bf16 %v5030_v62, %v5029_v56  ;;  %v2040_v59 = vsub.f32 1.0, %v1464_v0  ;;  %v3661_v17 = vsub.f32 %v13310_v24, %v10660_v40  ;;  %v6451_v43 = vunpack.c.l.bf16 %v5584_v33 }
 0x38e   : > { %v2597_v35 = vmax.f32 %v2021_v8, 0.0  ;;  %v2598_v22 = vmax.f32 %v2022_v13, 0.0  ;;  %v3662_v34 = vsub.f32 %v13310_v24, %v10670_v39  ;;  %v2615_v37 = vmax.f32 %v2039_v45, 0.0 }
 0x38f   : > { %v6469_v54 = vunpack.c.l.bf16 %v5593_v3  ;;  %v2616_v41 = vmax.f32 %v2040_v59, 0.0  ;;  %v4219_v30 = vand.u32 2147483647, %v3643_v10  ;;  %v7027_v23 = vmul.f32 %v6451_v43, %v5875_v57  ;;  %v281_v59 = vld [vmem:[%s9355_s21 + $0x10] sm:$0xff] }
 0x390   : > { %v2990_v25 = vpack.c.bf16 %v2598_v22, %v2597_v35  ;;  %v4220_v50 = vand.u32 2147483647, %v3644_v20  ;;  %v4237_v16 = vand.u32 2147483647, %v3661_v17  ;;  %v4238_v32 = vand.u32 2147483647, %v3662_v34 }
 0x391   : > { %v7045_v56 = vmul.f32 %v6469_v54, %v5893_v11  ;;  %v2999_v62 = vpack.c.bf16 %v2616_v41, %v2615_v37  ;;  %v4795_v0 = vsub.f32 1.0, %v4219_v30  ;;  %v5876_v13 = vunpack.c.h.bf16 %v10944_v63 }
 0x392   : > { %v4796_v21 = vsub.f32 1.0, %v4220_v50  ;;  %v4813_v15 = vsub.f32 1.0, %v4237_v16  ;;  %v6235_v8 = vunpack.c.l.bf16 %v2990_v25  ;;  %v4814_v24 = vsub.f32 1.0, %v4238_v32 }
 0x393   : > { %v7603_v7 = vpack.c.bf16 %v7045_v56, %v7027_v23  ;;  %v5371_v5 = vmax.f32 %v4795_v0, 0.0  ;;  %v6253_v45 = vunpack.c.l.bf16 %v2999_v62  ;;  %v5894_v43 = vunpack.c.h.bf16 %v10950_v28  ;;  %v9083_v28 = vld.sshfl [vmem:[#allocation1] sm:$0xff pattern:$0x73625140] }
 0x394   : > { %v5372_v10 = vmax.f32 %v4796_v21, 0.0  ;;  %v5389_v57 = vmax.f32 %v4813_v15, 0.0  ;;  %v6452_v20 = vunpack.c.h.bf16 %v5584_v33  ;;  %v5390_v11 = vmax.f32 %v4814_v24, 0.0 }
 0x395   : > { %8055 = vmatpush.bf16.msrb.mxu0 %v7603_v7  ;;  %v6470_v17 = vunpack.c.h.bf16 %v5593_v3  ;;  %v6236_v35 = vunpack.c.h.bf16 %v2990_v25  ;;  %v6254_v22 = vunpack.c.h.bf16 %v2999_v62  ;;  %v457_v37 = vperm.slane %v281_v59, 0  ;;  %v13311_v62 = vld [vmem:[#allocation19_spill] sm:$0xff] }
 0x396   : > { %v5764_v34 = vpack.c.bf16 %v5372_v10, %v5371_v5  ;;  %v7028_v54 = vmul.f32 %v6452_v20, %v5876_v13  ;;  %v458_v41 = vperm.slane %v281_v59, 2  ;;  %v5773_v63 = vpack.c.bf16 %v5390_v11, %v5389_v57  ;;  %v13312_v10 = vld [vmem:[#allocation22_spill] sm:$0xff] }
 0x397   : > { %v7046_v30 = vmul.f32 %v6470_v17, %v5894_v43  ;;  %v3231_v23 = vperm.slane %v281_v59, 1  ;;  %v3232_v50 = vperm.slane %v281_v59, 3  ;;  %v10969_v21 = vperm.slane %v457_v37, 0 }
 0x398   : > { %v6811_v16 = vunpack.c.l.bf16 %v5764_v34  ;;  %v6812_v56 = vunpack.c.h.bf16 %v5764_v34  ;;  %v10971_v15 = vperm.slane %v458_v41, 0  ;;  %8056 = vmatmul.bf16.vlgmr.msrb.gmra.mxu0 %v9083_v28  ;;  %v6829_v7 = vunpack.c.l.bf16 %v5773_v63 }
 0x399   : > { %v7604_v33 = vpack.c.bf16 %v7046_v30, %v7028_v54  ;;  %v6830_v3 = vunpack.c.h.bf16 %v5773_v63  ;;  %v10973_v24 = vperm.slane %v3231_v23, 1  ;;  %v763_v32 = vsub.f32 %v13311_v62, %v10969_v21  ;;  %v13314_v30 = vld [vmem:[#allocation6_spill] sm:$0xff] }
 0x39a   : > { %v7387_v5 = vmul.f32 %v6811_v16, %v6235_v8  ;;  %v7388_v25 = vmul.f32 %v6812_v56, %v6236_v35  ;;  %v764_v0 = vsub.f32 %v13311_v62, %v10971_v15  ;;  %v7405_v13 = vmul.f32 %v6829_v7, %v6253_v45  ;;  %v13313_v8 = vld [vmem:[#allocation5_spill] sm:$0xff] }
 0x39b   : > { %8081 = vmatpush.bf16.msrb.mxu2 %v7604_v33  ;;  %v7406_v59 = vmul.f32 %v6830_v3, %v6254_v22  ;;  %v781_v57 = vsub.f32 %v13312_v10, %v10969_v21  ;;  %v782_v43 = vsub.f32 %v13312_v10, %v10971_v15  ;;  %v1339_v20 = vand.u32 2147483647, %v763_v32 }
 0x39c   : > { %v1340_v11 = vand.u32 2147483647, %v764_v0  ;;  %v10983_v17 = vperm.slane %v3232_v50, 1  ;;  %v3537_v35 = vsub.f32 %v13313_v8, %v10973_v24  ;;  %v7783_v34 = vpack.c.bf16 %v7405_v13, %v7387_v5 }
 0x39d   : > { %v7784_v54 = vpack.c.bf16 %v7406_v59, %v7388_v25  ;;  %v1357_v37 = vand.u32 2147483647, %v781_v57  ;;  %v1358_v41 = vand.u32 2147483647, %v782_v43  ;;  %v1915_v45 = vsub.f32 1.0, %v1339_v20 }
 0x39e   : > { %v1916_v63 = vsub.f32 1.0, %v1340_v11  ;;  %v3538_v22 = vsub.f32 %v13313_v8, %v10983_v17  ;;  %v3555_v23 = vsub.f32 %v13314_v30, %v10973_v24  ;;  %8082 = vmatmul.bf16.vlgmr.msrb.gmra.mxu2 %v9083_v28  ;;  %8066 = vmatpush.bf16.msrb.mxu1 %v7783_v34  ;;  %v3556_v56 = vsub.f32 %v13314_v30, %v10983_v17  ;;  %v13315_v28 = vld [vmem:[#allocation50_spill] sm:$0xff] }
 0x39f   : > { %8092 = vmatpush.bf16.msrb.mxu3 %v7784_v54  ;;  %v1933_v50 = vsub.f32 1.0, %v1357_v37  ;;  %v1934_v16 = vsub.f32 1.0, %v1358_v41  ;;  %v4113_v7 = vand.u32 2147483647, %v3537_v35  ;;  %v2491_v33 = vmax.f32 %v1915_v45, 0.0 }
 0x3a0   : > { %v2492_v3 = vmax.f32 %v1916_v63, 0.0  ;;  %v4114_v5 = vand.u32 2147483647, %v3538_v22  ;;  %v4131_v25 = vand.u32 2147483647, %v3555_v23  ;;  %v833_v11 = vsub.f32 %v13315_v28, %v10656_v44 }
 0x3a1   : > { %v2509_v32 = vmax.f32 %v1933_v50, 0.0  ;;  %v2510_v0 = vmax.f32 %v1934_v16, 0.0  ;;  %v4132_v13 = vand.u32 2147483647, %v3556_v56  ;;  %v4689_v59 = vsub.f32 1.0, %v4113_v7  ;;  %v13316_v56 = vld [vmem:[#allocation46_spill] sm:$0xff] }
 0x3a2   : > { %v2937_v57 = vpack.c.bf16 %v2492_v3, %v2491_v33  ;;  %v4690_v43 = vsub.f32 1.0, %v4114_v5  ;;  %v4707_v20 = vsub.f32 1.0, %v4131_v25  ;;  %v834_v35 = vsub.f32 %v13315_v28, %v10658_v42 }
 0x3a3   : > { %v2946_v34 = vpack.c.bf16 %v2510_v0, %v2509_v32  ;;  %v4708_v54 = vsub.f32 1.0, %v4132_v13  ;;  %v5265_v37 = vmax.f32 %v4689_v59, 0.0  ;;  %v851_v7 = vsub.f32 %v13316_v56, %v10656_v44  ;;  %v13317_v13 = vld [vmem:[#allocation16_spill] sm:$0xff] }
 0x3a4   : > { %v5266_v41 = vmax.f32 %v4690_v43, 0.0  ;;  %v5283_v45 = vmax.f32 %v4707_v20, 0.0  ;;  %v6129_v63 = vunpack.c.l.bf16 %v2937_v57  ;;  %v6130_v22 = vunpack.c.h.bf16 %v2937_v57 }
 0x3a5   : > { %v5284_v23 = vmax.f32 %v4708_v54, 0.0  ;;  %v6147_v50 = vunpack.c.l.bf16 %v2946_v34  ;;  %v6148_v16 = vunpack.c.h.bf16 %v2946_v34  ;;  %v852_v3 = vsub.f32 %v13316_v56, %v10658_v42 }
 0x3a6   : > { %v5711_v33 = vpack.c.bf16 %v5266_v41, %v5265_v37  ;;  %v1409_v5 = vand.u32 2147483647, %v833_v11  ;;  %v1410_v25 = vand.u32 2147483647, %v834_v35  ;;  %v1427_v0 = vand.u32 2147483647, %v851_v7 }
 0x3a7   : > { %v5720_v32 = vpack.c.bf16 %v5284_v23, %v5283_v45  ;;  %v3607_v59 = vsub.f32 %v13317_v13, %v10660_v40  ;;  %v3608_v57 = vsub.f32 %v13317_v13, %v10670_v39  ;;  %v1428_v34 = vand.u32 2147483647, %v852_v3 }
 0x3a8   : > { %v6705_v43 = vunpack.c.l.bf16 %v5711_v33  ;;  %v6706_v20 = vunpack.c.h.bf16 %v5711_v33  ;;  %v1985_v54 = vsub.f32 1.0, %v1409_v5  ;;  %v1986_v37 = vsub.f32 1.0, %v1410_v25 }
 0x3a9   : > { %v6723_v28 = vunpack.c.l.bf16 %v5720_v32  ;;  %v6724_v30 = vunpack.c.h.bf16 %v5720_v32  ;;  %v2003_v41 = vsub.f32 1.0, %v1427_v0  ;;  %v2004_v11 = vsub.f32 1.0, %v1428_v34 }
 0x3aa   : > { %v7281_v8 = vmul.f32 %v6705_v43, %v6129_v63  ;;  %v7282_v56 = vmul.f32 %v6706_v20, %v6130_v22  ;;  %v2561_v35 = vmax.f32 %v1985_v54, 0.0  ;;  %v2562_v7 = vmax.f32 %v1986_v37, 0.0 }
 0x3ab   : > { %v7299_v45 = vmul.f32 %v6723_v28, %v6147_v50  ;;  %v7300_v23 = vmul.f32 %v6724_v30, %v6148_v16  ;;  %v2579_v10 = vmax.f32 %v2003_v41, 0.0  ;;  %v2580_v62 = vmax.f32 %v2004_v11, 0.0  ;;  %v13318_v16 = vld [vmem:[#allocation7_spill] sm:$0xff] }
 0x3ac   : > { %v3625_v13 = vsub.f32 %v13240_v48, %v10660_v40  ;;  %v3626_v33 = vsub.f32 %v13240_v48, %v10670_v39  ;;  %v4183_v3 = vand.u32 2147483647, %v3607_v59  ;;  %v2972_v25 = vpack.c.bf16 %v2562_v7, %v2561_v35 }
 0x3ad   : > { %v7731_v5 = vpack.c.bf16 %v7299_v45, %v7281_v8  ;;  %v7732_v32 = vpack.c.bf16 %v7300_v23, %v7282_v56  ;;  %v4184_v0 = vand.u32 2147483647, %v3608_v57  ;;  %v2981_v63 = vpack.c.bf16 %v2580_v62, %v2579_v10  ;;  %v13319_v10 = vld [vmem:[#allocation17_spill] sm:$0xff] }
 0x3ae   : > { %v4201_v22 = vand.u32 2147483647, %v3625_v13  ;;  %v4202_v43 = vand.u32 2147483647, %v3626_v33  ;;  %v4759_v20 = vsub.f32 1.0, %v4183_v3  ;;  %v6199_v28 = vunpack.c.l.bf16 %v2972_v25 }
 0x3af   : > { %8100 = vmatpush.bf16.msra.mxu0 %v7731_v5  ;;  %8126 = vmatpush.bf16.msra.mxu2 %v7732_v32  ;;  %v4760_v30 = vsub.f32 1.0, %v4184_v0  ;;  %v6200_v50 = vunpack.c.h.bf16 %v2972_v25  ;;  %v727_v34 = vsub.f32 %v13318_v16, %v10969_v21  ;;  %v6217_v59 = vunpack.c.l.bf16 %v2981_v63 }
 0x3b0   : > { %v4777_v54 = vsub.f32 1.0, %v4201_v22  ;;  %v4778_v37 = vsub.f32 1.0, %v4202_v43  ;;  %v5335_v41 = vmax.f32 %v4759_v20, 0.0  ;;  %v6218_v56 = vunpack.c.h.bf16 %v2981_v63 }
 0x3b1   : > { %v5336_v8 = vmax.f32 %v4760_v30, 0.0  ;;  %v728_v62 = vsub.f32 %v13318_v16, %v10971_v15  ;;  %v745_v13 = vsub.f32 %v13319_v10, %v10969_v21  ;;  %v746_v35 = vsub.f32 %v13319_v10, %v10971_v15 }
 0x3b2   : > { %v5353_v57 = vmax.f32 %v4777_v54, 0.0  ;;  %v5354_v11 = vmax.f32 %v4778_v37, 0.0  ;;  %v1303_v45 = vand.u32 2147483647, %v727_v34  ;;  %v3501_v3 = vsub.f32 %v9537_v14, %v10973_v24 }
 0x3b3   : > { %v5746_v23 = vpack.c.bf16 %v5336_v8, %v5335_v41  ;;  %v1304_v7 = vand.u32 2147483647, %v728_v62  ;;  %v1321_v33 = vand.u32 2147483647, %v745_v13  ;;  %v1322_v32 = vand.u32 2147483647, %v746_v35 }
 0x3b4   : > { %v5755_v5 = vpack.c.bf16 %v5354_v11, %v5353_v57  ;;  %v1879_v25 = vsub.f32 1.0, %v1303_v45  ;;  %v3502_v0 = vsub.f32 %v9537_v14, %v10983_v17  ;;  %v3519_v11 = vsub.f32 %v9454_v36, %v10973_v24 }
 0x3b5   : > { %v6775_v63 = vunpack.c.l.bf16 %v5746_v23  ;;  %v6776_v22 = vunpack.c.h.bf16 %v5746_v23  ;;  %v1880_v43 = vsub.f32 1.0, %v1304_v7  ;;  %v1897_v20 = vsub.f32 1.0, %v1321_v33 }
 0x3b6   : > { %v6793_v30 = vunpack.c.l.bf16 %v5755_v5  ;;  %v6794_v54 = vunpack.c.h.bf16 %v5755_v5  ;;  %v1898_v37 = vsub.f32 1.0, %v1322_v32  ;;  %v2455_v34 = vmax.f32 %v1879_v25, 0.0 }
 0x3b7   : > { %v7351_v41 = vmul.f32 %v6775_v63, %v6199_v28  ;;  %v7352_v8 = vmul.f32 %v6776_v22, %v6200_v50  ;;  %v2456_v62 = vmax.f32 %v1880_v43, 0.0  ;;  %v2473_v13 = vmax.f32 %v1897_v20, 0.0 }
 0x3b8   : > { %v7369_v10 = vmul.f32 %v6793_v30, %v6217_v59  ;;  %v7370_v16 = vmul.f32 %v6794_v54, %v6218_v56  ;;  %v2474_v57 = vmax.f32 %v1898_v37, 0.0  ;;  %v3520_v45 = vsub.f32 %v9454_v36, %v10983_v17 }
 0x3b9   : > { %v2919_v35 = vpack.c.bf16 %v2456_v62, %v2455_v34  ;;  %v4077_v23 = vand.u32 2147483647, %v3501_v3  ;;  %v4078_v7 = vand.u32 2147483647, %v3502_v0  ;;  %v4095_v25 = vand.u32 2147483647, %v3519_v11 }
 0x3ba   : > { %v7765_v33 = vpack.c.bf16 %v7369_v10, %v7351_v41  ;;  %v7766_v5 = vpack.c.bf16 %v7370_v16, %v7352_v8  ;;  %v2928_v32 = vpack.c.bf16 %v2474_v57, %v2473_v13  ;;  %v4096_v28 = vand.u32 2147483647, %v3520_v45 }
 0x3bb   : > { %v4653_v50 = vsub.f32 1.0, %v4077_v23  ;;  %v4654_v63 = vsub.f32 1.0, %v4078_v7  ;;  %v6093_v22 = vunpack.c.l.bf16 %v2919_v35  ;;  %v4671_v59 = vsub.f32 1.0, %v4095_v25 }
 0x3bc   : > { %8067 = vmatpush.bf16.msrb.mxu1 %v7765_v33  ;;  %8093 = vmatpush.bf16.msrb.mxu3 %v7766_v5  ;;  %v6111_v56 = vunpack.c.l.bf16 %v2928_v32  ;;  %v6094_v43 = vunpack.c.h.bf16 %v2919_v35  ;;  %v6112_v20 = vunpack.c.h.bf16 %v2928_v32  ;;  %v4672_v30 = vsub.f32 1.0, %v4096_v28 }
 0x3bd   : > { %v5229_v54 = vmax.f32 %v4653_v50, 0.0  ;;  %v5230_v37 = vmax.f32 %v4654_v63, 0.0  ;;  %v797_v3 = vsub.f32 %v9937_v9, %v10656_v44  ;;  %v5247_v10 = vmax.f32 %v4671_v59, 0.0 }
 0x3be   : > { %v798_v16 = vsub.f32 %v9937_v9, %v10658_v42  ;;  %v815_v0 = vsub.f32 %v10064_v46, %v10656_v44  ;;  %v816_v34 = vsub.f32 %v10064_v46, %v10658_v42  ;;  %v5248_v41 = vmax.f32 %v4672_v30, 0.0 }
 0x3bf   : > { %v5693_v8 = vpack.c.bf16 %v5230_v37, %v5229_v54  ;;  %v1373_v62 = vand.u32 2147483647, %v797_v3  ;;  %v3571_v13 = vsub.f32 %v10068_v6, %v10660_v40  ;;  %v3572_v45 = vsub.f32 %v10068_v6, %v10670_v39 }
 0x3c0   : > { %v1374_v57 = vand.u32 2147483647, %v798_v16  ;;  %v1391_v11 = vand.u32 2147483647, %v815_v0  ;;  %v1392_v35 = vand.u32 2147483647, %v816_v34  ;;  %v5702_v23 = vpack.c.bf16 %v5248_v41, %v5247_v10 }
 0x3c1   : > { %v6669_v7 = vunpack.c.l.bf16 %v5693_v8  ;;  %v6670_v33 = vunpack.c.h.bf16 %v5693_v8  ;;  %v1949_v5 = vsub.f32 1.0, %v1373_v62  ;;  %v3589_v42 = vsub.f32 %v10074_v38, %v10660_v40 }
 0x3c2   : > { %v1950_v44 = vsub.f32 1.0, %v1374_v57  ;;  %v1967_v32 = vsub.f32 1.0, %v1391_v11  ;;  %v1968_v25 = vsub.f32 1.0, %v1392_v35  ;;  %v6687_v28 = vunpack.c.l.bf16 %v5702_v23 }
 0x3c3   : > { %v7245_v50 = vmul.f32 %v6669_v7, %v6093_v22  ;;  %v6688_v63 = vunpack.c.h.bf16 %v5702_v23  ;;  %v7246_v59 = vmul.f32 %v6670_v33, %v6094_v43  ;;  %v2525_v30 = vmax.f32 %v1949_v5, 0.0 }
 0x3c4   : > { %v2526_v54 = vmax.f32 %v1950_v44, 0.0  ;;  %v2543_v37 = vmax.f32 %v1967_v32, 0.0  ;;  %v2544_v3 = vmax.f32 %v1968_v25, 0.0  ;;  %v7263_v16 = vmul.f32 %v6687_v28, %v6111_v56 }
 0x3c5   : > { %v7264_v0 = vmul.f32 %v6688_v63, %v6112_v20  ;;  %v3590_v10 = vsub.f32 %v10074_v38, %v10670_v39  ;;  %v4147_v34 = vand.u32 2147483647, %v3571_v13  ;;  %v4148_v62 = vand.u32 2147483647, %v3572_v45 }
 0x3c6   : > { %v2954_v41 = vpack.c.bf16 %v2526_v54, %v2525_v30  ;;  %v2963_v8 = vpack.c.bf16 %v2544_v3, %v2543_v37  ;;  %v4165_v57 = vand.u32 2147483647, %v3589_v42  ;;  %v7713_v11 = vpack.c.bf16 %v7263_v16, %v7245_v50 }
 0x3c7   : > { %v7714_v40 = vpack.c.bf16 %v7264_v0, %v7246_v59  ;;  %v4166_v35 = vand.u32 2147483647, %v3590_v10  ;;  %v4723_v22 = vsub.f32 1.0, %v4147_v34  ;;  %v4724_v23 = vsub.f32 1.0, %v4148_v62 }
 0x3c8   : > { %v4741_v43 = vsub.f32 1.0, %v4165_v57  ;;  %v6163_v7 = vunpack.c.l.bf16 %v2954_v41  ;;  %v6181_v33 = vunpack.c.l.bf16 %v2963_v8  ;;  %8101 = vmatpush.bf16.msra.mxu0 %v7713_v11  ;;  %v6164_v5 = vunpack.c.h.bf16 %v2954_v41 }
 0x3c9   : > { %8127 = vmatpush.bf16.msra.mxu2 %v7714_v40  ;;  %v4742_v56 = vsub.f32 1.0, %v4166_v35  ;;  %v5299_v20 = vmax.f32 %v4723_v22, 0.0  ;;  %v6182_v44 = vunpack.c.h.bf16 %v2963_v8  ;;  %v5300_v39 = vmax.f32 %v4724_v23, 0.0 }
 0x3ca   : > { %v5317_v13 = vmax.f32 %v4741_v43, 0.0  ;;  %v691_v45 = vsub.f32 %v9623_v1, %v10969_v21  ;;  %v692_v32 = vsub.f32 %v9623_v1, %v10971_v15  ;;  %v709_v42 = vsub.f32 %v9607_v52, %v10969_v21 }
 0x3cb   : > { %v5318_v25 = vmax.f32 %v4742_v56, 0.0  ;;  %v710_v28 = vsub.f32 %v9607_v52, %v10971_v15  ;;  %v3465_v50 = vsub.f32 %v9649_v26, %v10973_v24  ;;  %v5728_v63 = vpack.c.bf16 %v5300_v39, %v5299_v20 }
 0x3cc   : > { %v1267_v59 = vand.u32 2147483647, %v691_v45  ;;  %v1268_v30 = vand.u32 2147483647, %v692_v32  ;;  %v3466_v54 = vsub.f32 %v9649_v26, %v10983_v17  ;;  %v1285_v3 = vand.u32 2147483647, %v709_v42 }
 0x3cd   : > { %v5737_v37 = vpack.c.bf16 %v5318_v25, %v5317_v13  ;;  %v1286_v16 = vand.u32 2147483647, %v710_v28  ;;  %v3483_v0 = vsub.f32 %v9540_v51, %v10973_v24  ;;  %v6739_v10 = vunpack.c.l.bf16 %v5728_v63 }
 0x3ce   : > { %v6740_v34 = vunpack.c.h.bf16 %v5728_v63  ;;  %v1843_v41 = vsub.f32 1.0, %v1267_v59  ;;  %v1844_v8 = vsub.f32 1.0, %v1268_v30  ;;  %v1861_v11 = vsub.f32 1.0, %v1285_v3 }
 0x3cf   : > { %v6757_v62 = vunpack.c.l.bf16 %v5737_v37  ;;  %v6758_v57 = vunpack.c.h.bf16 %v5737_v37  ;;  %v1862_v40 = vsub.f32 1.0, %v1286_v16  ;;  %v7315_v35 = vmul.f32 %v6739_v10, %v6163_v7 }
 0x3d0   : > { %v7316_v22 = vmul.f32 %v6740_v34, %v6164_v5  ;;  %v2419_v23 = vmax.f32 %v1843_v41, 0.0  ;;  %v2420_v43 = vmax.f32 %v1844_v8, 0.0  ;;  %v2437_v39 = vmax.f32 %v1861_v11, 0.0 }
 0x3d1   : > { %v7333_v56 = vmul.f32 %v6757_v62, %v6181_v33  ;;  %v7334_v20 = vmul.f32 %v6758_v57, %v6182_v44  ;;  %v2438_v13 = vmax.f32 %v1862_v40, 0.0  ;;  %v3484_v32 = vsub.f32 %v9540_v51, %v10983_v17 }
 0x3d2   : > { %v11055_v45 = vpack.c.bf16 %v2420_v43, %v2419_v23  ;;  %v4041_v25 = vand.u32 2147483647, %v3465_v50  ;;  %v4042_v42 = vand.u32 2147483647, %v3466_v54  ;;  %v4059_v30 = vand.u32 2147483647, %v3483_v0 }
 0x3d3   : > { %v7747_v28 = vpack.c.bf16 %v7333_v56, %v7315_v35  ;;  %v7748_v63 = vpack.c.bf16 %v7334_v20, %v7316_v22  ;;  %v11059_v59 = vpack.c.bf16 %v2438_v13, %v2437_v39  ;;  %v4060_v7 = vand.u32 2147483647, %v3484_v32  ;;  %v9084_v23 = vld.sshfl [vmem:[#allocation1 + $0x8] sm:$0xff pattern:$0x73625140] }
 0x3d4   : > { %v4617_v5 = vsub.f32 1.0, %v4041_v25  ;;  %v4618_v37 = vsub.f32 1.0, %v4042_v42  ;;  %v6057_v33 = vunpack.c.l.bf16 %v11055_v45  ;;  %v4635_v44 = vsub.f32 1.0, %v4059_v30 }
 0x3d5   : > { %8068 = vmatpush.bf16.msrb.mxu1 %v7747_v28  ;;  %8094 = vmatpush.bf16.msrb.mxu3 %v7748_v63  ;;  %v6075_v3 = vunpack.c.l.bf16 %v11059_v59  ;;  %v1051_v16 = vsub.f32 %v9416_v49, %v10969_v21  ;;  %v1052_v50 = vsub.f32 %v9416_v49, %v10971_v15  ;;  %v4636_v54 = vsub.f32 1.0, %v4060_v7 }
 0x3d6   : > { %v5193_v10 = vmax.f32 %v4617_v5, 0.0  ;;  %v5194_v34 = vmax.f32 %v4618_v37, 0.0  ;;  %v1069_v0 = vsub.f32 %v9448_v19, %v10969_v21  ;;  %v5211_v41 = vmax.f32 %v4635_v44, 0.0 }
 0x3d7   : > { %v1070_v8 = vsub.f32 %v9448_v19, %v10971_v15  ;;  %v1627_v62 = vand.u32 2147483647, %v1051_v16  ;;  %v1628_v57 = vand.u32 2147483647, %v1052_v50  ;;  %v5212_v11 = vmax.f32 %v4636_v54, 0.0 }
 0x3d8   : > { %v5675_v40 = vpack.c.bf16 %v5194_v34, %v5193_v10  ;;  %v1645_v35 = vand.u32 2147483647, %v1069_v0  ;;  %v3825_v22 = vsub.f32 %v9412_v47, %v10973_v24  ;;  %8095 = vmatmul.bf16.vlgmr.msrb.gmra.mxu3 %v9084_v23  ;;  %8069 = vmatmul.bf16.vlgmr.msrb.gmra.mxu1 %v9084_v23  ;;  %v3826_v39 = vsub.f32 %v9412_v47, %v10983_v17 }
 0x3d9   : > { %v1646_v43 = vand.u32 2147483647, %v1070_v8  ;;  %v2203_v56 = vsub.f32 1.0, %v1627_v62  ;;  %v2204_v20 = vsub.f32 1.0, %v1628_v57  ;;  %v5684_v13 = vpack.c.bf16 %v5212_v11, %v5211_v41 }
 0x3da   : > { %v6633_v32 = vunpack.c.l.bf16 %v5675_v40  ;;  %v2221_v25 = vsub.f32 1.0, %v1645_v35  ;;  %v3843_v42 = vsub.f32 %v9483_v12, %v10973_v24  ;;  %v3844_v7 = vsub.f32 %v9483_v12, %v10983_v17 }
 0x3db   : > { %v2222_v28 = vsub.f32 1.0, %v1646_v43  ;;  %v2779_v63 = vmax.f32 %v2203_v56, 0.0  ;;  %v2780_v30 = vmax.f32 %v2204_v20, 0.0  ;;  %v6651_v5 = vunpack.c.l.bf16 %v5684_v13 }
 0x3dc   : > { %v7209_v37 = vmul.f32 %v6633_v32, %v6057_v33  ;;  %v2797_v44 = vmax.f32 %v2221_v25, 0.0  ;;  %v4401_v16 = vand.u32 2147483647, %v3825_v22  ;;  %v4402_v10 = vand.u32 2147483647, %v3826_v39 }
 0x3dd   : > { %v2798_v50 = vmax.f32 %v2222_v28, 0.0  ;;  %v3081_v54 = vpack.c.bf16 %v2780_v30, %v2779_v63  ;;  %v4419_v34 = vand.u32 2147483647, %v3843_v42  ;;  %v7227_v0 = vmul.f32 %v6651_v5, %v6075_v3 }
 0x3de   : > { %v4420_v41 = vand.u32 2147483647, %v3844_v7  ;;  %v4977_v8 = vsub.f32 1.0, %v4401_v16  ;;  %v6058_v62 = vunpack.c.h.bf16 %v11055_v45  ;;  %v4978_v11 = vsub.f32 1.0, %v4402_v10 }
 0x3df   : > { %v3090_v57 = vpack.c.bf16 %v2798_v50, %v2797_v44  ;;  %v4995_v35 = vsub.f32 1.0, %v4419_v34  ;;  %v6417_v23 = vunpack.c.l.bf16 %v3081_v54  ;;  %v7695_v43 = vpack.c.bf16 %v7227_v0, %v7209_v37 }
 0x3e0   : > { %v4996_v56 = vsub.f32 1.0, %v4420_v41  ;;  %v5553_v20 = vmax.f32 %v4977_v8, 0.0  ;;  %v6076_v33 = vunpack.c.h.bf16 %v11059_v59  ;;  %v5554_v32 = vmax.f32 %v4978_v11, 0.0 }
 0x3e1   : > { %v5571_v22 = vmax.f32 %v4995_v35, 0.0  ;;  %v6435_v25 = vunpack.c.l.bf16 %v3090_v57  ;;  %v6634_v28 = vunpack.c.h.bf16 %v5675_v40  ;;  %8102 = vmatpush.bf16.msra.mxu0 %v7695_v43  ;;  %v6652_v3 = vunpack.c.h.bf16 %v5684_v13 }
 0x3e2   : > { %v5572_v39 = vmax.f32 %v4996_v56, 0.0  ;;  %v6418_v42 = vunpack.c.h.bf16 %v3081_v54  ;;  %v6436_v63 = vunpack.c.h.bf16 %v3090_v57  ;;  %v5855_v30 = vpack.c.bf16 %v5554_v32, %v5553_v20 }
 0x3e3   : > { %v7210_v45 = vmul.f32 %v6634_v28, %v6058_v62  ;;  %v655_v7 = vsub.f32 %v9577_v60, %v10969_v21  ;;  %v656_v5 = vsub.f32 %v9577_v60, %v10971_v15  ;;  %v7228_v44 = vmul.f32 %v6652_v3, %v6076_v33 }
 0x3e4   : > { %v5864_v37 = vpack.c.bf16 %v5572_v39, %v5571_v22  ;;  %v673_v59 = vsub.f32 %v9704_v18, %v10969_v21  ;;  %v674_v40 = vsub.f32 %v9704_v18, %v10971_v15  ;;  %v6993_v16 = vunpack.c.l.bf16 %v5855_v30 }
 0x3e5   : > { %v6994_v13 = vunpack.c.h.bf16 %v5855_v30  ;;  %v1231_v50 = vand.u32 2147483647, %v655_v7  ;;  %v1232_v54 = vand.u32 2147483647, %v656_v5  ;;  %v7696_v34 = vpack.c.bf16 %v7228_v44, %v7210_v45 }
 0x3e6   : > { %v7011_v10 = vunpack.c.l.bf16 %v5864_v37  ;;  %v7012_v0 = vunpack.c.h.bf16 %v5864_v37  ;;  %v1249_v41 = vand.u32 2147483647, %v673_v59  ;;  %v7569_v8 = vmul.f32 %v6993_v16, %v6417_v23  ;;  %v13320_v37 = vld [vmem:[#allocation10_spill] sm:$0xff] }
 0x3e7   : > { %v7570_v62 = vmul.f32 %v6994_v13, %v6418_v42  ;;  %v1250_v57 = vand.u32 2147483647, %v674_v40  ;;  %v1807_v11 = vsub.f32 1.0, %v1231_v50  ;;  %8128 = vmatpush.bf16.msra.mxu2 %v7696_v34  ;;  %v1808_v56 = vsub.f32 1.0, %v1232_v54  ;;  %v13321_v34 = vld [vmem:[#allocation25_spill] sm:$0xff] }
 0x3e8   : > { %v7587_v35 = vmul.f32 %v7011_v10, %v6435_v25  ;;  %v7588_v43 = vmul.f32 %v7012_v0, %v6436_v63  ;;  %v1825_v20 = vsub.f32 1.0, %v1249_v41  ;;  %v3429_v22 = vsub.f32 %v9729_v55, %v10973_v24 }
 0x3e9   : > { %v1826_v33 = vsub.f32 1.0, %v1250_v57  ;;  %v2383_v32 = vmax.f32 %v1807_v11, 0.0  ;;  %v3430_v28 = vsub.f32 %v9729_v55, %v10983_v17  ;;  %v2384_v30 = vmax.f32 %v1808_v56, 0.0 }
 0x3ea   : > { %v7875_v39 = vpack.c.bf16 %v7587_v35, %v7569_v8  ;;  %v7876_v3 = vpack.c.bf16 %v7588_v43, %v7570_v62  ;;  %v2401_v23 = vmax.f32 %v1825_v20, 0.0  ;;  %v3447_v25 = vsub.f32 %v13202_v2, %v10973_v24  ;;  %v13322_v20 = vld [vmem:[#allocation23_spill] sm:$0xff] }
 0x3eb   : > { %v2402_v42 = vmax.f32 %v1826_v33, 0.0  ;;  %v3448_v63 = vsub.f32 %v13202_v2, %v10983_v17  ;;  %v4005_v45 = vand.u32 2147483647, %v3429_v22  ;;  %v11097_v7 = vpack.c.bf16 %v2384_v30, %v2383_v32 }
 0x3ec   : > { %8113 = vmatpush.bf16.msra.mxu1 %v7875_v39  ;;  %8139 = vmatpush.bf16.msra.mxu3 %v7876_v3  ;;  %v4006_v5 = vand.u32 2147483647, %v3430_v28  ;;  %v1015_v44 = vsub.f32 %v13320_v37, %v10969_v21  ;;  %v1016_v59 = vsub.f32 %v13320_v37, %v10971_v15  ;;  %v4023_v16 = vand.u32 2147483647, %v3447_v25 }
 0x3ed   : > { %v11103_v40 = vpack.c.bf16 %v2402_v42, %v2401_v23  ;;  %v4024_v13 = vand.u32 2147483647, %v3448_v63  ;;  %v4581_v50 = vsub.f32 1.0, %v4005_v45  ;;  %v6021_v10 = vunpack.c.l.bf16 %v11097_v7 }
 0x3ee   : > { %v4582_v54 = vsub.f32 1.0, %v4006_v5  ;;  %v1033_v0 = vsub.f32 %v13321_v34, %v10969_v21  ;;  %v1034_v41 = vsub.f32 %v13321_v34, %v10971_v15  ;;  %v4599_v8 = vsub.f32 1.0, %v4023_v16  ;;  %v13323_v5 = vld [vmem:[#allocation15_spill] sm:$0xff] }
 0x3ef   : > { %v4600_v62 = vsub.f32 1.0, %v4024_v13  ;;  %v5157_v57 = vmax.f32 %v4581_v50, 0.0  ;;  %v6039_v11 = vunpack.c.l.bf16 %v11103_v40  ;;  %v1591_v43 = vand.u32 2147483647, %v1015_v44 }
 0x3f0   : > { %v5158_v35 = vmax.f32 %v4582_v54, 0.0  ;;  %v1592_v56 = vand.u32 2147483647, %v1016_v59  ;;  %v3789_v33 = vsub.f32 %v13322_v20, %v10973_v24  ;;  %v5175_v32 = vmax.f32 %v4599_v8, 0.0 }
 0x3f1   : > { %v5176_v22 = vmax.f32 %v4600_v62, 0.0  ;;  %v1609_v28 = vand.u32 2147483647, %v1033_v0  ;;  %v1610_v39 = vand.u32 2147483647, %v1034_v41  ;;  %v2167_v30 = vsub.f32 1.0, %v1591_v43 }
 0x3f2   : > { %v5657_v3 = vpack.c.bf16 %v5158_v35, %v5157_v57  ;;  %v2168_v23 = vsub.f32 1.0, %v1592_v56  ;;  %v3790_v42 = vsub.f32 %v13322_v20, %v10983_v17  ;;  %v3807_v44 = vsub.f32 %v13323_v5, %v10973_v24 }
 0x3f3   : > { %v5666_v25 = vpack.c.bf16 %v5176_v22, %v5175_v32  ;;  %v2185_v63 = vsub.f32 1.0, %v1609_v28  ;;  %v2186_v45 = vsub.f32 1.0, %v1610_v39  ;;  %v2743_v16 = vmax.f32 %v2167_v30, 0.0 }
 0x3f4   : > { %v6597_v59 = vunpack.c.l.bf16 %v5657_v3  ;;  %v2744_v13 = vmax.f32 %v2168_v23, 0.0  ;;  %v3808_v50 = vsub.f32 %v13323_v5, %v10983_v17  ;;  %v4365_v8 = vand.u32 2147483647, %v3789_v33 }
 0x3f5   : > { %v6615_v54 = vunpack.c.l.bf16 %v5666_v25  ;;  %v2761_v0 = vmax.f32 %v2185_v63, 0.0  ;;  %v2762_v41 = vmax.f32 %v2186_v45, 0.0  ;;  %v4366_v35 = vand.u32 2147483647, %v3790_v42 }
 0x3f6   : > { %v7173_v62 = vmul.f32 %v6597_v59, %v6021_v10  ;;  %v3063_v57 = vpack.c.bf16 %v2744_v13, %v2743_v16  ;;  %v4383_v43 = vand.u32 2147483647, %v3807_v44  ;;  %v4384_v22 = vand.u32 2147483647, %v3808_v50 }
 0x3f7   : > { %v7191_v56 = vmul.f32 %v6615_v54, %v6039_v11  ;;  %v3072_v32 = vpack.c.bf16 %v2762_v41, %v2761_v0  ;;  %v4941_v28 = vsub.f32 1.0, %v4365_v8  ;;  %v4942_v39 = vsub.f32 1.0, %v4366_v35 }
 0x3f8   : > { %v4959_v20 = vsub.f32 1.0, %v4383_v43  ;;  %v6381_v34 = vunpack.c.l.bf16 %v3063_v57  ;;  %v6022_v30 = vunpack.c.h.bf16 %v11097_v7  ;;  %v4960_v37 = vsub.f32 1.0, %v4384_v22 }
 0x3f9   : > { %v7677_v23 = vpack.c.bf16 %v7191_v56, %v7173_v62  ;;  %v5517_v5 = vmax.f32 %v4941_v28, 0.0  ;;  %v6399_v2 = vunpack.c.l.bf16 %v3072_v32  ;;  %v5518_v63 = vmax.f32 %v4942_v39, 0.0 }
 0x3fa   : > { %v5535_v45 = vmax.f32 %v4959_v20, 0.0  ;;  %v6040_v10 = vunpack.c.h.bf16 %v11103_v40  ;;  %v6598_v33 = vunpack.c.h.bf16 %v5657_v3  ;;  %v5536_v42 = vmax.f32 %v4960_v37, 0.0  ;;  %v13324_v20 = vld [vmem:[#allocation41_spill] sm:$0xff] }
 0x3fb   : > { %8103 = vmatpush.bf16.msra.mxu0 %v7677_v23  ;;  %v6616_v11 = vunpack.c.h.bf16 %v5666_v25  ;;  %v6382_v44 = vunpack.c.h.bf16 %v3063_v57  ;;  %v6400_v59 = vunpack.c.h.bf16 %v3072_v32  ;;  %v5837_v16 = vpack.c.bf16 %v5518_v63, %v5517_v5 }
 0x3fc   : > { %v7174_v13 = vmul.f32 %v6598_v33, %v6022_v30  ;;  %v619_v50 = vsub.f32 %v13207_v4, %v10969_v21  ;;  %v620_v7 = vsub.f32 %v13207_v4, %v10971_v15  ;;  %v5846_v54 = vpack.c.bf16 %v5536_v42, %v5535_v45 }
 0x3fd   : > { %v7192_v0 = vmul.f32 %v6616_v11, %v6040_v10  ;;  %v637_v41 = vsub.f32 %v13324_v20, %v10969_v21  ;;  %v638_v40 = vsub.f32 %v13324_v20, %v10971_v15  ;;  %v6957_v37 = vunpack.c.l.bf16 %v5837_v16  ;;  %v13325_v10 = vld [vmem:[#allocation44_spill] sm:$0xff] }
 0x3fe   : > { %v6958_v3 = vunpack.c.h.bf16 %v5837_v16  ;;  %v1195_v25 = vand.u32 2147483647, %v619_v50  ;;  %v1196_v8 = vand.u32 2147483647, %v620_v7  ;;  %v6975_v5 = vunpack.c.l.bf16 %v5846_v54  ;;  %v13326_v50 = vld [vmem:[#allocation37_spill] sm:$0xff] }
 0x3ff   : > { %v7678_v62 = vpack.c.bf16 %v7192_v0, %v7174_v13  ;;  %v6976_v57 = vunpack.c.h.bf16 %v5846_v54  ;;  %v1213_v35 = vand.u32 2147483647, %v637_v41  ;;  %v7533_v43 = vmul.f32 %v6957_v37, %v6381_v34  ;;  %v13327_v41 = vld [vmem:[#allocation18_spill] sm:$0xff] }
 0x400   : > { %v7534_v56 = vmul.f32 %v6958_v3, %v6382_v44  ;;  %v1214_v32 = vand.u32 2147483647, %v638_v40  ;;  %v1771_v22 = vsub.f32 1.0, %v1195_v25  ;;  %v7551_v28 = vmul.f32 %v6975_v5, %v6399_v2 }
 0x401   : > { %8129 = vmatpush.bf16.msra.mxu2 %v7678_v62  ;;  %v7552_v39 = vmul.f32 %v6976_v57, %v6400_v59  ;;  %v1772_v30 = vsub.f32 1.0, %v1196_v8  ;;  %v1789_v23 = vsub.f32 1.0, %v1213_v35  ;;  %v3393_v33 = vsub.f32 %v13325_v10, %v10973_v24  ;;  %v13328_v35 = vld [vmem:[#allocation28_spill] sm:$0xff] }
 0x402   : > { %v1790_v63 = vsub.f32 1.0, %v1214_v32  ;;  %v2347_v45 = vmax.f32 %v1771_v22, 0.0  ;;  %v3394_v42 = vsub.f32 %v13325_v10, %v10983_v17  ;;  %v7857_v11 = vpack.c.bf16 %v7551_v28, %v7533_v43 }
 0x403   : > { %v7858_v16 = vpack.c.bf16 %v7552_v39, %v7534_v56  ;;  %v2348_v13 = vmax.f32 %v1772_v30, 0.0  ;;  %v2365_v34 = vmax.f32 %v1789_v23, 0.0  ;;  %v3411_v2 = vsub.f32 %v13326_v50, %v10973_v24 }
 0x404   : > { %v2366_v44 = vmax.f32 %v1790_v63, 0.0  ;;  %v3412_v59 = vsub.f32 %v13326_v50, %v10983_v17  ;;  %v3969_v7 = vand.u32 2147483647, %v3393_v33  ;;  %8114 = vmatpush.bf16.msra.mxu1 %v7857_v11  ;;  %v3970_v0 = vand.u32 2147483647, %v3394_v42 }
 0x405   : > { %8140 = vmatpush.bf16.msra.mxu3 %v7858_v16  ;;  %v11137_v54 = vpack.c.bf16 %v2348_v13, %v2347_v45  ;;  %v979_v40 = vsub.f32 %v13327_v41, %v10969_v21  ;;  %v980_v37 = vsub.f32 %v13327_v41, %v10971_v15  ;;  %v3987_v25 = vand.u32 2147483647, %v3411_v2  ;;  %v13329_v45 = vld [vmem:[#allocation11_spill] sm:$0xff] }
 0x406   : > { %v11143_v3 = vpack.c.bf16 %v2366_v44, %v2365_v34  ;;  %v3988_v8 = vand.u32 2147483647, %v3412_v59  ;;  %v4545_v5 = vsub.f32 1.0, %v3969_v7  ;;  %v4546_v62 = vsub.f32 1.0, %v3970_v0 }
 0x407   : > { %v5985_v57 = vunpack.c.l.bf16 %v11137_v54  ;;  %v997_v43 = vsub.f32 %v13328_v35, %v10969_v21  ;;  %v998_v56 = vsub.f32 %v13328_v35, %v10971_v15  ;;  %v4563_v32 = vsub.f32 1.0, %v3987_v25 }
 0x408   : > { %v4564_v22 = vsub.f32 1.0, %v3988_v8  ;;  %v5121_v28 = vmax.f32 %v4545_v5, 0.0  ;;  %v6003_v39 = vunpack.c.l.bf16 %v11143_v3  ;;  %v5122_v30 = vmax.f32 %v4546_v62, 0.0  ;;  %v13330_v8 = vld [vmem:[#allocation29_spill] sm:$0xff] }
 0x409   : > { %v1555_v23 = vand.u32 2147483647, %v979_v40  ;;  %v1556_v63 = vand.u32 2147483647, %v980_v37  ;;  %v3753_v33 = vsub.f32 %v13329_v45, %v10973_v24  ;;  %v5139_v42 = vmax.f32 %v4563_v32, 0.0 }
 0x40a   : > { %v5140_v11 = vmax.f32 %v4564_v22, 0.0  ;;  %v1573_v16 = vand.u32 2147483647, %v997_v43  ;;  %v1574_v13 = vand.u32 2147483647, %v998_v56  ;;  %v5639_v34 = vpack.c.bf16 %v5122_v30, %v5121_v28 }
 0x40b   : > { %v2131_v44 = vsub.f32 1.0, %v1555_v23  ;;  %v2132_v2 = vsub.f32 1.0, %v1556_v63  ;;  %v3754_v59 = vsub.f32 %v13329_v45, %v10983_v17  ;;  %v3771_v40 = vsub.f32 %v13330_v8, %v10973_v24 }
 0x40c   : > { %v5648_v7 = vpack.c.bf16 %v5140_v11, %v5139_v42  ;;  %v2149_v0 = vsub.f32 1.0, %v1573_v16  ;;  %v2150_v25 = vsub.f32 1.0, %v1574_v13  ;;  %v6561_v37 = vunpack.c.l.bf16 %v5639_v34 }
 0x40d   : > { %v2707_v5 = vmax.f32 %v2131_v44, 0.0  ;;  %v2708_v62 = vmax.f32 %v2132_v2, 0.0  ;;  %v3772_v32 = vsub.f32 %v13330_v8, %v10983_v17  ;;  %v4329_v28 = vand.u32 2147483647, %v3753_v33 }
 0x40e   : > { %v6579_v43 = vunpack.c.l.bf16 %v5648_v7  ;;  %v2725_v56 = vmax.f32 %v2149_v0, 0.0  ;;  %v2726_v22 = vmax.f32 %v2150_v25, 0.0  ;;  %v7137_v30 = vmul.f32 %v6561_v37, %v5985_v57 }
 0x40f   : > { %v3045_v23 = vpack.c.bf16 %v2708_v62, %v2707_v5  ;;  %v4330_v63 = vand.u32 2147483647, %v3754_v59  ;;  %v4347_v45 = vand.u32 2147483647, %v3771_v40  ;;  %v4348_v16 = vand.u32 2147483647, %v3772_v32 }
 0x410   : > { %v7155_v42 = vmul.f32 %v6579_v43, %v6003_v39  ;;  %v3054_v11 = vpack.c.bf16 %v2726_v22, %v2725_v56  ;;  %v4905_v13 = vsub.f32 1.0, %v4329_v28  ;;  %v5986_v44 = vunpack.c.h.bf16 %v11137_v54 }
 0x411   : > { %v4906_v35 = vsub.f32 1.0, %v4330_v63  ;;  %v4923_v41 = vsub.f32 1.0, %v4347_v45  ;;  %v6345_v50 = vunpack.c.l.bf16 %v3045_v23  ;;  %v4924_v10 = vsub.f32 1.0, %v4348_v16  ;;  %v13331_v45 = vld [vmem:[#allocation40_spill] sm:$0xff] }
 0x412   : > { %v7659_v2 = vpack.c.bf16 %v7155_v42, %v7137_v30  ;;  %v5481_v8 = vmax.f32 %v4905_v13, 0.0  ;;  %v6363_v20 = vunpack.c.l.bf16 %v3054_v11  ;;  %v6004_v57 = vunpack.c.h.bf16 %v11143_v3 }
 0x413   : > { %v5482_v0 = vmax.f32 %v4906_v35, 0.0  ;;  %v5499_v25 = vmax.f32 %v4923_v41, 0.0  ;;  %v6562_v33 = vunpack.c.h.bf16 %v5639_v34  ;;  %v5500_v59 = vmax.f32 %v4924_v10, 0.0  ;;  %v13332_v41 = vld [vmem:[#allocation49_spill] sm:$0xff] }
 0x414   : > { %8104 = vmatpush.bf16.msra.mxu0 %v7659_v2  ;;  %v6580_v39 = vunpack.c.h.bf16 %v5648_v7  ;;  %v6346_v40 = vunpack.c.h.bf16 %v3045_v23  ;;  %v6364_v37 = vunpack.c.h.bf16 %v3054_v11  ;;  %v583_v32 = vsub.f32 %v13331_v45, %v10969_v21 }
 0x415   : > { %v5819_v5 = vpack.c.bf16 %v5482_v0, %v5481_v8  ;;  %v7138_v62 = vmul.f32 %v6562_v33, %v5986_v44  ;;  %v584_v54 = vsub.f32 %v13331_v45, %v10971_v15  ;;  %v5828_v43 = vpack.c.bf16 %v5500_v59, %v5499_v25  ;;  %v13333_v33 = vld [vmem:[#allocation51_spill] sm:$0xff] }
 0x416   : > { %v7156_v56 = vmul.f32 %v6580_v39, %v6004_v57  ;;  %v601_v35 = vsub.f32 %v13332_v41, %v10969_v21  ;;  %v602_v3 = vsub.f32 %v13332_v41, %v10971_v15  ;;  %v1159_v7 = vand.u32 2147483647, %v583_v32 }
 0x417   : > { %v6921_v10 = vunpack.c.l.bf16 %v5819_v5  ;;  %v6922_v34 = vunpack.c.h.bf16 %v5819_v5  ;;  %v1160_v22 = vand.u32 2147483647, %v584_v54  ;;  %v6939_v8 = vunpack.c.l.bf16 %v5828_v43  ;;  %v13334_v54 = vld [vmem:[#allocation45_spill] sm:$0xff] }
 0x418   : > { %v7660_v28 = vpack.c.bf16 %v7156_v56, %v7138_v62  ;;  %v6940_v30 = vunpack.c.h.bf16 %v5828_v43  ;;  %v1177_v23 = vand.u32 2147483647, %v601_v35  ;;  %v1178_v11 = vand.u32 2147483647, %v602_v3  ;;  %v13335_v3 = vld [vmem:[#allocation26_spill] sm:$0xff] }
 0x419   : > { %v7497_v63 = vmul.f32 %v6921_v10, %v6345_v50  ;;  %v7498_v42 = vmul.f32 %v6922_v34, %v6346_v40  ;;  %v1735_v16 = vsub.f32 1.0, %v1159_v7  ;;  %v7515_v13 = vmul.f32 %v6939_v8, %v6363_v20 }
 0x41a   : > { %8130 = vmatpush.bf16.msra.mxu2 %v7660_v28  ;;  %v7516_v44 = vmul.f32 %v6940_v30, %v6364_v37  ;;  %v1736_v2 = vsub.f32 1.0, %v1160_v22  ;;  %v1753_v0 = vsub.f32 1.0, %v1177_v23  ;;  %v1754_v25 = vsub.f32 1.0, %v1178_v11 }
 0x41b   : > { %v2311_v57 = vmax.f32 %v1735_v16, 0.0  ;;  %v3357_v59 = vsub.f32 %v13333_v33, %v10973_v24  ;;  %v3358_v39 = vsub.f32 %v13333_v33, %v10983_v17  ;;  %v7839_v5 = vpack.c.bf16 %v7515_v13, %v7497_v63  ;;  %v13336_v63 = vld [vmem:[#allocation31_spill] sm:$0xff] }
 0x41c   : > { %v7840_v62 = vpack.c.bf16 %v7516_v44, %v7498_v42  ;;  %v2312_v32 = vmax.f32 %v1736_v2, 0.0  ;;  %v2329_v50 = vmax.f32 %v1753_v0, 0.0  ;;  %v2330_v40 = vmax.f32 %v1754_v25, 0.0 }
 0x41d   : > { %v3375_v20 = vsub.f32 %v13334_v54, %v10973_v24  ;;  %v3376_v37 = vsub.f32 %v13334_v54, %v10983_v17  ;;  %v3933_v43 = vand.u32 2147483647, %v3357_v59  ;;  %8115 = vmatpush.bf16.msra.mxu1 %v7839_v5  ;;  %v3934_v35 = vand.u32 2147483647, %v3358_v39  ;;  %v13337_v59 = vld [vmem:[#allocation38_spill] sm:$0xff] }
 0x41e   : > { %8141 = vmatpush.bf16.msra.mxu3 %v7840_v62  ;;  %v11177_v56 = vpack.c.bf16 %v2312_v32, %v2311_v57  ;;  %v943_v10 = vsub.f32 %v13335_v3, %v10969_v21  ;;  %v944_v34 = vsub.f32 %v13335_v3, %v10971_v15  ;;  %v11183_v7 = vpack.c.bf16 %v2330_v40, %v2329_v50 }
 0x41f   : > { %v3951_v22 = vand.u32 2147483647, %v3375_v20  ;;  %v3952_v8 = vand.u32 2147483647, %v3376_v37  ;;  %v4509_v28 = vsub.f32 1.0, %v3933_v43  ;;  %v4510_v30 = vsub.f32 1.0, %v3934_v35 }
 0x420   : > { %v5949_v23 = vunpack.c.l.bf16 %v11177_v56  ;;  %v961_v42 = vsub.f32 %v13336_v63, %v10969_v21  ;;  %v962_v11 = vsub.f32 %v13336_v63, %v10971_v15  ;;  %v5967_v2 = vunpack.c.l.bf16 %v11183_v7 }
 0x421   : > { %v4527_v16 = vsub.f32 1.0, %v3951_v22  ;;  %v4528_v13 = vsub.f32 1.0, %v3952_v8  ;;  %v5085_v44 = vmax.f32 %v4509_v28, 0.0  ;;  %v5086_v0 = vmax.f32 %v4510_v30, 0.0  ;;  %v13338_v28 = vld [vmem:[#allocation30_spill] sm:$0xff] }
 0x422   : > { %v1519_v25 = vand.u32 2147483647, %v943_v10  ;;  %v1520_v57 = vand.u32 2147483647, %v944_v34  ;;  %v3717_v39 = vsub.f32 %v13337_v59, %v10973_v24  ;;  %v1537_v32 = vand.u32 2147483647, %v961_v42 }
 0x423   : > { %v5103_v5 = vmax.f32 %v4527_v16, 0.0  ;;  %v5104_v62 = vmax.f32 %v4528_v13, 0.0  ;;  %v1538_v50 = vand.u32 2147483647, %v962_v11  ;;  %v5621_v40 = vpack.c.bf16 %v5086_v0, %v5085_v44 }
 0x424   : > { %v2095_v20 = vsub.f32 1.0, %v1519_v25  ;;  %v2096_v37 = vsub.f32 1.0, %v1520_v57  ;;  %v3718_v43 = vsub.f32 %v13337_v59, %v10983_v17  ;;  %v2113_v22 = vsub.f32 1.0, %v1537_v32 }
 0x425   : > { %v5630_v35 = vpack.c.bf16 %v5104_v62, %v5103_v5  ;;  %v2114_v8 = vsub.f32 1.0, %v1538_v50  ;;  %v3735_v10 = vsub.f32 %v13338_v28, %v10973_v24  ;;  %v6525_v34 = vunpack.c.l.bf16 %v5621_v40 }
 0x426   : > { %v2671_v30 = vmax.f32 %v2095_v20, 0.0  ;;  %v2672_v63 = vmax.f32 %v2096_v37, 0.0  ;;  %v3736_v16 = vsub.f32 %v13338_v28, %v10983_v17  ;;  %v2689_v11 = vmax.f32 %v2113_v22, 0.0 }
 0x427   : > { %v6543_v42 = vunpack.c.l.bf16 %v5630_v35  ;;  %v2690_v13 = vmax.f32 %v2114_v8, 0.0  ;;  %v4293_v44 = vand.u32 2147483647, %v3717_v39  ;;  %v7101_v0 = vmul.f32 %v6525_v34, %v5949_v23 }
 0x428   : > { %v3027_v25 = vpack.c.bf16 %v2672_v63, %v2671_v30  ;;  %v4294_v57 = vand.u32 2147483647, %v3718_v43  ;;  %v4311_v59 = vand.u32 2147483647, %v3735_v10  ;;  %v4312_v32 = vand.u32 2147483647, %v3736_v16 }
 0x429   : > { %v7119_v5 = vmul.f32 %v6543_v42, %v5967_v2  ;;  %v3036_v62 = vpack.c.bf16 %v2690_v13, %v2689_v11  ;;  %v4869_v50 = vsub.f32 1.0, %v4293_v44  ;;  %v5950_v20 = vunpack.c.h.bf16 %v11177_v56 }
 0x42a   : > { %v4870_v3 = vsub.f32 1.0, %v4294_v57  ;;  %v4887_v54 = vsub.f32 1.0, %v4311_v59  ;;  %v6309_v33 = vunpack.c.l.bf16 %v3027_v25  ;;  %v4888_v41 = vsub.f32 1.0, %v4312_v32 }
 0x42b   : > { %v7641_v37 = vpack.c.bf16 %v7119_v5, %v7101_v0  ;;  %v5445_v28 = vmax.f32 %v4869_v50, 0.0  ;;  %v6327_v45 = vunpack.c.l.bf16 %v3036_v62  ;;  %v5968_v23 = vunpack.c.h.bf16 %v11183_v7 }
 0x42c   : > { %v5446_v22 = vmax.f32 %v4870_v3, 0.0  ;;  %v5463_v8 = vmax.f32 %v4887_v54, 0.0  ;;  %v6526_v63 = vunpack.c.h.bf16 %v5621_v40  ;;  %v5464_v39 = vmax.f32 %v4888_v41, 0.0 }
 0x42d   : > { %8105 = vmatpush.bf16.msra.mxu0 %v7641_v37  ;;  %v6544_v2 = vunpack.c.h.bf16 %v5630_v35  ;;  %v6310_v43 = vunpack.c.h.bf16 %v3027_v25  ;;  %v6328_v10 = vunpack.c.h.bf16 %v3036_v62  ;;  %v547_v59 = vsub.f32 %v13222_v31, %v10969_v21 }
 0x42e   : > { %v5801_v34 = vpack.c.bf16 %v5446_v22, %v5445_v28  ;;  %v7102_v30 = vmul.f32 %v6526_v63, %v5950_v20  ;;  %v548_v56 = vsub.f32 %v13222_v31, %v10971_v15  ;;  %v5810_v16 = vpack.c.bf16 %v5464_v39, %v5463_v8 }
 0x42f   : > { %v7120_v42 = vmul.f32 %v6544_v2, %v5968_v23  ;;  %v565_v54 = vsub.f32 %v9933_v53, %v10969_v21  ;;  %v566_v3 = vsub.f32 %v9933_v53, %v10971_v15  ;;  %v1123_v40 = vand.u32 2147483647, %v547_v59 }
 0x430   : > { %v6885_v41 = vunpack.c.l.bf16 %v5801_v34  ;;  %v6886_v7 = vunpack.c.h.bf16 %v5801_v34  ;;  %v1124_v35 = vand.u32 2147483647, %v548_v56  ;;  %v6903_v28 = vunpack.c.l.bf16 %v5810_v16  ;;  %v13339_v34 = vld [vmem:[#allocation52_spill] sm:$0xff] }
 0x431   : > { %v7642_v11 = vpack.c.bf16 %v7120_v42, %v7102_v30  ;;  %v6904_v13 = vunpack.c.h.bf16 %v5810_v16  ;;  %v1141_v44 = vand.u32 2147483647, %v565_v54  ;;  %v1142_v57 = vand.u32 2147483647, %v566_v3  ;;  %v13340_v16 = vld [vmem:[#allocation33_spill] sm:$0xff] }
 0x432   : > { %v7461_v0 = vmul.f32 %v6885_v41, %v6309_v33  ;;  %v7462_v25 = vmul.f32 %v6886_v7, %v6310_v43  ;;  %v1699_v5 = vsub.f32 1.0, %v1123_v40  ;;  %v7479_v62 = vmul.f32 %v6903_v28, %v6327_v45 }
 0x433   : > { %8131 = vmatpush.bf16.msra.mxu2 %v7642_v11  ;;  %v7480_v32 = vmul.f32 %v6904_v13, %v6328_v10  ;;  %v1700_v50 = vsub.f32 1.0, %v1124_v35  ;;  %v1717_v20 = vsub.f32 1.0, %v1141_v44  ;;  %v1718_v37 = vsub.f32 1.0, %v1142_v57  ;;  %v13341_v11 = vld [vmem:[#allocation36_spill] sm:$0xff] }
 0x434   : > { %v2275_v22 = vmax.f32 %v1699_v5, 0.0  ;;  %v3321_v8 = vsub.f32 %v9954_v58, %v10973_v24  ;;  %v3322_v23 = vsub.f32 %v9954_v58, %v10983_v17  ;;  %v7821_v63 = vpack.c.bf16 %v7479_v62, %v7461_v0 }
 0x435   : > { %v7822_v39 = vpack.c.bf16 %v7480_v32, %v7462_v25  ;;  %v2276_v2 = vmax.f32 %v1700_v50, 0.0  ;;  %v2293_v33 = vmax.f32 %v1717_v20, 0.0  ;;  %v2294_v43 = vmax.f32 %v1718_v37, 0.0  ;;  %v13342_v20 = vld [vmem:[#allocation13_spill] sm:$0xff] }
 0x436   : > { %v3339_v45 = vsub.f32 %v13339_v34, %v10973_v24  ;;  %v3340_v10 = vsub.f32 %v13339_v34, %v10983_v17  ;;  %v3897_v30 = vand.u32 2147483647, %v3321_v8  ;;  %8116 = vmatpush.bf16.msra.mxu1 %v7821_v63  ;;  %v3898_v56 = vand.u32 2147483647, %v3322_v23 }
 0x437   : > { %8142 = vmatpush.bf16.msra.mxu3 %v7822_v39  ;;  %v11217_v59 = vpack.c.bf16 %v2276_v2, %v2275_v22  ;;  %v907_v42 = vsub.f32 %v13340_v16, %v10969_v21  ;;  %v908_v54 = vsub.f32 %v13340_v16, %v10971_v15  ;;  %v11223_v3 = vpack.c.bf16 %v2294_v43, %v2293_v33 }
 0x438   : > { %v3915_v41 = vand.u32 2147483647, %v3339_v45  ;;  %v3916_v7 = vand.u32 2147483647, %v3340_v10  ;;  %v4473_v40 = vsub.f32 1.0, %v3897_v30  ;;  %v4474_v35 = vsub.f32 1.0, %v3898_v56 }
 0x439   : > { %v5913_v28 = vunpack.c.l.bf16 %v11217_v59  ;;  %v925_v13 = vsub.f32 %v13341_v11, %v10969_v21  ;;  %v926_v44 = vsub.f32 %v13341_v11, %v10971_v15  ;;  %v5931_v5 = vunpack.c.l.bf16 %v11223_v3  ;;  %v13343_v56 = vld [vmem:[#allocation47_spill] sm:$0xff] }
 0x43a   : > { %v4491_v0 = vsub.f32 1.0, %v3915_v41  ;;  %v4492_v25 = vsub.f32 1.0, %v3916_v7  ;;  %v5049_v57 = vmax.f32 %v4473_v40, 0.0  ;;  %v5050_v62 = vmax.f32 %v4474_v35, 0.0 }
 0x43b   : > { %v1483_v32 = vand.u32 2147483647, %v907_v42  ;;  %v1484_v50 = vand.u32 2147483647, %v908_v54  ;;  %v3681_v37 = vsub.f32 %v13342_v20, %v10973_v24  ;;  %v1501_v23 = vand.u32 2147483647, %v925_v13 }
 0x43c   : > { %v5067_v22 = vmax.f32 %v4491_v0, 0.0  ;;  %v5068_v8 = vmax.f32 %v4492_v25, 0.0  ;;  %v1502_v63 = vand.u32 2147483647, %v926_v44  ;;  %v5603_v39 = vpack.c.bf16 %v5050_v62, %v5049_v57 }
 0x43d   : > { %v2059_v2 = vsub.f32 1.0, %v1483_v32  ;;  %v2060_v33 = vsub.f32 1.0, %v1484_v50  ;;  %v3682_v43 = vsub.f32 %v13342_v20, %v10983_v17  ;;  %v2077_v10 = vsub.f32 1.0, %v1501_v23 }
 0x43e   : > { %v5612_v45 = vpack.c.bf16 %v5068_v8, %v5067_v22  ;;  %v2078_v30 = vsub.f32 1.0, %v1502_v63  ;;  %v3699_v42 = vsub.f32 %v13343_v56, %v10973_v24  ;;  %v6489_v54 = vunpack.c.l.bf16 %v5603_v39 }
 0x43f   : > { %v2635_v41 = vmax.f32 %v2059_v2, 0.0  ;;  %v2636_v7 = vmax.f32 %v2060_v33, 0.0  ;;  %v3700_v40 = vsub.f32 %v13343_v56, %v10983_v17  ;;  %v2653_v13 = vmax.f32 %v2077_v10, 0.0 }
 0x440   : > { %v6507_v35 = vunpack.c.l.bf16 %v5612_v45  ;;  %v2654_v44 = vmax.f32 %v2078_v30, 0.0  ;;  %v4257_v0 = vand.u32 2147483647, %v3681_v37  ;;  %v7065_v25 = vmul.f32 %v6489_v54, %v5913_v28 }
 0x441   : > { %v3009_v57 = vpack.c.bf16 %v2636_v7, %v2635_v41  ;;  %v4258_v62 = vand.u32 2147483647, %v3682_v43  ;;  %v4275_v32 = vand.u32 2147483647, %v3699_v42  ;;  %v4276_v8 = vand.u32 2147483647, %v3700_v40 }
 0x442   : > { %v7083_v50 = vmul.f32 %v6507_v35, %v5931_v5  ;;  %v3018_v22 = vpack.c.bf16 %v2654_v44, %v2653_v13  ;;  %v4833_v23 = vsub.f32 1.0, %v4257_v0  ;;  %v5914_v2 = vunpack.c.h.bf16 %v11217_v59 }
 0x443   : > { %v4834_v63 = vsub.f32 1.0, %v4258_v62  ;;  %v4851_v20 = vsub.f32 1.0, %v4275_v32  ;;  %v6273_v11 = vunpack.c.l.bf16 %v3009_v57  ;;  %v4852_v16 = vsub.f32 1.0, %v4276_v8 }
 0x444   : > { %v7623_v33 = vpack.c.bf16 %v7083_v50, %v7065_v25  ;;  %v5409_v56 = vmax.f32 %v4833_v23, 0.0  ;;  %v6291_v34 = vunpack.c.l.bf16 %v3018_v22  ;;  %v5932_v28 = vunpack.c.h.bf16 %v11223_v3 }
 0x445   : > { %v5410_v10 = vmax.f32 %v4834_v63, 0.0  ;;  %v5427_v30 = vmax.f32 %v4851_v20, 0.0  ;;  %v6490_v37 = vunpack.c.h.bf16 %v5603_v39  ;;  %v5428_v43 = vmax.f32 %v4852_v16, 0.0 }
 0x446   : > { %8106 = vmatpush.bf16.msra.mxu0 %v7623_v33  ;;  %v6508_v5 = vunpack.c.h.bf16 %v5612_v45  ;;  %v6274_v42 = vunpack.c.h.bf16 %v3009_v57  ;;  %v6292_v54 = vunpack.c.h.bf16 %v3018_v22  ;;  %v511_v40 = vsub.f32 %v9921_v29, %v10969_v21 }
 0x447   : > { %v5783_v41 = vpack.c.bf16 %v5410_v10, %v5409_v56  ;;  %v7066_v7 = vmul.f32 %v6490_v37, %v5914_v2  ;;  %v512_v59 = vsub.f32 %v9921_v29, %v10971_v15  ;;  %v5792_v35 = vpack.c.bf16 %v5428_v43, %v5427_v30 }
 0x448   : > { %v7084_v13 = vmul.f32 %v6508_v5, %v5932_v28  ;;  %v529_v20 = vsub.f32 %v13266_v61, %v10969_v21  ;;  %v530_v3 = vsub.f32 %v13266_v61, %v10971_v15  ;;  %v1087_v45 = vand.u32 2147483647, %v511_v40 }
 0x449   : > { %v6849_v16 = vunpack.c.l.bf16 %v5783_v41  ;;  %v6850_v39 = vunpack.c.h.bf16 %v5783_v41  ;;  %v1088_v44 = vand.u32 2147483647, %v512_v59  ;;  %v6867_v56 = vunpack.c.l.bf16 %v5792_v35  ;;  %v13344_v41 = vld [vmem:[#allocation54_spill] sm:$0xff] }
 0x44a   : > { %v7624_v0 = vpack.c.bf16 %v7084_v13, %v7066_v7  ;;  %v6868_v25 = vunpack.c.h.bf16 %v5792_v35  ;;  %v1105_v57 = vand.u32 2147483647, %v529_v20  ;;  %v1106_v50 = vand.u32 2147483647, %v530_v3  ;;  %v13345_v35 = vld [vmem:[#allocation42_spill] sm:$0xff] }
 0x44b   : > { %v7425_v62 = vmul.f32 %v6849_v16, %v6273_v11  ;;  %v7426_v32 = vmul.f32 %v6850_v39, %v6274_v42  ;;  %v1663_v22 = vsub.f32 1.0, %v1087_v45  ;;  %v7443_v8 = vmul.f32 %v6867_v56, %v6291_v34 }
 0x44c   : > { %8132 = vmatpush.bf16.msra.mxu2 %v7624_v0  ;;  %v7444_v23 = vmul.f32 %v6868_v25, %v6292_v54  ;;  %v1664_v63 = vsub.f32 1.0, %v1088_v44  ;;  %v1681_v2 = vsub.f32 1.0, %v1105_v57  ;;  %v1682_v33 = vsub.f32 1.0, %v1106_v50  ;;  %v13346_v0 = vld [vmem:[#allocation39_spill] sm:$0xff] }
 0x44d   : > { %v2239_v10 = vmax.f32 %v1663_v22, 0.0  ;;  %v3285_v30 = vsub.f32 %v13305_v27, %v10973_v24  ;;  %v3286_v28 = vsub.f32 %v13305_v27, %v10983_v17  ;;  %v7803_v37 = vpack.c.bf16 %v7443_v8, %v7425_v62 }
 0x44e   : > { %v7804_v43 = vpack.c.bf16 %v7444_v23, %v7426_v32  ;;  %v2240_v5 = vmax.f32 %v1664_v63, 0.0  ;;  %v2257_v11 = vmax.f32 %v1681_v2, 0.0  ;;  %v2258_v42 = vmax.f32 %v1682_v33, 0.0  ;;  %v13347_v2 = vld [vmem:[#allocation53_spill] sm:$0xff] }
 0x44f   : > { %v3303_v34 = vsub.f32 %v13344_v41, %v10973_v24  ;;  %v3304_v54 = vsub.f32 %v13344_v41, %v10983_v17  ;;  %v3861_v7 = vand.u32 2147483647, %v3285_v30  ;;  %8117 = vmatpush.bf16.msra.mxu1 %v7803_v37  ;;  %v3862_v59 = vand.u32 2147483647, %v3286_v28 }
 0x450   : > { %8143 = vmatpush.bf16.msra.mxu3 %v7804_v43  ;;  %v11257_v40 = vpack.c.bf16 %v2240_v5, %v2239_v10  ;;  %v871_v13 = vsub.f32 %v13345_v35, %v10969_v21  ;;  %v872_v20 = vsub.f32 %v13345_v35, %v10971_v15  ;;  %v11263_v3 = vpack.c.bf16 %v2258_v42, %v2257_v11 }
 0x451   : > { %v3879_v16 = vand.u32 2147483647, %v3303_v34  ;;  %v3880_v39 = vand.u32 2147483647, %v3304_v54  ;;  %v4437_v45 = vsub.f32 1.0, %v3861_v7  ;;  %v4438_v44 = vsub.f32 1.0, %v3862_v59 }
 0x452   : > { %v5877_v56 = vunpack.c.l.bf16 %v11257_v40  ;;  %v889_v25 = vsub.f32 %v13346_v0, %v10969_v21  ;;  %v890_v57 = vsub.f32 %v13346_v0, %v10971_v15  ;;  %v5895_v22 = vunpack.c.l.bf16 %v11263_v3  ;;  %v13348_v59 = vld [vmem:[#allocation48_spill] sm:$0xff] }
 0x453   : > { %v4455_v62 = vsub.f32 1.0, %v3879_v16  ;;  %v4456_v32 = vsub.f32 1.0, %v3880_v39  ;;  %v5013_v50 = vmax.f32 %v4437_v45, 0.0  ;;  %v5014_v8 = vmax.f32 %v4438_v44, 0.0 }
 0x454   : > { %v1447_v23 = vand.u32 2147483647, %v871_v13  ;;  %v1448_v63 = vand.u32 2147483647, %v872_v20  ;;  %v3645_v33 = vsub.f32 %v13347_v2, %v10973_v24  ;;  %v1465_v28 = vand.u32 2147483647, %v889_v25 }
 0x455   : > { %v5031_v10 = vmax.f32 %v4455_v62, 0.0  ;;  %v5032_v30 = vmax.f32 %v4456_v32, 0.0  ;;  %v1466_v37 = vand.u32 2147483647, %v890_v57  ;;  %v5585_v43 = vpack.c.bf16 %v5014_v8, %v5013_v50 }
 0x456   : > { %v2023_v5 = vsub.f32 1.0, %v1447_v23  ;;  %v2024_v11 = vsub.f32 1.0, %v1448_v63  ;;  %v3646_v42 = vsub.f32 %v13347_v2, %v10983_v17  ;;  %v2041_v54 = vsub.f32 1.0, %v1465_v28 }
 0x457   : > { %v5594_v34 = vpack.c.bf16 %v5032_v30, %v5031_v10  ;;  %v2042_v7 = vsub.f32 1.0, %v1466_v37  ;;  %v3663_v13 = vsub.f32 %v13348_v59, %v10973_v24  ;;  %v6453_v20 = vunpack.c.l.bf16 %v5585_v43 }
 0x458   : > { %v2599_v16 = vmax.f32 %v2023_v5, 0.0  ;;  %v2600_v39 = vmax.f32 %v2024_v11, 0.0  ;;  %v3664_v45 = vsub.f32 %v13348_v59, %v10983_v17  ;;  %v2617_v25 = vmax.f32 %v2041_v54, 0.0 }
 0x459   : > { %v6471_v44 = vunpack.c.l.bf16 %v5594_v34  ;;  %v2618_v57 = vmax.f32 %v2042_v7, 0.0  ;;  %v4221_v62 = vand.u32 2147483647, %v3645_v33  ;;  %v7029_v32 = vmul.f32 %v6453_v20, %v5877_v56 }
 0x45a   : > { %v2991_v50 = vpack.c.bf16 %v2600_v39, %v2599_v16  ;;  %v4222_v8 = vand.u32 2147483647, %v3646_v42  ;;  %v4239_v23 = vand.u32 2147483647, %v3663_v13  ;;  %v4240_v30 = vand.u32 2147483647, %v3664_v45 }
 0x45b   : > { %v7047_v63 = vmul.f32 %v6471_v44, %v5895_v22  ;;  %v3000_v10 = vpack.c.bf16 %v2618_v57, %v2617_v25  ;;  %v4797_v28 = vsub.f32 1.0, %v4221_v62  ;;  %v5878_v5 = vunpack.c.h.bf16 %v11257_v40  ;;  %v9085_v44 = vld [vmem:[%s9355_s21 + $0x10] sm:$0xff] }
 0x45c   : > { %v4798_v37 = vsub.f32 1.0, %v4222_v8  ;;  %v4815_v2 = vsub.f32 1.0, %v4239_v23  ;;  %v6237_v0 = vunpack.c.l.bf16 %v2991_v50  ;;  %v4816_v59 = vsub.f32 1.0, %v4240_v30 }
 0x45d   : > { %v7605_v11 = vpack.c.bf16 %v7047_v63, %v7029_v32  ;;  %v5373_v35 = vmax.f32 %v4797_v28, 0.0  ;;  %v6255_v54 = vunpack.c.l.bf16 %v3000_v10  ;;  %v5896_v56 = vunpack.c.h.bf16 %v11263_v3  ;;  %v13349_v28 = vld [vmem:[#allocation19_spill] sm:$0xff] }
 0x45e   : > { %v5374_v7 = vmax.f32 %v4798_v37, 0.0  ;;  %v5391_v33 = vmax.f32 %v4815_v2, 0.0  ;;  %v6454_v42 = vunpack.c.h.bf16 %v5585_v43  ;;  %v5392_v22 = vmax.f32 %v4816_v59, 0.0  ;;  %v9086_v43 = vld.sshfl [vmem:[#allocation1] sm:$0xff pattern:$0x73625140] }
 0x45f   : > { %8107 = vmatpush.bf16.msra.mxu0 %v7605_v11  ;;  %v6472_v13 = vunpack.c.h.bf16 %v5594_v34  ;;  %v6238_v20 = vunpack.c.h.bf16 %v2991_v50  ;;  %v6256_v16 = vunpack.c.h.bf16 %v3000_v10  ;;  %v459_v25 = vperm.slane %v9085_v44, 4 }
 0x460   : > { %v5765_v39 = vpack.c.bf16 %v5374_v7, %v5373_v35  ;;  %v7030_v45 = vmul.f32 %v6454_v42, %v5878_v5  ;;  %v460_v40 = vperm.slane %v9085_v44, 6  ;;  %v5774_v57 = vpack.c.bf16 %v5392_v22, %v5391_v33  ;;  %v13350_v33 = vld [vmem:[#allocation22_spill] sm:$0xff] }
 0x461   : > { %v7048_v62 = vmul.f32 %v6472_v13, %v5896_v56  ;;  %v3233_v32 = vperm.slane %v9085_v44, 5  ;;  %v3234_v8 = vperm.slane %v9085_v44, 7  ;;  %v11282_v2 = vperm.slane %v459_v25, 0 }
 0x462   : > { %v6813_v23 = vunpack.c.l.bf16 %v5765_v39  ;;  %v6814_v63 = vunpack.c.h.bf16 %v5765_v39  ;;  %v11284_v3 = vperm.slane %v460_v40, 0  ;;  %8108 = vmatmul.bf16.vlgmr.msra.gmra.mxu0 %v9086_v43  ;;  %v6831_v34 = vunpack.c.l.bf16 %v5774_v57 }
 0x463   : > { %v7606_v59 = vpack.c.bf16 %v7048_v62, %v7030_v45  ;;  %v6832_v50 = vunpack.c.h.bf16 %v5774_v57  ;;  %v11286_v35 = vperm.slane %v3233_v32, 1  ;;  %v765_v37 = vsub.f32 %v13349_v28, %v11282_v2  ;;  %v13352_v62 = vld [vmem:[#allocation6_spill] sm:$0xff] }
 0x464   : > { %v7389_v10 = vmul.f32 %v6813_v23, %v6237_v0  ;;  %v7390_v30 = vmul.f32 %v6814_v63, %v6238_v20  ;;  %v766_v5 = vsub.f32 %v13349_v28, %v11284_v3  ;;  %v7407_v11 = vmul.f32 %v6831_v34, %v6255_v54  ;;  %v13351_v0 = vld [vmem:[#allocation5_spill] sm:$0xff] }
 0x465   : > { %8133 = vmatpush.bf16.msra.mxu2 %v7606_v59  ;;  %v7408_v7 = vmul.f32 %v6832_v50, %v6256_v16  ;;  %v783_v56 = vsub.f32 %v13350_v33, %v11282_v2  ;;  %v784_v42 = vsub.f32 %v13350_v33, %v11284_v3  ;;  %v1341_v22 = vand.u32 2147483647, %v765_v37 }
 0x466   : > { %v1342_v13 = vand.u32 2147483647, %v766_v5  ;;  %v11296_v39 = vperm.slane %v3234_v8, 1  ;;  %v3539_v20 = vsub.f32 %v13351_v0, %v11286_v35  ;;  %v7785_v45 = vpack.c.bf16 %v7407_v11, %v7389_v10 }
 0x467   : > { %v7786_v44 = vpack.c.bf16 %v7408_v7, %v7390_v30  ;;  %v1359_v25 = vand.u32 2147483647, %v783_v56  ;;  %v1360_v40 = vand.u32 2147483647, %v784_v42  ;;  %v1917_v54 = vsub.f32 1.0, %v1341_v22 }
 0x468   : > { %v1918_v57 = vsub.f32 1.0, %v1342_v13  ;;  %v3540_v16 = vsub.f32 %v13351_v0, %v11296_v39  ;;  %v3557_v32 = vsub.f32 %v13352_v62, %v11286_v35  ;;  %8134 = vmatmul.bf16.vlgmr.msra.gmra.mxu2 %v9086_v43  ;;  %8118 = vmatpush.bf16.msra.mxu1 %v7785_v45  ;;  %v3558_v63 = vsub.f32 %v13352_v62, %v11296_v39  ;;  %v13353_v43 = vld [vmem:[#allocation50_spill] sm:$0xff] }
 0x469   : > { %8144 = vmatpush.bf16.msra.mxu3 %v7786_v44  ;;  %v1935_v8 = vsub.f32 1.0, %v1359_v25  ;;  %v1936_v23 = vsub.f32 1.0, %v1360_v40  ;;  %v4115_v34 = vand.u32 2147483647, %v3539_v20  ;;  %v2493_v59 = vmax.f32 %v1917_v54, 0.0 }
 0x46a   : > { %v2494_v50 = vmax.f32 %v1918_v57, 0.0  ;;  %v4116_v10 = vand.u32 2147483647, %v3540_v16  ;;  %v4133_v30 = vand.u32 2147483647, %v3557_v32  ;;  %v835_v13 = vsub.f32 %v13353_v43, %v10969_v21 }
 0x46b   : > { %v2511_v37 = vmax.f32 %v1935_v8, 0.0  ;;  %v2512_v5 = vmax.f32 %v1936_v23, 0.0  ;;  %v4134_v11 = vand.u32 2147483647, %v3558_v63  ;;  %v4691_v7 = vsub.f32 1.0, %v4115_v34  ;;  %v13354_v63 = vld [vmem:[#allocation46_spill] sm:$0xff] }
 0x46c   : > { %v2938_v56 = vpack.c.bf16 %v2494_v50, %v2493_v59  ;;  %v4692_v42 = vsub.f32 1.0, %v4116_v10  ;;  %v4709_v22 = vsub.f32 1.0, %v4133_v30  ;;  %v836_v20 = vsub.f32 %v13353_v43, %v10971_v15 }
 0x46d   : > { %v2947_v45 = vpack.c.bf16 %v2512_v5, %v2511_v37  ;;  %v4710_v44 = vsub.f32 1.0, %v4134_v11  ;;  %v5267_v25 = vmax.f32 %v4691_v7, 0.0  ;;  %v853_v34 = vsub.f32 %v13354_v63, %v10969_v21  ;;  %v13355_v11 = vld [vmem:[#allocation16_spill] sm:$0xff] }
 0x46e   : > { %v5268_v40 = vmax.f32 %v4692_v42, 0.0  ;;  %v5285_v54 = vmax.f32 %v4709_v22, 0.0  ;;  %v6131_v57 = vunpack.c.l.bf16 %v2938_v56  ;;  %v6132_v16 = vunpack.c.h.bf16 %v2938_v56 }
 0x46f   : > { %v5286_v32 = vmax.f32 %v4710_v44, 0.0  ;;  %v6149_v8 = vunpack.c.l.bf16 %v2947_v45  ;;  %v6150_v23 = vunpack.c.h.bf16 %v2947_v45  ;;  %v854_v50 = vsub.f32 %v13354_v63, %v10971_v15 }
 0x470   : > { %v5712_v59 = vpack.c.bf16 %v5268_v40, %v5267_v25  ;;  %v1411_v10 = vand.u32 2147483647, %v835_v13  ;;  %v1412_v30 = vand.u32 2147483647, %v836_v20  ;;  %v1429_v5 = vand.u32 2147483647, %v853_v34 }
 0x471   : > { %v5721_v37 = vpack.c.bf16 %v5286_v32, %v5285_v54  ;;  %v3609_v7 = vsub.f32 %v13355_v11, %v10973_v24  ;;  %v3610_v56 = vsub.f32 %v13355_v11, %v10983_v17  ;;  %v1430_v45 = vand.u32 2147483647, %v854_v50 }
 0x472   : > { %v6707_v42 = vunpack.c.l.bf16 %v5712_v59  ;;  %v6708_v22 = vunpack.c.h.bf16 %v5712_v59  ;;  %v1987_v44 = vsub.f32 1.0, %v1411_v10  ;;  %v1988_v25 = vsub.f32 1.0, %v1412_v30 }
 0x473   : > { %v6725_v43 = vunpack.c.l.bf16 %v5721_v37  ;;  %v6726_v62 = vunpack.c.h.bf16 %v5721_v37  ;;  %v2005_v40 = vsub.f32 1.0, %v1429_v5  ;;  %v2006_v13 = vsub.f32 1.0, %v1430_v45 }
 0x474   : > { %v7283_v0 = vmul.f32 %v6707_v42, %v6131_v57  ;;  %v7284_v63 = vmul.f32 %v6708_v22, %v6132_v16  ;;  %v2563_v20 = vmax.f32 %v1987_v44, 0.0  ;;  %v2564_v34 = vmax.f32 %v1988_v25, 0.0 }
 0x475   : > { %v7301_v54 = vmul.f32 %v6725_v43, %v6149_v8  ;;  %v7302_v32 = vmul.f32 %v6726_v62, %v6150_v23  ;;  %v2581_v33 = vmax.f32 %v2005_v40, 0.0  ;;  %v2582_v28 = vmax.f32 %v2006_v13, 0.0  ;;  %v13356_v23 = vld [vmem:[#allocation7_spill] sm:$0xff] }
 0x476   : > { %v3627_v11 = vsub.f32 %v13240_v48, %v10973_v24  ;;  %v3628_v59 = vsub.f32 %v13240_v48, %v10983_v17  ;;  %v4185_v50 = vand.u32 2147483647, %v3609_v7  ;;  %v2973_v30 = vpack.c.bf16 %v2564_v34, %v2563_v20 }
 0x477   : > { %v7733_v10 = vpack.c.bf16 %v7301_v54, %v7283_v0  ;;  %v7734_v37 = vpack.c.bf16 %v7302_v32, %v7284_v63  ;;  %v4186_v5 = vand.u32 2147483647, %v3610_v56  ;;  %v2982_v57 = vpack.c.bf16 %v2582_v28, %v2581_v33  ;;  %v13357_v33 = vld [vmem:[#allocation17_spill] sm:$0xff] }
 0x478   : > { %v4203_v16 = vand.u32 2147483647, %v3627_v11  ;;  %v4204_v42 = vand.u32 2147483647, %v3628_v59  ;;  %v4761_v22 = vsub.f32 1.0, %v4185_v50  ;;  %v6201_v43 = vunpack.c.l.bf16 %v2973_v30 }
 0x479   : > { %8152 = vmatpush.bf16.msrb.mxu0 %v7733_v10  ;;  %8178 = vmatpush.bf16.msrb.mxu2 %v7734_v37  ;;  %v4762_v62 = vsub.f32 1.0, %v4186_v5  ;;  %v6202_v8 = vunpack.c.h.bf16 %v2973_v30  ;;  %v729_v45 = vsub.f32 %v13356_v23, %v11282_v2  ;;  %v6219_v7 = vunpack.c.l.bf16 %v2982_v57 }
 0x47a   : > { %v4779_v44 = vsub.f32 1.0, %v4203_v16  ;;  %v4780_v25 = vsub.f32 1.0, %v4204_v42  ;;  %v5337_v40 = vmax.f32 %v4761_v22, 0.0  ;;  %v6220_v63 = vunpack.c.h.bf16 %v2982_v57 }
 0x47b   : > { %v5338_v0 = vmax.f32 %v4762_v62, 0.0  ;;  %v730_v28 = vsub.f32 %v13356_v23, %v11284_v3  ;;  %v747_v11 = vsub.f32 %v13357_v33, %v11282_v2  ;;  %v748_v20 = vsub.f32 %v13357_v33, %v11284_v3 }
 0x47c   : > { %v5355_v56 = vmax.f32 %v4779_v44, 0.0  ;;  %v5356_v13 = vmax.f32 %v4780_v25, 0.0  ;;  %v1305_v54 = vand.u32 2147483647, %v729_v45  ;;  %v3503_v50 = vsub.f32 %v9537_v14, %v11286_v35 }
 0x47d   : > { %v5747_v32 = vpack.c.bf16 %v5338_v0, %v5337_v40  ;;  %v1306_v34 = vand.u32 2147483647, %v730_v28  ;;  %v1323_v59 = vand.u32 2147483647, %v747_v11  ;;  %v1324_v37 = vand.u32 2147483647, %v748_v20 }
 0x47e   : > { %v5756_v10 = vpack.c.bf16 %v5356_v13, %v5355_v56  ;;  %v1881_v30 = vsub.f32 1.0, %v1305_v54  ;;  %v3504_v5 = vsub.f32 %v9537_v14, %v11296_v39  ;;  %v3521_v13 = vsub.f32 %v9454_v36, %v11286_v35 }
 0x47f   : > { %v6777_v57 = vunpack.c.l.bf16 %v5747_v32  ;;  %v6778_v16 = vunpack.c.h.bf16 %v5747_v32  ;;  %v1882_v42 = vsub.f32 1.0, %v1306_v34  ;;  %v1899_v22 = vsub.f32 1.0, %v1323_v59 }
 0x480   : > { %v6795_v62 = vunpack.c.l.bf16 %v5756_v10  ;;  %v6796_v44 = vunpack.c.h.bf16 %v5756_v10  ;;  %v1900_v25 = vsub.f32 1.0, %v1324_v37  ;;  %v2457_v45 = vmax.f32 %v1881_v30, 0.0 }
 0x481   : > { %v7353_v40 = vmul.f32 %v6777_v57, %v6201_v43  ;;  %v7354_v0 = vmul.f32 %v6778_v16, %v6202_v8  ;;  %v2458_v28 = vmax.f32 %v1882_v42, 0.0  ;;  %v2475_v11 = vmax.f32 %v1899_v22, 0.0 }
 0x482   : > { %v7371_v33 = vmul.f32 %v6795_v62, %v6219_v7  ;;  %v7372_v23 = vmul.f32 %v6796_v44, %v6220_v63  ;;  %v2476_v56 = vmax.f32 %v1900_v25, 0.0  ;;  %v3522_v54 = vsub.f32 %v9454_v36, %v11296_v39 }
 0x483   : > { %v2920_v20 = vpack.c.bf16 %v2458_v28, %v2457_v45  ;;  %v4079_v32 = vand.u32 2147483647, %v3503_v50  ;;  %v4080_v34 = vand.u32 2147483647, %v3504_v5  ;;  %v4097_v30 = vand.u32 2147483647, %v3521_v13 }
 0x484   : > { %v7767_v59 = vpack.c.bf16 %v7371_v33, %v7353_v40  ;;  %v7768_v10 = vpack.c.bf16 %v7372_v23, %v7354_v0  ;;  %v2929_v37 = vpack.c.bf16 %v2476_v56, %v2475_v11  ;;  %v4098_v43 = vand.u32 2147483647, %v3522_v54 }
 0x485   : > { %v4655_v8 = vsub.f32 1.0, %v4079_v32  ;;  %v4656_v57 = vsub.f32 1.0, %v4080_v34  ;;  %v6095_v16 = vunpack.c.l.bf16 %v2920_v20  ;;  %v4673_v7 = vsub.f32 1.0, %v4097_v30 }
 0x486   : > { %8119 = vmatpush.bf16.msra.mxu1 %v7767_v59  ;;  %8145 = vmatpush.bf16.msra.mxu3 %v7768_v10  ;;  %v6113_v63 = vunpack.c.l.bf16 %v2929_v37  ;;  %v6096_v42 = vunpack.c.h.bf16 %v2920_v20  ;;  %v6114_v22 = vunpack.c.h.bf16 %v2929_v37  ;;  %v4674_v62 = vsub.f32 1.0, %v4098_v43 }
 0x487   : > { %v5231_v44 = vmax.f32 %v4655_v8, 0.0  ;;  %v5232_v25 = vmax.f32 %v4656_v57, 0.0  ;;  %v799_v50 = vsub.f32 %v9937_v9, %v10969_v21  ;;  %v5249_v33 = vmax.f32 %v4673_v7, 0.0 }
 0x488   : > { %v800_v23 = vsub.f32 %v9937_v9, %v10971_v15  ;;  %v817_v5 = vsub.f32 %v10064_v46, %v10969_v21  ;;  %v818_v45 = vsub.f32 %v10064_v46, %v10971_v15  ;;  %v5250_v40 = vmax.f32 %v4674_v62, 0.0 }
 0x489   : > { %v5694_v0 = vpack.c.bf16 %v5232_v25, %v5231_v44  ;;  %v1375_v28 = vand.u32 2147483647, %v799_v50  ;;  %v3573_v11 = vsub.f32 %v10068_v6, %v10973_v24  ;;  %v3574_v54 = vsub.f32 %v10068_v6, %v10983_v17 }
 0x48a   : > { %v1376_v56 = vand.u32 2147483647, %v800_v23  ;;  %v1393_v13 = vand.u32 2147483647, %v817_v5  ;;  %v1394_v20 = vand.u32 2147483647, %v818_v45  ;;  %v5703_v32 = vpack.c.bf16 %v5250_v40, %v5249_v33 }
 0x48b   : > { %v6671_v34 = vunpack.c.l.bf16 %v5694_v0  ;;  %v6672_v59 = vunpack.c.h.bf16 %v5694_v0  ;;  %v1951_v10 = vsub.f32 1.0, %v1375_v28  ;;  %v3591_v15 = vsub.f32 %v10074_v38, %v10973_v24 }
 0x48c   : > { %v1952_v21 = vsub.f32 1.0, %v1376_v56  ;;  %v1969_v37 = vsub.f32 1.0, %v1393_v13  ;;  %v1970_v30 = vsub.f32 1.0, %v1394_v20  ;;  %v6689_v43 = vunpack.c.l.bf16 %v5703_v32 }
 0x48d   : > { %v7247_v8 = vmul.f32 %v6671_v34, %v6095_v16  ;;  %v6690_v57 = vunpack.c.h.bf16 %v5703_v32  ;;  %v7248_v7 = vmul.f32 %v6672_v59, %v6096_v42  ;;  %v2527_v62 = vmax.f32 %v1951_v10, 0.0 }
 0x48e   : > { %v2528_v44 = vmax.f32 %v1952_v21, 0.0  ;;  %v2545_v25 = vmax.f32 %v1969_v37, 0.0  ;;  %v2546_v50 = vmax.f32 %v1970_v30, 0.0  ;;  %v7265_v23 = vmul.f32 %v6689_v43, %v6113_v63 }
 0x48f   : > { %v7266_v5 = vmul.f32 %v6690_v57, %v6114_v22  ;;  %v3592_v33 = vsub.f32 %v10074_v38, %v10983_v17  ;;  %v4149_v45 = vand.u32 2147483647, %v3573_v11  ;;  %v4150_v28 = vand.u32 2147483647, %v3574_v54 }
 0x490   : > { %v2955_v40 = vpack.c.bf16 %v2528_v44, %v2527_v62  ;;  %v2964_v0 = vpack.c.bf16 %v2546_v50, %v2545_v25  ;;  %v4167_v56 = vand.u32 2147483647, %v3591_v15  ;;  %v7715_v13 = vpack.c.bf16 %v7265_v23, %v7247_v8 }
 0x491   : > { %v7716_v24 = vpack.c.bf16 %v7266_v5, %v7248_v7  ;;  %v4168_v20 = vand.u32 2147483647, %v3592_v33  ;;  %v4725_v16 = vsub.f32 1.0, %v4149_v45  ;;  %v4726_v32 = vsub.f32 1.0, %v4150_v28 }
 0x492   : > { %v4743_v42 = vsub.f32 1.0, %v4167_v56  ;;  %v6165_v34 = vunpack.c.l.bf16 %v2955_v40  ;;  %v6183_v59 = vunpack.c.l.bf16 %v2964_v0  ;;  %8153 = vmatpush.bf16.msrb.mxu0 %v7715_v13  ;;  %v6166_v10 = vunpack.c.h.bf16 %v2955_v40 }
 0x493   : > { %8179 = vmatpush.bf16.msrb.mxu2 %v7716_v24  ;;  %v4744_v63 = vsub.f32 1.0, %v4168_v20  ;;  %v5301_v22 = vmax.f32 %v4725_v16, 0.0  ;;  %v6184_v21 = vunpack.c.h.bf16 %v2964_v0  ;;  %v5302_v17 = vmax.f32 %v4726_v32, 0.0 }
 0x494   : > { %v5319_v11 = vmax.f32 %v4743_v42, 0.0  ;;  %v693_v54 = vsub.f32 %v9623_v1, %v11282_v2  ;;  %v694_v37 = vsub.f32 %v9623_v1, %v11284_v3  ;;  %v711_v15 = vsub.f32 %v9607_v52, %v11282_v2 }
 0x495   : > { %v5320_v30 = vmax.f32 %v4744_v63, 0.0  ;;  %v712_v43 = vsub.f32 %v9607_v52, %v11284_v3  ;;  %v3467_v8 = vsub.f32 %v9649_v26, %v11286_v35  ;;  %v5729_v57 = vpack.c.bf16 %v5302_v17, %v5301_v22 }
 0x496   : > { %v1269_v7 = vand.u32 2147483647, %v693_v54  ;;  %v1270_v62 = vand.u32 2147483647, %v694_v37  ;;  %v3468_v44 = vsub.f32 %v9649_v26, %v11296_v39  ;;  %v1287_v50 = vand.u32 2147483647, %v711_v15 }
 0x497   : > { %v5738_v25 = vpack.c.bf16 %v5320_v30, %v5319_v11  ;;  %v1288_v23 = vand.u32 2147483647, %v712_v43  ;;  %v3485_v5 = vsub.f32 %v9540_v51, %v11286_v35  ;;  %v6741_v33 = vunpack.c.l.bf16 %v5729_v57 }
 0x498   : > { %v6742_v45 = vunpack.c.h.bf16 %v5729_v57  ;;  %v1845_v40 = vsub.f32 1.0, %v1269_v7  ;;  %v1846_v0 = vsub.f32 1.0, %v1270_v62  ;;  %v1863_v13 = vsub.f32 1.0, %v1287_v50 }
 0x499   : > { %v6759_v28 = vunpack.c.l.bf16 %v5738_v25  ;;  %v6760_v56 = vunpack.c.h.bf16 %v5738_v25  ;;  %v1864_v24 = vsub.f32 1.0, %v1288_v23  ;;  %v7317_v20 = vmul.f32 %v6741_v33, %v6165_v34 }
 0x49a   : > { %v7318_v16 = vmul.f32 %v6742_v45, %v6166_v10  ;;  %v2421_v32 = vmax.f32 %v1845_v40, 0.0  ;;  %v2422_v42 = vmax.f32 %v1846_v0, 0.0  ;;  %v2439_v17 = vmax.f32 %v1863_v13, 0.0 }
 0x49b   : > { %v7335_v63 = vmul.f32 %v6759_v28, %v6183_v59  ;;  %v7336_v22 = vmul.f32 %v6760_v56, %v6184_v21  ;;  %v2440_v11 = vmax.f32 %v1864_v24, 0.0  ;;  %v3486_v37 = vsub.f32 %v9540_v51, %v11296_v39 }
 0x49c   : > { %v11368_v54 = vpack.c.bf16 %v2422_v42, %v2421_v32  ;;  %v4043_v30 = vand.u32 2147483647, %v3467_v8  ;;  %v4044_v15 = vand.u32 2147483647, %v3468_v44  ;;  %v4061_v62 = vand.u32 2147483647, %v3485_v5 }
 0x49d   : > { %v7749_v43 = vpack.c.bf16 %v7335_v63, %v7317_v20  ;;  %v7750_v57 = vpack.c.bf16 %v7336_v22, %v7318_v16  ;;  %v11372_v7 = vpack.c.bf16 %v2440_v11, %v2439_v17  ;;  %v4062_v34 = vand.u32 2147483647, %v3486_v37  ;;  %v9087_v32 = vld.sshfl [vmem:[#allocation1 + $0x8] sm:$0xff pattern:$0x73625140] }
 0x49e   : > { %v4619_v10 = vsub.f32 1.0, %v4043_v30  ;;  %v4620_v25 = vsub.f32 1.0, %v4044_v15  ;;  %v6059_v59 = vunpack.c.l.bf16 %v11368_v54  ;;  %v4637_v21 = vsub.f32 1.0, %v4061_v62 }
 0x49f   : > { %8120 = vmatpush.bf16.msra.mxu1 %v7749_v43  ;;  %8146 = vmatpush.bf16.msra.mxu3 %v7750_v57  ;;  %v6077_v50 = vunpack.c.l.bf16 %v11372_v7  ;;  %v1053_v23 = vsub.f32 %v9416_v49, %v11282_v2  ;;  %v1054_v8 = vsub.f32 %v9416_v49, %v11284_v3  ;;  %v4638_v44 = vsub.f32 1.0, %v4062_v34 }
 0x4a0   : > { %v5195_v33 = vmax.f32 %v4619_v10, 0.0  ;;  %v5196_v45 = vmax.f32 %v4620_v25, 0.0  ;;  %v1071_v5 = vsub.f32 %v9448_v19, %v11282_v2  ;;  %v5213_v40 = vmax.f32 %v4637_v21, 0.0 }
 0x4a1   : > { %v1072_v0 = vsub.f32 %v9448_v19, %v11284_v3  ;;  %v1629_v28 = vand.u32 2147483647, %v1053_v23  ;;  %v1630_v56 = vand.u32 2147483647, %v1054_v8  ;;  %v5214_v13 = vmax.f32 %v4638_v44, 0.0 }
 0x4a2   : > { %v5676_v24 = vpack.c.bf16 %v5196_v45, %v5195_v33  ;;  %v1647_v20 = vand.u32 2147483647, %v1071_v5  ;;  %v3827_v16 = vsub.f32 %v9412_v47, %v11286_v35  ;;  %8147 = vmatmul.bf16.vlgmr.msra.gmra.mxu3 %v9087_v32  ;;  %8121 = vmatmul.bf16.vlgmr.msra.gmra.mxu1 %v9087_v32  ;;  %v3828_v17 = vsub.f32 %v9412_v47, %v11296_v39 }
 0x4a3   : > { %v1648_v42 = vand.u32 2147483647, %v1072_v0  ;;  %v2205_v63 = vsub.f32 1.0, %v1629_v28  ;;  %v2206_v22 = vsub.f32 1.0, %v1630_v56  ;;  %v5685_v11 = vpack.c.bf16 %v5214_v13, %v5213_v40 }
 0x4a4   : > { %v6635_v37 = vunpack.c.l.bf16 %v5676_v24  ;;  %v2223_v30 = vsub.f32 1.0, %v1647_v20  ;;  %v3845_v15 = vsub.f32 %v9483_v12, %v11286_v35  ;;  %v3846_v34 = vsub.f32 %v9483_v12, %v11296_v39 }
 0x4a5   : > { %v2224_v43 = vsub.f32 1.0, %v1648_v42  ;;  %v2781_v57 = vmax.f32 %v2205_v63, 0.0  ;;  %v2782_v62 = vmax.f32 %v2206_v22, 0.0  ;;  %v6653_v10 = vunpack.c.l.bf16 %v5685_v11 }
 0x4a6   : > { %v7211_v25 = vmul.f32 %v6635_v37, %v6059_v59  ;;  %v2799_v21 = vmax.f32 %v2223_v30, 0.0  ;;  %v4403_v23 = vand.u32 2147483647, %v3827_v16  ;;  %v4404_v33 = vand.u32 2147483647, %v3828_v17 }
 0x4a7   : > { %v2800_v8 = vmax.f32 %v2224_v43, 0.0  ;;  %v3082_v44 = vpack.c.bf16 %v2782_v62, %v2781_v57  ;;  %v4421_v45 = vand.u32 2147483647, %v3845_v15  ;;  %v7229_v5 = vmul.f32 %v6653_v10, %v6077_v50 }
 0x4a8   : > { %v4422_v40 = vand.u32 2147483647, %v3846_v34  ;;  %v4979_v0 = vsub.f32 1.0, %v4403_v23  ;;  %v6060_v28 = vunpack.c.h.bf16 %v11368_v54  ;;  %v4980_v13 = vsub.f32 1.0, %v4404_v33 }
 0x4a9   : > { %v3091_v56 = vpack.c.bf16 %v2800_v8, %v2799_v21  ;;  %v4997_v20 = vsub.f32 1.0, %v4421_v45  ;;  %v6419_v32 = vunpack.c.l.bf16 %v3082_v44  ;;  %v7697_v42 = vpack.c.bf16 %v7229_v5, %v7211_v25 }
 0x4aa   : > { %v4998_v63 = vsub.f32 1.0, %v4422_v40  ;;  %v5555_v22 = vmax.f32 %v4979_v0, 0.0  ;;  %v6078_v59 = vunpack.c.h.bf16 %v11372_v7  ;;  %v5556_v37 = vmax.f32 %v4980_v13, 0.0 }
 0x4ab   : > { %v5573_v16 = vmax.f32 %v4997_v20, 0.0  ;;  %v6437_v30 = vunpack.c.l.bf16 %v3091_v56  ;;  %v6636_v43 = vunpack.c.h.bf16 %v5676_v24  ;;  %8154 = vmatpush.bf16.msrb.mxu0 %v7697_v42  ;;  %v6654_v50 = vunpack.c.h.bf16 %v5685_v11 }
 0x4ac   : > { %v5574_v17 = vmax.f32 %v4998_v63, 0.0  ;;  %v6420_v15 = vunpack.c.h.bf16 %v3082_v44  ;;  %v6438_v57 = vunpack.c.h.bf16 %v3091_v56  ;;  %v5856_v62 = vpack.c.bf16 %v5556_v37, %v5555_v22 }
 0x4ad   : > { %v7212_v54 = vmul.f32 %v6636_v43, %v6060_v28  ;;  %v657_v34 = vsub.f32 %v9577_v60, %v11282_v2  ;;  %v658_v10 = vsub.f32 %v9577_v60, %v11284_v3  ;;  %v7230_v21 = vmul.f32 %v6654_v50, %v6078_v59 }
 0x4ae   : > { %v5865_v25 = vpack.c.bf16 %v5574_v17, %v5573_v16  ;;  %v675_v7 = vsub.f32 %v9704_v18, %v11282_v2  ;;  %v676_v24 = vsub.f32 %v9704_v18, %v11284_v3  ;;  %v6995_v23 = vunpack.c.l.bf16 %v5856_v62 }
 0x4af   : > { %v6996_v11 = vunpack.c.h.bf16 %v5856_v62  ;;  %v1233_v8 = vand.u32 2147483647, %v657_v34  ;;  %v1234_v44 = vand.u32 2147483647, %v658_v10  ;;  %v7698_v45 = vpack.c.bf16 %v7230_v21, %v7212_v54  ;;  %v13358_v54 = vld [vmem:[#allocation27_spill] sm:$0xff]  ;;  %v13359_v21 = vld [vmem:[#allocation10_spill] sm:$0xff] }
 0x4b0   : > { %v7013_v33 = vunpack.c.l.bf16 %v5865_v25  ;;  %v7014_v5 = vunpack.c.h.bf16 %v5865_v25  ;;  %v1251_v40 = vand.u32 2147483647, %v675_v7  ;;  %v7571_v0 = vmul.f32 %v6995_v23, %v6419_v32 }
 0x4b1   : > { %v7572_v28 = vmul.f32 %v6996_v11, %v6420_v15  ;;  %v1252_v56 = vand.u32 2147483647, %v676_v24  ;;  %v1809_v13 = vsub.f32 1.0, %v1233_v8  ;;  %8180 = vmatpush.bf16.msrb.mxu2 %v7698_v45  ;;  %v1810_v63 = vsub.f32 1.0, %v1234_v44 }
 0x4b2   : > { %v7589_v20 = vmul.f32 %v7013_v33, %v6437_v30  ;;  %v7590_v42 = vmul.f32 %v7014_v5, %v6438_v57  ;;  %v1827_v22 = vsub.f32 1.0, %v1251_v40  ;;  %v3431_v16 = vsub.f32 %v9729_v55, %v11286_v35  ;;  %v13360_v5 = vld [vmem:[#allocation25_spill] sm:$0xff] }
 0x4b3   : > { %v1828_v59 = vsub.f32 1.0, %v1252_v56  ;;  %v2385_v37 = vmax.f32 %v1809_v13, 0.0  ;;  %v3432_v43 = vsub.f32 %v9729_v55, %v11296_v39  ;;  %v2386_v62 = vmax.f32 %v1810_v63, 0.0 }
 0x4b4   : > { %v7877_v17 = vpack.c.bf16 %v7589_v20, %v7571_v0  ;;  %v7878_v50 = vpack.c.bf16 %v7590_v42, %v7572_v28  ;;  %v2403_v32 = vmax.f32 %v1827_v22, 0.0  ;;  %v3449_v30 = vsub.f32 %v13358_v54, %v11286_v35 }
 0x4b5   : > { %v2404_v15 = vmax.f32 %v1828_v59, 0.0  ;;  %v3450_v57 = vsub.f32 %v13358_v54, %v11296_v39  ;;  %v4007_v34 = vand.u32 2147483647, %v3431_v16  ;;  %v11410_v10 = vpack.c.bf16 %v2386_v62, %v2385_v37  ;;  %v13361_v59 = vld [vmem:[#allocation23_spill] sm:$0xff] }
 0x4b6   : > { %8165 = vmatpush.bf16.msrb.mxu1 %v7877_v17  ;;  %8191 = vmatpush.bf16.msrb.mxu3 %v7878_v50  ;;  %v4008_v25 = vand.u32 2147483647, %v3432_v43  ;;  %v1017_v7 = vsub.f32 %v13359_v21, %v11282_v2  ;;  %v1018_v24 = vsub.f32 %v13359_v21, %v11284_v3  ;;  %v4025_v11 = vand.u32 2147483647, %v3449_v30 }
 0x4b7   : > { %v11416_v23 = vpack.c.bf16 %v2404_v15, %v2403_v32  ;;  %v4026_v8 = vand.u32 2147483647, %v3450_v57  ;;  %v4583_v44 = vsub.f32 1.0, %v4007_v34  ;;  %v6023_v45 = vunpack.c.l.bf16 %v11410_v10 }
 0x4b8   : > { %v4584_v33 = vsub.f32 1.0, %v4008_v25  ;;  %v1035_v40 = vsub.f32 %v13360_v5, %v11282_v2  ;;  %v1036_v0 = vsub.f32 %v13360_v5, %v11284_v3  ;;  %v4601_v28 = vsub.f32 1.0, %v4025_v11  ;;  %v13362_v11 = vld [vmem:[#allocation15_spill] sm:$0xff] }
 0x4b9   : > { %v4602_v56 = vsub.f32 1.0, %v4026_v8  ;;  %v5159_v13 = vmax.f32 %v4583_v44, 0.0  ;;  %v6041_v20 = vunpack.c.l.bf16 %v11416_v23  ;;  %v1593_v63 = vand.u32 2147483647, %v1017_v7 }
 0x4ba   : > { %v5160_v42 = vmax.f32 %v4584_v33, 0.0  ;;  %v1594_v22 = vand.u32 2147483647, %v1018_v24  ;;  %v3791_v37 = vsub.f32 %v13361_v59, %v11286_v35  ;;  %v5177_v16 = vmax.f32 %v4601_v28, 0.0 }
 0x4bb   : > { %v5178_v43 = vmax.f32 %v4602_v56, 0.0  ;;  %v1611_v17 = vand.u32 2147483647, %v1035_v40  ;;  %v1612_v50 = vand.u32 2147483647, %v1036_v0  ;;  %v2169_v32 = vsub.f32 1.0, %v1593_v63 }
 0x4bc   : > { %v5658_v62 = vpack.c.bf16 %v5160_v42, %v5159_v13  ;;  %v2170_v15 = vsub.f32 1.0, %v1594_v22  ;;  %v3792_v30 = vsub.f32 %v13361_v59, %v11296_v39  ;;  %v3809_v7 = vsub.f32 %v13362_v11, %v11286_v35 }
 0x4bd   : > { %v5667_v57 = vpack.c.bf16 %v5178_v43, %v5177_v16  ;;  %v2187_v34 = vsub.f32 1.0, %v1611_v17  ;;  %v2188_v25 = vsub.f32 1.0, %v1612_v50  ;;  %v2745_v8 = vmax.f32 %v2169_v32, 0.0 }
 0x4be   : > { %v6599_v24 = vunpack.c.l.bf16 %v5658_v62  ;;  %v2746_v44 = vmax.f32 %v2170_v15, 0.0  ;;  %v3810_v33 = vsub.f32 %v13362_v11, %v11296_v39  ;;  %v4367_v56 = vand.u32 2147483647, %v3791_v37 }
 0x4bf   : > { %v6617_v40 = vunpack.c.l.bf16 %v5667_v57  ;;  %v2763_v0 = vmax.f32 %v2187_v34, 0.0  ;;  %v2764_v28 = vmax.f32 %v2188_v25, 0.0  ;;  %v4368_v63 = vand.u32 2147483647, %v3792_v30 }
 0x4c0   : > { %v7175_v13 = vmul.f32 %v6599_v24, %v6023_v45  ;;  %v3064_v42 = vpack.c.bf16 %v2746_v44, %v2745_v8  ;;  %v4385_v22 = vand.u32 2147483647, %v3809_v7  ;;  %v4386_v17 = vand.u32 2147483647, %v3810_v33 }
 0x4c1   : > { %v7193_v16 = vmul.f32 %v6617_v40, %v6041_v20  ;;  %v3073_v43 = vpack.c.bf16 %v2764_v28, %v2763_v0  ;;  %v4943_v50 = vsub.f32 1.0, %v4367_v56  ;;  %v4944_v59 = vsub.f32 1.0, %v4368_v63 }
 0x4c2   : > { %v4961_v5 = vsub.f32 1.0, %v4385_v22  ;;  %v6383_v21 = vunpack.c.l.bf16 %v3064_v42  ;;  %v6024_v32 = vunpack.c.h.bf16 %v11410_v10  ;;  %v4962_v54 = vsub.f32 1.0, %v4386_v17 }
 0x4c3   : > { %v7679_v15 = vpack.c.bf16 %v7193_v16, %v7175_v13  ;;  %v5519_v11 = vmax.f32 %v4943_v50, 0.0  ;;  %v6401_v55 = vunpack.c.l.bf16 %v3073_v43  ;;  %v5520_v34 = vmax.f32 %v4944_v59, 0.0 }
 0x4c4   : > { %v5537_v25 = vmax.f32 %v4961_v5, 0.0  ;;  %v6042_v45 = vunpack.c.h.bf16 %v11416_v23  ;;  %v6600_v37 = vunpack.c.h.bf16 %v5658_v62  ;;  %v5538_v30 = vmax.f32 %v4962_v54, 0.0  ;;  %v13363_v5 = vld [vmem:[#allocation41_spill] sm:$0xff] }
 0x4c5   : > { %8155 = vmatpush.bf16.msrb.mxu0 %v7679_v15  ;;  %v6618_v20 = vunpack.c.h.bf16 %v5667_v57  ;;  %v6384_v7 = vunpack.c.h.bf16 %v3064_v42  ;;  %v6402_v24 = vunpack.c.h.bf16 %v3073_v43  ;;  %v5838_v8 = vpack.c.bf16 %v5520_v34, %v5519_v11 }
 0x4c6   : > { %v7176_v44 = vmul.f32 %v6600_v37, %v6024_v32  ;;  %v621_v33 = vsub.f32 %v13207_v4, %v11282_v2  ;;  %v622_v10 = vsub.f32 %v13207_v4, %v11284_v3  ;;  %v5847_v40 = vpack.c.bf16 %v5538_v30, %v5537_v25 }
 0x4c7   : > { %v7194_v0 = vmul.f32 %v6618_v20, %v6042_v45  ;;  %v639_v59 = vsub.f32 %v13363_v5, %v11282_v2  ;;  %v640_v23 = vsub.f32 %v13363_v5, %v11284_v3  ;;  %v6959_v54 = vunpack.c.l.bf16 %v5838_v8  ;;  %v13364_v45 = vld [vmem:[#allocation44_spill] sm:$0xff] }
 0x4c8   : > { %v6960_v62 = vunpack.c.h.bf16 %v5838_v8  ;;  %v1197_v57 = vand.u32 2147483647, %v621_v33  ;;  %v1198_v28 = vand.u32 2147483647, %v622_v10  ;;  %v6977_v11 = vunpack.c.l.bf16 %v5847_v40  ;;  %v13365_v33 = vld [vmem:[#allocation37_spill] sm:$0xff] }
 0x4c9   : > { %v7680_v56 = vpack.c.bf16 %v7194_v0, %v7176_v44  ;;  %v6978_v13 = vunpack.c.h.bf16 %v5847_v40  ;;  %v1215_v42 = vand.u32 2147483647, %v639_v59  ;;  %v7535_v63 = vmul.f32 %v6959_v54, %v6383_v21  ;;  %v13366_v59 = vld [vmem:[#allocation18_spill] sm:$0xff] }
 0x4ca   : > { %v7536_v22 = vmul.f32 %v6960_v62, %v6384_v7  ;;  %v1216_v16 = vand.u32 2147483647, %v640_v23  ;;  %v1773_v43 = vsub.f32 1.0, %v1197_v57  ;;  %v7553_v17 = vmul.f32 %v6977_v11, %v6401_v55 }
 0x4cb   : > { %8181 = vmatpush.bf16.msrb.mxu2 %v7680_v56  ;;  %v7554_v50 = vmul.f32 %v6978_v13, %v6402_v24  ;;  %v1774_v32 = vsub.f32 1.0, %v1198_v28  ;;  %v1791_v15 = vsub.f32 1.0, %v1215_v42  ;;  %v3395_v37 = vsub.f32 %v13364_v45, %v11286_v35  ;;  %v13367_v42 = vld [vmem:[#allocation28_spill] sm:$0xff] }
 0x4cc   : > { %v1792_v34 = vsub.f32 1.0, %v1216_v16  ;;  %v2349_v25 = vmax.f32 %v1773_v43, 0.0  ;;  %v3396_v30 = vsub.f32 %v13364_v45, %v11296_v39  ;;  %v7859_v20 = vpack.c.bf16 %v7553_v17, %v7535_v63 }
 0x4cd   : > { %v7860_v8 = vpack.c.bf16 %v7554_v50, %v7536_v22  ;;  %v2350_v44 = vmax.f32 %v1774_v32, 0.0  ;;  %v2367_v21 = vmax.f32 %v1791_v15, 0.0  ;;  %v3413_v55 = vsub.f32 %v13365_v33, %v11286_v35 }
 0x4ce   : > { %v2368_v7 = vmax.f32 %v1792_v34, 0.0  ;;  %v3414_v24 = vsub.f32 %v13365_v33, %v11296_v39  ;;  %v3971_v10 = vand.u32 2147483647, %v3395_v37  ;;  %8166 = vmatpush.bf16.msrb.mxu1 %v7859_v20  ;;  %v3972_v0 = vand.u32 2147483647, %v3396_v30 }
 0x4cf   : > { %8192 = vmatpush.bf16.msrb.mxu3 %v7860_v8  ;;  %v11450_v40 = vpack.c.bf16 %v2350_v44, %v2349_v25  ;;  %v981_v23 = vsub.f32 %v13366_v59, %v11282_v2  ;;  %v982_v54 = vsub.f32 %v13366_v59, %v11284_v3  ;;  %v3989_v57 = vand.u32 2147483647, %v3413_v55  ;;  %v13368_v25 = vld [vmem:[#allocation11_spill] sm:$0xff] }
 0x4d0   : > { %v11456_v62 = vpack.c.bf16 %v2368_v7, %v2367_v21  ;;  %v3990_v28 = vand.u32 2147483647, %v3414_v24  ;;  %v4547_v11 = vsub.f32 1.0, %v3971_v10  ;;  %v4548_v56 = vsub.f32 1.0, %v3972_v0 }
 0x4d1   : > { %v5987_v13 = vunpack.c.l.bf16 %v11450_v40  ;;  %v999_v63 = vsub.f32 %v13367_v42, %v11282_v2  ;;  %v1000_v22 = vsub.f32 %v13367_v42, %v11284_v3  ;;  %v4565_v16 = vsub.f32 1.0, %v3989_v57 }
 0x4d2   : > { %v4566_v43 = vsub.f32 1.0, %v3990_v28  ;;  %v5123_v17 = vmax.f32 %v4547_v11, 0.0  ;;  %v6005_v50 = vunpack.c.l.bf16 %v11456_v62  ;;  %v5124_v32 = vmax.f32 %v4548_v56, 0.0  ;;  %v13369_v28 = vld [vmem:[#allocation29_spill] sm:$0xff] }
 0x4d3   : > { %v1557_v15 = vand.u32 2147483647, %v981_v23  ;;  %v1558_v34 = vand.u32 2147483647, %v982_v54  ;;  %v3755_v37 = vsub.f32 %v13368_v25, %v11286_v35  ;;  %v5141_v30 = vmax.f32 %v4565_v16, 0.0 }
 0x4d4   : > { %v5142_v20 = vmax.f32 %v4566_v43, 0.0  ;;  %v1575_v8 = vand.u32 2147483647, %v999_v63  ;;  %v1576_v44 = vand.u32 2147483647, %v1000_v22  ;;  %v5640_v21 = vpack.c.bf16 %v5124_v32, %v5123_v17 }
 0x4d5   : > { %v2133_v7 = vsub.f32 1.0, %v1557_v15  ;;  %v2134_v55 = vsub.f32 1.0, %v1558_v34  ;;  %v3756_v24 = vsub.f32 %v13368_v25, %v11296_v39  ;;  %v3773_v23 = vsub.f32 %v13369_v28, %v11286_v35 }
 0x4d6   : > { %v5649_v10 = vpack.c.bf16 %v5142_v20, %v5141_v30  ;;  %v2151_v0 = vsub.f32 1.0, %v1575_v8  ;;  %v2152_v57 = vsub.f32 1.0, %v1576_v44  ;;  %v6563_v54 = vunpack.c.l.bf16 %v5640_v21 }
 0x4d7   : > { %v2709_v11 = vmax.f32 %v2133_v7, 0.0  ;;  %v2710_v56 = vmax.f32 %v2134_v55, 0.0  ;;  %v3774_v16 = vsub.f32 %v13369_v28, %v11296_v39  ;;  %v4331_v17 = vand.u32 2147483647, %v3755_v37 }
 0x4d8   : > { %v6581_v63 = vunpack.c.l.bf16 %v5649_v10  ;;  %v2727_v22 = vmax.f32 %v2151_v0, 0.0  ;;  %v2728_v43 = vmax.f32 %v2152_v57, 0.0  ;;  %v7139_v32 = vmul.f32 %v6563_v54, %v5987_v13 }
 0x4d9   : > { %v3046_v15 = vpack.c.bf16 %v2710_v56, %v2709_v11  ;;  %v4332_v34 = vand.u32 2147483647, %v3756_v24  ;;  %v4349_v25 = vand.u32 2147483647, %v3773_v23  ;;  %v4350_v8 = vand.u32 2147483647, %v3774_v16 }
 0x4da   : > { %v7157_v30 = vmul.f32 %v6581_v63, %v6005_v50  ;;  %v3055_v20 = vpack.c.bf16 %v2728_v43, %v2727_v22  ;;  %v4907_v44 = vsub.f32 1.0, %v4331_v17  ;;  %v5988_v7 = vunpack.c.h.bf16 %v11450_v40 }
 0x4db   : > { %v4908_v42 = vsub.f32 1.0, %v4332_v34  ;;  %v4925_v59 = vsub.f32 1.0, %v4349_v25  ;;  %v6347_v33 = vunpack.c.l.bf16 %v3046_v15  ;;  %v4926_v45 = vsub.f32 1.0, %v4350_v8  ;;  %v13370_v25 = vld [vmem:[#allocation40_spill] sm:$0xff] }
 0x4dc   : > { %v7661_v55 = vpack.c.bf16 %v7157_v30, %v7139_v32  ;;  %v5483_v28 = vmax.f32 %v4907_v44, 0.0  ;;  %v6365_v5 = vunpack.c.l.bf16 %v3055_v20  ;;  %v6006_v13 = vunpack.c.h.bf16 %v11456_v62 }
 0x4dd   : > { %v5484_v0 = vmax.f32 %v4908_v42, 0.0  ;;  %v5501_v57 = vmax.f32 %v4925_v59, 0.0  ;;  %v6564_v37 = vunpack.c.h.bf16 %v5640_v21  ;;  %v5502_v24 = vmax.f32 %v4926_v45, 0.0  ;;  %v13371_v59 = vld [vmem:[#allocation49_spill] sm:$0xff] }
 0x4de   : > { %8156 = vmatpush.bf16.msrb.mxu0 %v7661_v55  ;;  %v6582_v50 = vunpack.c.h.bf16 %v5649_v10  ;;  %v6348_v23 = vunpack.c.h.bf16 %v3046_v15  ;;  %v6366_v54 = vunpack.c.h.bf16 %v3055_v20  ;;  %v585_v16 = vsub.f32 %v13370_v25, %v11282_v2 }
 0x4df   : > { %v5820_v11 = vpack.c.bf16 %v5484_v0, %v5483_v28  ;;  %v7140_v56 = vmul.f32 %v6564_v37, %v5988_v7  ;;  %v586_v40 = vsub.f32 %v13370_v25, %v11284_v3  ;;  %v5829_v63 = vpack.c.bf16 %v5502_v24, %v5501_v57  ;;  %v13372_v37 = vld [vmem:[#allocation51_spill] sm:$0xff] }
 0x4e0   : > { %v7158_v22 = vmul.f32 %v6582_v50, %v6006_v13  ;;  %v603_v42 = vsub.f32 %v13371_v59, %v11282_v2  ;;  %v604_v62 = vsub.f32 %v13371_v59, %v11284_v3  ;;  %v1161_v10 = vand.u32 2147483647, %v585_v16 }
 0x4e1   : > { %v6923_v45 = vunpack.c.l.bf16 %v5820_v11  ;;  %v6924_v21 = vunpack.c.h.bf16 %v5820_v11  ;;  %v1162_v43 = vand.u32 2147483647, %v586_v40  ;;  %v6941_v28 = vunpack.c.l.bf16 %v5829_v63  ;;  %v13373_v40 = vld [vmem:[#allocation45_spill] sm:$0xff] }
 0x4e2   : > { %v7662_v17 = vpack.c.bf16 %v7158_v22, %v7140_v56  ;;  %v6942_v32 = vunpack.c.h.bf16 %v5829_v63  ;;  %v1179_v15 = vand.u32 2147483647, %v603_v42  ;;  %v1180_v20 = vand.u32 2147483647, %v604_v62  ;;  %v13374_v62 = vld [vmem:[#allocation26_spill] sm:$0xff] }
 0x4e3   : > { %v7499_v34 = vmul.f32 %v6923_v45, %v6347_v33  ;;  %v7500_v30 = vmul.f32 %v6924_v21, %v6348_v23  ;;  %v1737_v8 = vsub.f32 1.0, %v1161_v10  ;;  %v7517_v44 = vmul.f32 %v6941_v28, %v6365_v5 }
 0x4e4   : > { %8182 = vmatpush.bf16.msrb.mxu2 %v7662_v17  ;;  %v7518_v7 = vmul.f32 %v6942_v32, %v6366_v54  ;;  %v1738_v55 = vsub.f32 1.0, %v1162_v43  ;;  %v1755_v0 = vsub.f32 1.0, %v1179_v15  ;;  %v1756_v57 = vsub.f32 1.0, %v1180_v20 }
 0x4e5   : > { %v2313_v13 = vmax.f32 %v1737_v8, 0.0  ;;  %v3359_v24 = vsub.f32 %v13372_v37, %v11286_v35  ;;  %v3360_v50 = vsub.f32 %v13372_v37, %v11296_v39  ;;  %v7841_v11 = vpack.c.bf16 %v7517_v44, %v7499_v34  ;;  %v13375_v34 = vld [vmem:[#allocation31_spill] sm:$0xff] }
 0x4e6   : > { %v7842_v56 = vpack.c.bf16 %v7518_v7, %v7500_v30  ;;  %v2314_v16 = vmax.f32 %v1738_v55, 0.0  ;;  %v2331_v33 = vmax.f32 %v1755_v0, 0.0  ;;  %v2332_v23 = vmax.f32 %v1756_v57, 0.0 }
 0x4e7   : > { %v3377_v5 = vsub.f32 %v13373_v40, %v11286_v35  ;;  %v3378_v54 = vsub.f32 %v13373_v40, %v11296_v39  ;;  %v3935_v63 = vand.u32 2147483647, %v3359_v24  ;;  %8167 = vmatpush.bf16.msrb.mxu1 %v7841_v11  ;;  %v3936_v42 = vand.u32 2147483647, %v3360_v50  ;;  %v13376_v24 = vld [vmem:[#allocation38_spill] sm:$0xff] }
 0x4e8   : > { %8193 = vmatpush.bf16.msrb.mxu3 %v7842_v56  ;;  %v11490_v22 = vpack.c.bf16 %v2314_v16, %v2313_v13  ;;  %v945_v45 = vsub.f32 %v13374_v62, %v11282_v2  ;;  %v946_v21 = vsub.f32 %v13374_v62, %v11284_v3  ;;  %v11496_v10 = vpack.c.bf16 %v2332_v23, %v2331_v33 }
 0x4e9   : > { %v3953_v43 = vand.u32 2147483647, %v3377_v5  ;;  %v3954_v28 = vand.u32 2147483647, %v3378_v54  ;;  %v4511_v17 = vsub.f32 1.0, %v3935_v63  ;;  %v4512_v32 = vsub.f32 1.0, %v3936_v42 }
 0x4ea   : > { %v5951_v15 = vunpack.c.l.bf16 %v11490_v22  ;;  %v963_v30 = vsub.f32 %v13375_v34, %v11282_v2  ;;  %v964_v20 = vsub.f32 %v13375_v34, %v11284_v3  ;;  %v5969_v55 = vunpack.c.l.bf16 %v11496_v10 }
 0x4eb   : > { %v4529_v8 = vsub.f32 1.0, %v3953_v43  ;;  %v4530_v44 = vsub.f32 1.0, %v3954_v28  ;;  %v5087_v7 = vmax.f32 %v4511_v17, 0.0  ;;  %v5088_v0 = vmax.f32 %v4512_v32, 0.0  ;;  %v13377_v17 = vld [vmem:[#allocation30_spill] sm:$0xff] }
 0x4ec   : > { %v1521_v57 = vand.u32 2147483647, %v945_v45  ;;  %v1522_v13 = vand.u32 2147483647, %v946_v21  ;;  %v3719_v50 = vsub.f32 %v13376_v24, %v11286_v35  ;;  %v1539_v16 = vand.u32 2147483647, %v963_v30 }
 0x4ed   : > { %v5105_v11 = vmax.f32 %v4529_v8, 0.0  ;;  %v5106_v56 = vmax.f32 %v4530_v44, 0.0  ;;  %v1540_v33 = vand.u32 2147483647, %v964_v20  ;;  %v5622_v23 = vpack.c.bf16 %v5088_v0, %v5087_v7 }
 0x4ee   : > { %v2097_v5 = vsub.f32 1.0, %v1521_v57  ;;  %v2098_v54 = vsub.f32 1.0, %v1522_v13  ;;  %v3720_v63 = vsub.f32 %v13376_v24, %v11296_v39  ;;  %v2115_v43 = vsub.f32 1.0, %v1539_v16 }
 0x4ef   : > { %v5631_v42 = vpack.c.bf16 %v5106_v56, %v5105_v11  ;;  %v2116_v28 = vsub.f32 1.0, %v1540_v33  ;;  %v3737_v45 = vsub.f32 %v13377_v17, %v11286_v35  ;;  %v6527_v21 = vunpack.c.l.bf16 %v5622_v23 }
 0x4f0   : > { %v2673_v32 = vmax.f32 %v2097_v5, 0.0  ;;  %v2674_v34 = vmax.f32 %v2098_v54, 0.0  ;;  %v3738_v8 = vsub.f32 %v13377_v17, %v11296_v39  ;;  %v2691_v20 = vmax.f32 %v2115_v43, 0.0 }
 0x4f1   : > { %v6545_v30 = vunpack.c.l.bf16 %v5631_v42  ;;  %v2692_v44 = vmax.f32 %v2116_v28, 0.0  ;;  %v4295_v7 = vand.u32 2147483647, %v3719_v50  ;;  %v7103_v0 = vmul.f32 %v6527_v21, %v5951_v15 }
 0x4f2   : > { %v3028_v57 = vpack.c.bf16 %v2674_v34, %v2673_v32  ;;  %v4296_v13 = vand.u32 2147483647, %v3720_v63  ;;  %v4313_v24 = vand.u32 2147483647, %v3737_v45  ;;  %v4314_v16 = vand.u32 2147483647, %v3738_v8 }
 0x4f3   : > { %v7121_v11 = vmul.f32 %v6545_v30, %v5969_v55  ;;  %v3037_v56 = vpack.c.bf16 %v2692_v44, %v2691_v20  ;;  %v4871_v33 = vsub.f32 1.0, %v4295_v7  ;;  %v5952_v5 = vunpack.c.h.bf16 %v11490_v22 }
 0x4f4   : > { %v4872_v62 = vsub.f32 1.0, %v4296_v13  ;;  %v4889_v40 = vsub.f32 1.0, %v4313_v24  ;;  %v6311_v37 = vunpack.c.l.bf16 %v3028_v57  ;;  %v4890_v59 = vsub.f32 1.0, %v4314_v16 }
 0x4f5   : > { %v7643_v54 = vpack.c.bf16 %v7121_v11, %v7103_v0  ;;  %v5447_v17 = vmax.f32 %v4871_v33, 0.0  ;;  %v6329_v25 = vunpack.c.l.bf16 %v3037_v56  ;;  %v5970_v15 = vunpack.c.h.bf16 %v11496_v10 }
 0x4f6   : > { %v5448_v43 = vmax.f32 %v4872_v62, 0.0  ;;  %v5465_v28 = vmax.f32 %v4889_v40, 0.0  ;;  %v6528_v34 = vunpack.c.h.bf16 %v5622_v23  ;;  %v5466_v50 = vmax.f32 %v4890_v59, 0.0 }
 0x4f7   : > { %8157 = vmatpush.bf16.msrb.mxu0 %v7643_v54  ;;  %v6546_v55 = vunpack.c.h.bf16 %v5631_v42  ;;  %v6312_v63 = vunpack.c.h.bf16 %v3028_v57  ;;  %v6330_v45 = vunpack.c.h.bf16 %v3037_v56  ;;  %v549_v24 = vsub.f32 %v13222_v31, %v11282_v2 }
 0x4f8   : > { %v5802_v21 = vpack.c.bf16 %v5448_v43, %v5447_v17  ;;  %v7104_v32 = vmul.f32 %v6528_v34, %v5952_v5  ;;  %v550_v22 = vsub.f32 %v13222_v31, %v11284_v3  ;;  %v5811_v8 = vpack.c.bf16 %v5466_v50, %v5465_v28 }
 0x4f9   : > { %v7122_v30 = vmul.f32 %v6546_v55, %v5970_v15  ;;  %v567_v40 = vsub.f32 %v9933_v53, %v11282_v2  ;;  %v568_v62 = vsub.f32 %v9933_v53, %v11284_v3  ;;  %v1125_v23 = vand.u32 2147483647, %v549_v24 }
 0x4fa   : > { %v6887_v59 = vunpack.c.l.bf16 %v5802_v21  ;;  %v6888_v10 = vunpack.c.h.bf16 %v5802_v21  ;;  %v1126_v42 = vand.u32 2147483647, %v550_v22  ;;  %v6905_v17 = vunpack.c.l.bf16 %v5811_v8  ;;  %v13378_v21 = vld [vmem:[#allocation52_spill] sm:$0xff] }
 0x4fb   : > { %v7644_v20 = vpack.c.bf16 %v7122_v30, %v7104_v32  ;;  %v6906_v44 = vunpack.c.h.bf16 %v5811_v8  ;;  %v1143_v7 = vand.u32 2147483647, %v567_v40  ;;  %v1144_v13 = vand.u32 2147483647, %v568_v62  ;;  %v13379_v8 = vld [vmem:[#allocation33_spill] sm:$0xff] }
 0x4fc   : > { %v7463_v0 = vmul.f32 %v6887_v59, %v6311_v37  ;;  %v7464_v57 = vmul.f32 %v6888_v10, %v6312_v63  ;;  %v1701_v11 = vsub.f32 1.0, %v1125_v23  ;;  %v7481_v56 = vmul.f32 %v6905_v17, %v6329_v25 }
 0x4fd   : > { %8183 = vmatpush.bf16.msrb.mxu2 %v7644_v20  ;;  %v7482_v16 = vmul.f32 %v6906_v44, %v6330_v45  ;;  %v1702_v33 = vsub.f32 1.0, %v1126_v42  ;;  %v1719_v5 = vsub.f32 1.0, %v1143_v7  ;;  %v1720_v54 = vsub.f32 1.0, %v1144_v13  ;;  %v13380_v20 = vld [vmem:[#allocation36_spill] sm:$0xff] }
 0x4fe   : > { %v2277_v43 = vmax.f32 %v1701_v11, 0.0  ;;  %v3323_v28 = vsub.f32 %v9954_v58, %v11286_v35  ;;  %v3324_v15 = vsub.f32 %v9954_v58, %v11296_v39  ;;  %v7823_v34 = vpack.c.bf16 %v7481_v56, %v7463_v0 }
 0x4ff   : > { %v7824_v50 = vpack.c.bf16 %v7482_v16, %v7464_v57  ;;  %v2278_v55 = vmax.f32 %v1702_v33, 0.0  ;;  %v2295_v37 = vmax.f32 %v1719_v5, 0.0  ;;  %v2296_v63 = vmax.f32 %v1720_v54, 0.0  ;;  %v13381_v5 = vld [vmem:[#allocation13_spill] sm:$0xff] }
 0x500   : > { %v3341_v25 = vsub.f32 %v13378_v21, %v11286_v35  ;;  %v3342_v45 = vsub.f32 %v13378_v21, %v11296_v39  ;;  %v3899_v32 = vand.u32 2147483647, %v3323_v28  ;;  %8168 = vmatpush.bf16.msrb.mxu1 %v7823_v34  ;;  %v3900_v22 = vand.u32 2147483647, %v3324_v15 }
 0x501   : > { %8194 = vmatpush.bf16.msrb.mxu3 %v7824_v50  ;;  %v11530_v24 = vpack.c.bf16 %v2278_v55, %v2277_v43  ;;  %v909_v30 = vsub.f32 %v13379_v8, %v11282_v2  ;;  %v910_v40 = vsub.f32 %v13379_v8, %v11284_v3  ;;  %v11536_v62 = vpack.c.bf16 %v2296_v63, %v2295_v37 }
 0x502   : > { %v3917_v59 = vand.u32 2147483647, %v3341_v25  ;;  %v3918_v10 = vand.u32 2147483647, %v3342_v45  ;;  %v4475_v23 = vsub.f32 1.0, %v3899_v32  ;;  %v4476_v42 = vsub.f32 1.0, %v3900_v22 }
 0x503   : > { %v5915_v17 = vunpack.c.l.bf16 %v11530_v24  ;;  %v927_v44 = vsub.f32 %v13380_v20, %v11282_v2  ;;  %v928_v7 = vsub.f32 %v13380_v20, %v11284_v3  ;;  %v5933_v11 = vunpack.c.l.bf16 %v11536_v62  ;;  %v13382_v22 = vld [vmem:[#allocation47_spill] sm:$0xff] }
 0x504   : > { %v4493_v0 = vsub.f32 1.0, %v3917_v59  ;;  %v4494_v57 = vsub.f32 1.0, %v3918_v10  ;;  %v5051_v13 = vmax.f32 %v4475_v23, 0.0  ;;  %v5052_v56 = vmax.f32 %v4476_v42, 0.0 }
 0x505   : > { %v1485_v16 = vand.u32 2147483647, %v909_v30  ;;  %v1486_v33 = vand.u32 2147483647, %v910_v40  ;;  %v3683_v54 = vsub.f32 %v13381_v5, %v11286_v35  ;;  %v1503_v15 = vand.u32 2147483647, %v927_v44 }
 0x506   : > { %v5069_v43 = vmax.f32 %v4493_v0, 0.0  ;;  %v5070_v28 = vmax.f32 %v4494_v57, 0.0  ;;  %v1504_v34 = vand.u32 2147483647, %v928_v7  ;;  %v5604_v50 = vpack.c.bf16 %v5052_v56, %v5051_v13 }
 0x507   : > { %v2061_v55 = vsub.f32 1.0, %v1485_v16  ;;  %v2062_v37 = vsub.f32 1.0, %v1486_v33  ;;  %v3684_v63 = vsub.f32 %v13381_v5, %v11296_v39  ;;  %v2079_v45 = vsub.f32 1.0, %v1503_v15 }
 0x508   : > { %v5613_v25 = vpack.c.bf16 %v5070_v28, %v5069_v43  ;;  %v2080_v32 = vsub.f32 1.0, %v1504_v34  ;;  %v3701_v30 = vsub.f32 %v13382_v22, %v11286_v35  ;;  %v6491_v40 = vunpack.c.l.bf16 %v5604_v50 }
 0x509   : > { %v2637_v59 = vmax.f32 %v2061_v55, 0.0  ;;  %v2638_v10 = vmax.f32 %v2062_v37, 0.0  ;;  %v3702_v23 = vsub.f32 %v13382_v22, %v11296_v39  ;;  %v2655_v44 = vmax.f32 %v2079_v45, 0.0 }
 0x50a   : > { %v6509_v42 = vunpack.c.l.bf16 %v5613_v25  ;;  %v2656_v7 = vmax.f32 %v2080_v32, 0.0  ;;  %v4259_v0 = vand.u32 2147483647, %v3683_v54  ;;  %v7067_v57 = vmul.f32 %v6491_v40, %v5915_v17 }
 0x50b   : > { %v3010_v13 = vpack.c.bf16 %v2638_v10, %v2637_v59  ;;  %v4260_v56 = vand.u32 2147483647, %v3684_v63  ;;  %v4277_v16 = vand.u32 2147483647, %v3701_v30  ;;  %v4278_v28 = vand.u32 2147483647, %v3702_v23 }
 0x50c   : > { %v7085_v33 = vmul.f32 %v6509_v42, %v5933_v11  ;;  %v3019_v43 = vpack.c.bf16 %v2656_v7, %v2655_v44  ;;  %v4835_v15 = vsub.f32 1.0, %v4259_v0  ;;  %v5916_v55 = vunpack.c.h.bf16 %v11530_v24 }
 0x50d   : > { %v4836_v34 = vsub.f32 1.0, %v4260_v56  ;;  %v4853_v5 = vsub.f32 1.0, %v4277_v16  ;;  %v6275_v20 = vunpack.c.l.bf16 %v3010_v13  ;;  %v4854_v8 = vsub.f32 1.0, %v4278_v28 }
 0x50e   : > { %v7625_v37 = vpack.c.bf16 %v7085_v33, %v7067_v57  ;;  %v5411_v22 = vmax.f32 %v4835_v15, 0.0  ;;  %v6293_v21 = vunpack.c.l.bf16 %v3019_v43  ;;  %v5934_v17 = vunpack.c.h.bf16 %v11536_v62 }
 0x50f   : > { %v5412_v45 = vmax.f32 %v4836_v34, 0.0  ;;  %v5429_v32 = vmax.f32 %v4853_v5, 0.0  ;;  %v6492_v54 = vunpack.c.h.bf16 %v5604_v50  ;;  %v5430_v63 = vmax.f32 %v4854_v8, 0.0 }
 0x510   : > { %8158 = vmatpush.bf16.msrb.mxu0 %v7625_v37  ;;  %v6510_v11 = vunpack.c.h.bf16 %v5613_v25  ;;  %v6276_v30 = vunpack.c.h.bf16 %v3010_v13  ;;  %v6294_v40 = vunpack.c.h.bf16 %v3019_v43  ;;  %v513_v23 = vsub.f32 %v9921_v29, %v11282_v2 }
 0x511   : > { %v5784_v59 = vpack.c.bf16 %v5412_v45, %v5411_v22  ;;  %v7068_v10 = vmul.f32 %v6492_v54, %v5916_v55  ;;  %v514_v24 = vsub.f32 %v9921_v29, %v11284_v3  ;;  %v5793_v42 = vpack.c.bf16 %v5430_v63, %v5429_v32 }
 0x512   : > { %v7086_v44 = vmul.f32 %v6510_v11, %v5934_v17  ;;  %v531_v5 = vsub.f32 %v13266_v61, %v11282_v2  ;;  %v532_v62 = vsub.f32 %v13266_v61, %v11284_v3  ;;  %v1089_v25 = vand.u32 2147483647, %v513_v23 }
 0x513   : > { %v6851_v8 = vunpack.c.l.bf16 %v5784_v59  ;;  %v6852_v50 = vunpack.c.h.bf16 %v5784_v59  ;;  %v1090_v7 = vand.u32 2147483647, %v514_v24  ;;  %v6869_v22 = vunpack.c.l.bf16 %v5793_v42  ;;  %v13383_v24 = vld [vmem:[#allocation42_spill] sm:$0xff] }
 0x514   : > { %v7626_v0 = vpack.c.bf16 %v7086_v44, %v7068_v10  ;;  %v6870_v57 = vunpack.c.h.bf16 %v5793_v42  ;;  %v1107_v13 = vand.u32 2147483647, %v531_v5  ;;  %v1108_v33 = vand.u32 2147483647, %v532_v62 }
 0x515   : > { %v7427_v56 = vmul.f32 %v6851_v8, %v6275_v20  ;;  %v7428_v16 = vmul.f32 %v6852_v50, %v6276_v30  ;;  %v1665_v43 = vsub.f32 1.0, %v1089_v25  ;;  %v7445_v28 = vmul.f32 %v6869_v22, %v6293_v21  ;;  %v13384_v22 = vld [vmem:[#allocation39_spill] sm:$0xff] }
 0x516   : > { %8184 = vmatpush.bf16.msrb.mxu2 %v7626_v0  ;;  %v7446_v15 = vmul.f32 %v6870_v57, %v6294_v40  ;;  %v1666_v34 = vsub.f32 1.0, %v1090_v7  ;;  %v1683_v55 = vsub.f32 1.0, %v1107_v13  ;;  %v1684_v37 = vsub.f32 1.0, %v1108_v33 }
 0x517   : > { %v2241_v45 = vmax.f32 %v1665_v43, 0.0  ;;  %v3287_v32 = vsub.f32 %v13305_v27, %v11286_v35  ;;  %v3288_v17 = vsub.f32 %v13305_v27, %v11296_v39  ;;  %v7805_v54 = vpack.c.bf16 %v7445_v28, %v7427_v56 }
 0x518   : > { %v7806_v63 = vpack.c.bf16 %v7446_v15, %v7428_v16  ;;  %v2242_v11 = vmax.f32 %v1666_v34, 0.0  ;;  %v2259_v20 = vmax.f32 %v1683_v55, 0.0  ;;  %v2260_v30 = vmax.f32 %v1684_v37, 0.0  ;;  %v13385_v34 = vld [vmem:[#allocation53_spill] sm:$0xff] }
 0x519   : > { %v3305_v21 = vsub.f32 %v13344_v41, %v11286_v35  ;;  %v3306_v40 = vsub.f32 %v13344_v41, %v11296_v39  ;;  %v3863_v59 = vand.u32 2147483647, %v3287_v32  ;;  %8169 = vmatpush.bf16.msrb.mxu1 %v7805_v54  ;;  %v3864_v23 = vand.u32 2147483647, %v3288_v17 }
 0x51a   : > { %8195 = vmatpush.bf16.msrb.mxu3 %v7806_v63  ;;  %v11570_v10 = vpack.c.bf16 %v2242_v11, %v2241_v45  ;;  %v873_v42 = vsub.f32 %v13383_v24, %v11282_v2  ;;  %v874_v44 = vsub.f32 %v13383_v24, %v11284_v3  ;;  %v11576_v5 = vpack.c.bf16 %v2260_v30, %v2259_v20 }
 0x51b   : > { %v3881_v62 = vand.u32 2147483647, %v3305_v21  ;;  %v3882_v8 = vand.u32 2147483647, %v3306_v40  ;;  %v4439_v50 = vsub.f32 1.0, %v3863_v59  ;;  %v4440_v25 = vsub.f32 1.0, %v3864_v23 }
 0x51c   : > { %v5879_v7 = vunpack.c.l.bf16 %v11570_v10  ;;  %v891_v0 = vsub.f32 %v13384_v22, %v11282_v2  ;;  %v892_v57 = vsub.f32 %v13384_v22, %v11284_v3  ;;  %v5897_v33 = vunpack.c.l.bf16 %v11576_v5  ;;  %v13386_v59 = vld [vmem:[#allocation48_spill] sm:$0xff] }
 0x51d   : > { %v4457_v13 = vsub.f32 1.0, %v3881_v62  ;;  %v4458_v56 = vsub.f32 1.0, %v3882_v8  ;;  %v5015_v16 = vmax.f32 %v4439_v50, 0.0  ;;  %v5016_v43 = vmax.f32 %v4440_v25, 0.0 }
 0x51e   : > { %v1449_v28 = vand.u32 2147483647, %v873_v42  ;;  %v1450_v15 = vand.u32 2147483647, %v874_v44  ;;  %v3647_v55 = vsub.f32 %v13385_v34, %v11286_v35  ;;  %v1467_v32 = vand.u32 2147483647, %v891_v0 }
 0x51f   : > { %v5033_v37 = vmax.f32 %v4457_v13, 0.0  ;;  %v5034_v45 = vmax.f32 %v4458_v56, 0.0  ;;  %v1468_v17 = vand.u32 2147483647, %v892_v57  ;;  %v5586_v54 = vpack.c.bf16 %v5016_v43, %v5015_v16 }
 0x520   : > { %v2025_v63 = vsub.f32 1.0, %v1449_v28  ;;  %v2026_v11 = vsub.f32 1.0, %v1450_v15  ;;  %v3648_v20 = vsub.f32 %v13385_v34, %v11296_v39  ;;  %v2043_v21 = vsub.f32 1.0, %v1467_v32 }
 0x521   : > { %v5595_v30 = vpack.c.bf16 %v5034_v45, %v5033_v37  ;;  %v2044_v40 = vsub.f32 1.0, %v1468_v17  ;;  %v3665_v23 = vsub.f32 %v13386_v59, %v11286_v35  ;;  %v6455_v42 = vunpack.c.l.bf16 %v5586_v54 }
 0x522   : > { %v2601_v44 = vmax.f32 %v2025_v63, 0.0  ;;  %v2602_v62 = vmax.f32 %v2026_v11, 0.0  ;;  %v3666_v8 = vsub.f32 %v13386_v59, %v11296_v39  ;;  %v2619_v25 = vmax.f32 %v2043_v21, 0.0 }
 0x523   : > { %v6473_v50 = vunpack.c.l.bf16 %v5595_v30  ;;  %v2620_v0 = vmax.f32 %v2044_v40, 0.0  ;;  %v4223_v57 = vand.u32 2147483647, %v3647_v55  ;;  %v7031_v13 = vmul.f32 %v6455_v42, %v5879_v7  ;;  %v282_v40 = vld [vmem:[%s9355_s21 + $0x18] sm:$0xff] }
 0x524   : > { %v2992_v56 = vpack.c.bf16 %v2602_v62, %v2601_v44  ;;  %v4224_v16 = vand.u32 2147483647, %v3648_v20  ;;  %v4241_v43 = vand.u32 2147483647, %v3665_v23  ;;  %v4242_v37 = vand.u32 2147483647, %v3666_v8 }
 0x525   : > { %v7049_v28 = vmul.f32 %v6473_v50, %v5897_v33  ;;  %v3001_v15 = vpack.c.bf16 %v2620_v0, %v2619_v25  ;;  %v4799_v45 = vsub.f32 1.0, %v4223_v57  ;;  %v5880_v11 = vunpack.c.h.bf16 %v11570_v10 }
 0x526   : > { %v4800_v32 = vsub.f32 1.0, %v4224_v16  ;;  %v4817_v17 = vsub.f32 1.0, %v4241_v43  ;;  %v6239_v63 = vunpack.c.l.bf16 %v2992_v56  ;;  %v4818_v59 = vsub.f32 1.0, %v4242_v37 }
 0x527   : > { %v7607_v34 = vpack.c.bf16 %v7049_v28, %v7031_v13  ;;  %v5375_v22 = vmax.f32 %v4799_v45, 0.0  ;;  %v6257_v21 = vunpack.c.l.bf16 %v3001_v15  ;;  %v5898_v42 = vunpack.c.h.bf16 %v11576_v5  ;;  %v9088_v5 = vld.sshfl [vmem:[#allocation1] sm:$0xff pattern:$0x73625140] }
 0x528   : > { %v5376_v55 = vmax.f32 %v4800_v32, 0.0  ;;  %v5393_v7 = vmax.f32 %v4817_v17, 0.0  ;;  %v6456_v20 = vunpack.c.h.bf16 %v5586_v54  ;;  %v5394_v33 = vmax.f32 %v4818_v59, 0.0 }
 0x529   : > { %8159 = vmatpush.bf16.msrb.mxu0 %v7607_v34  ;;  %v6474_v23 = vunpack.c.h.bf16 %v5595_v30  ;;  %v6240_v44 = vunpack.c.h.bf16 %v2992_v56  ;;  %v6258_v62 = vunpack.c.h.bf16 %v3001_v15  ;;  %v461_v25 = vperm.slane %v282_v40, 0  ;;  %v13387_v15 = vld [vmem:[#allocation19_spill] sm:$0xff] }
 0x52a   : > { %v5766_v8 = vpack.c.bf16 %v5376_v55, %v5375_v22  ;;  %v7032_v50 = vmul.f32 %v6456_v20, %v5880_v11  ;;  %v462_v0 = vperm.slane %v282_v40, 2  ;;  %v5775_v10 = vpack.c.bf16 %v5394_v33, %v5393_v7  ;;  %v13388_v55 = vld [vmem:[#allocation22_spill] sm:$0xff] }
 0x52b   : > { %v7050_v57 = vmul.f32 %v6474_v23, %v5898_v42  ;;  %v3235_v13 = vperm.slane %v282_v40, 1  ;;  %v3236_v16 = vperm.slane %v282_v40, 3  ;;  %v11595_v37 = vperm.slane %v461_v25, 0 }
 0x52c   : > { %v6815_v43 = vunpack.c.l.bf16 %v5766_v8  ;;  %v6816_v28 = vunpack.c.h.bf16 %v5766_v8  ;;  %v11597_v45 = vperm.slane %v462_v0, 0  ;;  %8160 = vmatmul.bf16.vlgmr.msrb.gmra.mxu0 %v9088_v5  ;;  %v6833_v34 = vunpack.c.l.bf16 %v5775_v10 }
 0x52d   : > { %v7608_v54 = vpack.c.bf16 %v7050_v57, %v7032_v50  ;;  %v6834_v30 = vunpack.c.h.bf16 %v5775_v10  ;;  %v11599_v59 = vperm.slane %v3235_v13, 1  ;;  %v767_v32 = vsub.f32 %v13387_v15, %v11595_v37  ;;  %v13390_v57 = vld [vmem:[#allocation6_spill] sm:$0xff] }
 0x52e   : > { %v7391_v22 = vmul.f32 %v6815_v43, %v6239_v63  ;;  %v7392_v56 = vmul.f32 %v6816_v28, %v6240_v44  ;;  %v768_v17 = vsub.f32 %v13387_v15, %v11597_v45  ;;  %v7409_v11 = vmul.f32 %v6833_v34, %v6257_v21  ;;  %v13389_v63 = vld [vmem:[#allocation5_spill] sm:$0xff] }
 0x52f   : > { %8185 = vmatpush.bf16.msrb.mxu2 %v7608_v54  ;;  %v7410_v40 = vmul.f32 %v6834_v30, %v6258_v62  ;;  %v785_v7 = vsub.f32 %v13388_v55, %v11595_v37  ;;  %v786_v42 = vsub.f32 %v13388_v55, %v11597_v45  ;;  %v1343_v20 = vand.u32 2147483647, %v767_v32 }
 0x530   : > { %v1344_v33 = vand.u32 2147483647, %v768_v17  ;;  %v11609_v23 = vperm.slane %v3236_v16, 1  ;;  %v3541_v44 = vsub.f32 %v13389_v63, %v11599_v59  ;;  %v7787_v8 = vpack.c.bf16 %v7409_v11, %v7391_v22 }
 0x531   : > { %v7788_v50 = vpack.c.bf16 %v7410_v40, %v7392_v56  ;;  %v1361_v25 = vand.u32 2147483647, %v785_v7  ;;  %v1362_v0 = vand.u32 2147483647, %v786_v42  ;;  %v1919_v21 = vsub.f32 1.0, %v1343_v20 }
 0x532   : > { %v1920_v10 = vsub.f32 1.0, %v1344_v33  ;;  %v3542_v62 = vsub.f32 %v13389_v63, %v11609_v23  ;;  %v3559_v13 = vsub.f32 %v13390_v57, %v11599_v59  ;;  %8186 = vmatmul.bf16.vlgmr.msrb.gmra.mxu2 %v9088_v5  ;;  %8170 = vmatpush.bf16.msrb.mxu1 %v7787_v8  ;;  %v3560_v28 = vsub.f32 %v13390_v57, %v11609_v23  ;;  %v13391_v5 = vld [vmem:[#allocation50_spill] sm:$0xff] }
 0x533   : > { %8196 = vmatpush.bf16.msrb.mxu3 %v7788_v50  ;;  %v1937_v16 = vsub.f32 1.0, %v1361_v25  ;;  %v1938_v43 = vsub.f32 1.0, %v1362_v0  ;;  %v4117_v34 = vand.u32 2147483647, %v3541_v44  ;;  %v2495_v54 = vmax.f32 %v1919_v21, 0.0 }
 0x534   : > { %v2496_v30 = vmax.f32 %v1920_v10, 0.0  ;;  %v4118_v22 = vand.u32 2147483647, %v3542_v62  ;;  %v4135_v56 = vand.u32 2147483647, %v3559_v13  ;;  %v837_v33 = vsub.f32 %v13391_v5, %v11282_v2 }
 0x535   : > { %v2513_v32 = vmax.f32 %v1937_v16, 0.0  ;;  %v2514_v17 = vmax.f32 %v1938_v43, 0.0  ;;  %v4136_v11 = vand.u32 2147483647, %v3560_v28  ;;  %v4693_v40 = vsub.f32 1.0, %v4117_v34  ;;  %v13392_v28 = vld [vmem:[#allocation46_spill] sm:$0xff] }
 0x536   : > { %v2939_v7 = vpack.c.bf16 %v2496_v30, %v2495_v54  ;;  %v4694_v42 = vsub.f32 1.0, %v4118_v22  ;;  %v4711_v20 = vsub.f32 1.0, %v4135_v56  ;;  %v838_v44 = vsub.f32 %v13391_v5, %v11284_v3 }
 0x537   : > { %v2948_v8 = vpack.c.bf16 %v2514_v17, %v2513_v32  ;;  %v4712_v50 = vsub.f32 1.0, %v4136_v11  ;;  %v5269_v25 = vmax.f32 %v4693_v40, 0.0  ;;  %v855_v34 = vsub.f32 %v13392_v28, %v11282_v2  ;;  %v13393_v11 = vld [vmem:[#allocation16_spill] sm:$0xff] }
 0x538   : > { %v5270_v0 = vmax.f32 %v4694_v42, 0.0  ;;  %v5287_v21 = vmax.f32 %v4711_v20, 0.0  ;;  %v6133_v10 = vunpack.c.l.bf16 %v2939_v7  ;;  %v6134_v62 = vunpack.c.h.bf16 %v2939_v7 }
 0x539   : > { %v5288_v13 = vmax.f32 %v4712_v50, 0.0  ;;  %v6151_v16 = vunpack.c.l.bf16 %v2948_v8  ;;  %v6152_v43 = vunpack.c.h.bf16 %v2948_v8  ;;  %v856_v30 = vsub.f32 %v13392_v28, %v11284_v3 }
 0x53a   : > { %v5713_v54 = vpack.c.bf16 %v5270_v0, %v5269_v25  ;;  %v1413_v22 = vand.u32 2147483647, %v837_v33  ;;  %v1414_v56 = vand.u32 2147483647, %v838_v44  ;;  %v1431_v17 = vand.u32 2147483647, %v855_v34 }
 0x53b   : > { %v5722_v32 = vpack.c.bf16 %v5288_v13, %v5287_v21  ;;  %v3611_v40 = vsub.f32 %v13393_v11, %v11286_v35  ;;  %v3612_v7 = vsub.f32 %v13393_v11, %v11296_v39  ;;  %v1432_v8 = vand.u32 2147483647, %v856_v30 }
 0x53c   : > { %v6709_v42 = vunpack.c.l.bf16 %v5713_v54  ;;  %v6710_v20 = vunpack.c.h.bf16 %v5713_v54  ;;  %v1989_v50 = vsub.f32 1.0, %v1413_v22  ;;  %v1990_v25 = vsub.f32 1.0, %v1414_v56 }
 0x53d   : > { %v6727_v5 = vunpack.c.l.bf16 %v5722_v32  ;;  %v6728_v57 = vunpack.c.h.bf16 %v5722_v32  ;;  %v2007_v0 = vsub.f32 1.0, %v1431_v17  ;;  %v2008_v33 = vsub.f32 1.0, %v1432_v8 }
 0x53e   : > { %v7285_v63 = vmul.f32 %v6709_v42, %v6133_v10  ;;  %v7286_v28 = vmul.f32 %v6710_v20, %v6134_v62  ;;  %v2565_v44 = vmax.f32 %v1989_v50, 0.0  ;;  %v2566_v34 = vmax.f32 %v1990_v25, 0.0 }
 0x53f   : > { %v7303_v21 = vmul.f32 %v6727_v5, %v6151_v16  ;;  %v7304_v13 = vmul.f32 %v6728_v57, %v6152_v43  ;;  %v2583_v55 = vmax.f32 %v2007_v0, 0.0  ;;  %v2584_v15 = vmax.f32 %v2008_v33, 0.0  ;;  %v13394_v43 = vld [vmem:[#allocation7_spill] sm:$0xff] }
 0x540   : > { %v3629_v11 = vsub.f32 %v13240_v48, %v11286_v35  ;;  %v3630_v54 = vsub.f32 %v13240_v48, %v11296_v39  ;;  %v4187_v30 = vand.u32 2147483647, %v3611_v40  ;;  %v2974_v56 = vpack.c.bf16 %v2566_v34, %v2565_v44 }
 0x541   : > { %v7735_v22 = vpack.c.bf16 %v7303_v21, %v7285_v63  ;;  %v7736_v32 = vpack.c.bf16 %v7304_v13, %v7286_v28  ;;  %v4188_v17 = vand.u32 2147483647, %v3612_v7  ;;  %v2983_v10 = vpack.c.bf16 %v2584_v15, %v2583_v55  ;;  %v13395_v55 = vld [vmem:[#allocation17_spill] sm:$0xff] }
 0x542   : > { %v4205_v62 = vand.u32 2147483647, %v3629_v11  ;;  %v4206_v42 = vand.u32 2147483647, %v3630_v54  ;;  %v4763_v20 = vsub.f32 1.0, %v4187_v30  ;;  %v6203_v5 = vunpack.c.l.bf16 %v2974_v56 }
 0x543   : > { %8204 = vmatpush.bf16.msra.mxu0 %v7735_v22  ;;  %8230 = vmatpush.bf16.msra.mxu2 %v7736_v32  ;;  %v4764_v57 = vsub.f32 1.0, %v4188_v17  ;;  %v6204_v16 = vunpack.c.h.bf16 %v2974_v56  ;;  %v731_v8 = vsub.f32 %v13394_v43, %v11595_v37  ;;  %v6221_v40 = vunpack.c.l.bf16 %v2983_v10 }
 0x544   : > { %v4781_v50 = vsub.f32 1.0, %v4205_v62  ;;  %v4782_v25 = vsub.f32 1.0, %v4206_v42  ;;  %v5339_v0 = vmax.f32 %v4763_v20, 0.0  ;;  %v6222_v28 = vunpack.c.h.bf16 %v2983_v10 }
 0x545   : > { %v5340_v63 = vmax.f32 %v4764_v57, 0.0  ;;  %v732_v15 = vsub.f32 %v13394_v43, %v11597_v45  ;;  %v749_v11 = vsub.f32 %v13395_v55, %v11595_v37  ;;  %v750_v44 = vsub.f32 %v13395_v55, %v11597_v45 }
 0x546   : > { %v5357_v7 = vmax.f32 %v4781_v50, 0.0  ;;  %v5358_v33 = vmax.f32 %v4782_v25, 0.0  ;;  %v1307_v21 = vand.u32 2147483647, %v731_v8  ;;  %v3505_v30 = vsub.f32 %v9537_v14, %v11599_v59 }
 0x547   : > { %v5748_v13 = vpack.c.bf16 %v5340_v63, %v5339_v0  ;;  %v1308_v34 = vand.u32 2147483647, %v732_v15  ;;  %v1325_v54 = vand.u32 2147483647, %v749_v11  ;;  %v1326_v32 = vand.u32 2147483647, %v750_v44 }
 0x548   : > { %v5757_v22 = vpack.c.bf16 %v5358_v33, %v5357_v7  ;;  %v1883_v56 = vsub.f32 1.0, %v1307_v21  ;;  %v3506_v17 = vsub.f32 %v9537_v14, %v11609_v23  ;;  %v3523_v33 = vsub.f32 %v9454_v36, %v11599_v59 }
 0x549   : > { %v6779_v10 = vunpack.c.l.bf16 %v5748_v13  ;;  %v6780_v62 = vunpack.c.h.bf16 %v5748_v13  ;;  %v1884_v42 = vsub.f32 1.0, %v1308_v34  ;;  %v1901_v20 = vsub.f32 1.0, %v1325_v54 }
 0x54a   : > { %v6797_v57 = vunpack.c.l.bf16 %v5757_v22  ;;  %v6798_v50 = vunpack.c.h.bf16 %v5757_v22  ;;  %v1902_v25 = vsub.f32 1.0, %v1326_v32  ;;  %v2459_v8 = vmax.f32 %v1883_v56, 0.0 }
 0x54b   : > { %v7355_v0 = vmul.f32 %v6779_v10, %v6203_v5  ;;  %v7356_v63 = vmul.f32 %v6780_v62, %v6204_v16  ;;  %v2460_v15 = vmax.f32 %v1884_v42, 0.0  ;;  %v2477_v11 = vmax.f32 %v1901_v20, 0.0 }
 0x54c   : > { %v7373_v55 = vmul.f32 %v6797_v57, %v6221_v40  ;;  %v7374_v43 = vmul.f32 %v6798_v50, %v6222_v28  ;;  %v2478_v7 = vmax.f32 %v1902_v25, 0.0  ;;  %v3524_v21 = vsub.f32 %v9454_v36, %v11609_v23 }
 0x54d   : > { %v2921_v44 = vpack.c.bf16 %v2460_v15, %v2459_v8  ;;  %v4081_v13 = vand.u32 2147483647, %v3505_v30  ;;  %v4082_v34 = vand.u32 2147483647, %v3506_v17  ;;  %v4099_v56 = vand.u32 2147483647, %v3523_v33 }
 0x54e   : > { %v7769_v54 = vpack.c.bf16 %v7373_v55, %v7355_v0  ;;  %v7770_v22 = vpack.c.bf16 %v7374_v43, %v7356_v63  ;;  %v2930_v32 = vpack.c.bf16 %v2478_v7, %v2477_v11  ;;  %v4100_v5 = vand.u32 2147483647, %v3524_v21 }
 0x54f   : > { %v4657_v16 = vsub.f32 1.0, %v4081_v13  ;;  %v4658_v10 = vsub.f32 1.0, %v4082_v34  ;;  %v6097_v62 = vunpack.c.l.bf16 %v2921_v44  ;;  %v4675_v40 = vsub.f32 1.0, %v4099_v56 }
 0x550   : > { %8171 = vmatpush.bf16.msrb.mxu1 %v7769_v54  ;;  %8197 = vmatpush.bf16.msrb.mxu3 %v7770_v22  ;;  %v6115_v28 = vunpack.c.l.bf16 %v2930_v32  ;;  %v6098_v42 = vunpack.c.h.bf16 %v2921_v44  ;;  %v6116_v20 = vunpack.c.h.bf16 %v2930_v32  ;;  %v4676_v57 = vsub.f32 1.0, %v4100_v5 }
 0x551   : > { %v5233_v50 = vmax.f32 %v4657_v16, 0.0  ;;  %v5234_v25 = vmax.f32 %v4658_v10, 0.0  ;;  %v801_v30 = vsub.f32 %v9937_v9, %v11282_v2  ;;  %v5251_v55 = vmax.f32 %v4675_v40, 0.0 }
 0x552   : > { %v802_v43 = vsub.f32 %v9937_v9, %v11284_v3  ;;  %v819_v17 = vsub.f32 %v10064_v46, %v11282_v2  ;;  %v820_v8 = vsub.f32 %v10064_v46, %v11284_v3  ;;  %v5252_v0 = vmax.f32 %v4676_v57, 0.0 }
 0x553   : > { %v5695_v63 = vpack.c.bf16 %v5234_v25, %v5233_v50  ;;  %v1377_v15 = vand.u32 2147483647, %v801_v30  ;;  %v3575_v11 = vsub.f32 %v10068_v6, %v11286_v35  ;;  %v3576_v21 = vsub.f32 %v10068_v6, %v11296_v39 }
 0x554   : > { %v1378_v7 = vand.u32 2147483647, %v802_v43  ;;  %v1395_v33 = vand.u32 2147483647, %v819_v17  ;;  %v1396_v44 = vand.u32 2147483647, %v820_v8  ;;  %v5704_v13 = vpack.c.bf16 %v5252_v0, %v5251_v55 }
 0x555   : > { %v6673_v34 = vunpack.c.l.bf16 %v5695_v63  ;;  %v6674_v54 = vunpack.c.h.bf16 %v5695_v63  ;;  %v1953_v22 = vsub.f32 1.0, %v1377_v15  ;;  %v3593_v3 = vsub.f32 %v10074_v38, %v11286_v35 }
 0x556   : > { %v1954_v2 = vsub.f32 1.0, %v1378_v7  ;;  %v1971_v32 = vsub.f32 1.0, %v1395_v33  ;;  %v1972_v56 = vsub.f32 1.0, %v1396_v44  ;;  %v6691_v5 = vunpack.c.l.bf16 %v5704_v13 }
 0x557   : > { %v7249_v16 = vmul.f32 %v6673_v34, %v6097_v62  ;;  %v6692_v10 = vunpack.c.h.bf16 %v5704_v13  ;;  %v7250_v40 = vmul.f32 %v6674_v54, %v6098_v42  ;;  %v2529_v57 = vmax.f32 %v1953_v22, 0.0 }
 0x558   : > { %v2530_v50 = vmax.f32 %v1954_v2, 0.0  ;;  %v2547_v25 = vmax.f32 %v1971_v32, 0.0  ;;  %v2548_v30 = vmax.f32 %v1972_v56, 0.0  ;;  %v7267_v43 = vmul.f32 %v6691_v5, %v6115_v28 }
 0x559   : > { %v7268_v17 = vmul.f32 %v6692_v10, %v6116_v20  ;;  %v3594_v55 = vsub.f32 %v10074_v38, %v11296_v39  ;;  %v4151_v8 = vand.u32 2147483647, %v3575_v11  ;;  %v4152_v15 = vand.u32 2147483647, %v3576_v21 }
 0x55a   : > { %v2956_v0 = vpack.c.bf16 %v2530_v50, %v2529_v57  ;;  %v2965_v63 = vpack.c.bf16 %v2548_v30, %v2547_v25  ;;  %v4169_v7 = vand.u32 2147483647, %v3593_v3  ;;  %v7717_v33 = vpack.c.bf16 %v7267_v43, %v7249_v16 }
 0x55b   : > { %v7718_v35 = vpack.c.bf16 %v7268_v17, %v7250_v40  ;;  %v4170_v44 = vand.u32 2147483647, %v3594_v55  ;;  %v4727_v62 = vsub.f32 1.0, %v4151_v8  ;;  %v4728_v13 = vsub.f32 1.0, %v4152_v15 }
 0x55c   : > { %v4745_v42 = vsub.f32 1.0, %v4169_v7  ;;  %v6167_v34 = vunpack.c.l.bf16 %v2956_v0  ;;  %v6185_v54 = vunpack.c.l.bf16 %v2965_v63  ;;  %8205 = vmatpush.bf16.msra.mxu0 %v7717_v33  ;;  %v6168_v22 = vunpack.c.h.bf16 %v2956_v0 }
 0x55d   : > { %8231 = vmatpush.bf16.msra.mxu2 %v7718_v35  ;;  %v4746_v28 = vsub.f32 1.0, %v4170_v44  ;;  %v5303_v20 = vmax.f32 %v4727_v62, 0.0  ;;  %v6186_v2 = vunpack.c.h.bf16 %v2965_v63  ;;  %v5304_v39 = vmax.f32 %v4728_v13, 0.0 }
 0x55e   : > { %v5321_v11 = vmax.f32 %v4745_v42, 0.0  ;;  %v695_v21 = vsub.f32 %v9623_v1, %v11595_v37  ;;  %v696_v32 = vsub.f32 %v9623_v1, %v11597_v45  ;;  %v713_v3 = vsub.f32 %v9607_v52, %v11595_v37 }
 0x55f   : > { %v5322_v56 = vmax.f32 %v4746_v28, 0.0  ;;  %v714_v5 = vsub.f32 %v9607_v52, %v11597_v45  ;;  %v3469_v16 = vsub.f32 %v9649_v26, %v11599_v59  ;;  %v5730_v10 = vpack.c.bf16 %v5304_v39, %v5303_v20 }
 0x560   : > { %v1271_v40 = vand.u32 2147483647, %v695_v21  ;;  %v1272_v57 = vand.u32 2147483647, %v696_v32  ;;  %v3470_v50 = vsub.f32 %v9649_v26, %v11609_v23  ;;  %v1289_v30 = vand.u32 2147483647, %v713_v3 }
 0x561   : > { %v5739_v25 = vpack.c.bf16 %v5322_v56, %v5321_v11  ;;  %v1290_v43 = vand.u32 2147483647, %v714_v5  ;;  %v3487_v17 = vsub.f32 %v9540_v51, %v11599_v59  ;;  %v6743_v55 = vunpack.c.l.bf16 %v5730_v10 }
 0x562   : > { %v6744_v8 = vunpack.c.h.bf16 %v5730_v10  ;;  %v1847_v0 = vsub.f32 1.0, %v1271_v40  ;;  %v1848_v63 = vsub.f32 1.0, %v1272_v57  ;;  %v1865_v33 = vsub.f32 1.0, %v1289_v30 }
 0x563   : > { %v6761_v15 = vunpack.c.l.bf16 %v5739_v25  ;;  %v6762_v7 = vunpack.c.h.bf16 %v5739_v25  ;;  %v1866_v35 = vsub.f32 1.0, %v1290_v43  ;;  %v7319_v44 = vmul.f32 %v6743_v55, %v6167_v34 }
 0x564   : > { %v7320_v62 = vmul.f32 %v6744_v8, %v6168_v22  ;;  %v2423_v13 = vmax.f32 %v1847_v0, 0.0  ;;  %v2424_v42 = vmax.f32 %v1848_v63, 0.0  ;;  %v2441_v39 = vmax.f32 %v1865_v33, 0.0 }
 0x565   : > { %v7337_v28 = vmul.f32 %v6761_v15, %v6185_v54  ;;  %v7338_v20 = vmul.f32 %v6762_v7, %v6186_v2  ;;  %v2442_v11 = vmax.f32 %v1866_v35, 0.0  ;;  %v3488_v32 = vsub.f32 %v9540_v51, %v11609_v23 }
 0x566   : > { %v11681_v21 = vpack.c.bf16 %v2424_v42, %v2423_v13  ;;  %v4045_v56 = vand.u32 2147483647, %v3469_v16  ;;  %v4046_v3 = vand.u32 2147483647, %v3470_v50  ;;  %v4063_v57 = vand.u32 2147483647, %v3487_v17 }
 0x567   : > { %v7751_v5 = vpack.c.bf16 %v7337_v28, %v7319_v44  ;;  %v7752_v10 = vpack.c.bf16 %v7338_v20, %v7320_v62  ;;  %v11685_v40 = vpack.c.bf16 %v2442_v11, %v2441_v39  ;;  %v4064_v34 = vand.u32 2147483647, %v3488_v32  ;;  %v9089_v13 = vld.sshfl [vmem:[#allocation1 + $0x8] sm:$0xff pattern:$0x73625140] }
 0x568   : > { %v4621_v22 = vsub.f32 1.0, %v4045_v56  ;;  %v4622_v25 = vsub.f32 1.0, %v4046_v3  ;;  %v6061_v54 = vunpack.c.l.bf16 %v11681_v21  ;;  %v4639_v2 = vsub.f32 1.0, %v4063_v57 }
 0x569   : > { %8172 = vmatpush.bf16.msrb.mxu1 %v7751_v5  ;;  %8198 = vmatpush.bf16.msrb.mxu3 %v7752_v10  ;;  %v6079_v30 = vunpack.c.l.bf16 %v11685_v40  ;;  %v1055_v43 = vsub.f32 %v9416_v49, %v11595_v37  ;;  %v1056_v16 = vsub.f32 %v9416_v49, %v11597_v45  ;;  %v4640_v50 = vsub.f32 1.0, %v4064_v34 }
 0x56a   : > { %v5197_v55 = vmax.f32 %v4621_v22, 0.0  ;;  %v5198_v8 = vmax.f32 %v4622_v25, 0.0  ;;  %v1073_v17 = vsub.f32 %v9448_v19, %v11595_v37  ;;  %v5215_v0 = vmax.f32 %v4639_v2, 0.0 }
 0x56b   : > { %v1074_v63 = vsub.f32 %v9448_v19, %v11597_v45  ;;  %v1631_v15 = vand.u32 2147483647, %v1055_v43  ;;  %v1632_v7 = vand.u32 2147483647, %v1056_v16  ;;  %v5216_v33 = vmax.f32 %v4640_v50, 0.0 }
 0x56c   : > { %v5677_v35 = vpack.c.bf16 %v5198_v8, %v5197_v55  ;;  %v1649_v44 = vand.u32 2147483647, %v1073_v17  ;;  %v3829_v62 = vsub.f32 %v9412_v47, %v11599_v59  ;;  %8199 = vmatmul.bf16.vlgmr.msrb.gmra.mxu3 %v9089_v13  ;;  %8173 = vmatmul.bf16.vlgmr.msrb.gmra.mxu1 %v9089_v13  ;;  %v3830_v39 = vsub.f32 %v9412_v47, %v11609_v23 }
 0x56d   : > { %v1650_v42 = vand.u32 2147483647, %v1074_v63  ;;  %v2207_v28 = vsub.f32 1.0, %v1631_v15  ;;  %v2208_v20 = vsub.f32 1.0, %v1632_v7  ;;  %v5686_v11 = vpack.c.bf16 %v5216_v33, %v5215_v0 }
 0x56e   : > { %v6637_v32 = vunpack.c.l.bf16 %v5677_v35  ;;  %v2225_v56 = vsub.f32 1.0, %v1649_v44  ;;  %v3847_v3 = vsub.f32 %v9483_v12, %v11599_v59  ;;  %v3848_v34 = vsub.f32 %v9483_v12, %v11609_v23 }
 0x56f   : > { %v2226_v5 = vsub.f32 1.0, %v1650_v42  ;;  %v2783_v10 = vmax.f32 %v2207_v28, 0.0  ;;  %v2784_v57 = vmax.f32 %v2208_v20, 0.0  ;;  %v6655_v22 = vunpack.c.l.bf16 %v5686_v11 }
 0x570   : > { %v7213_v25 = vmul.f32 %v6637_v32, %v6061_v54  ;;  %v2801_v2 = vmax.f32 %v2225_v56, 0.0  ;;  %v4405_v43 = vand.u32 2147483647, %v3829_v62  ;;  %v4406_v55 = vand.u32 2147483647, %v3830_v39 }
 0x571   : > { %v2802_v16 = vmax.f32 %v2226_v5, 0.0  ;;  %v3083_v50 = vpack.c.bf16 %v2784_v57, %v2783_v10  ;;  %v4423_v8 = vand.u32 2147483647, %v3847_v3  ;;  %v7231_v17 = vmul.f32 %v6655_v22, %v6079_v30 }
 0x572   : > { %v4424_v0 = vand.u32 2147483647, %v3848_v34  ;;  %v4981_v63 = vsub.f32 1.0, %v4405_v43  ;;  %v6062_v15 = vunpack.c.h.bf16 %v11681_v21  ;;  %v4982_v33 = vsub.f32 1.0, %v4406_v55  ;;  %v11715_v55 = vpop.f32.mrf.mxu0 }
 0x573   : > { %v3092_v7 = vpack.c.bf16 %v2802_v16, %v2801_v2  ;;  %v4999_v44 = vsub.f32 1.0, %v4423_v8  ;;  %v6421_v13 = vunpack.c.l.bf16 %v3083_v50  ;;  %v7699_v42 = vpack.c.bf16 %v7231_v17, %v7213_v25  ;;  %v11717_v8 = vpop.f32.mrf.mxu1 }
 0x574   : > { %v5000_v28 = vsub.f32 1.0, %v4424_v0  ;;  %v5557_v20 = vmax.f32 %v4981_v63, 0.0  ;;  %v6080_v54 = vunpack.c.h.bf16 %v11685_v40  ;;  %v5558_v32 = vmax.f32 %v4982_v33, 0.0  ;;  %v11721_v33 = vpop.f32.mrf.mxu3 }
 0x575   : > { %v5575_v62 = vmax.f32 %v4999_v44, 0.0  ;;  %v6439_v56 = vunpack.c.l.bf16 %v3092_v7  ;;  %v6638_v5 = vunpack.c.h.bf16 %v5677_v35  ;;  %8206 = vmatpush.bf16.msra.mxu0 %v7699_v42  ;;  %v6656_v30 = vunpack.c.h.bf16 %v5686_v11 }
 0x576   : > { %v5576_v39 = vmax.f32 %v5000_v28, 0.0  ;;  %v6422_v3 = vunpack.c.h.bf16 %v3083_v50  ;;  %v6440_v10 = vunpack.c.h.bf16 %v3092_v7  ;;  %v5857_v57 = vpack.c.bf16 %v5558_v32, %v5557_v20  ;;  %v11719_v7 = vpop.f32.mrf.mxu2 }
 0x577   : > { %v7214_v21 = vmul.f32 %v6638_v5, %v6062_v15  ;;  %v659_v34 = vsub.f32 %v9577_v60, %v11595_v37  ;;  %v660_v22 = vsub.f32 %v9577_v60, %v11597_v45  ;;  %v7232_v2 = vmul.f32 %v6656_v30, %v6080_v54 }
 0x578   : > { %v5866_v25 = vpack.c.bf16 %v5576_v39, %v5575_v62  ;;  %v677_v40 = vsub.f32 %v9704_v18, %v11595_v37  ;;  %v678_v35 = vsub.f32 %v9704_v18, %v11597_v45  ;;  %v6997_v43 = vunpack.c.l.bf16 %v5857_v57 }
 0x579   : > { %v6998_v11 = vunpack.c.h.bf16 %v5857_v57  ;;  %v1235_v16 = vand.u32 2147483647, %v659_v34  ;;  %v1236_v50 = vand.u32 2147483647, %v660_v22  ;;  %v7700_v0 = vpack.c.bf16 %v7232_v2, %v7214_v21  ;;  %v13396_v57 = vld [vmem:[#allocation35_spill] sm:$0xff] }
 0x57a   : > { %v7015_v17 = vunpack.c.l.bf16 %v5866_v25  ;;  %v7016_v63 = vunpack.c.h.bf16 %v5866_v25  ;;  %v1253_v15 = vand.u32 2147483647, %v677_v40  ;;  %v7573_v44 = vmul.f32 %v6997_v43, %v6421_v13  ;;  %v13397_v40 = vld [vmem:[#allocation27_spill] sm:$0xff] }
 0x57b   : > { %v7574_v42 = vmul.f32 %v6998_v11, %v6422_v3  ;;  %v1254_v28 = vand.u32 2147483647, %v678_v35  ;;  %v1811_v20 = vsub.f32 1.0, %v1235_v16  ;;  %8232 = vmatpush.bf16.msra.mxu2 %v7700_v0  ;;  %v1812_v62 = vsub.f32 1.0, %v1236_v50  ;;  %v13398_v16 = vld [vmem:[#allocation10_spill] sm:$0xff] }
 0x57c   : > { %v7591_v54 = vmul.f32 %v7015_v17, %v6439_v56  ;;  %v7592_v32 = vmul.f32 %v7016_v63, %v6440_v10  ;;  %v1829_v5 = vsub.f32 1.0, %v1253_v15  ;;  %v3433_v21 = vsub.f32 %v13396_v57, %v11599_v59 }
 0x57d   : > { %v1830_v39 = vsub.f32 1.0, %v1254_v28  ;;  %v2387_v30 = vmax.f32 %v1811_v20, 0.0  ;;  %v3434_v34 = vsub.f32 %v13396_v57, %v11609_v23  ;;  %v2388_v2 = vmax.f32 %v1812_v62, 0.0  ;;  %v7916_v28 = vpop.f32.mrf.mxu1 }
 0x57e   : > { %v7879_v22 = vpack.c.bf16 %v7591_v54, %v7573_v44  ;;  %v7880_v25 = vpack.c.bf16 %v7592_v32, %v7574_v42  ;;  %v2405_v13 = vmax.f32 %v1829_v5, 0.0  ;;  %v3451_v56 = vsub.f32 %v13397_v40, %v11599_v59  ;;  %v7903_v42 = vpop.f32.mrf.mxu0  ;;  %v13399_v32 = vld [vmem:[#allocation25_spill] sm:$0xff] }
 0x57f   : > { %v2406_v3 = vmax.f32 %v1830_v39, 0.0  ;;  %v3452_v10 = vsub.f32 %v13397_v40, %v11609_v23  ;;  %v4009_v35 = vand.u32 2147483647, %v3433_v21  ;;  %v11731_v43 = vpack.c.bf16 %v2388_v2, %v2387_v30  ;;  %v7929_v39 = vpop.f32.mrf.mxu2  ;;  %v7942_v30 = vpop.f32.mrf.mxu3 }
 0x580   : > { %8217 = vmatpush.bf16.msra.mxu1 %v7879_v22  ;;  %8243 = vmatpush.bf16.msra.mxu3 %v7880_v25  ;;  %v4010_v11 = vand.u32 2147483647, %v3434_v34  ;;  %v1019_v50 = vsub.f32 %v13398_v16, %v11595_v37  ;;  %v1020_v17 = vsub.f32 %v13398_v16, %v11597_v45  ;;  %v4027_v63 = vand.u32 2147483647, %v3451_v56  ;;  %v13400_v56 = vld [vmem:[#allocation23_spill] sm:$0xff] }
 0x581   : > { %v11737_v0 = vpack.c.bf16 %v2406_v3, %v2405_v13  ;;  %v4028_v15 = vand.u32 2147483647, %v3452_v10  ;;  %v4585_v44 = vsub.f32 1.0, %v4009_v35  ;;  %v6025_v54 = vunpack.c.l.bf16 %v11731_v43 }
 0x582   : > { %v4586_v20 = vsub.f32 1.0, %v4010_v11  ;;  %v1037_v62 = vsub.f32 %v13399_v32, %v11595_v37  ;;  %v1038_v5 = vsub.f32 %v13399_v32, %v11597_v45  ;;  %v4603_v21 = vsub.f32 1.0, %v4027_v63 }
 0x583   : > { %v4604_v34 = vsub.f32 1.0, %v4028_v15  ;;  %v5161_v22 = vmax.f32 %v4585_v44, 0.0  ;;  %v6043_v25 = vunpack.c.l.bf16 %v11737_v0  ;;  %v1595_v13 = vand.u32 2147483647, %v1019_v50 }
 0x584   : > { %v5162_v2 = vmax.f32 %v4586_v20, 0.0  ;;  %v1596_v3 = vand.u32 2147483647, %v1020_v17  ;;  %v3793_v10 = vsub.f32 %v13400_v56, %v11599_v59  ;;  %v5179_v35 = vmax.f32 %v4603_v21, 0.0  ;;  %v13401_v20 = vld [vmem:[#allocation15_spill] sm:$0xff] }
 0x585   : > { %v5180_v11 = vmax.f32 %v4604_v34, 0.0  ;;  %v1613_v42 = vand.u32 2147483647, %v1037_v62  ;;  %v1614_v28 = vand.u32 2147483647, %v1038_v5  ;;  %v2171_v40 = vsub.f32 1.0, %v1595_v13 }
 0x586   : > { %v5659_v16 = vpack.c.bf16 %v5162_v2, %v5161_v22  ;;  %v2172_v32 = vsub.f32 1.0, %v1596_v3  ;;  %v3794_v63 = vsub.f32 %v13400_v56, %v11609_v23  ;;  %v3811_v50 = vsub.f32 %v13401_v20, %v11599_v59 }
 0x587   : > { %v5668_v15 = vpack.c.bf16 %v5180_v11, %v5179_v35  ;;  %v2189_v44 = vsub.f32 1.0, %v1613_v42  ;;  %v2190_v39 = vsub.f32 1.0, %v1614_v28  ;;  %v2747_v30 = vmax.f32 %v2171_v40, 0.0 }
 0x588   : > { %v6601_v17 = vunpack.c.l.bf16 %v5659_v16  ;;  %v2748_v57 = vmax.f32 %v2172_v32, 0.0  ;;  %v3812_v21 = vsub.f32 %v13401_v20, %v11609_v23  ;;  %v4369_v22 = vand.u32 2147483647, %v3793_v10 }
 0x589   : > { %v6619_v62 = vunpack.c.l.bf16 %v5668_v15  ;;  %v2765_v5 = vmax.f32 %v2189_v44, 0.0  ;;  %v2766_v34 = vmax.f32 %v2190_v39, 0.0  ;;  %v4370_v3 = vand.u32 2147483647, %v3794_v63 }
 0x58a   : > { %v7177_v2 = vmul.f32 %v6601_v17, %v6025_v54  ;;  %v3065_v13 = vpack.c.bf16 %v2748_v57, %v2747_v30  ;;  %v4387_v56 = vand.u32 2147483647, %v3811_v50  ;;  %v4388_v42 = vand.u32 2147483647, %v3812_v21 }
 0x58b   : > { %v7195_v35 = vmul.f32 %v6619_v62, %v6043_v25  ;;  %v3074_v11 = vpack.c.bf16 %v2766_v34, %v2765_v5  ;;  %v4945_v28 = vsub.f32 1.0, %v4369_v22  ;;  %v4946_v18 = vsub.f32 1.0, %v4370_v3 }
 0x58c   : > { %v4963_v60 = vsub.f32 1.0, %v4387_v56  ;;  %v6385_v12 = vunpack.c.l.bf16 %v3065_v13  ;;  %v6026_v40 = vunpack.c.h.bf16 %v11731_v43  ;;  %v4964_v47 = vsub.f32 1.0, %v4388_v42 }
 0x58d   : > { %v7681_v32 = vpack.c.bf16 %v7195_v35, %v7177_v2  ;;  %v5521_v20 = vmax.f32 %v4945_v28, 0.0  ;;  %v6403_v19 = vunpack.c.l.bf16 %v3074_v11  ;;  %v5522_v44 = vmax.f32 %v4946_v18, 0.0 }
 0x58e   : > { %v5539_v39 = vmax.f32 %v4963_v60, 0.0  ;;  %v6044_v54 = vunpack.c.h.bf16 %v11737_v0  ;;  %v6602_v57 = vunpack.c.h.bf16 %v5659_v16  ;;  %v5540_v10 = vmax.f32 %v4964_v47, 0.0 }
 0x58f   : > { %8207 = vmatpush.bf16.msra.mxu0 %v7681_v32  ;;  %v6620_v25 = vunpack.c.h.bf16 %v5668_v15  ;;  %v6386_v63 = vunpack.c.h.bf16 %v3065_v13  ;;  %v6404_v50 = vunpack.c.h.bf16 %v3074_v11  ;;  %v5839_v17 = vpack.c.bf16 %v5522_v44, %v5521_v20  ;;  %v13404_v20 = vld [vmem:[#allocation41_spill] sm:$0xff] }
 0x590   : > { %v7178_v30 = vmul.f32 %v6602_v57, %v6026_v40  ;;  %v11757_v56 = vadd.f32 %v11717_v8, %v11715_v55  ;;  %v11761_v43 = vadd.f32 %v11721_v33, %v11719_v7  ;;  %v5848_v18 = vpack.c.bf16 %v5540_v10, %v5539_v39  ;;  %v13405_v40 = vld [vmem:[#allocation44_spill] sm:$0xff] }
 0x591   : > { %v7196_v60 = vmul.f32 %v6620_v25, %v6044_v54  ;;  %v623_v16 = vsub.f32 %v13207_v4, %v11595_v37  ;;  %v624_v47 = vsub.f32 %v13207_v4, %v11597_v45  ;;  %v6961_v0 = vunpack.c.l.bf16 %v5839_v17 }
 0x592   : > { %13402 = vst [vmem:[#allocation34_spill] sm:$0xff] %v11757_v56  ;;  %v6962_v15 = vunpack.c.h.bf16 %v5839_v17  ;;  %v641_v21 = vsub.f32 %v13404_v20, %v11595_v37  ;;  %v642_v55 = vsub.f32 %v13404_v20, %v11597_v45  ;;  %v6979_v8 = vunpack.c.l.bf16 %v5848_v18 }
 0x593   : > { %13403 = vst [vmem:[#allocation43_spill] sm:$0xff] %v11761_v43  ;;  %v7682_v62 = vpack.c.bf16 %v7196_v60, %v7178_v30  ;;  %v6980_v7 = vunpack.c.h.bf16 %v5848_v18  ;;  %v1199_v33 = vand.u32 2147483647, %v623_v16  ;;  %v7537_v5 = vmul.f32 %v6961_v0, %v6385_v12  ;;  %v13407_v60 = vld [vmem:[#allocation18_spill] sm:$0xff] }
 0x594   : > { %v7538_v34 = vmul.f32 %v6962_v15, %v6386_v63  ;;  %v1200_v22 = vand.u32 2147483647, %v624_v47  ;;  %v1217_v2 = vand.u32 2147483647, %v641_v21  ;;  %v7555_v13 = vmul.f32 %v6979_v8, %v6403_v19  ;;  %v13406_v19 = vld [vmem:[#allocation37_spill] sm:$0xff] }
 0x595   : > { %8233 = vmatpush.bf16.msra.mxu2 %v7682_v62  ;;  %v7556_v3 = vmul.f32 %v6980_v7, %v6404_v50  ;;  %v1218_v35 = vand.u32 2147483647, %v642_v55  ;;  %v1775_v11 = vsub.f32 1.0, %v1199_v33  ;;  %v3397_v32 = vsub.f32 %v13405_v40, %v11599_v59  ;;  %v13408_v7 = vld [vmem:[#allocation28_spill] sm:$0xff] }
 0x596   : > { %v1776_v42 = vsub.f32 1.0, %v1200_v22  ;;  %v1793_v28 = vsub.f32 1.0, %v1217_v2  ;;  %v3398_v44 = vsub.f32 %v13405_v40, %v11609_v23  ;;  %v7861_v39 = vpack.c.bf16 %v7555_v13, %v7537_v5 }
 0x597   : > { %v7862_v54 = vpack.c.bf16 %v7556_v3, %v7538_v34  ;;  %v1794_v57 = vsub.f32 1.0, %v1218_v35  ;;  %v2351_v12 = vmax.f32 %v1775_v11, 0.0  ;;  %v3415_v63 = vsub.f32 %v13406_v19, %v11599_v59 }
 0x598   : > { %v2352_v10 = vmax.f32 %v1776_v42, 0.0  ;;  %v2369_v25 = vmax.f32 %v1793_v28, 0.0  ;;  %v3416_v50 = vsub.f32 %v13406_v19, %v11609_v23  ;;  %8218 = vmatpush.bf16.msra.mxu1 %v7861_v39  ;;  %v3973_v30 = vand.u32 2147483647, %v3397_v32 }
 0x599   : > { %8244 = vmatpush.bf16.msra.mxu3 %v7862_v54  ;;  %v2370_v17 = vmax.f32 %v1794_v57, 0.0  ;;  %v3974_v18 = vand.u32 2147483647, %v3398_v44  ;;  %v983_v16 = vsub.f32 %v13407_v60, %v11595_v37  ;;  %v3991_v0 = vand.u32 2147483647, %v3415_v63 }
 0x59a   : > { %v11781_v47 = vpack.c.bf16 %v2352_v10, %v2351_v12  ;;  %v3992_v15 = vand.u32 2147483647, %v3416_v50  ;;  %v984_v21 = vsub.f32 %v13407_v60, %v11597_v45  ;;  %v4549_v8 = vsub.f32 1.0, %v3973_v30  ;;  %v13409_v12 = vld [vmem:[#allocation11_spill] sm:$0xff] }
 0x59b   : > { %v11785_v55 = vpack.c.bf16 %v2370_v17, %v2369_v25  ;;  %v4550_v62 = vsub.f32 1.0, %v3974_v18  ;;  %v1001_v33 = vsub.f32 %v13408_v7, %v11595_v37  ;;  %v4567_v5 = vsub.f32 1.0, %v3991_v0 }
 0x59c   : > { %v4568_v34 = vsub.f32 1.0, %v3992_v15  ;;  %v5989_v22 = vunpack.c.l.bf16 %v11781_v47  ;;  %v1002_v2 = vsub.f32 %v13408_v7, %v11597_v45  ;;  %v5125_v13 = vmax.f32 %v4549_v8, 0.0 }
 0x59d   : > { %v5126_v3 = vmax.f32 %v4550_v62, 0.0  ;;  %v6007_v35 = vunpack.c.l.bf16 %v11785_v55  ;;  %v1559_v11 = vand.u32 2147483647, %v983_v16  ;;  %v5143_v42 = vmax.f32 %v4567_v5, 0.0  ;;  %v13410_v16 = vld [vmem:[#allocation29_spill] sm:$0xff] }
 0x59e   : > { %v5144_v28 = vmax.f32 %v4568_v34, 0.0  ;;  %v1560_v32 = vand.u32 2147483647, %v984_v21  ;;  %v1577_v44 = vand.u32 2147483647, %v1001_v33  ;;  %v3757_v10 = vsub.f32 %v13409_v12, %v11599_v59 }
 0x59f   : > { %v5641_v39 = vpack.c.bf16 %v5126_v3, %v5125_v13  ;;  %v1578_v54 = vand.u32 2147483647, %v1002_v2  ;;  %v2135_v57 = vsub.f32 1.0, %v1559_v11  ;;  %v3758_v17 = vsub.f32 %v13409_v12, %v11609_v23 }
 0x5a0   : > { %v5650_v25 = vpack.c.bf16 %v5144_v28, %v5143_v42  ;;  %v2136_v63 = vsub.f32 1.0, %v1560_v32  ;;  %v2153_v50 = vsub.f32 1.0, %v1577_v44  ;;  %v3775_v15 = vsub.f32 %v13410_v16, %v11599_v59 }
 0x5a1   : > { %v6565_v30 = vunpack.c.l.bf16 %v5641_v39  ;;  %v2154_v18 = vsub.f32 1.0, %v1578_v54  ;;  %v2711_v0 = vmax.f32 %v2135_v57, 0.0  ;;  %v3776_v33 = vsub.f32 %v13410_v16, %v11609_v23 }
 0x5a2   : > { %v6583_v21 = vunpack.c.l.bf16 %v5650_v25  ;;  %v2712_v8 = vmax.f32 %v2136_v63, 0.0  ;;  %v2729_v62 = vmax.f32 %v2153_v50, 0.0  ;;  %v4333_v2 = vand.u32 2147483647, %v3757_v10 }
 0x5a3   : > { %v7141_v5 = vmul.f32 %v6565_v30, %v5989_v22  ;;  %v2730_v34 = vmax.f32 %v2154_v18, 0.0  ;;  %v4334_v13 = vand.u32 2147483647, %v3758_v17  ;;  %v4351_v42 = vand.u32 2147483647, %v3775_v15 }
 0x5a4   : > { %v7159_v3 = vmul.f32 %v6583_v21, %v6007_v35  ;;  %v3047_v11 = vpack.c.bf16 %v2712_v8, %v2711_v0  ;;  %v4352_v28 = vand.u32 2147483647, %v3776_v33  ;;  %v4909_v44 = vsub.f32 1.0, %v4333_v2  ;;  %v13411_v21 = vld [vmem:[#allocation40_spill] sm:$0xff] }
 0x5a5   : > { %v3056_v32 = vpack.c.bf16 %v2730_v34, %v2729_v62  ;;  %v4910_v54 = vsub.f32 1.0, %v4334_v13  ;;  %v5990_v57 = vunpack.c.h.bf16 %v11781_v47  ;;  %v4927_v56 = vsub.f32 1.0, %v4351_v42 }
 0x5a6   : > { %v7663_v43 = vpack.c.bf16 %v7159_v3, %v7141_v5  ;;  %v4928_v63 = vsub.f32 1.0, %v4352_v28  ;;  %v6349_v50 = vunpack.c.l.bf16 %v3047_v11  ;;  %v5485_v12 = vmax.f32 %v4909_v44, 0.0 }
 0x5a7   : > { %v5486_v7 = vmax.f32 %v4910_v54, 0.0  ;;  %v6367_v16 = vunpack.c.l.bf16 %v3056_v32  ;;  %v6008_v22 = vunpack.c.h.bf16 %v11785_v55  ;;  %v5503_v10 = vmax.f32 %v4927_v56, 0.0 }
 0x5a8   : > { %8208 = vmatpush.bf16.msra.mxu0 %v7663_v43  ;;  %v5504_v35 = vmax.f32 %v4928_v63, 0.0  ;;  %v6566_v17 = vunpack.c.h.bf16 %v5641_v39  ;;  %v6584_v30 = vunpack.c.h.bf16 %v5650_v25  ;;  %v6350_v0 = vunpack.c.h.bf16 %v3047_v11  ;;  %v13412_v43 = vld [vmem:[#allocation49_spill] sm:$0xff] }
 0x5a9   : > { %v5821_v18 = vpack.c.bf16 %v5486_v7, %v5485_v12  ;;  %v6368_v15 = vunpack.c.h.bf16 %v3056_v32  ;;  %v587_v47 = vsub.f32 %v13411_v21, %v11595_v37  ;;  %v588_v5 = vsub.f32 %v13411_v21, %v11597_v45 }
 0x5aa   : > { %v5830_v8 = vpack.c.bf16 %v5504_v35, %v5503_v10  ;;  %v7142_v62 = vmul.f32 %v6566_v17, %v5990_v57  ;;  %v7160_v33 = vmul.f32 %v6584_v30, %v6008_v22  ;;  %v605_v56 = vsub.f32 %v13412_v43, %v11595_v37  ;;  %v13413_v22 = vld [vmem:[#allocation51_spill] sm:$0xff] }
 0x5ab   : > { %v6925_v34 = vunpack.c.l.bf16 %v5821_v18  ;;  %v6926_v2 = vunpack.c.h.bf16 %v5821_v18  ;;  %v606_v55 = vsub.f32 %v13412_v43, %v11597_v45  ;;  %v1163_v25 = vand.u32 2147483647, %v587_v47 }
 0x5ac   : > { %v6943_v7 = vunpack.c.l.bf16 %v5830_v8  ;;  %v7664_v39 = vpack.c.bf16 %v7160_v33, %v7142_v62  ;;  %v6944_v12 = vunpack.c.h.bf16 %v5830_v8  ;;  %v1164_v11 = vand.u32 2147483647, %v588_v5 }
 0x5ad   : > { %v7501_v13 = vmul.f32 %v6925_v34, %v6349_v50  ;;  %v7502_v3 = vmul.f32 %v6926_v2, %v6350_v0  ;;  %v1181_v42 = vand.u32 2147483647, %v605_v56  ;;  %v1182_v44 = vand.u32 2147483647, %v606_v55  ;;  %v13415_v34 = vld [vmem:[#allocation26_spill] sm:$0xff] }
 0x5ae   : > { %v7519_v28 = vmul.f32 %v6943_v7, %v6367_v16  ;;  %8234 = vmatpush.bf16.msra.mxu2 %v7664_v39  ;;  %v7520_v32 = vmul.f32 %v6944_v12, %v6368_v15  ;;  %v1739_v54 = vsub.f32 1.0, %v1163_v25  ;;  %v1740_v57 = vsub.f32 1.0, %v1164_v11  ;;  %v13414_v16 = vld [vmem:[#allocation45_spill] sm:$0xff] }
 0x5af   : > { %v1757_v63 = vsub.f32 1.0, %v1181_v42  ;;  %v3361_v10 = vsub.f32 %v13413_v22, %v11599_v59  ;;  %v3362_v35 = vsub.f32 %v13413_v22, %v11609_v23  ;;  %v1758_v18 = vsub.f32 1.0, %v1182_v44 }
 0x5b0   : > { %v7843_v17 = vpack.c.bf16 %v7519_v28, %v7501_v13  ;;  %v7844_v30 = vpack.c.bf16 %v7520_v32, %v7502_v3  ;;  %v2315_v50 = vmax.f32 %v1739_v54, 0.0  ;;  %v2316_v0 = vmax.f32 %v1740_v57, 0.0  ;;  %v13416_v3 = vld [vmem:[#allocation31_spill] sm:$0xff] }
 0x5b1   : > { %v2333_v47 = vmax.f32 %v1757_v63, 0.0  ;;  %v3379_v8 = vsub.f32 %v13414_v16, %v11599_v59  ;;  %v3380_v15 = vsub.f32 %v13414_v16, %v11609_v23  ;;  %v2334_v62 = vmax.f32 %v1758_v18, 0.0 }
 0x5b2   : > { %8219 = vmatpush.bf16.msra.mxu1 %v7843_v17  ;;  %8245 = vmatpush.bf16.msra.mxu3 %v7844_v30  ;;  %v3937_v33 = vand.u32 2147483647, %v3361_v10  ;;  %v3938_v5 = vand.u32 2147483647, %v3362_v35  ;;  %v947_v2 = vsub.f32 %v13415_v34, %v11595_v37  ;;  %v11821_v56 = vpack.c.bf16 %v2316_v0, %v2315_v50 }
 0x5b3   : > { %v3955_v55 = vand.u32 2147483647, %v3379_v8  ;;  %v3956_v7 = vand.u32 2147483647, %v3380_v15  ;;  %v948_v39 = vsub.f32 %v13415_v34, %v11597_v45  ;;  %v11825_v12 = vpack.c.bf16 %v2334_v62, %v2333_v47  ;;  %v13417_v8 = vld [vmem:[#allocation38_spill] sm:$0xff] }
 0x5b4   : > { %v4513_v25 = vsub.f32 1.0, %v3937_v33  ;;  %v4514_v13 = vsub.f32 1.0, %v3938_v5  ;;  %v965_v11 = vsub.f32 %v13416_v3, %v11595_v37  ;;  %v5953_v32 = vunpack.c.l.bf16 %v11821_v56 }
 0x5b5   : > { %v4531_v42 = vsub.f32 1.0, %v3955_v55  ;;  %v4532_v28 = vsub.f32 1.0, %v3956_v7  ;;  %v966_v44 = vsub.f32 %v13416_v3, %v11597_v45  ;;  %v5971_v63 = vunpack.c.l.bf16 %v11825_v12 }
 0x5b6   : > { %v5089_v54 = vmax.f32 %v4513_v25, 0.0  ;;  %v5090_v57 = vmax.f32 %v4514_v13, 0.0  ;;  %v1523_v10 = vand.u32 2147483647, %v947_v2  ;;  %v1524_v30 = vand.u32 2147483647, %v948_v39 }
 0x5b7   : > { %v5107_v35 = vmax.f32 %v4531_v42, 0.0  ;;  %v5108_v17 = vmax.f32 %v4532_v28, 0.0  ;;  %v1541_v18 = vand.u32 2147483647, %v965_v11  ;;  %v1542_v0 = vand.u32 2147483647, %v966_v44 }
 0x5b8   : > { %v5623_v50 = vpack.c.bf16 %v5090_v57, %v5089_v54  ;;  %v2099_v47 = vsub.f32 1.0, %v1523_v10  ;;  %v3721_v15 = vsub.f32 %v13417_v8, %v11599_v59  ;;  %v2100_v33 = vsub.f32 1.0, %v1524_v30  ;;  %v13418_v2 = vld [vmem:[#allocation30_spill] sm:$0xff] }
 0x5b9   : > { %v5632_v62 = vpack.c.bf16 %v5108_v17, %v5107_v35  ;;  %v2117_v5 = vsub.f32 1.0, %v1541_v18  ;;  %v3722_v55 = vsub.f32 %v13417_v8, %v11609_v23  ;;  %v2118_v25 = vsub.f32 1.0, %v1542_v0 }
 0x5ba   : > { %v6529_v7 = vunpack.c.l.bf16 %v5623_v50  ;;  %v2675_v13 = vmax.f32 %v2099_v47, 0.0  ;;  %v3739_v42 = vsub.f32 %v13418_v2, %v11599_v59  ;;  %v2676_v11 = vmax.f32 %v2100_v33, 0.0 }
 0x5bb   : > { %v6547_v39 = vunpack.c.l.bf16 %v5632_v62  ;;  %v2693_v28 = vmax.f32 %v2117_v5, 0.0  ;;  %v3740_v44 = vsub.f32 %v13418_v2, %v11609_v23  ;;  %v2694_v57 = vmax.f32 %v2118_v25, 0.0 }
 0x5bc   : > { %v7105_v54 = vmul.f32 %v6529_v7, %v5953_v32  ;;  %v4297_v10 = vand.u32 2147483647, %v3721_v15  ;;  %v4298_v35 = vand.u32 2147483647, %v3722_v55  ;;  %v3029_v30 = vpack.c.bf16 %v2676_v11, %v2675_v13 }
 0x5bd   : > { %v7123_v17 = vmul.f32 %v6547_v39, %v5971_v63  ;;  %v4315_v18 = vand.u32 2147483647, %v3739_v42  ;;  %v4316_v8 = vand.u32 2147483647, %v3740_v44  ;;  %v3038_v3 = vpack.c.bf16 %v2694_v57, %v2693_v28 }
 0x5be   : > { %v4873_v0 = vsub.f32 1.0, %v4297_v10  ;;  %v4874_v47 = vsub.f32 1.0, %v4298_v35  ;;  %v5954_v34 = vunpack.c.h.bf16 %v11821_v56  ;;  %v6313_v5 = vunpack.c.l.bf16 %v3029_v30 }
 0x5bf   : > { %v7645_v16 = vpack.c.bf16 %v7123_v17, %v7105_v54  ;;  %v4891_v22 = vsub.f32 1.0, %v4315_v18  ;;  %v4892_v33 = vsub.f32 1.0, %v4316_v8  ;;  %v6331_v2 = vunpack.c.l.bf16 %v3038_v3 }
 0x5c0   : > { %v5449_v43 = vmax.f32 %v4873_v0, 0.0  ;;  %v5450_v21 = vmax.f32 %v4874_v47, 0.0  ;;  %v5972_v32 = vunpack.c.h.bf16 %v11825_v12  ;;  %v6530_v55 = vunpack.c.h.bf16 %v5623_v50 }
 0x5c1   : > { %8209 = vmatpush.bf16.msra.mxu0 %v7645_v16  ;;  %v5467_v15 = vmax.f32 %v4891_v22, 0.0  ;;  %v5468_v63 = vmax.f32 %v4892_v33, 0.0  ;;  %v6548_v7 = vunpack.c.h.bf16 %v5632_v62  ;;  %v6314_v13 = vunpack.c.h.bf16 %v3029_v30 }
 0x5c2   : > { %v5803_v25 = vpack.c.bf16 %v5450_v21, %v5449_v43  ;;  %v6332_v42 = vunpack.c.h.bf16 %v3038_v3  ;;  %v551_v56 = vsub.f32 %v13222_v31, %v11595_v37  ;;  %v7106_v11 = vmul.f32 %v6530_v55, %v5954_v34 }
 0x5c3   : > { %v5812_v39 = vpack.c.bf16 %v5468_v63, %v5467_v15  ;;  %v7124_v8 = vmul.f32 %v6548_v7, %v5972_v32  ;;  %v552_v28 = vsub.f32 %v13222_v31, %v11597_v45  ;;  %v569_v22 = vsub.f32 %v9933_v53, %v11595_v37 }
 0x5c4   : > { %v6889_v44 = vunpack.c.l.bf16 %v5803_v25  ;;  %v6890_v54 = vunpack.c.h.bf16 %v5803_v25  ;;  %v570_v16 = vsub.f32 %v9933_v53, %v11597_v45  ;;  %v1127_v3 = vand.u32 2147483647, %v551_v56 }
 0x5c5   : > { %v6907_v21 = vunpack.c.l.bf16 %v5812_v39  ;;  %v7646_v43 = vpack.c.bf16 %v7124_v8, %v7106_v11  ;;  %v6908_v12 = vunpack.c.h.bf16 %v5812_v39  ;;  %v1128_v57 = vand.u32 2147483647, %v552_v28  ;;  %v13420_v11 = vld [vmem:[#allocation33_spill] sm:$0xff] }
 0x5c6   : > { %v7465_v50 = vmul.f32 %v6889_v44, %v6313_v5  ;;  %v7466_v62 = vmul.f32 %v6890_v54, %v6314_v13  ;;  %v1145_v34 = vand.u32 2147483647, %v569_v22  ;;  %v1146_v17 = vand.u32 2147483647, %v570_v16 }
 0x5c7   : > { %v7483_v10 = vmul.f32 %v6907_v21, %v6331_v2  ;;  %8235 = vmatpush.bf16.msra.mxu2 %v7646_v43  ;;  %v7484_v35 = vmul.f32 %v6908_v12, %v6332_v42  ;;  %v1703_v30 = vsub.f32 1.0, %v1127_v3  ;;  %v1704_v18 = vsub.f32 1.0, %v1128_v57  ;;  %v13419_v2 = vld [vmem:[#allocation52_spill] sm:$0xff] }
 0x5c8   : > { %v1721_v0 = vsub.f32 1.0, %v1145_v34  ;;  %v3325_v47 = vsub.f32 %v9954_v58, %v11599_v59  ;;  %v3326_v33 = vsub.f32 %v9954_v58, %v11609_v23  ;;  %v1722_v63 = vsub.f32 1.0, %v1146_v17  ;;  %v13421_v12 = vld [vmem:[#allocation36_spill] sm:$0xff] }
 0x5c9   : > { %v7825_v32 = vpack.c.bf16 %v7483_v10, %v7465_v50  ;;  %v7826_v15 = vpack.c.bf16 %v7484_v35, %v7466_v62  ;;  %v2279_v5 = vmax.f32 %v1703_v30, 0.0  ;;  %v2280_v55 = vmax.f32 %v1704_v18, 0.0 }
 0x5ca   : > { %v2297_v7 = vmax.f32 %v1721_v0, 0.0  ;;  %v3343_v25 = vsub.f32 %v13419_v2, %v11599_v59  ;;  %v3344_v13 = vsub.f32 %v13419_v2, %v11609_v23  ;;  %v2298_v42 = vmax.f32 %v1722_v63, 0.0 }
 0x5cb   : > { %8220 = vmatpush.bf16.msra.mxu1 %v7825_v32  ;;  %8246 = vmatpush.bf16.msra.mxu3 %v7826_v15  ;;  %v3901_v56 = vand.u32 2147483647, %v3325_v47  ;;  %v3902_v39 = vand.u32 2147483647, %v3326_v33  ;;  %v911_v8 = vsub.f32 %v13420_v11, %v11595_v37  ;;  %v11861_v28 = vpack.c.bf16 %v2280_v55, %v2279_v5  ;;  %v13422_v5 = vld [vmem:[#allocation13_spill] sm:$0xff] }
 0x5cc   : > { %v3919_v44 = vand.u32 2147483647, %v3343_v25  ;;  %v3920_v54 = vand.u32 2147483647, %v3344_v13  ;;  %v912_v22 = vsub.f32 %v13420_v11, %v11597_v45  ;;  %v11865_v16 = vpack.c.bf16 %v2298_v42, %v2297_v7 }
 0x5cd   : > { %v4477_v21 = vsub.f32 1.0, %v3901_v56  ;;  %v4478_v43 = vsub.f32 1.0, %v3902_v39  ;;  %v929_v3 = vsub.f32 %v13421_v12, %v11595_v37  ;;  %v5917_v57 = vunpack.c.l.bf16 %v11861_v28 }
 0x5ce   : > { %v4495_v50 = vsub.f32 1.0, %v3919_v44  ;;  %v4496_v62 = vsub.f32 1.0, %v3920_v54  ;;  %v930_v34 = vsub.f32 %v13421_v12, %v11597_v45  ;;  %v5935_v17 = vunpack.c.l.bf16 %v11865_v16 }
 0x5cf   : > { %v5053_v10 = vmax.f32 %v4477_v21, 0.0  ;;  %v5054_v35 = vmax.f32 %v4478_v43, 0.0  ;;  %v1487_v30 = vand.u32 2147483647, %v911_v8  ;;  %v1488_v47 = vand.u32 2147483647, %v912_v22 }
 0x5d0   : > { %v5071_v18 = vmax.f32 %v4495_v50, 0.0  ;;  %v5072_v0 = vmax.f32 %v4496_v62, 0.0  ;;  %v1505_v33 = vand.u32 2147483647, %v929_v3  ;;  %v1506_v15 = vand.u32 2147483647, %v930_v34 }
 0x5d1   : > { %v5605_v32 = vpack.c.bf16 %v5054_v35, %v5053_v10  ;;  %v2063_v63 = vsub.f32 1.0, %v1487_v30  ;;  %v3685_v55 = vsub.f32 %v13422_v5, %v11599_v59  ;;  %v2064_v25 = vsub.f32 1.0, %v1488_v47  ;;  %v13423_v8 = vld [vmem:[#allocation47_spill] sm:$0xff] }
 0x5d2   : > { %v5614_v7 = vpack.c.bf16 %v5072_v0, %v5071_v18  ;;  %v2081_v13 = vsub.f32 1.0, %v1505_v33  ;;  %v3686_v42 = vsub.f32 %v13422_v5, %v11609_v23  ;;  %v2082_v39 = vsub.f32 1.0, %v1506_v15 }
 0x5d3   : > { %v6493_v56 = vunpack.c.l.bf16 %v5605_v32  ;;  %v2639_v44 = vmax.f32 %v2063_v63, 0.0  ;;  %v3703_v54 = vsub.f32 %v13423_v8, %v11599_v59  ;;  %v2640_v21 = vmax.f32 %v2064_v25, 0.0 }
 0x5d4   : > { %v6511_v22 = vunpack.c.l.bf16 %v5614_v7  ;;  %v2657_v43 = vmax.f32 %v2081_v13, 0.0  ;;  %v3704_v3 = vsub.f32 %v13423_v8, %v11609_v23  ;;  %v2658_v62 = vmax.f32 %v2082_v39, 0.0 }
 0x5d5   : > { %v7069_v50 = vmul.f32 %v6493_v56, %v5917_v57  ;;  %v4261_v34 = vand.u32 2147483647, %v3685_v55  ;;  %v4262_v10 = vand.u32 2147483647, %v3686_v42  ;;  %v3011_v30 = vpack.c.bf16 %v2640_v21, %v2639_v44 }
 0x5d6   : > { %v7087_v35 = vmul.f32 %v6511_v22, %v5935_v17  ;;  %v4279_v18 = vand.u32 2147483647, %v3703_v54  ;;  %v4280_v0 = vand.u32 2147483647, %v3704_v3  ;;  %v3020_v47 = vpack.c.bf16 %v2658_v62, %v2657_v43 }
 0x5d7   : > { %v4837_v33 = vsub.f32 1.0, %v4261_v34  ;;  %v4838_v15 = vsub.f32 1.0, %v4262_v10  ;;  %v5918_v63 = vunpack.c.h.bf16 %v11861_v28  ;;  %v6277_v13 = vunpack.c.l.bf16 %v3011_v30 }
 0x5d8   : > { %v7627_v5 = vpack.c.bf16 %v7087_v35, %v7069_v50  ;;  %v4855_v12 = vsub.f32 1.0, %v4279_v18  ;;  %v4856_v25 = vsub.f32 1.0, %v4280_v0  ;;  %v6295_v8 = vunpack.c.l.bf16 %v3020_v47 }
 0x5d9   : > { %v5413_v11 = vmax.f32 %v4837_v33, 0.0  ;;  %v5414_v2 = vmax.f32 %v4838_v15, 0.0  ;;  %v5936_v57 = vunpack.c.h.bf16 %v11865_v16  ;;  %v6494_v42 = vunpack.c.h.bf16 %v5605_v32 }
 0x5da   : > { %8210 = vmatpush.bf16.msra.mxu0 %v7627_v5  ;;  %v5431_v55 = vmax.f32 %v4855_v12, 0.0  ;;  %v5432_v17 = vmax.f32 %v4856_v25, 0.0  ;;  %v6512_v56 = vunpack.c.h.bf16 %v5614_v7  ;;  %v6278_v44 = vunpack.c.h.bf16 %v3011_v30 }
 0x5db   : > { %v5785_v39 = vpack.c.bf16 %v5414_v2, %v5413_v11  ;;  %v6296_v54 = vunpack.c.h.bf16 %v3020_v47  ;;  %v515_v28 = vsub.f32 %v9921_v29, %v11595_v37  ;;  %v7070_v21 = vmul.f32 %v6494_v42, %v5918_v63 }
 0x5dc   : > { %v5794_v22 = vpack.c.bf16 %v5432_v17, %v5431_v55  ;;  %v7088_v43 = vmul.f32 %v6512_v56, %v5936_v57  ;;  %v516_v3 = vsub.f32 %v9921_v29, %v11597_v45  ;;  %v533_v16 = vsub.f32 %v13266_v61, %v11595_v37 }
 0x5dd   : > { %v6853_v50 = vunpack.c.l.bf16 %v5785_v39  ;;  %v6854_v62 = vunpack.c.h.bf16 %v5785_v39  ;;  %v534_v12 = vsub.f32 %v13266_v61, %v11597_v45  ;;  %v1091_v5 = vand.u32 2147483647, %v515_v28 }
 0x5de   : > { %v6871_v2 = vunpack.c.l.bf16 %v5794_v22  ;;  %v7628_v11 = vpack.c.bf16 %v7088_v43, %v7070_v21  ;;  %v6872_v32 = vunpack.c.h.bf16 %v5794_v22  ;;  %v1092_v10 = vand.u32 2147483647, %v516_v3 }
 0x5df   : > { %v7429_v7 = vmul.f32 %v6853_v50, %v6277_v13  ;;  %v7430_v34 = vmul.f32 %v6854_v62, %v6278_v44  ;;  %v1109_v35 = vand.u32 2147483647, %v533_v16  ;;  %v1110_v0 = vand.u32 2147483647, %v534_v12 }
 0x5e0   : > { %v7447_v30 = vmul.f32 %v6871_v2, %v6295_v8  ;;  %8236 = vmatpush.bf16.msra.mxu2 %v7628_v11  ;;  %v7448_v18 = vmul.f32 %v6872_v32, %v6296_v54  ;;  %v1667_v47 = vsub.f32 1.0, %v1091_v5  ;;  %v1668_v33 = vsub.f32 1.0, %v1092_v10  ;;  %v13424_v2 = vld [vmem:[#allocation39_spill] sm:$0xff] }
 0x5e1   : > { %v1685_v15 = vsub.f32 1.0, %v1109_v35  ;;  %v3289_v63 = vsub.f32 %v13305_v27, %v11599_v59  ;;  %v3290_v25 = vsub.f32 %v13305_v27, %v11609_v23  ;;  %v1686_v17 = vsub.f32 1.0, %v1110_v0 }
 0x5e2   : > { %v7807_v57 = vpack.c.bf16 %v7447_v30, %v7429_v7  ;;  %v7808_v55 = vpack.c.bf16 %v7448_v18, %v7430_v34  ;;  %v2243_v13 = vmax.f32 %v1667_v47, 0.0  ;;  %v2244_v42 = vmax.f32 %v1668_v33, 0.0 }
 0x5e3   : > { %v2261_v56 = vmax.f32 %v1685_v15, 0.0  ;;  %v3307_v8 = vsub.f32 %v13344_v41, %v11599_v59  ;;  %v3308_v39 = vsub.f32 %v13344_v41, %v11609_v23  ;;  %v2262_v44 = vmax.f32 %v1686_v17, 0.0 }
 0x5e4   : > { %8221 = vmatpush.bf16.msra.mxu1 %v7807_v57  ;;  %8247 = vmatpush.bf16.msra.mxu3 %v7808_v55  ;;  %v3865_v54 = vand.u32 2147483647, %v3289_v63  ;;  %v3866_v28 = vand.u32 2147483647, %v3290_v25  ;;  %v875_v22 = vsub.f32 %v13383_v24, %v11595_v37  ;;  %v11901_v21 = vpack.c.bf16 %v2244_v42, %v2243_v13  ;;  %v13425_v55 = vld [vmem:[#allocation53_spill] sm:$0xff] }
 0x5e5   : > { %v3883_v43 = vand.u32 2147483647, %v3307_v8  ;;  %v3884_v3 = vand.u32 2147483647, %v3308_v39  ;;  %v876_v50 = vsub.f32 %v13383_v24, %v11597_v45  ;;  %v11905_v62 = vpack.c.bf16 %v2262_v44, %v2261_v56 }
 0x5e6   : > { %v4441_v16 = vsub.f32 1.0, %v3865_v54  ;;  %v4442_v12 = vsub.f32 1.0, %v3866_v28  ;;  %v893_v11 = vsub.f32 %v13424_v2, %v11595_v37  ;;  %v5881_v7 = vunpack.c.l.bf16 %v11901_v21  ;;  %v13426_v28 = vld [vmem:[#allocation48_spill] sm:$0xff] }
 0x5e7   : > { %v4459_v32 = vsub.f32 1.0, %v3883_v43  ;;  %v4460_v5 = vsub.f32 1.0, %v3884_v3  ;;  %v894_v34 = vsub.f32 %v13424_v2, %v11597_v45  ;;  %v5899_v30 = vunpack.c.l.bf16 %v11905_v62 }
 0x5e8   : > { %v5017_v10 = vmax.f32 %v4441_v16, 0.0  ;;  %v5018_v35 = vmax.f32 %v4442_v12, 0.0  ;;  %v1451_v18 = vand.u32 2147483647, %v875_v22  ;;  %v1452_v33 = vand.u32 2147483647, %v876_v50 }
 0x5e9   : > { %v5035_v0 = vmax.f32 %v4459_v32, 0.0  ;;  %v5036_v47 = vmax.f32 %v4460_v5, 0.0  ;;  %v1469_v15 = vand.u32 2147483647, %v893_v11  ;;  %v1470_v25 = vand.u32 2147483647, %v894_v34 }
 0x5ea   : > { %v5587_v63 = vpack.c.bf16 %v5018_v35, %v5017_v10  ;;  %v2027_v57 = vsub.f32 1.0, %v1451_v18  ;;  %v3649_v17 = vsub.f32 %v13425_v55, %v11599_v59  ;;  %v2028_v42 = vsub.f32 1.0, %v1452_v33 }
 0x5eb   : > { %v5596_v13 = vpack.c.bf16 %v5036_v47, %v5035_v0  ;;  %v2045_v56 = vsub.f32 1.0, %v1469_v15  ;;  %v3650_v8 = vsub.f32 %v13425_v55, %v11609_v23  ;;  %v2046_v44 = vsub.f32 1.0, %v1470_v25 }
 0x5ec   : > { %v6457_v39 = vunpack.c.l.bf16 %v5587_v63  ;;  %v2603_v54 = vmax.f32 %v2027_v57, 0.0  ;;  %v3667_v22 = vsub.f32 %v13426_v28, %v11599_v59  ;;  %v2604_v3 = vmax.f32 %v2028_v42, 0.0 }
 0x5ed   : > { %v6475_v43 = vunpack.c.l.bf16 %v5596_v13  ;;  %v2621_v50 = vmax.f32 %v2045_v56, 0.0  ;;  %v3668_v16 = vsub.f32 %v13426_v28, %v11609_v23  ;;  %v2622_v11 = vmax.f32 %v2046_v44, 0.0 }
 0x5ee   : > { %v7033_v12 = vmul.f32 %v6457_v39, %v5881_v7  ;;  %v4225_v32 = vand.u32 2147483647, %v3649_v17  ;;  %v4226_v5 = vand.u32 2147483647, %v3650_v8  ;;  %v2993_v10 = vpack.c.bf16 %v2604_v3, %v2603_v54  ;;  %v9090_v3 = vld [vmem:[%s9355_s21 + $0x18] sm:$0xff] }
 0x5ef   : > { %v7051_v34 = vmul.f32 %v6475_v43, %v5899_v30  ;;  %v4243_v35 = vand.u32 2147483647, %v3667_v22  ;;  %v4244_v18 = vand.u32 2147483647, %v3668_v16  ;;  %v3002_v0 = vpack.c.bf16 %v2622_v11, %v2621_v50 }
 0x5f0   : > { %v4801_v47 = vsub.f32 1.0, %v4225_v32  ;;  %v4802_v33 = vsub.f32 1.0, %v4226_v5  ;;  %v5882_v15 = vunpack.c.h.bf16 %v11901_v21  ;;  %v6241_v56 = vunpack.c.l.bf16 %v2993_v10 }
 0x5f1   : > { %v7609_v25 = vpack.c.bf16 %v7051_v34, %v7033_v12  ;;  %v4819_v57 = vsub.f32 1.0, %v4243_v35  ;;  %v4820_v42 = vsub.f32 1.0, %v4244_v18  ;;  %v6259_v7 = vunpack.c.l.bf16 %v3002_v0 }
 0x5f2   : > { %v5377_v55 = vmax.f32 %v4801_v47, 0.0  ;;  %v5378_v28 = vmax.f32 %v4802_v33, 0.0  ;;  %v5900_v17 = vunpack.c.h.bf16 %v11905_v62  ;;  %v6458_v39 = vunpack.c.h.bf16 %v5587_v63  ;;  %v9091_v62 = vld.sshfl [vmem:[#allocation1] sm:$0xff pattern:$0x73625140]  ;;  %v13428_v33 = vld [vmem:[#allocation22_spill] sm:$0xff] }
 0x5f3   : > { %8211 = vmatpush.bf16.msra.mxu0 %v7609_v25  ;;  %v5395_v30 = vmax.f32 %v4819_v57, 0.0  ;;  %v5396_v8 = vmax.f32 %v4820_v42, 0.0  ;;  %v6476_v44 = vunpack.c.h.bf16 %v5596_v13  ;;  %v6242_v22 = vunpack.c.h.bf16 %v2993_v10  ;;  %v13427_v10 = vld [vmem:[#allocation19_spill] sm:$0xff] }
 0x5f4   : > { %v5767_v54 = vpack.c.bf16 %v5378_v28, %v5377_v55  ;;  %v6260_v43 = vunpack.c.h.bf16 %v3002_v0  ;;  %v463_v21 = vperm.slane %v9090_v3, 4  ;;  %v7034_v16 = vmul.f32 %v6458_v39, %v5882_v15 }
 0x5f5   : > { %v5776_v50 = vpack.c.bf16 %v5396_v8, %v5395_v30  ;;  %v7052_v12 = vmul.f32 %v6476_v44, %v5900_v17  ;;  %v464_v11 = vperm.slane %v9090_v3, 6  ;;  %v3237_v35 = vperm.slane %v9090_v3, 5 }
 0x5f6   : > { %v6817_v32 = vunpack.c.l.bf16 %v5767_v54  ;;  %v6818_v5 = vunpack.c.h.bf16 %v5767_v54  ;;  %v11924_v34 = vperm.slane %v463_v21, 0  ;;  %8212 = vmatmul.bf16.vlgmr.msra.gmra.mxu0 %v9091_v62  ;;  %v3238_v39 = vperm.slane %v9090_v3, 7  ;;  %v13430_v3 = vld [vmem:[#allocation6_spill] sm:$0xff] }
 0x5f7   : > { %v6835_v18 = vunpack.c.l.bf16 %v5776_v50  ;;  %v7610_v47 = vpack.c.bf16 %v7052_v12, %v7034_v16  ;;  %v6836_v63 = vunpack.c.h.bf16 %v5776_v50  ;;  %v11926_v13 = vperm.slane %v464_v11, 0 }
 0x5f8   : > { %v7393_v55 = vmul.f32 %v6817_v32, %v6241_v56  ;;  %v7394_v28 = vmul.f32 %v6818_v5, %v6242_v22  ;;  %v769_v0 = vsub.f32 %v13427_v10, %v11924_v34  ;;  %v787_v15 = vsub.f32 %v13428_v33, %v11924_v34 }
 0x5f9   : > { %v7411_v25 = vmul.f32 %v6835_v18, %v6259_v7  ;;  %8237 = vmatpush.bf16.msra.mxu2 %v7610_v47  ;;  %v7412_v57 = vmul.f32 %v6836_v63, %v6260_v43  ;;  %v770_v42 = vsub.f32 %v13427_v10, %v11926_v13  ;;  %v788_v17 = vsub.f32 %v13428_v33, %v11926_v13  ;;  %v13429_v43 = vld [vmem:[#allocation5_spill] sm:$0xff] }
 0x5fa   : > { %v1345_v30 = vand.u32 2147483647, %v769_v0  ;;  %v1363_v8 = vand.u32 2147483647, %v787_v15  ;;  %v11936_v56 = vperm.slane %v3237_v35, 1  ;;  %v11938_v7 = vperm.slane %v3238_v39, 1 }
 0x5fb   : > { %v7789_v44 = vpack.c.bf16 %v7411_v25, %v7393_v55  ;;  %v7790_v54 = vpack.c.bf16 %v7412_v57, %v7394_v28  ;;  %v1346_v22 = vand.u32 2147483647, %v770_v42  ;;  %v1364_v21 = vand.u32 2147483647, %v788_v17  ;;  %v13431_v35 = vld [vmem:[#allocation50_spill] sm:$0xff] }
 0x5fc   : > { %v1921_v50 = vsub.f32 1.0, %v1345_v30  ;;  %v1939_v16 = vsub.f32 1.0, %v1363_v8  ;;  %v3543_v12 = vsub.f32 %v13429_v43, %v11936_v56  ;;  %8238 = vmatmul.bf16.vlgmr.msra.gmra.mxu2 %v9091_v62  ;;  %v3561_v5 = vsub.f32 %v13430_v3, %v11936_v56  ;;  %v13432_v30 = vld [vmem:[#allocation46_spill] sm:$0xff] }
 0x5fd   : > { %8222 = vmatpush.bf16.msra.mxu1 %v7789_v44  ;;  %8248 = vmatpush.bf16.msra.mxu3 %v7790_v54  ;;  %v1922_v11 = vsub.f32 1.0, %v1346_v22  ;;  %v1940_v32 = vsub.f32 1.0, %v1364_v21  ;;  %v839_v18 = vsub.f32 %v13431_v35, %v11595_v37  ;;  %v3544_v55 = vsub.f32 %v13429_v43, %v11938_v7 }
 0x5fe   : > { %v2497_v47 = vmax.f32 %v1921_v50, 0.0  ;;  %v2515_v63 = vmax.f32 %v1939_v16, 0.0  ;;  %v3562_v28 = vsub.f32 %v13430_v3, %v11938_v7  ;;  %v4119_v15 = vand.u32 2147483647, %v3543_v12 }
 0x5ff   : > { %v2498_v0 = vmax.f32 %v1922_v11, 0.0  ;;  %v2516_v62 = vmax.f32 %v1940_v32, 0.0  ;;  %v4137_v25 = vand.u32 2147483647, %v3561_v5  ;;  %v4120_v57 = vand.u32 2147483647, %v3544_v55 }
 0x600   : > { %v4138_v42 = vand.u32 2147483647, %v3562_v28  ;;  %v840_v17 = vsub.f32 %v13431_v35, %v11597_v45  ;;  %v857_v8 = vsub.f32 %v13432_v30, %v11595_v37  ;;  %v4695_v54 = vsub.f32 1.0, %v4119_v15 }
 0x601   : > { %v2940_v39 = vpack.c.bf16 %v2498_v0, %v2497_v47  ;;  %v2949_v44 = vpack.c.bf16 %v2516_v62, %v2515_v63  ;;  %v4713_v22 = vsub.f32 1.0, %v4137_v25  ;;  %v4696_v21 = vsub.f32 1.0, %v4120_v57  ;;  %v13433_v63 = vld [vmem:[#allocation16_spill] sm:$0xff] }
 0x602   : > { %v4714_v50 = vsub.f32 1.0, %v4138_v42  ;;  %v858_v16 = vsub.f32 %v13432_v30, %v11597_v45  ;;  %v1415_v11 = vand.u32 2147483647, %v839_v18  ;;  %v5271_v12 = vmax.f32 %v4695_v54, 0.0 }
 0x603   : > { %v5289_v32 = vmax.f32 %v4713_v22, 0.0  ;;  %v6135_v5 = vunpack.c.l.bf16 %v2940_v39  ;;  %v6153_v55 = vunpack.c.l.bf16 %v2949_v44  ;;  %v5272_v28 = vmax.f32 %v4696_v21, 0.0 }
 0x604   : > { %v5290_v3 = vmax.f32 %v4714_v50, 0.0  ;;  %v6136_v35 = vunpack.c.h.bf16 %v2940_v39  ;;  %v6154_v43 = vunpack.c.h.bf16 %v2949_v44  ;;  %v1416_v33 = vand.u32 2147483647, %v840_v17 }
 0x605   : > { %v1433_v10 = vand.u32 2147483647, %v857_v8  ;;  %v1434_v47 = vand.u32 2147483647, %v858_v16  ;;  %v3613_v0 = vsub.f32 %v13433_v63, %v11599_v59  ;;  %v5714_v62 = vpack.c.bf16 %v5272_v28, %v5271_v12 }
 0x606   : > { %v5723_v15 = vpack.c.bf16 %v5290_v3, %v5289_v32  ;;  %v1991_v25 = vsub.f32 1.0, %v1415_v11  ;;  %v3614_v18 = vsub.f32 %v13433_v63, %v11609_v23  ;;  %v1992_v57 = vsub.f32 1.0, %v1416_v33 }
 0x607   : > { %v2009_v42 = vsub.f32 1.0, %v1433_v10  ;;  %v2010_v54 = vsub.f32 1.0, %v1434_v47  ;;  %v3631_v22 = vsub.f32 %v13240_v48, %v11599_v59  ;;  %v6711_v39 = vunpack.c.l.bf16 %v5714_v62 }
 0x608   : > { %v6729_v44 = vunpack.c.l.bf16 %v5723_v15  ;;  %v6712_v17 = vunpack.c.h.bf16 %v5714_v62  ;;  %v6730_v8 = vunpack.c.h.bf16 %v5723_v15  ;;  %v2567_v21 = vmax.f32 %v1991_v25, 0.0 }
 0x609   : > { %v2568_v50 = vmax.f32 %v1992_v57, 0.0  ;;  %v2585_v16 = vmax.f32 %v2009_v42, 0.0  ;;  %v2586_v30 = vmax.f32 %v2010_v54, 0.0  ;;  %v7287_v12 = vmul.f32 %v6711_v39, %v6135_v5  ;;  %v13434_v54 = vld [vmem:[#allocation7_spill] sm:$0xff] }
 0x60a   : > { %v7305_v3 = vmul.f32 %v6729_v44, %v6153_v55  ;;  %v7288_v11 = vmul.f32 %v6712_v17, %v6136_v35  ;;  %v7306_v32 = vmul.f32 %v6730_v8, %v6154_v43  ;;  %v3632_v10 = vsub.f32 %v13240_v48, %v11609_v23  ;;  %v13435_v44 = vld [vmem:[#allocation17_spill] sm:$0xff] }
 0x60b   : > { %v2975_v28 = vpack.c.bf16 %v2568_v50, %v2567_v21  ;;  %v2984_v63 = vpack.c.bf16 %v2586_v30, %v2585_v16  ;;  %v4189_v33 = vand.u32 2147483647, %v3613_v0  ;;  %v4190_v24 = vand.u32 2147483647, %v3614_v18 }
 0x60c   : > { %v7737_v47 = vpack.c.bf16 %v7305_v3, %v7287_v12  ;;  %v7738_v2 = vpack.c.bf16 %v7306_v32, %v7288_v11  ;;  %v4207_v41 = vand.u32 2147483647, %v3631_v22  ;;  %v4208_v62 = vand.u32 2147483647, %v3632_v10 }
 0x60d   : > { %v4765_v15 = vsub.f32 1.0, %v4189_v33  ;;  %v6205_v25 = vunpack.c.l.bf16 %v2975_v28  ;;  %v6223_v57 = vunpack.c.l.bf16 %v2984_v63  ;;  %v4766_v5 = vsub.f32 1.0, %v4190_v24 }
 0x60e   : > { %8256 = vmatpush.bf16.msrb.mxu0 %v7737_v47  ;;  %8282 = vmatpush.bf16.msrb.mxu2 %v7738_v2  ;;  %v4783_v55 = vsub.f32 1.0, %v4207_v41  ;;  %v6206_v35 = vunpack.c.h.bf16 %v2975_v28  ;;  %v6224_v43 = vunpack.c.h.bf16 %v2984_v63  ;;  %v4784_v42 = vsub.f32 1.0, %v4208_v62 }
 0x60f   : > { %v5341_v30 = vmax.f32 %v4765_v15, 0.0  ;;  %v733_v39 = vsub.f32 %v13434_v54, %v11924_v34  ;;  %v734_v0 = vsub.f32 %v13434_v54, %v11926_v13  ;;  %v5342_v18 = vmax.f32 %v4766_v5, 0.0 }
 0x610   : > { %v5359_v22 = vmax.f32 %v4783_v55, 0.0  ;;  %v751_v17 = vsub.f32 %v13435_v44, %v11924_v34  ;;  %v752_v2 = vsub.f32 %v13435_v44, %v11926_v13  ;;  %v5360_v24 = vmax.f32 %v4784_v42, 0.0 }
 0x611   : > { %v1309_v41 = vand.u32 2147483647, %v733_v39  ;;  %v1310_v8 = vand.u32 2147483647, %v734_v0  ;;  %v3507_v63 = vsub.f32 %v9537_v14, %v11936_v56  ;;  %v5749_v21 = vpack.c.bf16 %v5342_v18, %v5341_v30 }
 0x612   : > { %v1327_v50 = vand.u32 2147483647, %v751_v17  ;;  %v1328_v16 = vand.u32 2147483647, %v752_v2  ;;  %v3508_v12 = vsub.f32 %v9537_v14, %v11938_v7  ;;  %v5758_v3 = vpack.c.bf16 %v5360_v24, %v5359_v22 }
 0x613   : > { %v1885_v11 = vsub.f32 1.0, %v1309_v41  ;;  %v1886_v32 = vsub.f32 1.0, %v1310_v8  ;;  %v3525_v28 = vsub.f32 %v9454_v36, %v11936_v56  ;;  %v6781_v10 = vunpack.c.l.bf16 %v5749_v21 }
 0x614   : > { %v6782_v33 = vunpack.c.h.bf16 %v5749_v21  ;;  %v1903_v47 = vsub.f32 1.0, %v1327_v50  ;;  %v1904_v62 = vsub.f32 1.0, %v1328_v16  ;;  %v6799_v15 = vunpack.c.l.bf16 %v5758_v3 }
 0x615   : > { %v6800_v5 = vunpack.c.h.bf16 %v5758_v3  ;;  %v2461_v55 = vmax.f32 %v1885_v11, 0.0  ;;  %v2462_v42 = vmax.f32 %v1886_v32, 0.0  ;;  %v7357_v30 = vmul.f32 %v6781_v10, %v6205_v25 }
 0x616   : > { %v7358_v39 = vmul.f32 %v6782_v33, %v6206_v35  ;;  %v2479_v0 = vmax.f32 %v1903_v47, 0.0  ;;  %v2480_v18 = vmax.f32 %v1904_v62, 0.0  ;;  %v7375_v17 = vmul.f32 %v6799_v15, %v6223_v57 }
 0x617   : > { %v7376_v2 = vmul.f32 %v6800_v5, %v6224_v43  ;;  %v2922_v22 = vpack.c.bf16 %v2462_v42, %v2461_v55  ;;  %v3526_v24 = vsub.f32 %v9454_v36, %v11938_v7  ;;  %v4083_v8 = vand.u32 2147483647, %v3507_v63 }
 0x618   : > { %v2931_v41 = vpack.c.bf16 %v2480_v18, %v2479_v0  ;;  %v4084_v14 = vand.u32 2147483647, %v3508_v12  ;;  %v4101_v21 = vand.u32 2147483647, %v3525_v28  ;;  %v7771_v50 = vpack.c.bf16 %v7375_v17, %v7357_v30 }
 0x619   : > { %v7772_v16 = vpack.c.bf16 %v7376_v2, %v7358_v39  ;;  %v4102_v44 = vand.u32 2147483647, %v3526_v24  ;;  %v6099_v3 = vunpack.c.l.bf16 %v2922_v22  ;;  %v4659_v11 = vsub.f32 1.0, %v4083_v8 }
 0x61a   : > { %v4660_v32 = vsub.f32 1.0, %v4084_v14  ;;  %v4677_v25 = vsub.f32 1.0, %v4101_v21  ;;  %v6117_v35 = vunpack.c.l.bf16 %v2931_v41  ;;  %8223 = vmatpush.bf16.msra.mxu1 %v7771_v50  ;;  %v6100_v43 = vunpack.c.h.bf16 %v2922_v22 }
 0x61b   : > { %8249 = vmatpush.bf16.msra.mxu3 %v7772_v16  ;;  %v4678_v57 = vsub.f32 1.0, %v4102_v44  ;;  %v6118_v10 = vunpack.c.h.bf16 %v2931_v41  ;;  %v803_v33 = vsub.f32 %v9937_v9, %v11595_v37  ;;  %v5235_v47 = vmax.f32 %v4659_v11, 0.0 }
 0x61c   : > { %v5236_v63 = vmax.f32 %v4660_v32, 0.0  ;;  %v5253_v12 = vmax.f32 %v4677_v25, 0.0  ;;  %v804_v28 = vsub.f32 %v9937_v9, %v11597_v45  ;;  %v821_v14 = vsub.f32 %v10064_v46, %v11595_v37 }
 0x61d   : > { %v5254_v62 = vmax.f32 %v4678_v57, 0.0  ;;  %v822_v15 = vsub.f32 %v10064_v46, %v11597_v45  ;;  %v1379_v5 = vand.u32 2147483647, %v803_v33  ;;  %v3577_v42 = vsub.f32 %v10068_v6, %v11599_v59 }
 0x61e   : > { %v5696_v44 = vpack.c.bf16 %v5236_v63, %v5235_v47  ;;  %v1380_v55 = vand.u32 2147483647, %v804_v28  ;;  %v3578_v30 = vsub.f32 %v10068_v6, %v11609_v23  ;;  %v1397_v0 = vand.u32 2147483647, %v821_v14 }
 0x61f   : > { %v5705_v39 = vpack.c.bf16 %v5254_v62, %v5253_v12  ;;  %v1398_v18 = vand.u32 2147483647, %v822_v15  ;;  %v1955_v17 = vsub.f32 1.0, %v1379_v5  ;;  %v3595_v37 = vsub.f32 %v10074_v38, %v11599_v59 }
 0x620   : > { %v6675_v2 = vunpack.c.l.bf16 %v5696_v44  ;;  %v6676_v22 = vunpack.c.h.bf16 %v5696_v44  ;;  %v1956_v24 = vsub.f32 1.0, %v1380_v55  ;;  %v1973_v8 = vsub.f32 1.0, %v1397_v0 }
 0x621   : > { %v6693_v45 = vunpack.c.l.bf16 %v5705_v39  ;;  %v6694_v41 = vunpack.c.h.bf16 %v5705_v39  ;;  %v1974_v21 = vsub.f32 1.0, %v1398_v18  ;;  %v2531_v11 = vmax.f32 %v1955_v17, 0.0 }
 0x622   : > { %v7251_v50 = vmul.f32 %v6675_v2, %v6099_v3  ;;  %v7252_v16 = vmul.f32 %v6676_v22, %v6100_v43  ;;  %v2532_v32 = vmax.f32 %v1956_v24, 0.0  ;;  %v2549_v33 = vmax.f32 %v1973_v8, 0.0 }
 0x623   : > { %v7269_v25 = vmul.f32 %v6693_v45, %v6117_v35  ;;  %v7270_v57 = vmul.f32 %v6694_v41, %v6118_v10  ;;  %v2550_v47 = vmax.f32 %v1974_v21, 0.0  ;;  %v3596_v12 = vsub.f32 %v10074_v38, %v11609_v23 }
 0x624   : > { %v2957_v63 = vpack.c.bf16 %v2532_v32, %v2531_v11  ;;  %v4153_v28 = vand.u32 2147483647, %v3577_v42  ;;  %v4154_v62 = vand.u32 2147483647, %v3578_v30  ;;  %v4171_v5 = vand.u32 2147483647, %v3595_v37 }
 0x625   : > { %v7719_v14 = vpack.c.bf16 %v7269_v25, %v7251_v50  ;;  %v7720_v59 = vpack.c.bf16 %v7270_v57, %v7252_v16  ;;  %v2966_v15 = vpack.c.bf16 %v2550_v47, %v2549_v33  ;;  %v4172_v44 = vand.u32 2147483647, %v3596_v12 }
 0x626   : > { %v4729_v55 = vsub.f32 1.0, %v4153_v28  ;;  %v4730_v3 = vsub.f32 1.0, %v4154_v62  ;;  %v6169_v43 = vunpack.c.l.bf16 %v2957_v63  ;;  %v4747_v35 = vsub.f32 1.0, %v4171_v5 }
 0x627   : > { %8257 = vmatpush.bf16.msrb.mxu0 %v7719_v14  ;;  %8283 = vmatpush.bf16.msrb.mxu2 %v7720_v59  ;;  %v6187_v10 = vunpack.c.l.bf16 %v2966_v15  ;;  %v6170_v39 = vunpack.c.h.bf16 %v2957_v63  ;;  %v6188_v0 = vunpack.c.h.bf16 %v2966_v15  ;;  %v4748_v18 = vsub.f32 1.0, %v4172_v44 }
 0x628   : > { %v5305_v17 = vmax.f32 %v4729_v55, 0.0  ;;  %v5306_v2 = vmax.f32 %v4730_v3, 0.0  ;;  %v697_v23 = vsub.f32 %v9623_v1, %v11924_v34  ;;  %v5323_v42 = vmax.f32 %v4747_v35, 0.0 }
 0x629   : > { %v698_v30 = vsub.f32 %v9623_v1, %v11926_v13  ;;  %v715_v22 = vsub.f32 %v9607_v52, %v11924_v34  ;;  %v716_v24 = vsub.f32 %v9607_v52, %v11926_v13  ;;  %v5324_v37 = vmax.f32 %v4748_v18, 0.0 }
 0x62a   : > { %v5731_v45 = vpack.c.bf16 %v5306_v2, %v5305_v17  ;;  %v1273_v41 = vand.u32 2147483647, %v697_v23  ;;  %v3471_v8 = vsub.f32 %v9649_v26, %v11936_v56  ;;  %v3472_v11 = vsub.f32 %v9649_v26, %v11938_v7 }
 0x62b   : > { %v1274_v21 = vand.u32 2147483647, %v698_v30  ;;  %v1291_v50 = vand.u32 2147483647, %v715_v22  ;;  %v1292_v16 = vand.u32 2147483647, %v716_v24  ;;  %v5740_v32 = vpack.c.bf16 %v5324_v37, %v5323_v42 }
 0x62c   : > { %v6745_v25 = vunpack.c.l.bf16 %v5731_v45  ;;  %v6746_v57 = vunpack.c.h.bf16 %v5731_v45  ;;  %v1849_v33 = vsub.f32 1.0, %v1273_v41  ;;  %v3489_v28 = vsub.f32 %v9540_v51, %v11936_v56 }
 0x62d   : > { %v1850_v47 = vsub.f32 1.0, %v1274_v21  ;;  %v1867_v63 = vsub.f32 1.0, %v1291_v50  ;;  %v1868_v12 = vsub.f32 1.0, %v1292_v16  ;;  %v6763_v62 = vunpack.c.l.bf16 %v5740_v32 }
 0x62e   : > { %v7321_v14 = vmul.f32 %v6745_v25, %v6169_v43  ;;  %v6764_v59 = vunpack.c.h.bf16 %v5740_v32  ;;  %v7322_v15 = vmul.f32 %v6746_v57, %v6170_v39  ;;  %v2425_v5 = vmax.f32 %v1849_v33, 0.0  ;;  %v13436_v25 = vld [vmem:[#allocation12_spill] sm:$0xff] }
 0x62f   : > { %v2426_v44 = vmax.f32 %v1850_v47, 0.0  ;;  %v2443_v55 = vmax.f32 %v1867_v63, 0.0  ;;  %v2444_v3 = vmax.f32 %v1868_v12, 0.0  ;;  %v7339_v35 = vmul.f32 %v6763_v62, %v6187_v10 }
 0x630   : > { %v7340_v18 = vmul.f32 %v6764_v59, %v6188_v0  ;;  %v3490_v17 = vsub.f32 %v9540_v51, %v11938_v7  ;;  %v4047_v2 = vand.u32 2147483647, %v3471_v8  ;;  %v4048_v30 = vand.u32 2147483647, %v3472_v11 }
 0x631   : > { %v12012_v23 = vpack.c.bf16 %v2426_v44, %v2425_v5  ;;  %v12014_v42 = vpack.c.bf16 %v2444_v3, %v2443_v55  ;;  %v4065_v22 = vand.u32 2147483647, %v3489_v28  ;;  %v7753_v24 = vpack.c.bf16 %v7339_v35, %v7321_v14  ;;  %v13437_v28 = vld [vmem:[#allocation8_spill] sm:$0xff]  ;;  %v9092_v44 = vld.sshfl [vmem:[#allocation1 + $0x8] sm:$0xff pattern:$0x73625140] }
 0x632   : > { %v7754_v43 = vpack.c.bf16 %v7340_v18, %v7322_v15  ;;  %v4066_v37 = vand.u32 2147483647, %v3490_v17  ;;  %v4623_v39 = vsub.f32 1.0, %v4047_v2  ;;  %v4624_v45 = vsub.f32 1.0, %v4048_v30  ;;  %v13438_v18 = vld [vmem:[#allocation14_spill] sm:$0xff] }
 0x633   : > { %v4641_v41 = vsub.f32 1.0, %v4065_v22  ;;  %v6063_v21 = vunpack.c.l.bf16 %v12012_v23  ;;  %v6081_v10 = vunpack.c.l.bf16 %v12014_v42  ;;  %8224 = vmatpush.bf16.msra.mxu1 %v7753_v24  ;;  %v1057_v50 = vsub.f32 %v9416_v49, %v11924_v34 }
 0x634   : > { %8250 = vmatpush.bf16.msra.mxu3 %v7754_v43  ;;  %v4642_v0 = vsub.f32 1.0, %v4066_v37  ;;  %v5199_v8 = vmax.f32 %v4623_v39, 0.0  ;;  %v1058_v16 = vsub.f32 %v9416_v49, %v11926_v13  ;;  %v5200_v11 = vmax.f32 %v4624_v45, 0.0 }
 0x635   : > { %v5217_v32 = vmax.f32 %v4641_v41, 0.0  ;;  %v1075_v57 = vsub.f32 %v13436_v25, %v11924_v34  ;;  %v1076_v33 = vsub.f32 %v13436_v25, %v11926_v13  ;;  %v1633_v63 = vand.u32 2147483647, %v1057_v50 }
 0x636   : > { %v5218_v47 = vmax.f32 %v4642_v0, 0.0  ;;  %v1634_v12 = vand.u32 2147483647, %v1058_v16  ;;  %v3831_v62 = vsub.f32 %v13437_v28, %v11936_v56  ;;  %v5678_v14 = vpack.c.bf16 %v5200_v11, %v5199_v8  ;;  %8225 = vmatmul.bf16.vlgmr.msra.gmra.mxu1 %v9092_v44 }
 0x637   : > { %v1651_v59 = vand.u32 2147483647, %v1075_v57  ;;  %v1652_v15 = vand.u32 2147483647, %v1076_v33  ;;  %v3832_v5 = vsub.f32 %v13437_v28, %v11938_v7  ;;  %8251 = vmatmul.bf16.vlgmr.msra.gmra.mxu3 %v9092_v44  ;;  %v2209_v3 = vsub.f32 1.0, %v1633_v63 }
 0x638   : > { %v5687_v55 = vpack.c.bf16 %v5218_v47, %v5217_v32  ;;  %v2210_v35 = vsub.f32 1.0, %v1634_v12  ;;  %v3849_v17 = vsub.f32 %v13438_v18, %v11936_v56  ;;  %v6639_v2 = vunpack.c.l.bf16 %v5678_v14 }
 0x639   : > { %v2227_v30 = vsub.f32 1.0, %v1651_v59  ;;  %v2228_v22 = vsub.f32 1.0, %v1652_v15  ;;  %v3850_v24 = vsub.f32 %v13438_v18, %v11938_v7  ;;  %v2785_v37 = vmax.f32 %v2209_v3, 0.0 }
 0x63a   : > { %v6657_v43 = vunpack.c.l.bf16 %v5687_v55  ;;  %v2786_v39 = vmax.f32 %v2210_v35, 0.0  ;;  %v4407_v45 = vand.u32 2147483647, %v3831_v62  ;;  %v7215_v41 = vmul.f32 %v6639_v2, %v6063_v21 }
 0x63b   : > { %v2803_v0 = vmax.f32 %v2227_v30, 0.0  ;;  %v2804_v8 = vmax.f32 %v2228_v22, 0.0  ;;  %v4408_v50 = vand.u32 2147483647, %v3832_v5  ;;  %v4425_v32 = vand.u32 2147483647, %v3849_v17 }
 0x63c   : > { %v7233_v16 = vmul.f32 %v6657_v43, %v6081_v10  ;;  %v3084_v11 = vpack.c.bf16 %v2786_v39, %v2785_v37  ;;  %v4426_v57 = vand.u32 2147483647, %v3850_v24  ;;  %v4983_v47 = vsub.f32 1.0, %v4407_v45  ;;  %v13439_v43 = vld [vmem:[#allocation24_spill] sm:$0xff] }
 0x63d   : > { %v3093_v33 = vpack.c.bf16 %v2804_v8, %v2803_v0  ;;  %v4984_v63 = vsub.f32 1.0, %v4408_v50  ;;  %v6064_v12 = vunpack.c.h.bf16 %v12012_v23  ;;  %v5001_v15 = vsub.f32 1.0, %v4425_v32 }
 0x63e   : > { %v7701_v59 = vpack.c.bf16 %v7233_v16, %v7215_v41  ;;  %v5002_v44 = vsub.f32 1.0, %v4426_v57  ;;  %v6423_v18 = vunpack.c.l.bf16 %v3084_v11  ;;  %v5559_v3 = vmax.f32 %v4983_v47, 0.0  ;;  %v12046_v16 = vpop.f32.mrf.mxu1  ;;  %v12048_v47 = vpop.f32.mrf.mxu2 }
 0x63f   : > { %v5560_v35 = vmax.f32 %v4984_v63, 0.0  ;;  %v6441_v62 = vunpack.c.l.bf16 %v3093_v33  ;;  %v6082_v21 = vunpack.c.h.bf16 %v12014_v42  ;;  %v5577_v5 = vmax.f32 %v5001_v15, 0.0  ;;  %v13440_v42 = vld [vmem:[#allocation32_spill] sm:$0xff]  ;;  %v12050_v63 = vpop.f32.mrf.mxu3 }
 0x640   : > { %8258 = vmatpush.bf16.msrb.mxu0 %v7701_v59  ;;  %v5578_v10 = vmax.f32 %v5002_v44, 0.0  ;;  %v6640_v2 = vunpack.c.h.bf16 %v5678_v14  ;;  %v6658_v17 = vunpack.c.h.bf16 %v5687_v55  ;;  %v6424_v22 = vunpack.c.h.bf16 %v3084_v11  ;;  %v12044_v55 = vpop.f32.mrf.mxu0 }
 0x641   : > { %v5858_v30 = vpack.c.bf16 %v5560_v35, %v5559_v3  ;;  %v6442_v24 = vunpack.c.h.bf16 %v3093_v33  ;;  %v661_v23 = vsub.f32 %v13439_v43, %v11924_v34  ;;  %v662_v41 = vsub.f32 %v13439_v43, %v11926_v13 }
 0x642   : > { %v5867_v37 = vpack.c.bf16 %v5578_v10, %v5577_v5  ;;  %v7216_v39 = vmul.f32 %v6640_v2, %v6064_v12  ;;  %v7234_v45 = vmul.f32 %v6658_v17, %v6082_v21  ;;  %v679_v50 = vsub.f32 %v13440_v42, %v11924_v34  ;;  %v13441_v17 = vld [vmem:[#allocation35_spill] sm:$0xff] }
 0x643   : > { %v6999_v0 = vunpack.c.l.bf16 %v5858_v30  ;;  %v7000_v8 = vunpack.c.h.bf16 %v5858_v30  ;;  %v680_v14 = vsub.f32 %v13440_v42, %v11926_v13  ;;  %v1237_v33 = vand.u32 2147483647, %v661_v23 }
 0x644   : > { %v7017_v11 = vunpack.c.l.bf16 %v5867_v37  ;;  %v7702_v32 = vpack.c.bf16 %v7234_v45, %v7216_v39  ;;  %v7018_v57 = vunpack.c.h.bf16 %v5867_v37  ;;  %v1238_v15 = vand.u32 2147483647, %v662_v41 }
 0x645   : > { %v7575_v12 = vmul.f32 %v6999_v0, %v6423_v18  ;;  %v7576_v59 = vmul.f32 %v7000_v8, %v6424_v22  ;;  %v1255_v44 = vand.u32 2147483647, %v679_v50  ;;  %v1256_v21 = vand.u32 2147483647, %v680_v14 }
 0x646   : > { %v7593_v3 = vmul.f32 %v7017_v11, %v6441_v62  ;;  %8284 = vmatpush.bf16.msrb.mxu2 %v7702_v32  ;;  %v7594_v35 = vmul.f32 %v7018_v57, %v6442_v24  ;;  %v1813_v5 = vsub.f32 1.0, %v1237_v33  ;;  %v1814_v10 = vsub.f32 1.0, %v1238_v15  ;;  %v13442_v62 = vld [vmem:[#allocation27_spill] sm:$0xff]  ;;  %v13443_v11 = vld [vmem:[#allocation10_spill] sm:$0xff] }
 0x647   : > { %v1831_v2 = vsub.f32 1.0, %v1255_v44  ;;  %v3435_v30 = vsub.f32 %v13441_v17, %v11936_v56  ;;  %v3436_v23 = vsub.f32 %v13441_v17, %v11938_v7  ;;  %v1832_v45 = vsub.f32 1.0, %v1256_v21  ;;  %v7968_v44 = vpop.f32.mrf.mxu1 }
 0x648   : > { %v7881_v37 = vpack.c.bf16 %v7593_v3, %v7575_v12  ;;  %v7882_v39 = vpack.c.bf16 %v7594_v35, %v7576_v59  ;;  %v2389_v18 = vmax.f32 %v1813_v5, 0.0  ;;  %v2390_v22 = vmax.f32 %v1814_v10, 0.0  ;;  %v7955_v15 = vpop.f32.mrf.mxu0  ;;  %v13444_v5 = vld [vmem:[#allocation25_spill] sm:$0xff] }
 0x649   : > { %v2407_v41 = vmax.f32 %v1831_v2, 0.0  ;;  %v3453_v0 = vsub.f32 %v13442_v62, %v11936_v56  ;;  %v3454_v24 = vsub.f32 %v13442_v62, %v11938_v7  ;;  %v2408_v8 = vmax.f32 %v1832_v45, 0.0  ;;  %v7981_v2 = vpop.f32.mrf.mxu2 }
 0x64a   : > { %8269 = vmatpush.bf16.msrb.mxu1 %v7881_v37  ;;  %8295 = vmatpush.bf16.msrb.mxu3 %v7882_v39  ;;  %v4011_v50 = vand.u32 2147483647, %v3435_v30  ;;  %v4012_v14 = vand.u32 2147483647, %v3436_v23  ;;  %v1021_v32 = vsub.f32 %v13443_v11, %v11924_v34  ;;  %v12062_v57 = vpack.c.bf16 %v2390_v22, %v2389_v18  ;;  %v7994_v30 = vpop.f32.mrf.mxu3 }
 0x64b   : > { %v4029_v33 = vand.u32 2147483647, %v3453_v0  ;;  %v4030_v12 = vand.u32 2147483647, %v3454_v24  ;;  %v1022_v59 = vsub.f32 %v13443_v11, %v11926_v13  ;;  %v12066_v3 = vpack.c.bf16 %v2408_v8, %v2407_v41 }
 0x64c   : > { %v4587_v35 = vsub.f32 1.0, %v4011_v50  ;;  %v4588_v21 = vsub.f32 1.0, %v4012_v14  ;;  %v1039_v10 = vsub.f32 %v13444_v5, %v11924_v34  ;;  %v6027_v39 = vunpack.c.l.bf16 %v12062_v57 }
 0x64d   : > { %v4605_v23 = vsub.f32 1.0, %v4029_v33  ;;  %v4606_v37 = vsub.f32 1.0, %v4030_v12  ;;  %v1040_v45 = vsub.f32 %v13444_v5, %v11926_v13  ;;  %v6045_v0 = vunpack.c.l.bf16 %v12066_v3  ;;  %v13445_v33 = vld [vmem:[#allocation23_spill] sm:$0xff] }
 0x64e   : > { %v5163_v18 = vmax.f32 %v4587_v35, 0.0  ;;  %v5164_v22 = vmax.f32 %v4588_v21, 0.0  ;;  %v1597_v41 = vand.u32 2147483647, %v1021_v32  ;;  %v1598_v50 = vand.u32 2147483647, %v1022_v59 }
 0x64f   : > { %v5181_v24 = vmax.f32 %v4605_v23, 0.0  ;;  %v5182_v8 = vmax.f32 %v4606_v37, 0.0  ;;  %v1615_v14 = vand.u32 2147483647, %v1039_v10  ;;  %v1616_v44 = vand.u32 2147483647, %v1040_v45 }
 0x650   : > { %v5660_v15 = vpack.c.bf16 %v5164_v22, %v5163_v18  ;;  %v2173_v2 = vsub.f32 1.0, %v1597_v41  ;;  %v3795_v12 = vsub.f32 %v13445_v33, %v11936_v56  ;;  %v2174_v11 = vsub.f32 1.0, %v1598_v50  ;;  %v13446_v32 = vld [vmem:[#allocation15_spill] sm:$0xff] }
 0x651   : > { %v5669_v30 = vpack.c.bf16 %v5182_v8, %v5181_v24  ;;  %v2191_v62 = vsub.f32 1.0, %v1615_v14  ;;  %v3796_v35 = vsub.f32 %v13445_v33, %v11938_v7  ;;  %v2192_v5 = vsub.f32 1.0, %v1616_v44 }
 0x652   : > { %v6603_v21 = vunpack.c.l.bf16 %v5660_v15  ;;  %v2749_v17 = vmax.f32 %v2173_v2, 0.0  ;;  %v3813_v23 = vsub.f32 %v13446_v32, %v11936_v56  ;;  %v2750_v10 = vmax.f32 %v2174_v11, 0.0 }
 0x653   : > { %v6621_v59 = vunpack.c.l.bf16 %v5669_v30  ;;  %v2767_v37 = vmax.f32 %v2191_v62, 0.0  ;;  %v3814_v45 = vsub.f32 %v13446_v32, %v11938_v7  ;;  %v2768_v22 = vmax.f32 %v2192_v5, 0.0 }
 0x654   : > { %v7179_v18 = vmul.f32 %v6603_v21, %v6027_v39  ;;  %v4371_v41 = vand.u32 2147483647, %v3795_v12  ;;  %v4372_v24 = vand.u32 2147483647, %v3796_v35  ;;  %v3066_v50 = vpack.c.bf16 %v2750_v10, %v2749_v17 }
 0x655   : > { %v7197_v8 = vmul.f32 %v6621_v59, %v6045_v0  ;;  %v4389_v14 = vand.u32 2147483647, %v3813_v23  ;;  %v4390_v33 = vand.u32 2147483647, %v3814_v45  ;;  %v3075_v42 = vpack.c.bf16 %v2768_v22, %v2767_v37 }
 0x656   : > { %v4947_v44 = vsub.f32 1.0, %v4371_v41  ;;  %v4948_v2 = vsub.f32 1.0, %v4372_v24  ;;  %v6028_v43 = vunpack.c.h.bf16 %v12062_v57  ;;  %v6387_v62 = vunpack.c.l.bf16 %v3066_v50 }
 0x657   : > { %v7683_v28 = vpack.c.bf16 %v7197_v8, %v7179_v18  ;;  %v4965_v25 = vsub.f32 1.0, %v4389_v14  ;;  %v4966_v11 = vsub.f32 1.0, %v4390_v33  ;;  %v6405_v32 = vunpack.c.l.bf16 %v3075_v42 }
 0x658   : > { %v5523_v49 = vmax.f32 %v4947_v44, 0.0  ;;  %v5524_v51 = vmax.f32 %v4948_v2, 0.0  ;;  %v6046_v5 = vunpack.c.h.bf16 %v12066_v3  ;;  %v6604_v17 = vunpack.c.h.bf16 %v5660_v15 }
 0x659   : > { %8259 = vmatpush.bf16.msrb.mxu0 %v7683_v28  ;;  %v5541_v39 = vmax.f32 %v4965_v25, 0.0  ;;  %v5542_v0 = vmax.f32 %v4966_v11, 0.0  ;;  %v6622_v12 = vunpack.c.h.bf16 %v5669_v30  ;;  %v6388_v21 = vunpack.c.h.bf16 %v3066_v50 }
 0x65a   : > { %v5840_v35 = vpack.c.bf16 %v5524_v51, %v5523_v49  ;;  %v6406_v23 = vunpack.c.h.bf16 %v3075_v42  ;;  %v12086_v57 = vadd.f32 %v12046_v16, %v12044_v55  ;;  %v7180_v33 = vmul.f32 %v6604_v17, %v6028_v43 }
 0x65b   : > { %v5849_v59 = vpack.c.bf16 %v5542_v0, %v5541_v39  ;;  %v7198_v10 = vmul.f32 %v6622_v12, %v6046_v5  ;;  %v12090_v37 = vadd.f32 %v12050_v63, %v12048_v47  ;;  %v625_v25 = vsub.f32 %v13207_v4, %v11924_v34 }
 0x65c   : > { %13447 = vst [vmem:[#allocation55_spill] sm:$0xff] %v12086_v57  ;;  %v6963_v3 = vunpack.c.l.bf16 %v5840_v35  ;;  %v6964_v28 = vunpack.c.h.bf16 %v5840_v35  ;;  %v626_v49 = vsub.f32 %v13207_v4, %v11926_v13  ;;  %v643_v55 = vsub.f32 %v13404_v20, %v11924_v34 }
 0x65d   : > { %13448 = vst [vmem:[#allocation56_spill] sm:$0xff] %v12090_v37  ;;  %v6981_v51 = vunpack.c.l.bf16 %v5849_v59  ;;  %v7684_v42 = vpack.c.bf16 %v7198_v10, %v7180_v33  ;;  %v6982_v15 = vunpack.c.h.bf16 %v5849_v59  ;;  %v644_v47 = vsub.f32 %v13404_v20, %v11926_v13 }
 0x65e   : > { %v7539_v43 = vmul.f32 %v6963_v3, %v6387_v62  ;;  %v7540_v16 = vmul.f32 %v6964_v28, %v6388_v21  ;;  %v1201_v63 = vand.u32 2147483647, %v625_v25  ;;  %v1202_v18 = vand.u32 2147483647, %v626_v49 }
 0x65f   : > { %v7557_v30 = vmul.f32 %v6981_v51, %v6405_v32  ;;  %8285 = vmatpush.bf16.msrb.mxu2 %v7684_v42  ;;  %v7558_v45 = vmul.f32 %v6982_v15, %v6406_v23  ;;  %v1219_v22 = vand.u32 2147483647, %v643_v55  ;;  %v1220_v41 = vand.u32 2147483647, %v644_v47  ;;  %v13449_v15 = vld [vmem:[#allocation28_spill] sm:$0xff] }
 0x660   : > { %v1777_v24 = vsub.f32 1.0, %v1201_v63  ;;  %v3399_v8 = vsub.f32 %v13405_v40, %v11936_v56  ;;  %v3400_v50 = vsub.f32 %v13405_v40, %v11938_v7  ;;  %v1778_v2 = vsub.f32 1.0, %v1202_v18 }
 0x661   : > { %v7863_v14 = vpack.c.bf16 %v7557_v30, %v7539_v43  ;;  %v7864_v44 = vpack.c.bf16 %v7558_v45, %v7540_v16  ;;  %v1795_v11 = vsub.f32 1.0, %v1219_v22  ;;  %v1796_v62 = vsub.f32 1.0, %v1220_v41 }
 0x662   : > { %v2353_v5 = vmax.f32 %v1777_v24, 0.0  ;;  %v3417_v32 = vsub.f32 %v13406_v19, %v11936_v56  ;;  %v3418_v39 = vsub.f32 %v13406_v19, %v11938_v7  ;;  %v2354_v0 = vmax.f32 %v1778_v2, 0.0  ;;  %v13450_v2 = vld [vmem:[#allocation11_spill] sm:$0xff] }
 0x663   : > { %8270 = vmatpush.bf16.msrb.mxu1 %v7863_v14  ;;  %8296 = vmatpush.bf16.msrb.mxu3 %v7864_v44  ;;  %v2371_v17 = vmax.f32 %v1795_v11, 0.0  ;;  %v3975_v12 = vand.u32 2147483647, %v3399_v8  ;;  %v3976_v35 = vand.u32 2147483647, %v3400_v50  ;;  %v2372_v21 = vmax.f32 %v1796_v62, 0.0 }
 0x664   : > { %v3993_v23 = vand.u32 2147483647, %v3417_v32  ;;  %v3994_v59 = vand.u32 2147483647, %v3418_v39  ;;  %v985_v33 = vsub.f32 %v13407_v60, %v11924_v34  ;;  %v12110_v10 = vpack.c.bf16 %v2354_v0, %v2353_v5 }
 0x665   : > { %v4551_v3 = vsub.f32 1.0, %v3975_v12  ;;  %v4552_v28 = vsub.f32 1.0, %v3976_v35  ;;  %v986_v25 = vsub.f32 %v13407_v60, %v11926_v13  ;;  %v12114_v49 = vpack.c.bf16 %v2372_v21, %v2371_v17  ;;  %v13451_v35 = vld [vmem:[#allocation29_spill] sm:$0xff] }
 0x666   : > { %v4569_v51 = vsub.f32 1.0, %v3993_v23  ;;  %v4570_v42 = vsub.f32 1.0, %v3994_v59  ;;  %v1003_v55 = vsub.f32 %v13449_v15, %v11924_v34  ;;  %v5991_v47 = vunpack.c.l.bf16 %v12110_v10 }
 0x667   : > { %v5127_v43 = vmax.f32 %v4551_v3, 0.0  ;;  %v5128_v16 = vmax.f32 %v4552_v28, 0.0  ;;  %v1004_v63 = vsub.f32 %v13449_v15, %v11926_v13  ;;  %v6009_v18 = vunpack.c.l.bf16 %v12114_v49 }
 0x668   : > { %v5145_v30 = vmax.f32 %v4569_v51, 0.0  ;;  %v5146_v45 = vmax.f32 %v4570_v42, 0.0  ;;  %v1561_v22 = vand.u32 2147483647, %v985_v33  ;;  %v1562_v24 = vand.u32 2147483647, %v986_v25 }
 0x669   : > { %v5642_v41 = vpack.c.bf16 %v5128_v16, %v5127_v43  ;;  %v1579_v8 = vand.u32 2147483647, %v1003_v55  ;;  %v1580_v50 = vand.u32 2147483647, %v1004_v63  ;;  %v3759_v11 = vsub.f32 %v13450_v2, %v11936_v56 }
 0x66a   : > { %v5651_v14 = vpack.c.bf16 %v5146_v45, %v5145_v30  ;;  %v2137_v44 = vsub.f32 1.0, %v1561_v22  ;;  %v3760_v62 = vsub.f32 %v13450_v2, %v11938_v7  ;;  %v2138_v32 = vsub.f32 1.0, %v1562_v24 }
 0x66b   : > { %v6567_v5 = vunpack.c.l.bf16 %v5642_v41  ;;  %v2155_v39 = vsub.f32 1.0, %v1579_v8  ;;  %v2156_v0 = vsub.f32 1.0, %v1580_v50  ;;  %v3777_v21 = vsub.f32 %v13451_v35, %v11936_v56 }
 0x66c   : > { %v6585_v17 = vunpack.c.l.bf16 %v5651_v14  ;;  %v2713_v12 = vmax.f32 %v2137_v44, 0.0  ;;  %v3778_v23 = vsub.f32 %v13451_v35, %v11938_v7  ;;  %v2714_v33 = vmax.f32 %v2138_v32, 0.0 }
 0x66d   : > { %v7143_v59 = vmul.f32 %v6567_v5, %v5991_v47  ;;  %v2731_v3 = vmax.f32 %v2155_v39, 0.0  ;;  %v2732_v28 = vmax.f32 %v2156_v0, 0.0  ;;  %v4335_v51 = vand.u32 2147483647, %v3759_v11 }
 0x66e   : > { %v7161_v25 = vmul.f32 %v6585_v17, %v6009_v18  ;;  %v4336_v42 = vand.u32 2147483647, %v3760_v62  ;;  %v4353_v55 = vand.u32 2147483647, %v3777_v21  ;;  %v3048_v43 = vpack.c.bf16 %v2714_v33, %v2713_v12  ;;  %v13452_v21 = vld [vmem:[#allocation40_spill] sm:$0xff] }
 0x66f   : > { %v3057_v16 = vpack.c.bf16 %v2732_v28, %v2731_v3  ;;  %v4354_v63 = vand.u32 2147483647, %v3778_v23  ;;  %v5992_v30 = vunpack.c.h.bf16 %v12110_v10  ;;  %v4911_v22 = vsub.f32 1.0, %v4335_v51 }
 0x670   : > { %v7665_v45 = vpack.c.bf16 %v7161_v25, %v7143_v59  ;;  %v4912_v24 = vsub.f32 1.0, %v4336_v42  ;;  %v4929_v8 = vsub.f32 1.0, %v4353_v55  ;;  %v6351_v44 = vunpack.c.l.bf16 %v3048_v43 }
 0x671   : > { %v4930_v50 = vsub.f32 1.0, %v4354_v63  ;;  %v6369_v37 = vunpack.c.l.bf16 %v3057_v16  ;;  %v6010_v47 = vunpack.c.h.bf16 %v12114_v49  ;;  %v5487_v5 = vmax.f32 %v4911_v22, 0.0  ;;  %v13453_v49 = vld [vmem:[#allocation49_spill] sm:$0xff] }
 0x672   : > { %8260 = vmatpush.bf16.msrb.mxu0 %v7665_v45  ;;  %v5488_v18 = vmax.f32 %v4912_v24, 0.0  ;;  %v5505_v11 = vmax.f32 %v4929_v8, 0.0  ;;  %v6568_v62 = vunpack.c.h.bf16 %v5642_v41  ;;  %v6586_v39 = vunpack.c.h.bf16 %v5651_v14 }
 0x673   : > { %v5506_v32 = vmax.f32 %v4930_v50, 0.0  ;;  %v6352_v0 = vunpack.c.h.bf16 %v3048_v43  ;;  %v6370_v17 = vunpack.c.h.bf16 %v3057_v16  ;;  %v589_v23 = vsub.f32 %v13452_v21, %v11924_v34 }
 0x674   : > { %v5822_v12 = vpack.c.bf16 %v5488_v18, %v5487_v5  ;;  %v7144_v10 = vmul.f32 %v6568_v62, %v5992_v30  ;;  %v590_v59 = vsub.f32 %v13452_v21, %v11926_v13  ;;  %v7162_v3 = vmul.f32 %v6586_v39, %v6010_v47  ;;  %v13454_v62 = vld [vmem:[#allocation51_spill] sm:$0xff] }
 0x675   : > { %v5831_v33 = vpack.c.bf16 %v5506_v32, %v5505_v11  ;;  %v607_v28 = vsub.f32 %v13453_v49, %v11924_v34  ;;  %v608_v41 = vsub.f32 %v13453_v49, %v11926_v13  ;;  %v1165_v51 = vand.u32 2147483647, %v589_v23 }
 0x676   : > { %v6927_v25 = vunpack.c.l.bf16 %v5822_v12  ;;  %v6928_v14 = vunpack.c.h.bf16 %v5822_v12  ;;  %v1166_v42 = vand.u32 2147483647, %v590_v59  ;;  %v7666_v43 = vpack.c.bf16 %v7162_v3, %v7144_v10  ;;  %v13455_v59 = vld [vmem:[#allocation45_spill] sm:$0xff] }
 0x677   : > { %v6945_v55 = vunpack.c.l.bf16 %v5831_v33  ;;  %v6946_v16 = vunpack.c.h.bf16 %v5831_v33  ;;  %v1183_v63 = vand.u32 2147483647, %v607_v28  ;;  %v1184_v22 = vand.u32 2147483647, %v608_v41  ;;  %v13456_v41 = vld [vmem:[#allocation26_spill] sm:$0xff] }
 0x678   : > { %v7503_v30 = vmul.f32 %v6927_v25, %v6351_v44  ;;  %v7504_v45 = vmul.f32 %v6928_v14, %v6352_v0  ;;  %v1741_v24 = vsub.f32 1.0, %v1165_v51  ;;  %8286 = vmatpush.bf16.msrb.mxu2 %v7666_v43  ;;  %v1742_v47 = vsub.f32 1.0, %v1166_v42 }
 0x679   : > { %v7521_v8 = vmul.f32 %v6945_v55, %v6369_v37  ;;  %v7522_v50 = vmul.f32 %v6946_v16, %v6370_v17  ;;  %v1759_v5 = vsub.f32 1.0, %v1183_v63  ;;  %v1760_v18 = vsub.f32 1.0, %v1184_v22 }
 0x67a   : > { %v2317_v11 = vmax.f32 %v1741_v24, 0.0  ;;  %v3363_v32 = vsub.f32 %v13454_v62, %v11936_v56  ;;  %v3364_v39 = vsub.f32 %v13454_v62, %v11938_v7  ;;  %v2318_v23 = vmax.f32 %v1742_v47, 0.0 }
 0x67b   : > { %v7845_v12 = vpack.c.bf16 %v7521_v8, %v7503_v30  ;;  %v7846_v10 = vpack.c.bf16 %v7522_v50, %v7504_v45  ;;  %v2335_v44 = vmax.f32 %v1759_v5, 0.0  ;;  %v2336_v0 = vmax.f32 %v1760_v18, 0.0  ;;  %v13457_v30 = vld [vmem:[#allocation31_spill] sm:$0xff] }
 0x67c   : > { %v3381_v37 = vsub.f32 %v13455_v59, %v11936_v56  ;;  %v3382_v17 = vsub.f32 %v13455_v59, %v11938_v7  ;;  %v3939_v33 = vand.u32 2147483647, %v3363_v32  ;;  %v12148_v3 = vpack.c.bf16 %v2318_v23, %v2317_v11  ;;  %v13458_v32 = vld [vmem:[#allocation38_spill] sm:$0xff] }
 0x67d   : > { %8271 = vmatpush.bf16.msrb.mxu1 %v7845_v12  ;;  %8297 = vmatpush.bf16.msrb.mxu3 %v7846_v10  ;;  %v3940_v28 = vand.u32 2147483647, %v3364_v39  ;;  %v949_v25 = vsub.f32 %v13456_v41, %v11924_v34  ;;  %v950_v14 = vsub.f32 %v13456_v41, %v11926_v13  ;;  %v12154_v51 = vpack.c.bf16 %v2336_v0, %v2335_v44 }
 0x67e   : > { %v3957_v42 = vand.u32 2147483647, %v3381_v37  ;;  %v3958_v55 = vand.u32 2147483647, %v3382_v17  ;;  %v4515_v43 = vsub.f32 1.0, %v3939_v33  ;;  %v5955_v63 = vunpack.c.l.bf16 %v12148_v3 }
 0x67f   : > { %v4516_v16 = vsub.f32 1.0, %v3940_v28  ;;  %v967_v45 = vsub.f32 %v13457_v30, %v11924_v34  ;;  %v968_v22 = vsub.f32 %v13457_v30, %v11926_v13  ;;  %v5973_v47 = vunpack.c.l.bf16 %v12154_v51 }
 0x680   : > { %v4533_v24 = vsub.f32 1.0, %v3957_v42  ;;  %v4534_v8 = vsub.f32 1.0, %v3958_v55  ;;  %v5091_v50 = vmax.f32 %v4515_v43, 0.0  ;;  %v1525_v18 = vand.u32 2147483647, %v949_v25  ;;  %v13459_v43 = vld [vmem:[#allocation30_spill] sm:$0xff] }
 0x681   : > { %v5092_v5 = vmax.f32 %v4516_v16, 0.0  ;;  %v1526_v11 = vand.u32 2147483647, %v950_v14  ;;  %v3723_v39 = vsub.f32 %v13458_v32, %v11936_v56  ;;  %v1543_v23 = vand.u32 2147483647, %v967_v45 }
 0x682   : > { %v5109_v12 = vmax.f32 %v4533_v24, 0.0  ;;  %v5110_v10 = vmax.f32 %v4534_v8, 0.0  ;;  %v1544_v44 = vand.u32 2147483647, %v968_v22  ;;  %v2101_v37 = vsub.f32 1.0, %v1525_v18 }
 0x683   : > { %v5624_v0 = vpack.c.bf16 %v5092_v5, %v5091_v50  ;;  %v2102_v17 = vsub.f32 1.0, %v1526_v11  ;;  %v3724_v33 = vsub.f32 %v13458_v32, %v11938_v7  ;;  %v2119_v42 = vsub.f32 1.0, %v1543_v23 }
 0x684   : > { %v5633_v28 = vpack.c.bf16 %v5110_v10, %v5109_v12  ;;  %v2120_v55 = vsub.f32 1.0, %v1544_v44  ;;  %v3741_v25 = vsub.f32 %v13459_v43, %v11936_v56  ;;  %v2677_v16 = vmax.f32 %v2101_v37, 0.0 }
 0x685   : > { %v6531_v14 = vunpack.c.l.bf16 %v5624_v0  ;;  %v2678_v57 = vmax.f32 %v2102_v17, 0.0  ;;  %v3742_v24 = vsub.f32 %v13459_v43, %v11938_v7  ;;  %v2695_v22 = vmax.f32 %v2119_v42, 0.0 }
 0x686   : > { %v6549_v45 = vunpack.c.l.bf16 %v5633_v28  ;;  %v2696_v8 = vmax.f32 %v2120_v55, 0.0  ;;  %v4299_v50 = vand.u32 2147483647, %v3723_v39  ;;  %v4300_v11 = vand.u32 2147483647, %v3724_v33 }
 0x687   : > { %v7107_v5 = vmul.f32 %v6531_v14, %v5955_v63  ;;  %v3030_v18 = vpack.c.bf16 %v2678_v57, %v2677_v16  ;;  %v4317_v32 = vand.u32 2147483647, %v3741_v25  ;;  %v4318_v23 = vand.u32 2147483647, %v3742_v24 }
 0x688   : > { %v7125_v12 = vmul.f32 %v6549_v45, %v5973_v47  ;;  %v3039_v10 = vpack.c.bf16 %v2696_v8, %v2695_v22  ;;  %v4875_v44 = vsub.f32 1.0, %v4299_v50  ;;  %v4876_v30 = vsub.f32 1.0, %v4300_v11 }
 0x689   : > { %v4893_v41 = vsub.f32 1.0, %v4317_v32  ;;  %v6315_v59 = vunpack.c.l.bf16 %v3030_v18  ;;  %v5956_v37 = vunpack.c.h.bf16 %v12148_v3  ;;  %v4894_v62 = vsub.f32 1.0, %v4318_v23 }
 0x68a   : > { %v7647_v17 = vpack.c.bf16 %v7125_v12, %v7107_v5  ;;  %v5451_v43 = vmax.f32 %v4875_v44, 0.0  ;;  %v6333_v49 = vunpack.c.l.bf16 %v3039_v10  ;;  %v5452_v42 = vmax.f32 %v4876_v30, 0.0 }
 0x68b   : > { %v5469_v55 = vmax.f32 %v4893_v41, 0.0  ;;  %v5974_v63 = vunpack.c.h.bf16 %v12154_v51  ;;  %v6532_v57 = vunpack.c.h.bf16 %v5624_v0  ;;  %v5470_v39 = vmax.f32 %v4894_v62, 0.0 }
 0x68c   : > { %8261 = vmatpush.bf16.msrb.mxu0 %v7647_v17  ;;  %v6550_v47 = vunpack.c.h.bf16 %v5633_v28  ;;  %v6316_v33 = vunpack.c.h.bf16 %v3030_v18  ;;  %v6334_v25 = vunpack.c.h.bf16 %v3039_v10  ;;  %v5804_v14 = vpack.c.bf16 %v5452_v42, %v5451_v43 }
 0x68d   : > { %v7108_v16 = vmul.f32 %v6532_v57, %v5956_v37  ;;  %v553_v32 = vsub.f32 %v13222_v31, %v11924_v34  ;;  %v554_v3 = vsub.f32 %v13222_v31, %v11926_v13  ;;  %v5813_v24 = vpack.c.bf16 %v5470_v39, %v5469_v55 }
 0x68e   : > { %v7126_v45 = vmul.f32 %v6550_v47, %v5974_v63  ;;  %v571_v41 = vsub.f32 %v9933_v53, %v11924_v34  ;;  %v572_v51 = vsub.f32 %v9933_v53, %v11926_v13  ;;  %v6891_v62 = vunpack.c.l.bf16 %v5804_v14 }
 0x68f   : > { %v6892_v30 = vunpack.c.h.bf16 %v5804_v14  ;;  %v1129_v0 = vand.u32 2147483647, %v553_v32  ;;  %v1130_v28 = vand.u32 2147483647, %v554_v3  ;;  %v6909_v43 = vunpack.c.l.bf16 %v5813_v24  ;;  %v13460_v14 = vld [vmem:[#allocation52_spill] sm:$0xff] }
 0x690   : > { %v7648_v22 = vpack.c.bf16 %v7126_v45, %v7108_v16  ;;  %v6910_v8 = vunpack.c.h.bf16 %v5813_v24  ;;  %v1147_v50 = vand.u32 2147483647, %v571_v41  ;;  %v7467_v5 = vmul.f32 %v6891_v62, %v6315_v59  ;;  %v13461_v24 = vld [vmem:[#allocation33_spill] sm:$0xff] }
 0x691   : > { %v7468_v18 = vmul.f32 %v6892_v30, %v6316_v33  ;;  %v1148_v11 = vand.u32 2147483647, %v572_v51  ;;  %v1705_v12 = vsub.f32 1.0, %v1129_v0  ;;  %v7485_v10 = vmul.f32 %v6909_v43, %v6333_v49 }
 0x692   : > { %8287 = vmatpush.bf16.msrb.mxu2 %v7648_v22  ;;  %v7486_v23 = vmul.f32 %v6910_v8, %v6334_v25  ;;  %v1706_v44 = vsub.f32 1.0, %v1130_v28  ;;  %v1723_v37 = vsub.f32 1.0, %v1147_v50  ;;  %v3327_v55 = vsub.f32 %v9954_v58, %v11936_v56  ;;  %v13462_v22 = vld [vmem:[#allocation36_spill] sm:$0xff] }
 0x693   : > { %v1724_v17 = vsub.f32 1.0, %v1148_v11  ;;  %v2281_v42 = vmax.f32 %v1705_v12, 0.0  ;;  %v3328_v63 = vsub.f32 %v9954_v58, %v11938_v7  ;;  %v7827_v57 = vpack.c.bf16 %v7485_v10, %v7467_v5 }
 0x694   : > { %v7828_v39 = vpack.c.bf16 %v7486_v23, %v7468_v18  ;;  %v2282_v47 = vmax.f32 %v1706_v44, 0.0  ;;  %v2299_v59 = vmax.f32 %v1723_v37, 0.0  ;;  %v3345_v49 = vsub.f32 %v13460_v14, %v11936_v56  ;;  %v13463_v37 = vld [vmem:[#allocation13_spill] sm:$0xff] }
 0x695   : > { %v2300_v33 = vmax.f32 %v1724_v17, 0.0  ;;  %v3346_v25 = vsub.f32 %v13460_v14, %v11938_v7  ;;  %v3903_v16 = vand.u32 2147483647, %v3327_v55  ;;  %8272 = vmatpush.bf16.msrb.mxu1 %v7827_v57  ;;  %v3904_v3 = vand.u32 2147483647, %v3328_v63 }
 0x696   : > { %8298 = vmatpush.bf16.msrb.mxu3 %v7828_v39  ;;  %v12188_v32 = vpack.c.bf16 %v2282_v47, %v2281_v42  ;;  %v913_v45 = vsub.f32 %v13461_v24, %v11924_v34  ;;  %v914_v41 = vsub.f32 %v13461_v24, %v11926_v13  ;;  %v3921_v62 = vand.u32 2147483647, %v3345_v49 }
 0x697   : > { %v12194_v51 = vpack.c.bf16 %v2300_v33, %v2299_v59  ;;  %v3922_v30 = vand.u32 2147483647, %v3346_v25  ;;  %v4479_v0 = vsub.f32 1.0, %v3903_v16  ;;  %v4480_v28 = vsub.f32 1.0, %v3904_v3  ;;  %v13464_v3 = vld [vmem:[#allocation47_spill] sm:$0xff] }
 0x698   : > { %v5919_v43 = vunpack.c.l.bf16 %v12188_v32  ;;  %v931_v8 = vsub.f32 %v13462_v22, %v11924_v34  ;;  %v932_v50 = vsub.f32 %v13462_v22, %v11926_v13  ;;  %v4497_v5 = vsub.f32 1.0, %v3921_v62 }
 0x699   : > { %v4498_v18 = vsub.f32 1.0, %v3922_v30  ;;  %v5055_v11 = vmax.f32 %v4479_v0, 0.0  ;;  %v5937_v12 = vunpack.c.l.bf16 %v12194_v51  ;;  %v5056_v10 = vmax.f32 %v4480_v28, 0.0 }
 0x69a   : > { %v1489_v23 = vand.u32 2147483647, %v913_v45  ;;  %v1490_v44 = vand.u32 2147483647, %v914_v41  ;;  %v3687_v17 = vsub.f32 %v13463_v37, %v11936_v56  ;;  %v5073_v42 = vmax.f32 %v4497_v5, 0.0 }
 0x69b   : > { %v5074_v55 = vmax.f32 %v4498_v18, 0.0  ;;  %v1507_v63 = vand.u32 2147483647, %v931_v8  ;;  %v1508_v57 = vand.u32 2147483647, %v932_v50  ;;  %v5606_v39 = vpack.c.bf16 %v5056_v10, %v5055_v11 }
 0x69c   : > { %v2065_v47 = vsub.f32 1.0, %v1489_v23  ;;  %v2066_v59 = vsub.f32 1.0, %v1490_v44  ;;  %v3688_v33 = vsub.f32 %v13463_v37, %v11938_v7  ;;  %v3705_v45 = vsub.f32 %v13464_v3, %v11936_v56 }
 0x69d   : > { %v5615_v49 = vpack.c.bf16 %v5074_v55, %v5073_v42  ;;  %v2083_v25 = vsub.f32 1.0, %v1507_v63  ;;  %v2084_v16 = vsub.f32 1.0, %v1508_v57  ;;  %v6495_v41 = vunpack.c.l.bf16 %v5606_v39 }
 0x69e   : > { %v2641_v62 = vmax.f32 %v2065_v47, 0.0  ;;  %v2642_v30 = vmax.f32 %v2066_v59, 0.0  ;;  %v3706_v0 = vsub.f32 %v13464_v3, %v11938_v7  ;;  %v4263_v5 = vand.u32 2147483647, %v3687_v17 }
 0x69f   : > { %v6513_v28 = vunpack.c.l.bf16 %v5615_v49  ;;  %v2659_v8 = vmax.f32 %v2083_v25, 0.0  ;;  %v2660_v50 = vmax.f32 %v2084_v16, 0.0  ;;  %v7071_v18 = vmul.f32 %v6495_v41, %v5919_v43 }
 0x6a0   : > { %v3012_v11 = vpack.c.bf16 %v2642_v30, %v2641_v62  ;;  %v4264_v10 = vand.u32 2147483647, %v3688_v33  ;;  %v4281_v23 = vand.u32 2147483647, %v3705_v45  ;;  %v4282_v55 = vand.u32 2147483647, %v3706_v0 }
 0x6a1   : > { %v7089_v44 = vmul.f32 %v6513_v28, %v5937_v12  ;;  %v3021_v42 = vpack.c.bf16 %v2660_v50, %v2659_v8  ;;  %v4839_v63 = vsub.f32 1.0, %v4263_v5  ;;  %v5920_v47 = vunpack.c.h.bf16 %v12188_v32 }
 0x6a2   : > { %v4840_v57 = vsub.f32 1.0, %v4264_v10  ;;  %v4857_v37 = vsub.f32 1.0, %v4281_v23  ;;  %v6279_v22 = vunpack.c.l.bf16 %v3012_v11  ;;  %v4858_v24 = vsub.f32 1.0, %v4282_v55 }
 0x6a3   : > { %v7629_v59 = vpack.c.bf16 %v7089_v44, %v7071_v18  ;;  %v5415_v3 = vmax.f32 %v4839_v63, 0.0  ;;  %v6297_v14 = vunpack.c.l.bf16 %v3021_v42  ;;  %v5938_v43 = vunpack.c.h.bf16 %v12194_v51 }
 0x6a4   : > { %v5416_v25 = vmax.f32 %v4840_v57, 0.0  ;;  %v5433_v16 = vmax.f32 %v4857_v37, 0.0  ;;  %v6496_v17 = vunpack.c.h.bf16 %v5606_v39  ;;  %v5434_v33 = vmax.f32 %v4858_v24, 0.0 }
 0x6a5   : > { %8262 = vmatpush.bf16.msrb.mxu0 %v7629_v59  ;;  %v6514_v12 = vunpack.c.h.bf16 %v5615_v49  ;;  %v6280_v45 = vunpack.c.h.bf16 %v3012_v11  ;;  %v6298_v41 = vunpack.c.h.bf16 %v3021_v42  ;;  %v517_v0 = vsub.f32 %v9921_v29, %v11924_v34 }
 0x6a6   : > { %v5786_v62 = vpack.c.bf16 %v5416_v25, %v5415_v3  ;;  %v7072_v30 = vmul.f32 %v6496_v17, %v5920_v47  ;;  %v518_v32 = vsub.f32 %v9921_v29, %v11926_v13  ;;  %v5795_v28 = vpack.c.bf16 %v5434_v33, %v5433_v16 }
 0x6a7   : > { %v7090_v8 = vmul.f32 %v6514_v12, %v5938_v43  ;;  %v535_v37 = vsub.f32 %v13266_v61, %v11924_v34  ;;  %v536_v51 = vsub.f32 %v13266_v61, %v11926_v13  ;;  %v1093_v49 = vand.u32 2147483647, %v517_v0 }
 0x6a8   : > { %v6855_v24 = vunpack.c.l.bf16 %v5786_v62  ;;  %v6856_v39 = vunpack.c.h.bf16 %v5786_v62  ;;  %v1094_v50 = vand.u32 2147483647, %v518_v32  ;;  %v6873_v3 = vunpack.c.l.bf16 %v5795_v28  ;;  %v13465_v62 = vld [vmem:[#allocation54_spill] sm:$0xff] }
 0x6a9   : > { %v7630_v5 = vpack.c.bf16 %v7090_v8, %v7072_v30  ;;  %v6874_v18 = vunpack.c.h.bf16 %v5795_v28  ;;  %v1111_v11 = vand.u32 2147483647, %v535_v37  ;;  %v1112_v44 = vand.u32 2147483647, %v536_v51  ;;  %v13466_v28 = vld [vmem:[#allocation42_spill] sm:$0xff] }
 0x6aa   : > { %v7431_v10 = vmul.f32 %v6855_v24, %v6279_v22  ;;  %v7432_v23 = vmul.f32 %v6856_v39, %v6280_v45  ;;  %v1669_v42 = vsub.f32 1.0, %v1093_v49  ;;  %v7449_v55 = vmul.f32 %v6873_v3, %v6297_v14 }
 0x6ab   : > { %8288 = vmatpush.bf16.msrb.mxu2 %v7630_v5  ;;  %v7450_v63 = vmul.f32 %v6874_v18, %v6298_v41  ;;  %v1670_v57 = vsub.f32 1.0, %v1094_v50  ;;  %v1687_v47 = vsub.f32 1.0, %v1111_v11  ;;  %v1688_v59 = vsub.f32 1.0, %v1112_v44  ;;  %v13467_v5 = vld [vmem:[#allocation39_spill] sm:$0xff] }
 0x6ac   : > { %v2245_v25 = vmax.f32 %v1669_v42, 0.0  ;;  %v3291_v16 = vsub.f32 %v13305_v27, %v11936_v56  ;;  %v3292_v43 = vsub.f32 %v13305_v27, %v11938_v7  ;;  %v7809_v17 = vpack.c.bf16 %v7449_v55, %v7431_v10 }
 0x6ad   : > { %v7810_v33 = vpack.c.bf16 %v7450_v63, %v7432_v23  ;;  %v2246_v12 = vmax.f32 %v1670_v57, 0.0  ;;  %v2263_v22 = vmax.f32 %v1687_v47, 0.0  ;;  %v2264_v45 = vmax.f32 %v1688_v59, 0.0  ;;  %v13468_v47 = vld [vmem:[#allocation53_spill] sm:$0xff] }
 0x6ae   : > { %v3309_v14 = vsub.f32 %v13465_v62, %v11936_v56  ;;  %v3310_v41 = vsub.f32 %v13465_v62, %v11938_v7  ;;  %v3867_v30 = vand.u32 2147483647, %v3291_v16  ;;  %8273 = vmatpush.bf16.msrb.mxu1 %v7809_v17  ;;  %v3868_v32 = vand.u32 2147483647, %v3292_v43 }
 0x6af   : > { %8299 = vmatpush.bf16.msrb.mxu3 %v7810_v33  ;;  %v12228_v0 = vpack.c.bf16 %v2246_v12, %v2245_v25  ;;  %v877_v8 = vsub.f32 %v13466_v28, %v11924_v34  ;;  %v878_v37 = vsub.f32 %v13466_v28, %v11926_v13  ;;  %v12234_v51 = vpack.c.bf16 %v2264_v45, %v2263_v22 }
 0x6b0   : > { %v3885_v24 = vand.u32 2147483647, %v3309_v14  ;;  %v3886_v39 = vand.u32 2147483647, %v3310_v41  ;;  %v4443_v49 = vsub.f32 1.0, %v3867_v30  ;;  %v4444_v50 = vsub.f32 1.0, %v3868_v32 }
 0x6b1   : > { %v5883_v3 = vunpack.c.l.bf16 %v12228_v0  ;;  %v895_v18 = vsub.f32 %v13467_v5, %v11924_v34  ;;  %v896_v11 = vsub.f32 %v13467_v5, %v11926_v13  ;;  %v5901_v42 = vunpack.c.l.bf16 %v12234_v51  ;;  %v13469_v32 = vld [vmem:[#allocation48_spill] sm:$0xff] }
 0x6b2   : > { %v4461_v10 = vsub.f32 1.0, %v3885_v24  ;;  %v4462_v23 = vsub.f32 1.0, %v3886_v39  ;;  %v5019_v44 = vmax.f32 %v4443_v49, 0.0  ;;  %v5020_v55 = vmax.f32 %v4444_v50, 0.0 }
 0x6b3   : > { %v1453_v63 = vand.u32 2147483647, %v877_v8  ;;  %v1454_v57 = vand.u32 2147483647, %v878_v37  ;;  %v3651_v59 = vsub.f32 %v13468_v47, %v11936_v56  ;;  %v1471_v43 = vand.u32 2147483647, %v895_v18 }
 0x6b4   : > { %v5037_v25 = vmax.f32 %v4461_v10, 0.0  ;;  %v5038_v16 = vmax.f32 %v4462_v23, 0.0  ;;  %v1472_v17 = vand.u32 2147483647, %v896_v11  ;;  %v5588_v33 = vpack.c.bf16 %v5020_v55, %v5019_v44 }
 0x6b5   : > { %v2029_v12 = vsub.f32 1.0, %v1453_v63  ;;  %v2030_v22 = vsub.f32 1.0, %v1454_v57  ;;  %v3652_v45 = vsub.f32 %v13468_v47, %v11938_v7  ;;  %v2047_v41 = vsub.f32 1.0, %v1471_v43 }
 0x6b6   : > { %v5597_v14 = vpack.c.bf16 %v5038_v16, %v5037_v25  ;;  %v2048_v30 = vsub.f32 1.0, %v1472_v17  ;;  %v3669_v8 = vsub.f32 %v13469_v32, %v11936_v56  ;;  %v6459_v37 = vunpack.c.l.bf16 %v5588_v33 }
 0x6b7   : > { %v2605_v24 = vmax.f32 %v2029_v12, 0.0  ;;  %v2606_v39 = vmax.f32 %v2030_v22, 0.0  ;;  %v3670_v49 = vsub.f32 %v13469_v32, %v11938_v7  ;;  %v2623_v18 = vmax.f32 %v2047_v41, 0.0 }
 0x6b8   : > { %v6477_v50 = vunpack.c.l.bf16 %v5597_v14  ;;  %v2624_v11 = vmax.f32 %v2048_v30, 0.0  ;;  %v4227_v10 = vand.u32 2147483647, %v3651_v59  ;;  %v7035_v23 = vmul.f32 %v6459_v37, %v5883_v3  ;;  %v283_v30 = vld [vmem:[%s9355_s21 + $0x20] sm:$0xf] }
 0x6b9   : > { %v2994_v44 = vpack.c.bf16 %v2606_v39, %v2605_v24  ;;  %v4228_v55 = vand.u32 2147483647, %v3652_v45  ;;  %v4245_v63 = vand.u32 2147483647, %v3669_v8  ;;  %v4246_v16 = vand.u32 2147483647, %v3670_v49 }
 0x6ba   : > { %v7053_v57 = vmul.f32 %v6477_v50, %v5901_v42  ;;  %v3003_v25 = vpack.c.bf16 %v2624_v11, %v2623_v18  ;;  %v4803_v43 = vsub.f32 1.0, %v4227_v10  ;;  %v5884_v22 = vunpack.c.h.bf16 %v12228_v0 }
 0x6bb   : > { %v4804_v17 = vsub.f32 1.0, %v4228_v55  ;;  %v4821_v47 = vsub.f32 1.0, %v4245_v63  ;;  %v6243_v12 = vunpack.c.l.bf16 %v2994_v44  ;;  %v4822_v32 = vsub.f32 1.0, %v4246_v16 }
 0x6bc   : > { %v7611_v5 = vpack.c.bf16 %v7053_v57, %v7035_v23  ;;  %v5379_v28 = vmax.f32 %v4803_v43, 0.0  ;;  %v6261_v41 = vunpack.c.l.bf16 %v3003_v25  ;;  %v5902_v37 = vunpack.c.h.bf16 %v12234_v51  ;;  %v9093_v51 = vld.sshfl [vmem:[#allocation1] sm:$0xff pattern:$0x73625140] }
 0x6bd   : > { %v5380_v59 = vmax.f32 %v4804_v17, 0.0  ;;  %v5397_v3 = vmax.f32 %v4821_v47, 0.0  ;;  %v6460_v45 = vunpack.c.h.bf16 %v5588_v33  ;;  %v5398_v42 = vmax.f32 %v4822_v32, 0.0 }
 0x6be   : > { %8263 = vmatpush.bf16.msrb.mxu0 %v7611_v5  ;;  %v6478_v8 = vunpack.c.h.bf16 %v5597_v14  ;;  %v6244_v24 = vunpack.c.h.bf16 %v2994_v44  ;;  %v6262_v39 = vunpack.c.h.bf16 %v3003_v25  ;;  %v465_v18 = vperm.slane %v283_v30, 0  ;;  %v13470_v25 = vld [vmem:[#allocation19_spill] sm:$0xff] }
 0x6bf   : > { %v5768_v49 = vpack.c.bf16 %v5380_v59, %v5379_v28  ;;  %v7036_v50 = vmul.f32 %v6460_v45, %v5884_v22  ;;  %v466_v11 = vperm.slane %v283_v30, 2  ;;  %v5777_v0 = vpack.c.bf16 %v5398_v42, %v5397_v3  ;;  %v13471_v59 = vld [vmem:[#allocation22_spill] sm:$0xff] }
 0x6c0   : > { %v7054_v10 = vmul.f32 %v6478_v8, %v5902_v37  ;;  %v3239_v23 = vperm.slane %v283_v30, 1  ;;  %v3240_v55 = vperm.slane %v283_v30, 3  ;;  %v12253_v16 = vperm.slane %v465_v18, 0 }
 0x6c1   : > { %v6819_v63 = vunpack.c.l.bf16 %v5768_v49  ;;  %v6820_v57 = vunpack.c.h.bf16 %v5768_v49  ;;  %v12255_v47 = vperm.slane %v466_v11, 0  ;;  %8264 = vmatmul.bf16.vlgmr.msrb.gmra.mxu0 %v9093_v51  ;;  %v6837_v5 = vunpack.c.l.bf16 %v5777_v0 }
 0x6c2   : > { %v7612_v33 = vpack.c.bf16 %v7054_v10, %v7036_v50  ;;  %v6838_v14 = vunpack.c.h.bf16 %v5777_v0  ;;  %v12257_v32 = vperm.slane %v3239_v23, 1  ;;  %v771_v43 = vsub.f32 %v13470_v25, %v12253_v16  ;;  %v13473_v10 = vld [vmem:[#allocation6_spill] sm:$0xff] }
 0x6c3   : > { %v7395_v28 = vmul.f32 %v6819_v63, %v6243_v12  ;;  %v7396_v44 = vmul.f32 %v6820_v57, %v6244_v24  ;;  %v772_v17 = vsub.f32 %v13470_v25, %v12255_v47  ;;  %v7413_v22 = vmul.f32 %v6837_v5, %v6261_v41  ;;  %v13472_v12 = vld [vmem:[#allocation5_spill] sm:$0xff] }
 0x6c4   : > { %8289 = vmatpush.bf16.msrb.mxu2 %v7612_v33  ;;  %v7414_v30 = vmul.f32 %v6838_v14, %v6262_v39  ;;  %v789_v3 = vsub.f32 %v13471_v59, %v12253_v16  ;;  %v790_v37 = vsub.f32 %v13471_v59, %v12255_v47  ;;  %v1347_v45 = vand.u32 2147483647, %v771_v43 }
 0x6c5   : > { %v1348_v42 = vand.u32 2147483647, %v772_v17  ;;  %v12267_v8 = vperm.slane %v3240_v55, 1  ;;  %v3545_v24 = vsub.f32 %v13472_v12, %v12257_v32  ;;  %v7791_v49 = vpack.c.bf16 %v7413_v22, %v7395_v28 }
 0x6c6   : > { %v7792_v50 = vpack.c.bf16 %v7414_v30, %v7396_v44  ;;  %v1365_v18 = vand.u32 2147483647, %v789_v3  ;;  %v1366_v11 = vand.u32 2147483647, %v790_v37  ;;  %v1923_v41 = vsub.f32 1.0, %v1347_v45 }
 0x6c7   : > { %v1924_v0 = vsub.f32 1.0, %v1348_v42  ;;  %v3546_v39 = vsub.f32 %v13472_v12, %v12267_v8  ;;  %v3563_v23 = vsub.f32 %v13473_v10, %v12257_v32  ;;  %8290 = vmatmul.bf16.vlgmr.msrb.gmra.mxu2 %v9093_v51  ;;  %8274 = vmatpush.bf16.msrb.mxu1 %v7791_v49  ;;  %v3564_v57 = vsub.f32 %v13473_v10, %v12267_v8  ;;  %v13474_v51 = vld [vmem:[#allocation50_spill] sm:$0xff] }
 0x6c8   : > { %8300 = vmatpush.bf16.msrb.mxu3 %v7792_v50  ;;  %v1941_v55 = vsub.f32 1.0, %v1365_v18  ;;  %v1942_v63 = vsub.f32 1.0, %v1366_v11  ;;  %v4121_v5 = vand.u32 2147483647, %v3545_v24  ;;  %v2499_v33 = vmax.f32 %v1923_v41, 0.0  ;;  %v13475_v10 = vld [vmem:[#allocation46_spill] sm:$0xff] }
 0x6c9   : > { %v2500_v14 = vmax.f32 %v1924_v0, 0.0  ;;  %v4122_v28 = vand.u32 2147483647, %v3546_v39  ;;  %v4139_v44 = vand.u32 2147483647, %v3563_v23  ;;  %v841_v37 = vsub.f32 %v13474_v51, %v11924_v34 }
 0x6ca   : > { %v2517_v25 = vmax.f32 %v1941_v55, 0.0  ;;  %v2518_v43 = vmax.f32 %v1942_v63, 0.0  ;;  %v4140_v17 = vand.u32 2147483647, %v3564_v57  ;;  %v4697_v22 = vsub.f32 1.0, %v4121_v5 }
 0x6cb   : > { %v2941_v30 = vpack.c.bf16 %v2500_v14, %v2499_v33  ;;  %v4698_v59 = vsub.f32 1.0, %v4122_v28  ;;  %v4715_v3 = vsub.f32 1.0, %v4139_v44  ;;  %v842_v24 = vsub.f32 %v13474_v51, %v11926_v13  ;;  %v13476_v28 = vld [vmem:[#allocation16_spill] sm:$0xff] }
 0x6cc   : > { %v2950_v45 = vpack.c.bf16 %v2518_v43, %v2517_v25  ;;  %v4716_v42 = vsub.f32 1.0, %v4140_v17  ;;  %v5273_v12 = vmax.f32 %v4697_v22, 0.0  ;;  %v859_v23 = vsub.f32 %v13475_v10, %v11924_v34 }
 0x6cd   : > { %v5274_v49 = vmax.f32 %v4698_v59, 0.0  ;;  %v5291_v50 = vmax.f32 %v4715_v3, 0.0  ;;  %v6137_v18 = vunpack.c.l.bf16 %v2941_v30  ;;  %v6138_v11 = vunpack.c.h.bf16 %v2941_v30 }
 0x6ce   : > { %v5292_v41 = vmax.f32 %v4716_v42, 0.0  ;;  %v6155_v0 = vunpack.c.l.bf16 %v2950_v45  ;;  %v6156_v39 = vunpack.c.h.bf16 %v2950_v45  ;;  %v860_v63 = vsub.f32 %v13475_v10, %v11926_v13 }
 0x6cf   : > { %v5715_v55 = vpack.c.bf16 %v5274_v49, %v5273_v12  ;;  %v1417_v57 = vand.u32 2147483647, %v841_v37  ;;  %v1418_v5 = vand.u32 2147483647, %v842_v24  ;;  %v1435_v14 = vand.u32 2147483647, %v859_v23 }
 0x6d0   : > { %v5724_v33 = vpack.c.bf16 %v5292_v41, %v5291_v50  ;;  %v3615_v44 = vsub.f32 %v13476_v28, %v11936_v56  ;;  %v3616_v25 = vsub.f32 %v13476_v28, %v11938_v7  ;;  %v1436_v22 = vand.u32 2147483647, %v860_v63 }
 0x6d1   : > { %v6713_v43 = vunpack.c.l.bf16 %v5715_v55  ;;  %v6714_v17 = vunpack.c.h.bf16 %v5715_v55  ;;  %v1993_v30 = vsub.f32 1.0, %v1417_v57  ;;  %v1994_v45 = vsub.f32 1.0, %v1418_v5 }
 0x6d2   : > { %v6731_v59 = vunpack.c.l.bf16 %v5724_v33  ;;  %v6732_v3 = vunpack.c.h.bf16 %v5724_v33  ;;  %v2011_v42 = vsub.f32 1.0, %v1435_v14  ;;  %v2012_v37 = vsub.f32 1.0, %v1436_v22 }
 0x6d3   : > { %v7289_v12 = vmul.f32 %v6713_v43, %v6137_v18  ;;  %v7290_v49 = vmul.f32 %v6714_v17, %v6138_v11  ;;  %v2569_v24 = vmax.f32 %v1993_v30, 0.0  ;;  %v2570_v23 = vmax.f32 %v1994_v45, 0.0 }
 0x6d4   : > { %v7307_v50 = vmul.f32 %v6731_v59, %v6155_v0  ;;  %v7308_v41 = vmul.f32 %v6732_v3, %v6156_v39  ;;  %v2587_v10 = vmax.f32 %v2011_v42, 0.0  ;;  %v2588_v51 = vmax.f32 %v2012_v37, 0.0 }
 0x6d5   : > { %v3633_v28 = vsub.f32 %v13240_v48, %v11936_v56  ;;  %v3634_v55 = vsub.f32 %v13240_v48, %v11938_v7  ;;  %v4191_v63 = vand.u32 2147483647, %v3615_v44  ;;  %v2976_v5 = vpack.c.bf16 %v2570_v23, %v2569_v24 }
 0x6d6   : > { %v7739_v57 = vpack.c.bf16 %v7307_v50, %v7289_v12  ;;  %v7740_v33 = vpack.c.bf16 %v7308_v41, %v7290_v49  ;;  %v4192_v14 = vand.u32 2147483647, %v3616_v25  ;;  %v2985_v18 = vpack.c.bf16 %v2588_v51, %v2587_v10  ;;  %v13477_v10 = vld [vmem:[#allocation17_spill] sm:$0xff] }
 0x6d7   : > { %v4209_v11 = vand.u32 2147483647, %v3633_v28  ;;  %v4210_v43 = vand.u32 2147483647, %v3634_v55  ;;  %v4767_v17 = vsub.f32 1.0, %v4191_v63  ;;  %v6207_v39 = vunpack.c.l.bf16 %v2976_v5  ;;  %v13478_v55 = vld [vmem:[#allocation20_spill] sm:$0xff] }
 0x6d8   : > { %8308 = vmatpush.bf16.msra.mxu0 %v7739_v57  ;;  %8334 = vmatpush.bf16.msra.mxu2 %v7740_v33  ;;  %v4768_v0 = vsub.f32 1.0, %v4192_v14  ;;  %v6208_v22 = vunpack.c.h.bf16 %v2976_v5  ;;  %v735_v30 = vsub.f32 %v13434_v54, %v12253_v16  ;;  %v6225_v44 = vunpack.c.l.bf16 %v2985_v18 }
 0x6d9   : > { %v4785_v59 = vsub.f32 1.0, %v4209_v11  ;;  %v4786_v3 = vsub.f32 1.0, %v4210_v43  ;;  %v5343_v45 = vmax.f32 %v4767_v17, 0.0  ;;  %v6226_v12 = vunpack.c.h.bf16 %v2985_v18 }
 0x6da   : > { %v5344_v42 = vmax.f32 %v4768_v0, 0.0  ;;  %v736_v51 = vsub.f32 %v13434_v54, %v12255_v47  ;;  %v753_v28 = vsub.f32 %v13477_v10, %v12253_v16  ;;  %v754_v37 = vsub.f32 %v13477_v10, %v12255_v47 }
 0x6db   : > { %v5361_v25 = vmax.f32 %v4785_v59, 0.0  ;;  %v5362_v49 = vmax.f32 %v4786_v3, 0.0  ;;  %v1311_v24 = vand.u32 2147483647, %v735_v30  ;;  %v3509_v63 = vsub.f32 %v13478_v55, %v12257_v32 }
 0x6dc   : > { %v5750_v50 = vpack.c.bf16 %v5344_v42, %v5343_v45  ;;  %v1312_v41 = vand.u32 2147483647, %v736_v51  ;;  %v1329_v23 = vand.u32 2147483647, %v753_v28  ;;  %v1330_v33 = vand.u32 2147483647, %v754_v37 }
 0x6dd   : > { %v5759_v57 = vpack.c.bf16 %v5362_v49, %v5361_v25  ;;  %v1887_v5 = vsub.f32 1.0, %v1311_v24  ;;  %v3510_v54 = vsub.f32 %v13478_v55, %v12267_v8  ;;  %v3527_v49 = vsub.f32 %v9454_v36, %v12257_v32 }
 0x6de   : > { %v6783_v14 = vunpack.c.l.bf16 %v5750_v50  ;;  %v6784_v18 = vunpack.c.h.bf16 %v5750_v50  ;;  %v1888_v11 = vsub.f32 1.0, %v1312_v41  ;;  %v1905_v43 = vsub.f32 1.0, %v1329_v23 }
 0x6df   : > { %v6801_v17 = vunpack.c.l.bf16 %v5759_v57  ;;  %v6802_v0 = vunpack.c.h.bf16 %v5759_v57  ;;  %v1906_v59 = vsub.f32 1.0, %v1330_v33  ;;  %v2463_v30 = vmax.f32 %v1887_v5, 0.0 }
 0x6e0   : > { %v7359_v3 = vmul.f32 %v6783_v14, %v6207_v39  ;;  %v7360_v45 = vmul.f32 %v6784_v18, %v6208_v22  ;;  %v2464_v42 = vmax.f32 %v1888_v11, 0.0  ;;  %v2481_v51 = vmax.f32 %v1905_v43, 0.0 }
 0x6e1   : > { %v7377_v10 = vmul.f32 %v6801_v17, %v6225_v44  ;;  %v7378_v28 = vmul.f32 %v6802_v0, %v6226_v12  ;;  %v2482_v25 = vmax.f32 %v1906_v59, 0.0  ;;  %v3528_v24 = vsub.f32 %v9454_v36, %v12267_v8 }
 0x6e2   : > { %v2923_v37 = vpack.c.bf16 %v2464_v42, %v2463_v30  ;;  %v4085_v50 = vand.u32 2147483647, %v3509_v63  ;;  %v4086_v41 = vand.u32 2147483647, %v3510_v54  ;;  %v4103_v33 = vand.u32 2147483647, %v3527_v49 }
 0x6e3   : > { %v7773_v23 = vpack.c.bf16 %v7377_v10, %v7359_v3  ;;  %v7774_v55 = vpack.c.bf16 %v7378_v28, %v7360_v45  ;;  %v2932_v57 = vpack.c.bf16 %v2482_v25, %v2481_v51  ;;  %v4104_v39 = vand.u32 2147483647, %v3528_v24 }
 0x6e4   : > { %v4661_v22 = vsub.f32 1.0, %v4085_v50  ;;  %v4662_v5 = vsub.f32 1.0, %v4086_v41  ;;  %v6101_v14 = vunpack.c.l.bf16 %v2923_v37  ;;  %v4679_v44 = vsub.f32 1.0, %v4103_v33 }
 0x6e5   : > { %8275 = vmatpush.bf16.msrb.mxu1 %v7773_v23  ;;  %8301 = vmatpush.bf16.msrb.mxu3 %v7774_v55  ;;  %v6119_v12 = vunpack.c.l.bf16 %v2932_v57  ;;  %v6102_v18 = vunpack.c.h.bf16 %v2923_v37  ;;  %v6120_v11 = vunpack.c.h.bf16 %v2932_v57  ;;  %v4680_v43 = vsub.f32 1.0, %v4104_v39 }
 0x6e6   : > { %v5237_v17 = vmax.f32 %v4661_v22, 0.0  ;;  %v5238_v0 = vmax.f32 %v4662_v5, 0.0  ;;  %v805_v36 = vsub.f32 %v9937_v9, %v11924_v34  ;;  %v5255_v63 = vmax.f32 %v4679_v44, 0.0 }
 0x6e7   : > { %v806_v54 = vsub.f32 %v9937_v9, %v11926_v13  ;;  %v823_v59 = vsub.f32 %v10064_v46, %v11924_v34  ;;  %v824_v30 = vsub.f32 %v10064_v46, %v11926_v13  ;;  %v5256_v3 = vmax.f32 %v4680_v43, 0.0 }
 0x6e8   : > { %v5697_v45 = vpack.c.bf16 %v5238_v0, %v5237_v17  ;;  %v1381_v42 = vand.u32 2147483647, %v805_v36  ;;  %v3579_v51 = vsub.f32 %v10068_v6, %v11936_v56  ;;  %v3580_v49 = vsub.f32 %v10068_v6, %v11938_v7 }
 0x6e9   : > { %v1382_v10 = vand.u32 2147483647, %v806_v54  ;;  %v1399_v28 = vand.u32 2147483647, %v823_v59  ;;  %v1400_v25 = vand.u32 2147483647, %v824_v30  ;;  %v5706_v37 = vpack.c.bf16 %v5256_v3, %v5255_v63 }
 0x6ea   : > { %v6677_v24 = vunpack.c.l.bf16 %v5697_v45  ;;  %v6678_v50 = vunpack.c.h.bf16 %v5697_v45  ;;  %v1957_v41 = vsub.f32 1.0, %v1381_v42  ;;  %v3597_v13 = vsub.f32 %v10074_v38, %v11936_v56 }
 0x6eb   : > { %v1958_v34 = vsub.f32 1.0, %v1382_v10  ;;  %v1975_v23 = vsub.f32 1.0, %v1399_v28  ;;  %v1976_v55 = vsub.f32 1.0, %v1400_v25  ;;  %v6695_v57 = vunpack.c.l.bf16 %v5706_v37 }
 0x6ec   : > { %v7253_v33 = vmul.f32 %v6677_v24, %v6101_v14  ;;  %v6696_v39 = vunpack.c.h.bf16 %v5706_v37  ;;  %v7254_v22 = vmul.f32 %v6678_v50, %v6102_v18  ;;  %v2533_v5 = vmax.f32 %v1957_v41, 0.0 }
 0x6ed   : > { %v2534_v44 = vmax.f32 %v1958_v34, 0.0  ;;  %v2551_v43 = vmax.f32 %v1975_v23, 0.0  ;;  %v2552_v17 = vmax.f32 %v1976_v55, 0.0  ;;  %v7271_v0 = vmul.f32 %v6695_v57, %v6119_v12 }
 0x6ee   : > { %v7272_v36 = vmul.f32 %v6696_v39, %v6120_v11  ;;  %v3598_v63 = vsub.f32 %v10074_v38, %v11938_v7  ;;  %v4155_v54 = vand.u32 2147483647, %v3579_v51  ;;  %v4156_v3 = vand.u32 2147483647, %v3580_v49 }
 0x6ef   : > { %v2958_v59 = vpack.c.bf16 %v2534_v44, %v2533_v5  ;;  %v2967_v30 = vpack.c.bf16 %v2552_v17, %v2551_v43  ;;  %v4173_v45 = vand.u32 2147483647, %v3597_v13  ;;  %v7721_v42 = vpack.c.bf16 %v7271_v0, %v7253_v33 }
 0x6f0   : > { %v7722_v56 = vpack.c.bf16 %v7272_v36, %v7254_v22  ;;  %v4174_v10 = vand.u32 2147483647, %v3598_v63  ;;  %v4731_v14 = vsub.f32 1.0, %v4155_v54  ;;  %v4732_v28 = vsub.f32 1.0, %v4156_v3 }
 0x6f1   : > { %v4749_v18 = vsub.f32 1.0, %v4173_v45  ;;  %v6171_v25 = vunpack.c.l.bf16 %v2958_v59  ;;  %v6189_v37 = vunpack.c.l.bf16 %v2967_v30  ;;  %8309 = vmatpush.bf16.msra.mxu0 %v7721_v42  ;;  %v6172_v24 = vunpack.c.h.bf16 %v2958_v59 }
 0x6f2   : > { %8335 = vmatpush.bf16.msra.mxu2 %v7722_v56  ;;  %v4750_v12 = vsub.f32 1.0, %v4174_v10  ;;  %v5307_v11 = vmax.f32 %v4731_v14, 0.0  ;;  %v6190_v50 = vunpack.c.h.bf16 %v2967_v30  ;;  %v5308_v7 = vmax.f32 %v4732_v28, 0.0 }
 0x6f3   : > { %v5325_v51 = vmax.f32 %v4749_v18, 0.0  ;;  %v699_v49 = vsub.f32 %v9623_v1, %v12253_v16  ;;  %v700_v41 = vsub.f32 %v9623_v1, %v12255_v47  ;;  %v717_v23 = vsub.f32 %v9607_v52, %v12253_v16  ;;  %v13479_v1 = vld [vmem:[#allocation21_spill] sm:$0xff] }
 0x6f4   : > { %v5326_v34 = vmax.f32 %v4750_v12, 0.0  ;;  %v718_v55 = vsub.f32 %v9607_v52, %v12255_v47  ;;  %v3473_v13 = vsub.f32 %v9649_v26, %v12257_v32  ;;  %v5732_v57 = vpack.c.bf16 %v5308_v7, %v5307_v11 }
 0x6f5   : > { %v1275_v33 = vand.u32 2147483647, %v699_v49  ;;  %v1276_v39 = vand.u32 2147483647, %v700_v41  ;;  %v3474_v22 = vsub.f32 %v9649_v26, %v12267_v8  ;;  %v1293_v44 = vand.u32 2147483647, %v717_v23 }
 0x6f6   : > { %v5741_v5 = vpack.c.bf16 %v5326_v34, %v5325_v51  ;;  %v1294_v43 = vand.u32 2147483647, %v718_v55  ;;  %v3491_v17 = vsub.f32 %v13479_v1, %v12257_v32  ;;  %v6747_v0 = vunpack.c.l.bf16 %v5732_v57 }
 0x6f7   : > { %v6748_v36 = vunpack.c.h.bf16 %v5732_v57  ;;  %v1851_v63 = vsub.f32 1.0, %v1275_v33  ;;  %v1852_v54 = vsub.f32 1.0, %v1276_v39  ;;  %v1869_v30 = vsub.f32 1.0, %v1293_v44  ;;  %v13480_v33 = vld [vmem:[#allocation9_spill] sm:$0xff] }
 0x6f8   : > { %v6765_v52 = vunpack.c.l.bf16 %v5741_v5  ;;  %v6766_v59 = vunpack.c.h.bf16 %v5741_v5  ;;  %v1870_v3 = vsub.f32 1.0, %v1294_v43  ;;  %v7323_v45 = vmul.f32 %v6747_v0, %v6171_v25  ;;  %v13481_v43 = vld [vmem:[#allocation12_spill] sm:$0xff] }
 0x6f9   : > { %v7324_v42 = vmul.f32 %v6748_v36, %v6172_v24  ;;  %v2427_v56 = vmax.f32 %v1851_v63, 0.0  ;;  %v2428_v10 = vmax.f32 %v1852_v54, 0.0  ;;  %v2445_v28 = vmax.f32 %v1869_v30, 0.0  ;;  %v13482_v30 = vld [vmem:[#allocation8_spill] sm:$0xff] }
 0x6fa   : > { %v7341_v14 = vmul.f32 %v6765_v52, %v6189_v37  ;;  %v7342_v26 = vmul.f32 %v6766_v59, %v6190_v50  ;;  %v2446_v18 = vmax.f32 %v1870_v3, 0.0  ;;  %v3492_v11 = vsub.f32 %v13479_v1, %v12267_v8 }
 0x6fb   : > { %v12339_v12 = vpack.c.bf16 %v2428_v10, %v2427_v56  ;;  %v4049_v7 = vand.u32 2147483647, %v3473_v13  ;;  %v4050_v51 = vand.u32 2147483647, %v3474_v22  ;;  %v4067_v23 = vand.u32 2147483647, %v3491_v17 }
 0x6fc   : > { %v7755_v49 = vpack.c.bf16 %v7341_v14, %v7323_v45  ;;  %v7756_v41 = vpack.c.bf16 %v7342_v26, %v7324_v42  ;;  %v12343_v34 = vpack.c.bf16 %v2446_v18, %v2445_v28  ;;  %v4068_v25 = vand.u32 2147483647, %v3492_v11  ;;  %v9094_v45 = vld.sshfl [vmem:[#allocation1 + $0x8] sm:$0xff pattern:$0x73625140]  ;;  %v13483_v11 = vld [vmem:[#allocation14_spill] sm:$0xff] }
 0x6fd   : > { %v4625_v24 = vsub.f32 1.0, %v4049_v7  ;;  %v4626_v55 = vsub.f32 1.0, %v4050_v51  ;;  %v6065_v37 = vunpack.c.l.bf16 %v12339_v12  ;;  %v4643_v50 = vsub.f32 1.0, %v4067_v23 }
 0x6fe   : > { %8276 = vmatpush.bf16.msrb.mxu1 %v7755_v49  ;;  %8302 = vmatpush.bf16.msrb.mxu3 %v7756_v41  ;;  %v6083_v57 = vunpack.c.l.bf16 %v12343_v34  ;;  %v1059_v39 = vsub.f32 %v13480_v33, %v12253_v16  ;;  %v1060_v13 = vsub.f32 %v13480_v33, %v12255_v47  ;;  %v4644_v22 = vsub.f32 1.0, %v4068_v25 }
 0x6ff   : > { %v5201_v5 = vmax.f32 %v4625_v24, 0.0  ;;  %v5202_v44 = vmax.f32 %v4626_v55, 0.0  ;;  %v1077_v1 = vsub.f32 %v13481_v43, %v12253_v16  ;;  %v5219_v17 = vmax.f32 %v4643_v50, 0.0 }
 0x700   : > { %v1078_v0 = vsub.f32 %v13481_v43, %v12255_v47  ;;  %v1635_v36 = vand.u32 2147483647, %v1059_v39  ;;  %v1636_v63 = vand.u32 2147483647, %v1060_v13  ;;  %v5220_v54 = vmax.f32 %v4644_v22, 0.0 }
 0x701   : > { %v5679_v52 = vpack.c.bf16 %v5202_v44, %v5201_v5  ;;  %v1653_v59 = vand.u32 2147483647, %v1077_v1  ;;  %v3833_v3 = vsub.f32 %v13482_v30, %v12257_v32  ;;  %8303 = vmatmul.bf16.vlgmr.msrb.gmra.mxu3 %v9094_v45  ;;  %8277 = vmatmul.bf16.vlgmr.msrb.gmra.mxu1 %v9094_v45  ;;  %v3834_v14 = vsub.f32 %v13482_v30, %v12267_v8 }
 0x702   : > { %v1654_v42 = vand.u32 2147483647, %v1078_v0  ;;  %v2211_v56 = vsub.f32 1.0, %v1635_v36  ;;  %v2212_v10 = vsub.f32 1.0, %v1636_v63  ;;  %v5688_v26 = vpack.c.bf16 %v5220_v54, %v5219_v17 }
 0x703   : > { %v6641_v28 = vunpack.c.l.bf16 %v5679_v52  ;;  %v2229_v18 = vsub.f32 1.0, %v1653_v59  ;;  %v3851_v7 = vsub.f32 %v13483_v11, %v12257_v32  ;;  %v3852_v23 = vsub.f32 %v13483_v11, %v12267_v8  ;;  %v13484_v11 = vld [vmem:[#allocation24_spill] sm:$0xff] }
 0x704   : > { %v2230_v51 = vsub.f32 1.0, %v1654_v42  ;;  %v2787_v49 = vmax.f32 %v2211_v56, 0.0  ;;  %v2788_v41 = vmax.f32 %v2212_v10, 0.0  ;;  %v6659_v25 = vunpack.c.l.bf16 %v5688_v26 }
 0x705   : > { %v7217_v24 = vmul.f32 %v6641_v28, %v6065_v37  ;;  %v2805_v55 = vmax.f32 %v2229_v18, 0.0  ;;  %v4409_v50 = vand.u32 2147483647, %v3833_v3  ;;  %v4410_v13 = vand.u32 2147483647, %v3834_v14 }
 0x706   : > { %v2806_v33 = vmax.f32 %v2230_v51, 0.0  ;;  %v3085_v39 = vpack.c.bf16 %v2788_v41, %v2787_v49  ;;  %v4427_v22 = vand.u32 2147483647, %v3851_v7  ;;  %v7235_v5 = vmul.f32 %v6659_v25, %v6083_v57 }
 0x707   : > { %v4428_v44 = vand.u32 2147483647, %v3852_v23  ;;  %v4985_v43 = vsub.f32 1.0, %v4409_v50  ;;  %v6066_v1 = vunpack.c.h.bf16 %v12339_v12  ;;  %v4986_v0 = vsub.f32 1.0, %v4410_v13  ;;  %v12373_v50 = vpop.f32.mrf.mxu0 }
 0x708   : > { %v3094_v17 = vpack.c.bf16 %v2806_v33, %v2805_v55  ;;  %v5003_v36 = vsub.f32 1.0, %v4427_v22  ;;  %v6425_v63 = vunpack.c.l.bf16 %v3085_v39  ;;  %v7703_v54 = vpack.c.bf16 %v7235_v5, %v7217_v24  ;;  %v12375_v33 = vpop.f32.mrf.mxu1 }
 0x709   : > { %v5004_v59 = vsub.f32 1.0, %v4428_v44  ;;  %v5561_v30 = vmax.f32 %v4985_v43, 0.0  ;;  %v6084_v37 = vunpack.c.h.bf16 %v12343_v34  ;;  %v5562_v45 = vmax.f32 %v4986_v0, 0.0  ;;  %v13485_v34 = vld [vmem:[#allocation32_spill] sm:$0xff]  ;;  %v12377_v44 = vpop.f32.mrf.mxu2  ;;  %v12379_v43 = vpop.f32.mrf.mxu3 }
 0x70a   : > { %v5579_v3 = vmax.f32 %v5003_v36, 0.0  ;;  %v6443_v42 = vunpack.c.l.bf16 %v3094_v17  ;;  %v6642_v56 = vunpack.c.h.bf16 %v5679_v52  ;;  %8310 = vmatpush.bf16.msra.mxu0 %v7703_v54  ;;  %v6660_v57 = vunpack.c.h.bf16 %v5688_v26 }
 0x70b   : > { %v5580_v10 = vmax.f32 %v5004_v59, 0.0  ;;  %v6426_v14 = vunpack.c.h.bf16 %v3085_v39  ;;  %v6444_v28 = vunpack.c.h.bf16 %v3094_v17  ;;  %v5859_v18 = vpack.c.bf16 %v5562_v45, %v5561_v30 }
 0x70c   : > { %v7218_v12 = vmul.f32 %v6642_v56, %v6066_v1  ;;  %v663_v7 = vsub.f32 %v13484_v11, %v12253_v16  ;;  %v664_v51 = vsub.f32 %v13484_v11, %v12255_v47  ;;  %v7236_v41 = vmul.f32 %v6660_v57, %v6084_v37  ;;  %v13486_v56 = vld [vmem:[#allocation35_spill] sm:$0xff] }
 0x70d   : > { %v5868_v49 = vpack.c.bf16 %v5580_v10, %v5579_v3  ;;  %v681_v23 = vsub.f32 %v13485_v34, %v12253_v16  ;;  %v682_v52 = vsub.f32 %v13485_v34, %v12255_v47  ;;  %v7001_v25 = vunpack.c.l.bf16 %v5859_v18  ;;  %v13488_v34 = vld [vmem:[#allocation10_spill] sm:$0xff] }
 0x70e   : > { %v7002_v26 = vunpack.c.h.bf16 %v5859_v18  ;;  %v1239_v24 = vand.u32 2147483647, %v663_v7  ;;  %v1240_v55 = vand.u32 2147483647, %v664_v51  ;;  %v7704_v13 = vpack.c.bf16 %v7236_v41, %v7218_v12  ;;  %v13487_v7 = vld [vmem:[#allocation27_spill] sm:$0xff] }
 0x70f   : > { %v7019_v39 = vunpack.c.l.bf16 %v5868_v49  ;;  %v7020_v22 = vunpack.c.h.bf16 %v5868_v49  ;;  %v1257_v5 = vand.u32 2147483647, %v681_v23  ;;  %v7577_v1 = vmul.f32 %v7001_v25, %v6425_v63 }
 0x710   : > { %v7578_v17 = vmul.f32 %v7002_v26, %v6426_v14  ;;  %v1258_v0 = vand.u32 2147483647, %v682_v52  ;;  %v1815_v36 = vsub.f32 1.0, %v1239_v24  ;;  %8336 = vmatpush.bf16.msra.mxu2 %v7704_v13  ;;  %v1816_v30 = vsub.f32 1.0, %v1240_v55  ;;  %v8020_v13 = vpop.f32.mrf.mxu1 }
 0x711   : > { %v7595_v54 = vmul.f32 %v7019_v39, %v6443_v42  ;;  %v7596_v59 = vmul.f32 %v7020_v22, %v6444_v28  ;;  %v1833_v37 = vsub.f32 1.0, %v1257_v5  ;;  %v3437_v10 = vsub.f32 %v13486_v56, %v12257_v32  ;;  %v8007_v39 = vpop.f32.mrf.mxu0 }
 0x712   : > { %v1834_v45 = vsub.f32 1.0, %v1258_v0  ;;  %v2391_v3 = vmax.f32 %v1815_v36, 0.0  ;;  %v3438_v57 = vsub.f32 %v13486_v56, %v12267_v8  ;;  %v2392_v11 = vmax.f32 %v1816_v30, 0.0  ;;  %v8033_v36 = vpop.f32.mrf.mxu2 }
 0x713   : > { %v7883_v18 = vpack.c.bf16 %v7595_v54, %v7577_v1  ;;  %v7884_v12 = vpack.c.bf16 %v7596_v59, %v7578_v17  ;;  %v2409_v63 = vmax.f32 %v1833_v37, 0.0  ;;  %v3455_v42 = vsub.f32 %v13487_v7, %v12257_v32  ;;  %v13489_v1 = vld [vmem:[#allocation25_spill] sm:$0xff]  ;;  %v8046_v54 = vpop.f32.mrf.mxu3 }
 0x714   : > { %v2410_v14 = vmax.f32 %v1834_v45, 0.0  ;;  %v3456_v28 = vsub.f32 %v13487_v7, %v12267_v8  ;;  %v4013_v51 = vand.u32 2147483647, %v3437_v10  ;;  %v12389_v49 = vpack.c.bf16 %v2392_v11, %v2391_v3 }
 0x715   : > { %8321 = vmatpush.bf16.msra.mxu1 %v7883_v18  ;;  %8347 = vmatpush.bf16.msra.mxu3 %v7884_v12  ;;  %v4014_v41 = vand.u32 2147483647, %v3438_v57  ;;  %v1023_v23 = vsub.f32 %v13488_v34, %v12253_v16  ;;  %v1024_v52 = vsub.f32 %v13488_v34, %v12255_v47  ;;  %v4031_v26 = vand.u32 2147483647, %v3455_v42  ;;  %v13490_v57 = vld [vmem:[#allocation23_spill] sm:$0xff] }
 0x716   : > { %v12395_v25 = vpack.c.bf16 %v2410_v14, %v2409_v63  ;;  %v4032_v24 = vand.u32 2147483647, %v3456_v28  ;;  %v4589_v55 = vsub.f32 1.0, %v4013_v51  ;;  %v6029_v5 = vunpack.c.l.bf16 %v12389_v49 }
 0x717   : > { %v4590_v22 = vsub.f32 1.0, %v4014_v41  ;;  %v1041_v17 = vsub.f32 %v13489_v1, %v12253_v16  ;;  %v1042_v0 = vsub.f32 %v13489_v1, %v12255_v47  ;;  %v4607_v59 = vsub.f32 1.0, %v4031_v26 }
 0x718   : > { %v4608_v30 = vsub.f32 1.0, %v4032_v24  ;;  %v5165_v37 = vmax.f32 %v4589_v55, 0.0  ;;  %v6047_v45 = vunpack.c.l.bf16 %v12395_v25  ;;  %v1599_v56 = vand.u32 2147483647, %v1023_v23  ;;  %v13491_v24 = vld [vmem:[#allocation15_spill] sm:$0xff] }
 0x719   : > { %v5166_v3 = vmax.f32 %v4590_v22, 0.0  ;;  %v1600_v10 = vand.u32 2147483647, %v1024_v52  ;;  %v3797_v18 = vsub.f32 %v13490_v57, %v12257_v32  ;;  %v5183_v12 = vmax.f32 %v4607_v59, 0.0 }
 0x71a   : > { %v5184_v11 = vmax.f32 %v4608_v30, 0.0  ;;  %v1617_v63 = vand.u32 2147483647, %v1041_v17  ;;  %v1618_v14 = vand.u32 2147483647, %v1042_v0  ;;  %v2175_v42 = vsub.f32 1.0, %v1599_v56 }
 0x71b   : > { %v5661_v7 = vpack.c.bf16 %v5166_v3, %v5165_v37  ;;  %v2176_v28 = vsub.f32 1.0, %v1600_v10  ;;  %v3798_v51 = vsub.f32 %v13490_v57, %v12267_v8  ;;  %v3815_v23 = vsub.f32 %v13491_v24, %v12257_v32 }
 0x71c   : > { %v5670_v41 = vpack.c.bf16 %v5184_v11, %v5183_v12  ;;  %v2193_v34 = vsub.f32 1.0, %v1617_v63  ;;  %v2194_v26 = vsub.f32 1.0, %v1618_v14  ;;  %v2751_v55 = vmax.f32 %v2175_v42, 0.0 }
 0x71d   : > { %v6605_v52 = vunpack.c.l.bf16 %v5661_v7  ;;  %v2752_v39 = vmax.f32 %v2176_v28, 0.0  ;;  %v3816_v13 = vsub.f32 %v13491_v24, %v12267_v8  ;;  %v4373_v0 = vand.u32 2147483647, %v3797_v18 }
 0x71e   : > { %v6623_v22 = vunpack.c.l.bf16 %v5670_v41  ;;  %v2769_v1 = vmax.f32 %v2193_v34, 0.0  ;;  %v2770_v17 = vmax.f32 %v2194_v26, 0.0  ;;  %v4374_v59 = vand.u32 2147483647, %v3798_v51 }
 0x71f   : > { %v7181_v36 = vmul.f32 %v6605_v52, %v6029_v5  ;;  %v3067_v54 = vpack.c.bf16 %v2752_v39, %v2751_v55  ;;  %v4391_v30 = vand.u32 2147483647, %v3815_v23  ;;  %v4392_v56 = vand.u32 2147483647, %v3816_v13 }
 0x720   : > { %v7199_v37 = vmul.f32 %v6623_v22, %v6047_v45  ;;  %v3076_v3 = vpack.c.bf16 %v2770_v17, %v2769_v1  ;;  %v4949_v10 = vsub.f32 1.0, %v4373_v0  ;;  %v4950_v57 = vsub.f32 1.0, %v4374_v59 }
 0x721   : > { %v4967_v12 = vsub.f32 1.0, %v4391_v30  ;;  %v6389_v11 = vunpack.c.l.bf16 %v3067_v54  ;;  %v6030_v63 = vunpack.c.h.bf16 %v12389_v49  ;;  %v4968_v42 = vsub.f32 1.0, %v4392_v56 }
 0x722   : > { %v7685_v14 = vpack.c.bf16 %v7199_v37, %v7181_v36  ;;  %v5525_v28 = vmax.f32 %v4949_v10, 0.0  ;;  %v6407_v24 = vunpack.c.l.bf16 %v3076_v3  ;;  %v5526_v34 = vmax.f32 %v4950_v57, 0.0 }
 0x723   : > { %v5543_v26 = vmax.f32 %v4967_v12, 0.0  ;;  %v6048_v5 = vunpack.c.h.bf16 %v12395_v25  ;;  %v6606_v18 = vunpack.c.h.bf16 %v5661_v7  ;;  %v5544_v51 = vmax.f32 %v4968_v42, 0.0 }
 0x724   : > { %8311 = vmatpush.bf16.msra.mxu0 %v7685_v14  ;;  %v6624_v45 = vunpack.c.h.bf16 %v5670_v41  ;;  %v6390_v23 = vunpack.c.h.bf16 %v3067_v54  ;;  %v6408_v52 = vunpack.c.h.bf16 %v3076_v3  ;;  %v5841_v55 = vpack.c.bf16 %v5526_v34, %v5525_v28 }
 0x725   : > { %v7182_v39 = vmul.f32 %v6606_v18, %v6030_v63  ;;  %v12415_v13 = vadd.f32 %v12375_v33, %v12373_v50  ;;  %v12419_v49 = vadd.f32 %v12379_v43, %v12377_v44  ;;  %v5850_v22 = vpack.c.bf16 %v5544_v51, %v5543_v26 }
 0x726   : > { %v7200_v1 = vmul.f32 %v6624_v45, %v6048_v5  ;;  %v627_v25 = vsub.f32 %v13207_v4, %v12253_v16  ;;  %v628_v7 = vsub.f32 %v13207_v4, %v12255_v47  ;;  %v6965_v41 = vunpack.c.l.bf16 %v5841_v55 }
 0x727   : > { %v6966_v17 = vunpack.c.h.bf16 %v5841_v55  ;;  %v645_v0 = vsub.f32 %v13404_v20, %v12253_v16  ;;  %v646_v50 = vsub.f32 %v13404_v20, %v12255_v47  ;;  %v6983_v33 = vunpack.c.l.bf16 %v5850_v22 }
 0x728   : > { %v7686_v36 = vpack.c.bf16 %v7200_v1, %v7182_v39  ;;  %v6984_v44 = vunpack.c.h.bf16 %v5850_v22  ;;  %v1203_v43 = vand.u32 2147483647, %v627_v25  ;;  %v7541_v54 = vmul.f32 %v6965_v41, %v6389_v11 }
 0x729   : > { %v7542_v59 = vmul.f32 %v6966_v17, %v6390_v23  ;;  %v1204_v30 = vand.u32 2147483647, %v628_v7  ;;  %v1221_v37 = vand.u32 2147483647, %v645_v0  ;;  %v7559_v3 = vmul.f32 %v6983_v33, %v6407_v24 }
 0x72a   : > { %8337 = vmatpush.bf16.msra.mxu2 %v7686_v36  ;;  %v7560_v56 = vmul.f32 %v6984_v44, %v6408_v52  ;;  %v1222_v4 = vand.u32 2147483647, %v646_v50  ;;  %v1779_v10 = vsub.f32 1.0, %v1203_v43  ;;  %v3401_v63 = vsub.f32 %v13405_v40, %v12257_v32 }
 0x72b   : > { %v1780_v57 = vsub.f32 1.0, %v1204_v30  ;;  %v1797_v12 = vsub.f32 1.0, %v1221_v37  ;;  %v3402_v20 = vsub.f32 %v13405_v40, %v12267_v8  ;;  %v7865_v14 = vpack.c.bf16 %v7559_v3, %v7541_v54 }
 0x72c   : > { %v7866_v42 = vpack.c.bf16 %v7560_v56, %v7542_v59  ;;  %v1798_v28 = vsub.f32 1.0, %v1222_v4  ;;  %v2355_v11 = vmax.f32 %v1779_v10, 0.0  ;;  %v3419_v24 = vsub.f32 %v13406_v19, %v12257_v32 }
 0x72d   : > { %v2356_v34 = vmax.f32 %v1780_v57, 0.0  ;;  %v2373_v26 = vmax.f32 %v1797_v12, 0.0  ;;  %v3420_v5 = vsub.f32 %v13406_v19, %v12267_v8  ;;  %8322 = vmatpush.bf16.msra.mxu1 %v7865_v14  ;;  %v3977_v51 = vand.u32 2147483647, %v3401_v63 }
 0x72e   : > { %8348 = vmatpush.bf16.msra.mxu3 %v7866_v42  ;;  %v2374_v18 = vmax.f32 %v1798_v28, 0.0  ;;  %v3978_v45 = vand.u32 2147483647, %v3402_v20  ;;  %v987_v40 = vsub.f32 %v13407_v60, %v12253_v16  ;;  %v3995_v52 = vand.u32 2147483647, %v3419_v24 }
 0x72f   : > { %v12439_v23 = vpack.c.bf16 %v2356_v34, %v2355_v11  ;;  %v3996_v55 = vand.u32 2147483647, %v3420_v5  ;;  %v988_v39 = vsub.f32 %v13407_v60, %v12255_v47  ;;  %v4553_v1 = vsub.f32 1.0, %v3977_v51 }
 0x730   : > { %v12443_v22 = vpack.c.bf16 %v2374_v18, %v2373_v26  ;;  %v4554_v25 = vsub.f32 1.0, %v3978_v45  ;;  %v1005_v19 = vsub.f32 %v13449_v15, %v12253_v16  ;;  %v4571_v7 = vsub.f32 1.0, %v3995_v52 }
 0x731   : > { %v4572_v41 = vsub.f32 1.0, %v3996_v55  ;;  %v5993_v17 = vunpack.c.l.bf16 %v12439_v23  ;;  %v1006_v0 = vsub.f32 %v13449_v15, %v12255_v47  ;;  %v5129_v50 = vmax.f32 %v4553_v1, 0.0 }
 0x732   : > { %v5130_v33 = vmax.f32 %v4554_v25, 0.0  ;;  %v6011_v36 = vunpack.c.l.bf16 %v12443_v22  ;;  %v1563_v44 = vand.u32 2147483647, %v987_v40  ;;  %v5147_v60 = vmax.f32 %v4571_v7, 0.0 }
 0x733   : > { %v5148_v43 = vmax.f32 %v4572_v41, 0.0  ;;  %v1564_v54 = vand.u32 2147483647, %v988_v39  ;;  %v1581_v59 = vand.u32 2147483647, %v1005_v19  ;;  %v3761_v56 = vsub.f32 %v13450_v2, %v12257_v32 }
 0x734   : > { %v5643_v30 = vpack.c.bf16 %v5130_v33, %v5129_v50  ;;  %v1582_v37 = vand.u32 2147483647, %v1006_v0  ;;  %v2139_v3 = vsub.f32 1.0, %v1563_v44  ;;  %v3762_v15 = vsub.f32 %v13450_v2, %v12267_v8 }
 0x735   : > { %v5652_v4 = vpack.c.bf16 %v5148_v43, %v5147_v60  ;;  %v2140_v10 = vsub.f32 1.0, %v1564_v54  ;;  %v2157_v57 = vsub.f32 1.0, %v1581_v59  ;;  %v3779_v14 = vsub.f32 %v13451_v35, %v12257_v32 }
 0x736   : > { %v6569_v12 = vunpack.c.l.bf16 %v5643_v30  ;;  %v2158_v63 = vsub.f32 1.0, %v1582_v37  ;;  %v2715_v20 = vmax.f32 %v2139_v3, 0.0  ;;  %v3780_v34 = vsub.f32 %v13451_v35, %v12267_v8 }
 0x737   : > { %v6587_v42 = vunpack.c.l.bf16 %v5652_v4  ;;  %v2716_v28 = vmax.f32 %v2140_v10, 0.0  ;;  %v2733_v11 = vmax.f32 %v2157_v57, 0.0  ;;  %v4337_v5 = vand.u32 2147483647, %v3761_v56 }
 0x738   : > { %v7145_v26 = vmul.f32 %v6569_v12, %v5993_v17  ;;  %v2734_v24 = vmax.f32 %v2158_v63, 0.0  ;;  %v4338_v18 = vand.u32 2147483647, %v3762_v15  ;;  %v4355_v40 = vand.u32 2147483647, %v3779_v14 }
 0x739   : > { %v7163_v51 = vmul.f32 %v6587_v42, %v6011_v36  ;;  %v3049_v45 = vpack.c.bf16 %v2716_v28, %v2715_v20  ;;  %v4356_v2 = vand.u32 2147483647, %v3780_v34  ;;  %v4913_v55 = vsub.f32 1.0, %v4337_v5 }
 0x73a   : > { %v3058_v52 = vpack.c.bf16 %v2734_v24, %v2733_v11  ;;  %v4914_v39 = vsub.f32 1.0, %v4338_v18  ;;  %v5994_v1 = vunpack.c.h.bf16 %v12439_v23  ;;  %v4931_v19 = vsub.f32 1.0, %v4355_v40 }
 0x73b   : > { %v7667_v25 = vpack.c.bf16 %v7163_v51, %v7145_v26  ;;  %v4932_v7 = vsub.f32 1.0, %v4356_v2  ;;  %v6353_v41 = vunpack.c.l.bf16 %v3049_v45  ;;  %v5489_v0 = vmax.f32 %v4913_v55, 0.0 }
 0x73c   : > { %v5490_v50 = vmax.f32 %v4914_v39, 0.0  ;;  %v6371_v35 = vunpack.c.l.bf16 %v3058_v52  ;;  %v6012_v17 = vunpack.c.h.bf16 %v12443_v22  ;;  %v5507_v33 = vmax.f32 %v4931_v19, 0.0  ;;  %v13492_v22 = vld [vmem:[#allocation49_spill] sm:$0xff] }
 0x73d   : > { %8312 = vmatpush.bf16.msra.mxu0 %v7667_v25  ;;  %v5508_v36 = vmax.f32 %v4932_v7, 0.0  ;;  %v6570_v44 = vunpack.c.h.bf16 %v5643_v30  ;;  %v6588_v60 = vunpack.c.h.bf16 %v5652_v4  ;;  %v6354_v54 = vunpack.c.h.bf16 %v3049_v45  ;;  %v13493_v45 = vld [vmem:[#allocation51_spill] sm:$0xff]  ;;  %v13494_v7 = vld [vmem:[#allocation45_spill] sm:$0xff] }
 0x73e   : > { %v5823_v43 = vpack.c.bf16 %v5490_v50, %v5489_v0  ;;  %v6372_v59 = vunpack.c.h.bf16 %v3058_v52  ;;  %v591_v23 = vsub.f32 %v13452_v21, %v12253_v16  ;;  %v592_v10 = vsub.f32 %v13452_v21, %v12255_v47 }
 0x73f   : > { %v5832_v37 = vpack.c.bf16 %v5508_v36, %v5507_v33  ;;  %v7146_v3 = vmul.f32 %v6570_v44, %v5994_v1  ;;  %v7164_v56 = vmul.f32 %v6588_v60, %v6012_v17  ;;  %v609_v12 = vsub.f32 %v13492_v22, %v12253_v16  ;;  %v13495_v33 = vld [vmem:[#allocation26_spill] sm:$0xff] }
 0x740   : > { %v6929_v57 = vunpack.c.l.bf16 %v5823_v43  ;;  %v6930_v15 = vunpack.c.h.bf16 %v5823_v43  ;;  %v610_v30 = vsub.f32 %v13492_v22, %v12255_v47  ;;  %v1167_v14 = vand.u32 2147483647, %v591_v23 }
 0x741   : > { %v6947_v4 = vunpack.c.l.bf16 %v5832_v37  ;;  %v7668_v63 = vpack.c.bf16 %v7164_v56, %v7146_v3  ;;  %v6948_v20 = vunpack.c.h.bf16 %v5832_v37  ;;  %v1168_v11 = vand.u32 2147483647, %v592_v10  ;;  %v13496_v3 = vld [vmem:[#allocation31_spill] sm:$0xff] }
 0x742   : > { %v7505_v42 = vmul.f32 %v6929_v57, %v6353_v41  ;;  %v7506_v28 = vmul.f32 %v6930_v15, %v6354_v54  ;;  %v1185_v34 = vand.u32 2147483647, %v609_v12  ;;  %v1186_v21 = vand.u32 2147483647, %v610_v30 }
 0x743   : > { %v7523_v26 = vmul.f32 %v6947_v4, %v6371_v35  ;;  %8338 = vmatpush.bf16.msra.mxu2 %v7668_v63  ;;  %v7524_v24 = vmul.f32 %v6948_v20, %v6372_v59  ;;  %v1743_v5 = vsub.f32 1.0, %v1167_v14  ;;  %v1744_v18 = vsub.f32 1.0, %v1168_v11 }
 0x744   : > { %v1761_v51 = vsub.f32 1.0, %v1185_v34  ;;  %v3365_v40 = vsub.f32 %v13493_v45, %v12257_v32  ;;  %v3366_v2 = vsub.f32 %v13493_v45, %v12267_v8  ;;  %v1762_v39 = vsub.f32 1.0, %v1186_v21 }
 0x745   : > { %v7847_v52 = vpack.c.bf16 %v7523_v26, %v7505_v42  ;;  %v7848_v55 = vpack.c.bf16 %v7524_v24, %v7506_v28  ;;  %v2319_v1 = vmax.f32 %v1743_v5, 0.0  ;;  %v2320_v25 = vmax.f32 %v1744_v18, 0.0  ;;  %v13497_v24 = vld [vmem:[#allocation38_spill] sm:$0xff] }
 0x746   : > { %v2337_v19 = vmax.f32 %v1761_v51, 0.0  ;;  %v3383_v41 = vsub.f32 %v13494_v7, %v12257_v32  ;;  %v3384_v0 = vsub.f32 %v13494_v7, %v12267_v8  ;;  %v2338_v50 = vmax.f32 %v1762_v39, 0.0 }
 0x747   : > { %8323 = vmatpush.bf16.msra.mxu1 %v7847_v52  ;;  %8349 = vmatpush.bf16.msra.mxu3 %v7848_v55  ;;  %v3941_v35 = vand.u32 2147483647, %v3365_v40  ;;  %v3942_v17 = vand.u32 2147483647, %v3366_v2  ;;  %v951_v36 = vsub.f32 %v13495_v33, %v12253_v16  ;;  %v12479_v44 = vpack.c.bf16 %v2320_v25, %v2319_v1  ;;  %v13498_v55 = vld [vmem:[#allocation30_spill] sm:$0xff] }
 0x748   : > { %v3959_v60 = vand.u32 2147483647, %v3383_v41  ;;  %v3960_v43 = vand.u32 2147483647, %v3384_v0  ;;  %v952_v54 = vsub.f32 %v13495_v33, %v12255_v47  ;;  %v12483_v59 = vpack.c.bf16 %v2338_v50, %v2337_v19 }
 0x749   : > { %v4517_v23 = vsub.f32 1.0, %v3941_v35  ;;  %v4518_v37 = vsub.f32 1.0, %v3942_v17  ;;  %v969_v56 = vsub.f32 %v13496_v3, %v12253_v16  ;;  %v5957_v15 = vunpack.c.l.bf16 %v12479_v44 }
 0x74a   : > { %v4535_v10 = vsub.f32 1.0, %v3959_v60  ;;  %v4536_v57 = vsub.f32 1.0, %v3960_v43  ;;  %v970_v22 = vsub.f32 %v13496_v3, %v12255_v47  ;;  %v5975_v4 = vunpack.c.l.bf16 %v12483_v59 }
 0x74b   : > { %v5093_v12 = vmax.f32 %v4517_v23, 0.0  ;;  %v5094_v30 = vmax.f32 %v4518_v37, 0.0  ;;  %v1527_v63 = vand.u32 2147483647, %v951_v36  ;;  %v1528_v42 = vand.u32 2147483647, %v952_v54 }
 0x74c   : > { %v5111_v20 = vmax.f32 %v4535_v10, 0.0  ;;  %v5112_v14 = vmax.f32 %v4536_v57, 0.0  ;;  %v1545_v28 = vand.u32 2147483647, %v969_v56  ;;  %v1546_v34 = vand.u32 2147483647, %v970_v22 }
 0x74d   : > { %v5625_v11 = vpack.c.bf16 %v5094_v30, %v5093_v12  ;;  %v2103_v26 = vsub.f32 1.0, %v1527_v63  ;;  %v3725_v21 = vsub.f32 %v13497_v24, %v12257_v32  ;;  %v2104_v18 = vsub.f32 1.0, %v1528_v42 }
 0x74e   : > { %v5634_v5 = vpack.c.bf16 %v5112_v14, %v5111_v20  ;;  %v2121_v51 = vsub.f32 1.0, %v1545_v28  ;;  %v3726_v45 = vsub.f32 %v13497_v24, %v12267_v8  ;;  %v2122_v2 = vsub.f32 1.0, %v1546_v34 }
 0x74f   : > { %v6533_v40 = vunpack.c.l.bf16 %v5625_v11  ;;  %v2679_v52 = vmax.f32 %v2103_v26, 0.0  ;;  %v3743_v39 = vsub.f32 %v13498_v55, %v12257_v32  ;;  %v2680_v25 = vmax.f32 %v2104_v18, 0.0 }
 0x750   : > { %v6551_v1 = vunpack.c.l.bf16 %v5634_v5  ;;  %v2697_v19 = vmax.f32 %v2121_v51, 0.0  ;;  %v3744_v7 = vsub.f32 %v13498_v55, %v12267_v8  ;;  %v2698_v0 = vmax.f32 %v2122_v2, 0.0 }
 0x751   : > { %v7109_v41 = vmul.f32 %v6533_v40, %v5957_v15  ;;  %v4301_v50 = vand.u32 2147483647, %v3725_v21  ;;  %v4302_v35 = vand.u32 2147483647, %v3726_v45  ;;  %v3031_v33 = vpack.c.bf16 %v2680_v25, %v2679_v52 }
 0x752   : > { %v7127_v17 = vmul.f32 %v6551_v1, %v5975_v4  ;;  %v4319_v36 = vand.u32 2147483647, %v3743_v39  ;;  %v4320_v60 = vand.u32 2147483647, %v3744_v7  ;;  %v3040_v43 = vpack.c.bf16 %v2698_v0, %v2697_v19 }
 0x753   : > { %v4877_v54 = vsub.f32 1.0, %v4301_v50  ;;  %v4878_v23 = vsub.f32 1.0, %v4302_v35  ;;  %v5958_v37 = vunpack.c.h.bf16 %v12479_v44  ;;  %v6317_v57 = vunpack.c.l.bf16 %v3031_v33 }
 0x754   : > { %v7649_v3 = vpack.c.bf16 %v7127_v17, %v7109_v41  ;;  %v4895_v56 = vsub.f32 1.0, %v4319_v36  ;;  %v4896_v10 = vsub.f32 1.0, %v4320_v60  ;;  %v6335_v30 = vunpack.c.l.bf16 %v3040_v43 }
 0x755   : > { %v5453_v22 = vmax.f32 %v4877_v54, 0.0  ;;  %v5454_v12 = vmax.f32 %v4878_v23, 0.0  ;;  %v5976_v15 = vunpack.c.h.bf16 %v12483_v59  ;;  %v6534_v20 = vunpack.c.h.bf16 %v5625_v11  ;;  %v13499_v23 = vld [vmem:[#allocation52_spill] sm:$0xff] }
 0x756   : > { %8313 = vmatpush.bf16.msra.mxu0 %v7649_v3  ;;  %v5471_v63 = vmax.f32 %v4895_v56, 0.0  ;;  %v5472_v4 = vmax.f32 %v4896_v10, 0.0  ;;  %v6552_v14 = vunpack.c.h.bf16 %v5634_v5  ;;  %v6318_v28 = vunpack.c.h.bf16 %v3031_v33 }
 0x757   : > { %v5805_v42 = vpack.c.bf16 %v5454_v12, %v5453_v22  ;;  %v6336_v34 = vunpack.c.h.bf16 %v3040_v43  ;;  %v555_v44 = vsub.f32 %v13222_v31, %v12253_v16  ;;  %v7110_v24 = vmul.f32 %v6534_v20, %v5958_v37  ;;  %v13500_v22 = vld [vmem:[#allocation33_spill] sm:$0xff] }
 0x758   : > { %v5814_v26 = vpack.c.bf16 %v5472_v4, %v5471_v63  ;;  %v7128_v21 = vmul.f32 %v6552_v14, %v5976_v15  ;;  %v556_v18 = vsub.f32 %v13222_v31, %v12255_v47  ;;  %v573_v59 = vsub.f32 %v9933_v53, %v12253_v16 }
 0x759   : > { %v6893_v51 = vunpack.c.l.bf16 %v5805_v42  ;;  %v6894_v45 = vunpack.c.h.bf16 %v5805_v42  ;;  %v574_v11 = vsub.f32 %v9933_v53, %v12255_v47  ;;  %v1131_v52 = vand.u32 2147483647, %v555_v44  ;;  %v13501_v42 = vld [vmem:[#allocation36_spill] sm:$0xff] }
 0x75a   : > { %v6911_v5 = vunpack.c.l.bf16 %v5814_v26  ;;  %v7650_v40 = vpack.c.bf16 %v7128_v21, %v7110_v24  ;;  %v6912_v2 = vunpack.c.h.bf16 %v5814_v26  ;;  %v1132_v1 = vand.u32 2147483647, %v556_v18 }
 0x75b   : > { %v7469_v55 = vmul.f32 %v6893_v51, %v6317_v57  ;;  %v7470_v39 = vmul.f32 %v6894_v45, %v6318_v28  ;;  %v1149_v25 = vand.u32 2147483647, %v573_v59  ;;  %v1150_v31 = vand.u32 2147483647, %v574_v11 }
 0x75c   : > { %v7487_v19 = vmul.f32 %v6911_v5, %v6335_v30  ;;  %8339 = vmatpush.bf16.msra.mxu2 %v7650_v40  ;;  %v7488_v7 = vmul.f32 %v6912_v2, %v6336_v34  ;;  %v1707_v41 = vsub.f32 1.0, %v1131_v52  ;;  %v1708_v0 = vsub.f32 1.0, %v1132_v1 }
 0x75d   : > { %v1725_v50 = vsub.f32 1.0, %v1149_v25  ;;  %v3329_v35 = vsub.f32 %v9954_v58, %v12257_v32  ;;  %v3330_v53 = vsub.f32 %v9954_v58, %v12267_v8  ;;  %v1726_v36 = vsub.f32 1.0, %v1150_v31 }
 0x75e   : > { %v7829_v17 = vpack.c.bf16 %v7487_v19, %v7469_v55  ;;  %v7830_v33 = vpack.c.bf16 %v7488_v7, %v7470_v39  ;;  %v2283_v60 = vmax.f32 %v1707_v41, 0.0  ;;  %v2284_v43 = vmax.f32 %v1708_v0, 0.0  ;;  %v13502_v39 = vld [vmem:[#allocation13_spill] sm:$0xff] }
 0x75f   : > { %v2301_v54 = vmax.f32 %v1725_v50, 0.0  ;;  %v3347_v37 = vsub.f32 %v13499_v23, %v12257_v32  ;;  %v3348_v3 = vsub.f32 %v13499_v23, %v12267_v8  ;;  %v2302_v56 = vmax.f32 %v1726_v36, 0.0 }
 0x760   : > { %8324 = vmatpush.bf16.msra.mxu1 %v7829_v17  ;;  %8350 = vmatpush.bf16.msra.mxu3 %v7830_v33  ;;  %v3905_v10 = vand.u32 2147483647, %v3329_v35  ;;  %v3906_v57 = vand.u32 2147483647, %v3330_v53  ;;  %v915_v58 = vsub.f32 %v13500_v22, %v12253_v16  ;;  %v12519_v12 = vpack.c.bf16 %v2284_v43, %v2283_v60  ;;  %v13503_v35 = vld [vmem:[#allocation47_spill] sm:$0xff] }
 0x761   : > { %v3923_v30 = vand.u32 2147483647, %v3347_v37  ;;  %v3924_v15 = vand.u32 2147483647, %v3348_v3  ;;  %v916_v63 = vsub.f32 %v13500_v22, %v12255_v47  ;;  %v12523_v4 = vpack.c.bf16 %v2302_v56, %v2301_v54 }
 0x762   : > { %v4481_v20 = vsub.f32 1.0, %v3905_v10  ;;  %v4482_v14 = vsub.f32 1.0, %v3906_v57  ;;  %v933_v28 = vsub.f32 %v13501_v42, %v12253_v16  ;;  %v5921_v26 = vunpack.c.l.bf16 %v12519_v12 }
 0x763   : > { %v4499_v34 = vsub.f32 1.0, %v3923_v30  ;;  %v4500_v44 = vsub.f32 1.0, %v3924_v15  ;;  %v934_v24 = vsub.f32 %v13501_v42, %v12255_v47  ;;  %v5939_v51 = vunpack.c.l.bf16 %v12523_v4 }
 0x764   : > { %v5057_v21 = vmax.f32 %v4481_v20, 0.0  ;;  %v5058_v18 = vmax.f32 %v4482_v14, 0.0  ;;  %v1491_v45 = vand.u32 2147483647, %v915_v58  ;;  %v1492_v5 = vand.u32 2147483647, %v916_v63 }
 0x765   : > { %v5075_v59 = vmax.f32 %v4499_v34, 0.0  ;;  %v5076_v11 = vmax.f32 %v4500_v44, 0.0  ;;  %v1509_v40 = vand.u32 2147483647, %v933_v28  ;;  %v1510_v52 = vand.u32 2147483647, %v934_v24 }
 0x766   : > { %v5607_v2 = vpack.c.bf16 %v5058_v18, %v5057_v21  ;;  %v2067_v55 = vsub.f32 1.0, %v1491_v45  ;;  %v3689_v1 = vsub.f32 %v13502_v39, %v12257_v32  ;;  %v2068_v19 = vsub.f32 1.0, %v1492_v5 }
 0x767   : > { %v5616_v25 = vpack.c.bf16 %v5076_v11, %v5075_v59  ;;  %v2085_v7 = vsub.f32 1.0, %v1509_v40  ;;  %v3690_v31 = vsub.f32 %v13502_v39, %v12267_v8  ;;  %v2086_v0 = vsub.f32 1.0, %v1510_v52 }
 0x768   : > { %v6497_v41 = vunpack.c.l.bf16 %v5607_v2  ;;  %v2643_v50 = vmax.f32 %v2067_v55, 0.0  ;;  %v3707_v53 = vsub.f32 %v13503_v35, %v12257_v32  ;;  %v2644_v33 = vmax.f32 %v2068_v19, 0.0 }
 0x769   : > { %v6515_v17 = vunpack.c.l.bf16 %v5616_v25  ;;  %v2661_v36 = vmax.f32 %v2085_v7, 0.0  ;;  %v3708_v60 = vsub.f32 %v13503_v35, %v12267_v8  ;;  %v2662_v54 = vmax.f32 %v2086_v0, 0.0 }
 0x76a   : > { %v7073_v43 = vmul.f32 %v6497_v41, %v5921_v26  ;;  %v4265_v23 = vand.u32 2147483647, %v3689_v1  ;;  %v4266_v37 = vand.u32 2147483647, %v3690_v31  ;;  %v3013_v56 = vpack.c.bf16 %v2644_v33, %v2643_v50 }
 0x76b   : > { %v7091_v3 = vmul.f32 %v6515_v17, %v5939_v51  ;;  %v4283_v10 = vand.u32 2147483647, %v3707_v53  ;;  %v4284_v57 = vand.u32 2147483647, %v3708_v60  ;;  %v3022_v22 = vpack.c.bf16 %v2662_v54, %v2661_v36 }
 0x76c   : > { %v4841_v58 = vsub.f32 1.0, %v4265_v23  ;;  %v4842_v30 = vsub.f32 1.0, %v4266_v37  ;;  %v5922_v15 = vunpack.c.h.bf16 %v12519_v12  ;;  %v6281_v42 = vunpack.c.l.bf16 %v3013_v56 }
 0x76d   : > { %v7631_v63 = vpack.c.bf16 %v7091_v3, %v7073_v43  ;;  %v4859_v20 = vsub.f32 1.0, %v4283_v10  ;;  %v4860_v14 = vsub.f32 1.0, %v4284_v57  ;;  %v6299_v44 = vunpack.c.l.bf16 %v3022_v22 }
 0x76e   : > { %v5417_v28 = vmax.f32 %v4841_v58, 0.0  ;;  %v5418_v34 = vmax.f32 %v4842_v30, 0.0  ;;  %v5940_v26 = vunpack.c.h.bf16 %v12523_v4  ;;  %v6498_v18 = vunpack.c.h.bf16 %v5607_v2 }
 0x76f   : > { %8314 = vmatpush.bf16.msra.mxu0 %v7631_v63  ;;  %v5435_v24 = vmax.f32 %v4859_v20, 0.0  ;;  %v5436_v21 = vmax.f32 %v4860_v14, 0.0  ;;  %v6516_v51 = vunpack.c.h.bf16 %v5616_v25  ;;  %v6282_v59 = vunpack.c.h.bf16 %v3013_v56  ;;  %v13504_v63 = vld [vmem:[#allocation42_spill] sm:$0xff] }
 0x770   : > { %v5787_v45 = vpack.c.bf16 %v5418_v34, %v5417_v28  ;;  %v6300_v11 = vunpack.c.h.bf16 %v3022_v22  ;;  %v519_v12 = vsub.f32 %v9921_v29, %v12253_v16  ;;  %v7074_v40 = vmul.f32 %v6498_v18, %v5922_v15 }
 0x771   : > { %v5796_v5 = vpack.c.bf16 %v5436_v21, %v5435_v24  ;;  %v7092_v52 = vmul.f32 %v6516_v51, %v5940_v26  ;;  %v520_v55 = vsub.f32 %v9921_v29, %v12255_v47  ;;  %v537_v4 = vsub.f32 %v13266_v61, %v12253_v16 }
 0x772   : > { %v6857_v39 = vunpack.c.l.bf16 %v5787_v45  ;;  %v6858_v1 = vunpack.c.h.bf16 %v5787_v45  ;;  %v538_v2 = vsub.f32 %v13266_v61, %v12255_v47  ;;  %v1095_v31 = vand.u32 2147483647, %v519_v12 }
 0x773   : > { %v6875_v25 = vunpack.c.l.bf16 %v5796_v5  ;;  %v7632_v19 = vpack.c.bf16 %v7092_v52, %v7074_v40  ;;  %v6876_v7 = vunpack.c.h.bf16 %v5796_v5  ;;  %v1096_v50 = vand.u32 2147483647, %v520_v55 }
 0x774   : > { %v7433_v41 = vmul.f32 %v6857_v39, %v6281_v42  ;;  %v7434_v0 = vmul.f32 %v6858_v1, %v6282_v59  ;;  %v1113_v35 = vand.u32 2147483647, %v537_v4  ;;  %v1114_v29 = vand.u32 2147483647, %v538_v2 }
 0x775   : > { %v7451_v53 = vmul.f32 %v6875_v25, %v6299_v44  ;;  %8340 = vmatpush.bf16.msra.mxu2 %v7632_v19  ;;  %v7452_v17 = vmul.f32 %v6876_v7, %v6300_v11  ;;  %v1671_v33 = vsub.f32 1.0, %v1095_v31  ;;  %v1672_v36 = vsub.f32 1.0, %v1096_v50  ;;  %v13506_v25 = vld [vmem:[#allocation53_spill] sm:$0xff] }
 0x776   : > { %v1689_v60 = vsub.f32 1.0, %v1113_v35  ;;  %v3293_v43 = vsub.f32 %v13305_v27, %v12257_v32  ;;  %v3294_v61 = vsub.f32 %v13305_v27, %v12267_v8  ;;  %v1690_v37 = vsub.f32 1.0, %v1114_v29 }
 0x777   : > { %v7811_v54 = vpack.c.bf16 %v7451_v53, %v7433_v41  ;;  %v7812_v23 = vpack.c.bf16 %v7452_v17, %v7434_v0  ;;  %v2247_v3 = vmax.f32 %v1671_v33, 0.0  ;;  %v2248_v56 = vmax.f32 %v1672_v36, 0.0  ;;  %v13507_v17 = vld [vmem:[#allocation48_spill] sm:$0xff] }
 0x778   : > { %v2265_v10 = vmax.f32 %v1689_v60, 0.0  ;;  %v3311_v57 = vsub.f32 %v13465_v62, %v12257_v32  ;;  %v3312_v22 = vsub.f32 %v13465_v62, %v12267_v8  ;;  %v2266_v58 = vmax.f32 %v1690_v37, 0.0  ;;  %v13505_v62 = vld [vmem:[#allocation39_spill] sm:$0xff] }
 0x779   : > { %8325 = vmatpush.bf16.msra.mxu1 %v7811_v54  ;;  %8351 = vmatpush.bf16.msra.mxu3 %v7812_v23  ;;  %v3869_v30 = vand.u32 2147483647, %v3293_v43  ;;  %v3870_v15 = vand.u32 2147483647, %v3294_v61  ;;  %v879_v27 = vsub.f32 %v13504_v63, %v12253_v16  ;;  %v12559_v20 = vpack.c.bf16 %v2248_v56, %v2247_v3 }
 0x77a   : > { %v3887_v14 = vand.u32 2147483647, %v3311_v57  ;;  %v3888_v42 = vand.u32 2147483647, %v3312_v22  ;;  %v880_v28 = vsub.f32 %v13504_v63, %v12255_v47  ;;  %v12563_v34 = vpack.c.bf16 %v2266_v58, %v2265_v10 }
 0x77b   : > { %v4445_v44 = vsub.f32 1.0, %v3869_v30  ;;  %v4446_v26 = vsub.f32 1.0, %v3870_v15  ;;  %v897_v24 = vsub.f32 %v13505_v62, %v12253_v16  ;;  %v5885_v51 = vunpack.c.l.bf16 %v12559_v20 }
 0x77c   : > { %v4463_v21 = vsub.f32 1.0, %v3887_v14  ;;  %v4464_v18 = vsub.f32 1.0, %v3888_v42  ;;  %v898_v45 = vsub.f32 %v13505_v62, %v12255_v47  ;;  %v5903_v12 = vunpack.c.l.bf16 %v12563_v34 }
 0x77d   : > { %v5021_v59 = vmax.f32 %v4445_v44, 0.0  ;;  %v5022_v11 = vmax.f32 %v4446_v26, 0.0  ;;  %v1455_v5 = vand.u32 2147483647, %v879_v27  ;;  %v1456_v55 = vand.u32 2147483647, %v880_v28 }
 0x77e   : > { %v5039_v40 = vmax.f32 %v4463_v21, 0.0  ;;  %v5040_v52 = vmax.f32 %v4464_v18, 0.0  ;;  %v1473_v39 = vand.u32 2147483647, %v897_v24  ;;  %v1474_v4 = vand.u32 2147483647, %v898_v45 }
 0x77f   : > { %v5589_v1 = vpack.c.bf16 %v5022_v11, %v5021_v59  ;;  %v2031_v2 = vsub.f32 1.0, %v1455_v5  ;;  %v3653_v19 = vsub.f32 %v13506_v25, %v12257_v32  ;;  %v2032_v31 = vsub.f32 1.0, %v1456_v55 }
 0x780   : > { %v5598_v7 = vpack.c.bf16 %v5040_v52, %v5039_v40  ;;  %v2049_v41 = vsub.f32 1.0, %v1473_v39  ;;  %v3654_v0 = vsub.f32 %v13506_v25, %v12267_v8  ;;  %v2050_v35 = vsub.f32 1.0, %v1474_v4  ;;  %v13508_v40 = vld [vmem:[#allocation55_spill] sm:$0xff]  ;;  %v13509_v52 = vld [vmem:[#allocation50_spill] sm:$0xff] }
 0x781   : > { %v6461_v50 = vunpack.c.l.bf16 %v5589_v1  ;;  %v2607_v53 = vmax.f32 %v2031_v2, 0.0  ;;  %v3671_v29 = vsub.f32 %v13507_v17, %v12257_v32  ;;  %v2608_v36 = vmax.f32 %v2032_v31, 0.0  ;;  %v9095_v4 = vld.sshfl [vmem:[#allocation1] sm:$0xff pattern:$0x73625140]  ;;  %v13510_v2 = vld [vmem:[#allocation46_spill] sm:$0xff] }
 0x782   : > { %v6479_v33 = vunpack.c.l.bf16 %v5598_v7  ;;  %v2625_v60 = vmax.f32 %v2049_v41, 0.0  ;;  %v3672_v43 = vsub.f32 %v13507_v17, %v12267_v8  ;;  %v2626_v54 = vmax.f32 %v2050_v35, 0.0 }
 0x783   : > { %v7037_v61 = vmul.f32 %v6461_v50, %v5885_v51  ;;  %v4229_v23 = vand.u32 2147483647, %v3653_v19  ;;  %v4230_v37 = vand.u32 2147483647, %v3654_v0  ;;  %v2995_v56 = vpack.c.bf16 %v2608_v36, %v2607_v53 }
 0x784   : > { %v7055_v3 = vmul.f32 %v6479_v33, %v5903_v12  ;;  %v4247_v10 = vand.u32 2147483647, %v3671_v29  ;;  %v4248_v57 = vand.u32 2147483647, %v3672_v43  ;;  %v3004_v22 = vpack.c.bf16 %v2626_v54, %v2625_v60  ;;  %v13511_v60 = vld [vmem:[#allocation34_spill] sm:$0xff]  ;;  %v13512_v54 = vld [vmem:[#allocation16_spill] sm:$0xff] }
 0x785   : > { %v4805_v58 = vsub.f32 1.0, %v4229_v23  ;;  %v4806_v30 = vsub.f32 1.0, %v4230_v37  ;;  %v5886_v15 = vunpack.c.h.bf16 %v12559_v20  ;;  %v6245_v42 = vunpack.c.l.bf16 %v2995_v56 }
 0x786   : > { %v7613_v63 = vpack.c.bf16 %v7055_v3, %v7037_v61  ;;  %v4823_v27 = vsub.f32 1.0, %v4247_v10  ;;  %v4824_v14 = vsub.f32 1.0, %v4248_v57  ;;  %v6263_v26 = vunpack.c.l.bf16 %v3004_v22 }
 0x787   : > { %v5381_v28 = vmax.f32 %v4805_v58, 0.0  ;;  %v5382_v44 = vmax.f32 %v4806_v30, 0.0  ;;  %v5904_v62 = vunpack.c.h.bf16 %v12563_v34  ;;  %v6462_v18 = vunpack.c.h.bf16 %v5589_v1 }
 0x788   : > { %8315 = vmatpush.bf16.msra.mxu0 %v7613_v63  ;;  %v5399_v24 = vmax.f32 %v4823_v27, 0.0  ;;  %v5400_v21 = vmax.f32 %v4824_v14, 0.0  ;;  %v6480_v51 = vunpack.c.h.bf16 %v5598_v7  ;;  %v6246_v59 = vunpack.c.h.bf16 %v2995_v56 }
 0x789   : > { %v5769_v45 = vpack.c.bf16 %v5382_v44, %v5381_v28  ;;  %v6264_v11 = vunpack.c.h.bf16 %v3004_v22  ;;  %v7038_v20 = vmul.f32 %v6462_v18, %v5886_v15  ;;  %v843_v55 = vsub.f32 %v13509_v52, %v12253_v16  ;;  %v12605_v28 = vpop.f32.mrf.mxu1  ;;  %v12611_v18 = vpop.f32.mrf.mxu3 }
 0x78a   : > { %v5778_v12 = vpack.c.bf16 %v5400_v21, %v5399_v24  ;;  %v7056_v5 = vmul.f32 %v6480_v51, %v5904_v62  ;;  %v844_v1 = vsub.f32 %v13509_v52, %v12255_v47  ;;  %v861_v25 = vsub.f32 %v13510_v2, %v12253_v16  ;;  %v12609_v21 = vpop.f32.mrf.mxu2 }
 0x78b   : > { %v6821_v39 = vunpack.c.l.bf16 %v5769_v45  ;;  %v6822_v34 = vunpack.c.h.bf16 %v5769_v45  ;;  %8316 = vmatmul.bf16.vlgmr.msra.gmra.mxu0 %v9095_v4  ;;  %v862_v41 = vsub.f32 %v13510_v2, %v12255_v47  ;;  %v1419_v35 = vand.u32 2147483647, %v843_v55 }
 0x78c   : > { %8944 = vmatpush.msk.msrb.mxu0 %vm8366_vm0, %v13508_v40  ;;  %v6839_v19 = vunpack.c.l.bf16 %v5778_v12  ;;  %v7614_v7 = vpack.c.bf16 %v7056_v5, %v7038_v20  ;;  %v6840_v31 = vunpack.c.h.bf16 %v5778_v12  ;;  %v1420_v53 = vand.u32 2147483647, %v844_v1 }
 0x78d   : > { %v7397_v0 = vmul.f32 %v6821_v39, %v6245_v42  ;;  %v7398_v50 = vmul.f32 %v6822_v34, %v6246_v59  ;;  %v1437_v33 = vand.u32 2147483647, %v861_v25  ;;  %v1438_v36 = vand.u32 2147483647, %v862_v41  ;;  %v12603_v42 = vpop.f32.mrf.mxu0 }
 0x78e   : > { %8952 = vmatpush.msk.msra.mxu0 %vm8366_vm0, %v12415_v13  ;;  %v7415_v17 = vmul.f32 %v6839_v19, %v6263_v26  ;;  %8341 = vmatpush.bf16.msra.mxu2 %v7614_v7  ;;  %v7416_v29 = vmul.f32 %v6840_v31, %v6264_v11  ;;  %v1995_v43 = vsub.f32 1.0, %v1419_v35  ;;  %v1996_v61 = vsub.f32 1.0, %v1420_v53 }
 0x78f   : > { %v3617_v23 = vsub.f32 %v13512_v54, %v12257_v32  ;;  %v3618_v13 = vsub.f32 %v13512_v54, %v12267_v8  ;;  %v2013_v56 = vsub.f32 1.0, %v1437_v33  ;;  %v2014_v10 = vsub.f32 1.0, %v1438_v36 }
 0x790   : > { %v7793_v37 = vpack.c.bf16 %v7415_v17, %v7397_v0  ;;  %v7794_v3 = vpack.c.bf16 %v7416_v29, %v7398_v50  ;;  %v2571_v57 = vmax.f32 %v1995_v43, 0.0  ;;  %v2572_v22 = vmax.f32 %v1996_v61, 0.0 }
 0x791   : > { %8342 = vmatmul.bf16.vlgmr.msra.gmra.mxu2 %v9095_v4  ;;  %v3635_v58 = vsub.f32 %v13240_v48, %v12257_v32  ;;  %v3636_v30 = vsub.f32 %v13240_v48, %v12267_v8  ;;  %v2589_v15 = vmax.f32 %v2013_v56, 0.0  ;;  %v2590_v63 = vmax.f32 %v2014_v10, 0.0  ;;  %v8072_v29 = vpop.f32.mrf.mxu1  ;;  %v8098_v43 = vpop.f32.mrf.mxu3 }
 0x792   : > { %8948 = vmatpush.msk.msrb.mxu2 %vm8366_vm0, %v13511_v60  ;;  %8326 = vmatpush.bf16.msra.mxu1 %v7793_v37  ;;  %v4193_v27 = vand.u32 2147483647, %v3617_v23  ;;  %v4194_v14 = vand.u32 2147483647, %v3618_v13  ;;  %v2977_v44 = vpack.c.bf16 %v2572_v22, %v2571_v57  ;;  %v807_v24 = vsub.f32 %v9937_v9, %v12253_v16  ;;  %v8085_v60 = vpop.f32.mrf.mxu2  ;;  %v8462_v29 = vld [vmem:[%s12742_s3 + $0x10] sm:$0xff] }
 0x793   : > { %8352 = vmatpush.bf16.msra.mxu3 %v7794_v3  ;;  %v4211_v26 = vand.u32 2147483647, %v3635_v58  ;;  %v4212_v62 = vand.u32 2147483647, %v3636_v30  ;;  %v2986_v48 = vpack.c.bf16 %v2590_v63, %v2589_v15  ;;  %v808_v59 = vsub.f32 %v9937_v9, %v12255_v47  ;;  %v13514_v60 = vld [vmem:[#allocation43_spill] sm:$0xff] }
 0x794   : > { %v4769_v51 = vsub.f32 1.0, %v4193_v27  ;;  %v4770_v45 = vsub.f32 1.0, %v4194_v14  ;;  %v6209_v20 = vunpack.c.l.bf16 %v2977_v44  ;;  %v6210_v55 = vunpack.c.h.bf16 %v2977_v44  ;;  %v9096_v43 = vld.sshfl [vmem:[#allocation1 + $0x8] sm:$0xff pattern:$0x73625140] }
 0x795   : > { %v4787_v11 = vsub.f32 1.0, %v4211_v26  ;;  %v4788_v12 = vsub.f32 1.0, %v4212_v62  ;;  %v6227_v52 = vunpack.c.l.bf16 %v2986_v48  ;;  %v825_v4 = vsub.f32 %v10064_v46, %v12253_v16  ;;  %v8059_v16 = vpop.f32.mrf.mxu0  ;;  %v12630_v62 = vld [vmem:[%s12742_s3 + $0x8] sm:$0xff] }
 0x796   : > { %v5345_v5 = vmax.f32 %v4769_v51, 0.0  ;;  %v5346_v40 = vmax.f32 %v4770_v45, 0.0  ;;  %v826_v1 = vsub.f32 %v10064_v46, %v12255_v47  ;;  %v6228_v25 = vunpack.c.h.bf16 %v2986_v48  ;;  %v12637_v45 = vld [vmem:[%s12742_s3] sm:$0xff]  ;;  %v8514_v16 = vld [vmem:[%s12742_s3 + $0x18] sm:$0xff] }
 0x797   : > { %v5363_v39 = vmax.f32 %v4787_v11, 0.0  ;;  %v5364_v34 = vmax.f32 %v4788_v12, 0.0  ;;  %v1383_v19 = vand.u32 2147483647, %v807_v24  ;;  %v1384_v7 = vand.u32 2147483647, %v808_v59 }
 0x798   : > { %v5751_v2 = vpack.c.bf16 %v5346_v40, %v5345_v5  ;;  %v1401_v31 = vand.u32 2147483647, %v825_v4  ;;  %v1402_v41 = vand.u32 2147483647, %v826_v1  ;;  %v3581_v0 = vsub.f32 %v10068_v6, %v12257_v32 }
 0x799   : > { %v5760_v9 = vpack.c.bf16 %v5364_v34, %v5363_v39  ;;  %v1959_v35 = vsub.f32 1.0, %v1383_v19  ;;  %v1960_v53 = vsub.f32 1.0, %v1384_v7  ;;  %v3582_v17 = vsub.f32 %v10068_v6, %v12267_v8  ;;  %v8122_v51 = vpop.f32.mrf.mxu1  ;;  %v8148_v5 = vpop.f32.mrf.mxu3 }
 0x79a   : > { %v6785_v50 = vunpack.c.l.bf16 %v5751_v2  ;;  %v6786_v46 = vunpack.c.h.bf16 %v5751_v2  ;;  %v1977_v36 = vsub.f32 1.0, %v1401_v31  ;;  %v1978_v54 = vsub.f32 1.0, %v1402_v41 }
 0x79b   : > { %v6803_v33 = vunpack.c.l.bf16 %v5760_v9  ;;  %v6804_v47 = vunpack.c.h.bf16 %v5760_v9  ;;  %v2535_v3 = vmax.f32 %v1959_v35, 0.0  ;;  %v2536_v56 = vmax.f32 %v1960_v53, 0.0  ;;  %8945 = vmatmul.msk.f32.vlgmr.msrb.gmra.mxu0 %vm8362_vm1, %v12630_v62 }
 0x79c   : > { %v7361_v61 = vmul.f32 %v6785_v50, %v6209_v20  ;;  %v7362_v13 = vmul.f32 %v6786_v46, %v6210_v55  ;;  %v3599_v10 = vsub.f32 %v10074_v38, %v12257_v32  ;;  %v3600_v6 = vsub.f32 %v10074_v38, %v12267_v8  ;;  %v8135_v20 = vpop.f32.mrf.mxu2 }
 0x79d   : > { %v7379_v23 = vmul.f32 %v6803_v33, %v6227_v52  ;;  %v7380_v37 = vmul.f32 %v6804_v47, %v6228_v25  ;;  %v4157_v57 = vand.u32 2147483647, %v3581_v0  ;;  %v2553_v30 = vmax.f32 %v1977_v36, 0.0  ;;  %v8109_v48 = vpop.f32.mrf.mxu0  ;;  %v13513_v36 = vld [vmem:[#allocation56_spill] sm:$0xff] }
 0x79e   : > { %v4158_v15 = vand.u32 2147483647, %v3582_v17  ;;  %v2554_v63 = vmax.f32 %v1978_v54, 0.0  ;;  %v4175_v27 = vand.u32 2147483647, %v3599_v10  ;;  %v8071_v8 = vadd.f32 %v12605_v28, %v12603_v42 }
 0x79f   : > { %v7775_v22 = vpack.c.bf16 %v7379_v23, %v7361_v61  ;;  %v7776_v58 = vpack.c.bf16 %v7380_v37, %v7362_v13  ;;  %v4176_v14 = vand.u32 2147483647, %v3600_v6  ;;  %v4733_v44 = vsub.f32 1.0, %v4157_v57 }
 0x7a0   : > { %v4734_v26 = vsub.f32 1.0, %v4158_v15  ;;  %v4751_v32 = vsub.f32 1.0, %v4175_v27  ;;  %v2959_v59 = vpack.c.bf16 %v2536_v56, %v2535_v3  ;;  %v8123_v12 = vadd.f32 %v8122_v51, %v8109_v48  ;;  %8956 = vmatpush.msk.msra.mxu2 %vm8366_vm0, %v8071_v8  ;;  %v8670_v27 = vld [vmem:[%s12742_s3 + $0x30] sm:$0xff] }
 0x7a1   : > { %8327 = vmatpush.bf16.msra.mxu1 %v7775_v22  ;;  %8353 = vmatpush.bf16.msra.mxu3 %v7776_v58  ;;  %v4752_v24 = vsub.f32 1.0, %v4176_v14  ;;  %v5309_v38 = vmax.f32 %v4733_v44, 0.0  ;;  %v2968_v40 = vpack.c.bf16 %v2554_v63, %v2553_v30  ;;  %v8124_v35 = vpop.f32.mrf.mxu1  ;;  %v8150_v17 = vpop.f32.mrf.mxu3  ;;  %v8097_v47 = vadd.f32 %v12611_v18, %v12609_v21  ;;  %v8618_v21 = vld [vmem:[%s12742_s3 + $0x28] sm:$0xff]  ;;  %v8566_v18 = vld [vmem:[%s12742_s3 + $0x20] sm:$0xff] }
 0x7a2   : > { %v5310_v11 = vmax.f32 %v4734_v26, 0.0  ;;  %v5327_v52 = vmax.f32 %v4751_v32, 0.0  ;;  %8960 = vmatpush.msk.msrb.mxu0 %vm8366_vm0, %v8123_v12  ;;  %8949 = vmatmul.msk.f32.vlgmr.msrb.gmra.mxu2 %vm8362_vm1, %v12637_v45  ;;  %v6173_v39 = vunpack.c.l.bf16 %v2959_v59  ;;  %v6174_v4 = vunpack.c.h.bf16 %v2959_v59 }
 0x7a3   : > { %v5328_v55 = vmax.f32 %v4752_v24, 0.0  ;;  %v6191_v2 = vunpack.c.l.bf16 %v2968_v40  ;;  %v6192_v19 = vunpack.c.h.bf16 %v2968_v40  ;;  %8953 = vmatmul.msk.f32.vlgmr.msra.gmra.mxu0 %vm8362_vm1, %v8462_v29  ;;  %v8149_v6 = vadd.f32 %v8148_v5, %v8135_v20 }
 0x7a4   : > { %v5733_v42 = vpack.c.bf16 %v5310_v11, %v5309_v38  ;;  %v8137_v53 = vpop.f32.mrf.mxu2 }
 0x7a5   : > { %v5742_v28 = vpack.c.bf16 %v5328_v55, %v5327_v52  ;;  %v8111_v50 = vpop.f32.mrf.mxu0 }
 0x7a6   : > { %v6749_v34 = vunpack.c.l.bf16 %v5733_v42  ;;  %v6750_v1 = vunpack.c.h.bf16 %v5733_v42 }
 0x7a7   : > { %v6767_v25 = vunpack.c.l.bf16 %v5742_v28  ;;  %v6768_v7 = vunpack.c.h.bf16 %v5742_v28 }
 0x7a8   : > { %v7325_v9 = vmul.f32 %v6749_v34, %v6173_v39  ;;  %v7326_v31 = vmul.f32 %v6750_v1, %v6174_v4  ;;  %v8774_v34 = vld [vmem:[%s12742_s3 + $0x40] sm:$0xff] }
 0x7a9   : > { %v7343_v41 = vmul.f32 %v6767_v25, %v6191_v2  ;;  %v7344_v0 = vmul.f32 %v6768_v7, %v6192_v19  ;;  %v8174_v54 = vpop.f32.mrf.mxu1  ;;  %v8200_v37 = vpop.f32.mrf.mxu3 }
 0x7aa   : > { %8957 = vmatmul.msk.f32.vlgmr.msra.gmra.mxu2 %vm8362_vm1, %v8514_v16 }
 0x7ab   : > { %v7757_v33 = vpack.c.bf16 %v7343_v41, %v7325_v9  ;;  %v7758_v46 = vpack.c.bf16 %v7344_v0, %v7326_v31  ;;  %8961 = vmatmul.msk.f32.vlgmr.msrb.gmra.mxu0 %vm8362_vm1, %v8566_v18 }
 0x7ac   : > { %v8187_v13 = vpop.f32.mrf.mxu2 }
 0x7ad   : > { %8328 = vmatpush.bf16.msra.mxu1 %v7757_v33  ;;  %8354 = vmatpush.bf16.msra.mxu3 %v7758_v46  ;;  %v8161_v61 = vpop.f32.mrf.mxu0  ;;  %v8201_v57 = vadd.f32 %v8200_v37, %v8187_v13 }
 0x7ae   : > { %v8175_v23 = vadd.f32 %v8174_v54, %v8161_v61 }
 0x7b0   : > { %8329 = vmatmul.bf16.vlgmr.msra.gmra.mxu1 %v9096_v43  ;;  %8355 = vmatmul.bf16.vlgmr.msra.gmra.mxu3 %v9096_v43 }
 0x7b1   : > { %8946 = vmatpush.msk.msrb.mxu1 %vm8366_vm0, %v13513_v36  ;;  %8950 = vmatpush.msk.msrb.mxu3 %vm8366_vm0, %v13514_v60  ;;  %v8176_v3 = vpop.f32.mrf.mxu1  ;;  %v8202_v10 = vpop.f32.mrf.mxu3 }
 0x7b2   : > { %8964 = vmatpush.msk.msrb.mxu2 %vm8366_vm0, %v8175_v23 }
 0x7b3   : > { %8954 = vmatpush.msk.msra.mxu1 %vm8366_vm0, %v12419_v49  ;;  %8958 = vmatpush.msk.msra.mxu3 %vm8366_vm0, %v8097_v47 }
 0x7b4   : > { %8965 = vmatmul.msk.f32.vlgmr.msrb.gmra.mxu2 %vm8362_vm1, %v8618_v21  ;;  %v8189_v56 = vpop.f32.mrf.mxu2 }
 0x7b5   : > { %v8163_v49 = vpop.f32.mrf.mxu0 }
 0x7b9   : > { %v8226_v58 = vpop.f32.mrf.mxu1  ;;  %v8252_v63 = vpop.f32.mrf.mxu3 }
 0x7bc   : > { %v8239_v15 = vpop.f32.mrf.mxu2 }
 0x7bd   : > { %v8213_v22 = vpop.f32.mrf.mxu0  ;;  %v8253_v14 = vadd.f32 %v8252_v63, %v8239_v15 }
 0x7be   : > { %v8227_v30 = vadd.f32 %v8226_v58, %v8213_v22 }
 0x7c0   : > { %8947 = vmatmul.msk.f32.vlgmr.msrb.gmra.mxu1 %vm8362_vm1, %v12630_v62  ;;  %8951 = vmatmul.msk.f32.vlgmr.msrb.gmra.mxu3 %vm8362_vm1, %v12637_v45  ;;  %v8722_v45 = vld [vmem:[%s12742_s3 + $0x38] sm:$0xff] }
 0x7c1   : > { %8962 = vmatpush.msk.msrb.mxu1 %vm8366_vm0, %v8149_v6  ;;  %8966 = vmatpush.msk.msrb.mxu3 %vm8366_vm0, %v8201_v57  ;;  %v8228_v26 = vpop.f32.mrf.mxu1  ;;  %v8254_v32 = vpop.f32.mrf.mxu3 }
 0x7c2   : > { %8968 = vmatpush.msk.msra.mxu0 %vm8366_vm0, %v8227_v30 }
 0x7c3   : > { %8969 = vmatmul.msk.f32.vlgmr.msra.gmra.mxu0 %vm8362_vm1, %v8670_v27 }
 0x7c4   : > { %v8241_v62 = vpop.f32.mrf.mxu2 }
 0x7c5   : > { %v8215_v44 = vpop.f32.mrf.mxu0 }
 0x7c8   : > { %8959 = vmatmul.msk.f32.vlgmr.msra.gmra.mxu3 %vm8362_vm1, %v8514_v16  ;;  %8955 = vmatmul.msk.f32.vlgmr.msra.gmra.mxu1 %vm8362_vm1, %v8462_v29 }
 0x7c9   : > { %8970 = vmatpush.msk.msra.mxu1 %vm8366_vm0, %v8253_v14  ;;  %v8278_v38 = vpop.f32.mrf.mxu1  ;;  %v8304_v51 = vpop.f32.mrf.mxu3 }
 0x7cc   : > { %v8291_v48 = vpop.f32.mrf.mxu2 }
 0x7cd   : > { %v8265_v24 = vpop.f32.mrf.mxu0  ;;  %v8305_v59 = vadd.f32 %v8304_v51, %v8291_v48 }
 0x7ce   : > { %v8279_v8 = vadd.f32 %v8278_v38, %v8265_v24 }
 0x7cf   : > { %8974 = vmatpush.msk.msra.mxu3 %vm8366_vm0, %v8305_v59 }
 0x7d0   : > { %8967 = vmatmul.msk.f32.vlgmr.msrb.gmra.mxu3 %vm8362_vm1, %v8618_v21  ;;  %8963 = vmatmul.msk.f32.vlgmr.msrb.gmra.mxu1 %vm8362_vm1, %v8566_v18 }
 0x7d1   : > { %8972 = vmatpush.msk.msra.mxu2 %vm8366_vm0, %v8279_v8  ;;  %v8280_v12 = vpop.f32.mrf.mxu1  ;;  %v8306_v5 = vpop.f32.mrf.mxu3 }
 0x7d2   : > { %8973 = vmatmul.msk.f32.vlgmr.msra.gmra.mxu2 %vm8362_vm1, %v8722_v45 }
 0x7d4   : > { %v8293_v20 = vpop.f32.mrf.mxu2 }
 0x7d5   : > { %v8267_v11 = vpop.f32.mrf.mxu0 }
 0x7d8   : > { %8975 = vmatmul.msk.f32.vlgmr.msra.gmra.mxu3 %vm8362_vm1, %v8722_v45  ;;  %8971 = vmatmul.msk.f32.vlgmr.msra.gmra.mxu1 %vm8362_vm1, %v8670_v27 }
 0x808   : > { %v8317_v40 = vpop.f32.mrf.mxu0 }
 0x810   : > { %v8319_v52 = vpop.f32.mrf.mxu0 }
 0x814   : > { %v8343_v55 = vpop.f32.mrf.mxu2 }
 0x818   : > { %v8390_v19 = vpop.f32.mrf.mxu0 }
 0x81c   : > { %v8345_v42 = vpop.f32.mrf.mxu2 }
 0x820   : > { %v8489_v41 = vpop.f32.mrf.mxu0 }
 0x825   : > { %v8439_v7 = vpop.f32.mrf.mxu2 }
 0x826   : > { %v8440_v0 = vadd.f32 %v8439_v7, %v8390_v19 }
 0x828   : > { %v8512_v53 = vadd.f32 %v8489_v41, %v8440_v0  ;;  %v8593_v29 = vpop.f32.mrf.mxu0 }
 0x82d   : > { %v8330_v28 = vpop.f32.mrf.mxu1  ;;  %v8541_v50 = vpop.f32.mrf.mxu2 }
 0x82e   : > { %v8331_v39 = vadd.f32 %v8330_v28, %v8317_v40  ;;  %v8564_v33 = vadd.f32 %v8541_v50, %v8512_v53 }
 0x830   : > { %8976 = vmatpush.msk.msrb.mxu0 %vm8366_vm0, %v8331_v39  ;;  %v8616_v36 = vadd.f32 %v8593_v29, %v8564_v33 }
 0x831   : > { %8977 = vmatmul.msk.f32.vlgmr.msrb.gmra.mxu0 %vm8362_vm1, %v8774_v34 }
 0x833   : > { %v8356_v4 = vpop.f32.mrf.mxu3 }
 0x834   : > { %v8357_v1 = vadd.f32 %v8356_v4, %v8343_v55 }
 0x835   : > { %v8332_v2 = vpop.f32.mrf.mxu1 }
 0x836   : > { %8978 = vmatpush.msk.msrb.mxu1 %vm8366_vm0, %v8357_v1 }
 0x837   : > { %8979 = vmatmul.msk.f32.vlgmr.msrb.gmra.mxu1 %vm8362_vm1, %v8774_v34  ;;  %v8645_v47 = vpop.f32.mrf.mxu2 }
 0x838   : > { %v8668_v61 = vadd.f32 %v8645_v47, %v8616_v36 }
 0x83b   : > { %v8358_v25 = vpop.f32.mrf.mxu3 }
 0x83d   : > { %v8410_v9 = vpop.f32.mrf.mxu1 }
 0x840   : > { %v8697_v23 = vpop.f32.mrf.mxu0 }
 0x841   : > { %v8720_v37 = vadd.f32 %v8697_v23, %v8668_v61 }
 0x843   : > { %v8459_v31 = vpop.f32.mrf.mxu3 }
 0x844   : > { %v8460_v17 = vadd.f32 %v8459_v31, %v8410_v9 }
 0x845   : > { %v8509_v35 = vpop.f32.mrf.mxu1 }
 0x846   : > { %v8513_v46 = vadd.f32 %v8509_v35, %v8460_v17 }
 0x84b   : > { %v8561_v16 = vpop.f32.mrf.mxu3 }
 0x84c   : > { %v8565_v43 = vadd.f32 %v8561_v16, %v8513_v46 }
 0x84d   : > { %v8613_v60 = vpop.f32.mrf.mxu1 }
 0x84e   : > { %v8617_v13 = vadd.f32 %v8613_v60, %v8565_v43 }
 0x853   : > { %v8665_v54 = vpop.f32.mrf.mxu3 }
 0x854   : > { %v8669_v18 = vadd.f32 %v8665_v54, %v8617_v13 }
 0x855   : > { %v8749_v21 = vpop.f32.mrf.mxu2  ;;  %v8717_v49 = vpop.f32.mrf.mxu1 }
 0x856   : > { %v8772_v3 = vadd.f32 %v8749_v21, %v8720_v37  ;;  %v8721_v10 = vadd.f32 %v8717_v49, %v8669_v18 }
 0x85b   : > { %v8769_v57 = vpop.f32.mrf.mxu3 }
 0x85c   : > { %v8773_v22 = vadd.f32 %v8769_v57, %v8721_v10 }
 0x8ae   : > { %v8801_v56 = vpop.f32.mrf.mxu0 }
 0x8af   : > { %v8824_v6 = vadd.f32 %v8801_v56, %v8772_v3 }
 0x8b1   : > { %8826 = vst [vmem:[%s230_s6] sm:$0xff] %v8824_v6 }
 0x8b4   : > { %v8821_v58 = vpop.f32.mrf.mxu1 }
 0x8b5   : > { %v8825_v30 = vadd.f32 %v8821_v58, %v8773_v22 }
 0x8b7   : > { %8827 = vst [vmem:[%s230_s6 + $0x8] sm:$0xff] %v8825_v30 }
 0x8b8   : > { %9124 = shalt.err (!%p9121_p5)
}
 0x8b9   : > { %8988 = dma.vmem_to_hbm [thread:$0]  (%p9244_p4), %s8845_s7, 256, %s8847_s8, %s8829_s18  }
 0x8ba PF: > { %p8994_p6 = scmp.ge.s32.totalorder %s9175_s20, 2  ;;  %s8858_s22 = sand.u32 1, %s9155_s15  }
 0x8bb   : > { %s8859_s24 = scalar_lea.sflag [#allocation3], %s8858_s22 }
 0x8bc   : > { %p8991_p7 = pnand %p8994_p6, %p9251_p8 }
 0x8be   : > { %p8992_p9 = pneg %p8991_p7 }
 0x8c0   : > { %9150 = dma.done.wait (%p8992_p9), %s8859_s24, 256  }
 0x8c1   : > { %9152 = vsyncadd (%p8992_p9), %s8859_s24, 4294967040  ;;  %s17_s20 = sadd.s32 1, %s9175_s20   ;;  %s13515_s15 = smov %s9159_s16 }
 0x8c2   : > { %p14_p10 = scmp.ge.s32.totalorder %s17_s20, 4   ;;  %s13516_s16 = smov %s9163_s17 }
 0x8c3   : > { %s13517_s17 = smov %s9257_s28  ;;  %s13518_s18 = smov %s9171_s19 }
 0x8c4   : > { %s13519_s19 = smov %s13521_s23  ;;  %16 = sbr.rel (!%p14_p10) target bundleno = 4 (0x4), region = 74 }
 0x8c9   :  { %8865 = vsyncpa [#allocation3], 1 }
 0x8ca   :  { %8867 = vsyncpa [#allocation3 + $0x1], 1 }

</bundles_post_ra>
